<compile_context>
chip_gen: v6e
topology: v6e:2x2x1
jax: 0.10.0
libtpu: 0.0.40
codegen_flags: <defaults>
</compile_context>

<pallas_src>
import jax
import jax.numpy as jnp
from jax.experimental import pallas as pl
from jax.experimental.pallas import tpu as pltpu

PATCH = 16
ATT_DEPTH = 3
POOL = 2 ** ATT_DEPTH                    # 8  (conv_adjust kernel/stride)
OUT_HW = 512                             # hardcoded by nn.Fold(output_size=(512, 512))
ADJ_HW = OUT_HW // POOL                  # 64 (conv_adjust output spatial size)
N_PATCH_BIG = (OUT_HW // PATCH) ** 2     # 1024 fold patches
N_PATCH_SMALL = (ADJ_HW // PATCH) ** 2   # 16 unfold patches
PATCH2 = PATCH * PATCH                   # 256

ROW_STRIPE = 128                         # input rows processed per kernel-1 grid step
POOL_STRIPE = ROW_STRIPE // POOL         # 16 pooled rows per step
N_STRIPES = OUT_HW // ROW_STRIPE         # 4 stripes


def _argmax_pool_kernel(x_ref, pcolt_ref, adj_ref, rowsum_ref):
    # x_ref:      (C, 128, 512)  input stripe
    # pcolt_ref:  (512, 64)      column-pooling matrix, pre-scaled by 1/64
    # adj_ref:    (C, 16, 64)    pooled output stripe
    # rowsum_ref: (C, 16, 512)   VMEM scratch holding per-chunk row sums
    C = x_ref.shape[0]
    n_chunks = ROW_STRIPE // POOL   # 16 chunks of 8 rows; each pools to one output row

    for k in range(n_chunks):
        r0 = k * POOL
        # First-occurrence argmax over channels on an 8-row chunk: only a handful of
        # vregs live at a time (no register-file spills, unlike a full-plane argmax).
        best = x_ref[0, r0:r0 + POOL, :]
        best_idx = jnp.zeros((POOL, OUT_HW), dtype=jnp.int32)
        for c in range(1, C):
            xc = x_ref[c, r0:r0 + POOL, :]
            upd = xc > best
            best = jnp.where(upd, xc, best)
            best_idx = jnp.where(upd, jnp.int32(c), best_idx)
        # Row-pool (sum of the 8 rows of each one-hot) on the VPU/XLU, per channel.
        for c in range(C):
            oh = (best_idx == c).astype(jnp.float32)
            rowsum_ref[c, k:k + 1, :] = jnp.sum(oh, axis=0, keepdims=True)

    # Column pooling: one (16,512)@(512,64) MXU matmul per channel, constant RHS
    # held in the MXU; 1/64 scale is already folded into pcolt.
    pcolt = pcolt_ref[...]
    for c in range(C):
        adj_ref[c] = jnp.dot(rowsum_ref[c], pcolt,
                             preferred_element_type=jnp.float32)


def _bmm_kernel(uft_ref, attT_ref, out_ref):
    # uft_ref: (256, 16)  unfolded feature map, transposed (tiny, per-(b,c) constant)
    # attT_ref: (16, 1024) attention, lane-dense
    # out_ref: (256, 1024) modulated^T, lane-dense
    out_ref[...] = jnp.dot(uft_ref[...], attT_ref[...],
                           preferred_element_type=jnp.float32)


def dpaa_user2d_forward(x, attentions):
    B, C, H, W = x.shape
    assert (H, W) == (OUT_HW, OUT_HW), "nn.Fold output_size is hardcoded to (512, 512)"
    x = x.astype(jnp.float32)
    attentions = attentions.astype(jnp.float32)

    # Column-pooling matrix with the 1/(8*8) conv_adjust scale folded in.
    pcolt = ((jnp.arange(W)[:, None] // POOL ==
              jnp.arange(ADJ_HW)[None, :]).astype(jnp.float32) / float(POOL * POOL))

    # ---- kernel 1: argmax one-hot + 8x8 ones-conv (stride 8) / 64, row-striped ----
    adjusted = pl.pallas_call(
        _argmax_pool_kernel,
        out_shape=jax.ShapeDtypeStruct((B, C, ADJ_HW, ADJ_HW), jnp.float32),
        grid=(B, N_STRIPES),
        in_specs=[
            pl.BlockSpec((None, C, ROW_STRIPE, W), lambda b, s: (b, 0, s, 0)),
            pl.BlockSpec((W, ADJ_HW), lambda b, s: (0, 0)),
        ],
        out_specs=pl.BlockSpec((None, C, POOL_STRIPE, ADJ_HW),
                               lambda b, s: (b, 0, s, 0)),
        scratch_shapes=[pltpu.VMEM((C, POOL_STRIPE, W), jnp.float32)],
        compiler_params=pltpu.CompilerParams(
            dimension_semantics=("parallel", "parallel")),
    )(x, pcolt)

    # ---- glue: nn.Unfold(16, stride=16) on (B,C,64,64), built directly transposed ----
    # ufT[b, c, r*16+cc, p] = adjusted[b, c, 16*(p//4)+r, 16*(p%4)+cc]
    nb = ADJ_HW // PATCH  # 4
    ufT = adjusted.reshape(B, C, nb, PATCH, nb, PATCH).transpose(0, 1, 3, 5, 2, 4)
    ufT = ufT.reshape(B, C, PATCH2, N_PATCH_SMALL)

    # Lane-dense attention operand (B, C, 16, 1024).
    attT = jnp.swapaxes(attentions, 2, 3)

    # ---- kernel 2: per-channel bmm in transposed orientation (256,16)@(16,1024) ----
    modT = pl.pallas_call(
        _bmm_kernel,
        out_shape=jax.ShapeDtypeStruct((B, C, PATCH2, N_PATCH_BIG), jnp.float32),
        grid=(B, C),
        in_specs=[
            pl.BlockSpec((None, None, PATCH2, N_PATCH_SMALL),
                         lambda b, c: (b, c, 0, 0)),
            pl.BlockSpec((None, None, N_PATCH_SMALL, N_PATCH_BIG),
                         lambda b, c: (b, c, 0, 0)),
        ],
        out_specs=pl.BlockSpec((None, None, PATCH2, N_PATCH_BIG),
                               lambda b, c: (b, c, 0, 0)),
        compiler_params=pltpu.CompilerParams(
            dimension_semantics=("parallel", "parallel")),
    )(ufT, attT)

    # ---- glue: nn.Fold((512,512), 16, stride=16) + out = x*(1+corr)^2 in XLA ----
    # modT[b, c, r*16+cc, 32*i+j] -> corr[b, c, 16*i+r, 16*j+cc]; XLA fuses the
    # transpose with the elementwise so corr is not re-read from HBM.
    NB = OUT_HW // PATCH  # 32
    corr = modT.reshape(B, C, PATCH, PATCH, NB, NB).transpose(0, 1, 4, 2, 5, 3)
    corr = corr.reshape(B, C, OUT_HW, OUT_HW)

    one_plus = 1.0 + corr
    out = x * one_plus * one_plus      # == (x + corr*x) + corr*(x + corr*x)
    return out, corr


def _reference_forward(x, attentions):
    # Pure-JAX reference mirroring the PyTorch graph (sanity check).
    B, C, H, W = x.shape
    idx = jnp.argmax(x, axis=1)                                           # (B, H, W)
    onehot = (idx[:, None, :, :] ==
              jnp.arange(C)[None, :, None, None]).astype(jnp.float32)
    adjusted = onehot.reshape(B, C, ADJ_HW, POOL, ADJ_HW, POOL).sum(axis=(3, 5)) / (POOL * POOL)
    nb = ADJ_HW // PATCH
    uf = adjusted.reshape(B, C, nb, PATCH, nb, PATCH).transpose(0, 1, 2, 4, 3, 5)
    uf = uf.reshape(B, C, N_PATCH_SMALL, PATCH2)
    modulated = jnp.einsum("bcnk,bckp->bcnp", attentions, uf, precision="highest")
    NB = OUT_HW // PATCH
    corr = modulated.reshape(B, C, NB, NB, PATCH, PATCH).transpose(0, 1, 2, 4, 3, 5)
    corr = corr.reshape(B, C, OUT_HW, OUT_HW)
    x2 = x + corr * x
    return x2 + corr * x2, corr


if __name__ == "__main__":
    B, C = 2, 4
    key = jax.random.PRNGKey(0)
    kx, ka = jax.random.split(key)
    x = jax.random.normal(kx, (B, C, OUT_HW, OUT_HW), dtype=jnp.float32)
    attentions = jax.nn.softmax(
        jax.random.normal(ka, (B, C, N_PATCH_BIG, N_PATCH_SMALL), dtype=jnp.float32),
        axis=-1)

    out, corr = jax.jit(dpaa_user2d_forward)(x, attentions)
    jax.block_until_ready((out, corr))

    ref_out, ref_corr = _reference_forward(x, attentions)
    assert jnp.allclose(corr, ref_corr, rtol=1e-2, atol=1e-2)
    assert jnp.allclose(out, ref_out, rtol=1e-2, atol=1e-2)

    print("KERNEL_OK")
</pallas_src>

<mosaic_0001>
module attributes {stable_mosaic.version = 11 : i64} {
  func.func @_argmax_pool_kernel(%arg0: i32, %arg1: i32, %arg2: memref<1x4x128x512xf32, #tpu.memory_space<vmem>>, %arg3: memref<512x64xf32, #tpu.memory_space<vmem>>, %arg4: memref<1x4x16x64xf32, #tpu.memory_space<vmem>>, %arg5: memref<4x16x512xf32, #tpu.memory_space<vmem>>) attributes {dimension_semantics = [#tpu.dimension_semantics<parallel>, #tpu.dimension_semantics<parallel>], iteration_bounds = array<i64: 2, 4>, scalar_prefetch = 0 : i64, scratch_operands = 1 : i64, tpu.core_type = #tpu.core_type<tc>, window_params = [{transform_indices = @transform_0, window_bounds = array<i64: 1, 4, 128, 512>}, {pipeline_mode = #tpu.pipeline_mode<synchronous>, transform_indices = @transform_1, window_bounds = array<i64: 512, 64>}, {transform_indices = @transform_2, window_bounds = array<i64: 1, 4, 16, 64>}]} {
    %c0 = arith.constant 0 : index
    %c0_0 = arith.constant 0 : index
    %c0_1 = arith.constant 0 : index
    %c0_2 = arith.constant 0 : index
    %0 = vector.load %arg2[%c0, %c0_0, %c0_1, %c0_2] : memref<1x4x128x512xf32, #tpu.memory_space<vmem>>, vector<1x1x8x512xf32>
    %1 = vector.shape_cast %0 : vector<1x1x8x512xf32> to vector<8x512xf32>
    %c0_i32 = arith.constant 0 : i32
    %2 = vector.broadcast %c0_i32 : i32 to vector<8x512xi32>
    %c0_3 = arith.constant 0 : index
    %c1 = arith.constant 1 : index
    %c0_4 = arith.constant 0 : index
    %c0_5 = arith.constant 0 : index
    %3 = vector.load %arg2[%c0_3, %c1, %c0_4, %c0_5] : memref<1x4x128x512xf32, #tpu.memory_space<vmem>>, vector<1x1x8x512xf32>
    %4 = vector.shape_cast %3 : vector<1x1x8x512xf32> to vector<8x512xf32>
    %5 = arith.cmpf ogt, %4, %1 : vector<8x512xf32>
    %6 = arith.select %5, %4, %1 : vector<8x512xi1>, vector<8x512xf32>
    %c1_i32 = arith.constant 1 : i32
    %7 = vector.broadcast %c1_i32 : i32 to vector<8x512xi32>
    %8 = arith.select %5, %7, %2 : vector<8x512xi1>, vector<8x512xi32>
    %c0_6 = arith.constant 0 : index
    %c2 = arith.constant 2 : index
    %c0_7 = arith.constant 0 : index
    %c0_8 = arith.constant 0 : index
    %9 = vector.load %arg2[%c0_6, %c2, %c0_7, %c0_8] : memref<1x4x128x512xf32, #tpu.memory_space<vmem>>, vector<1x1x8x512xf32>
    %10 = vector.shape_cast %9 : vector<1x1x8x512xf32> to vector<8x512xf32>
    %11 = arith.cmpf ogt, %10, %6 : vector<8x512xf32>
    %12 = arith.select %11, %10, %6 : vector<8x512xi1>, vector<8x512xf32>
    %c2_i32 = arith.constant 2 : i32
    %13 = vector.broadcast %c2_i32 : i32 to vector<8x512xi32>
    %14 = arith.select %11, %13, %8 : vector<8x512xi1>, vector<8x512xi32>
    %c0_9 = arith.constant 0 : index
    %c3 = arith.constant 3 : index
    %c0_10 = arith.constant 0 : index
    %c0_11 = arith.constant 0 : index
    %15 = vector.load %arg2[%c0_9, %c3, %c0_10, %c0_11] : memref<1x4x128x512xf32, #tpu.memory_space<vmem>>, vector<1x1x8x512xf32>
    %16 = vector.shape_cast %15 : vector<1x1x8x512xf32> to vector<8x512xf32>
    %17 = arith.cmpf ogt, %16, %12 : vector<8x512xf32>
    %c3_i32 = arith.constant 3 : i32
    %18 = vector.broadcast %c3_i32 : i32 to vector<8x512xi32>
    %19 = arith.select %17, %18, %14 : vector<8x512xi1>, vector<8x512xi32>
    %c0_i32_12 = arith.constant 0 : i32
    %20 = vector.broadcast %c0_i32_12 : i32 to vector<8x512xi32>
    %21 = arith.cmpi eq, %19, %20 : vector<8x512xi32>
    %22 = arith.extui %21 : vector<8x512xi1> to vector<8x512xi32>
    %23 = arith.sitofp %22 : vector<8x512xi32> to vector<8x512xf32>
    %cst = arith.constant dense<0.000000e+00> : vector<512xf32>
    %24 = vector.multi_reduction <add>, %23, %cst [0] : vector<8x512xf32> to vector<512xf32>
    %25 = vector.shape_cast %24 : vector<512xf32> to vector<1x512xf32>
    %c0_13 = arith.constant 0 : index
    %c0_14 = arith.constant 0 : index
    %c0_15 = arith.constant 0 : index
    %26 = vector.load %arg5[%c0_13, %c0_14, %c0_15] : memref<4x16x512xf32, #tpu.memory_space<vmem>>, vector<1x1x512xf32>
    %27 = vector.shape_cast %26 : vector<1x1x512xf32> to vector<1x512xf32>
    %28 = vector.shape_cast %25 : vector<1x512xf32> to vector<1x1x512xf32>
    tpu.vector_store %arg5[%c0_13, %c0_14, %c0_15], %28 {strides = array<i32>} : memref<4x16x512xf32, #tpu.memory_space<vmem>>, vector<1x1x512xf32>,
    %c1_i32_16 = arith.constant 1 : i32
    %29 = vector.broadcast %c1_i32_16 : i32 to vector<8x512xi32>
    %30 = arith.cmpi eq, %19, %29 : vector<8x512xi32>
    %31 = arith.extui %30 : vector<8x512xi1> to vector<8x512xi32>
    %32 = arith.sitofp %31 : vector<8x512xi32> to vector<8x512xf32>
    %cst_17 = arith.constant dense<0.000000e+00> : vector<512xf32>
    %33 = vector.multi_reduction <add>, %32, %cst_17 [0] : vector<8x512xf32> to vector<512xf32>
    %34 = vector.shape_cast %33 : vector<512xf32> to vector<1x512xf32>
    %c1_18 = arith.constant 1 : index
    %c0_19 = arith.constant 0 : index
    %c0_20 = arith.constant 0 : index
    %35 = vector.load %arg5[%c1_18, %c0_19, %c0_20] : memref<4x16x512xf32, #tpu.memory_space<vmem>>, vector<1x1x512xf32>
    %36 = vector.shape_cast %35 : vector<1x1x512xf32> to vector<1x512xf32>
    %37 = vector.shape_cast %34 : vector<1x512xf32> to vector<1x1x512xf32>
    tpu.vector_store %arg5[%c1_18, %c0_19, %c0_20], %37 {strides = array<i32>} : memref<4x16x512xf32, #tpu.memory_space<vmem>>, vector<1x1x512xf32>,
    %c2_i32_21 = arith.constant 2 : i32
    %38 = vector.broadcast %c2_i32_21 : i32 to vector<8x512xi32>
    %39 = arith.cmpi eq, %19, %38 : vector<8x512xi32>
    %40 = arith.extui %39 : vector<8x512xi1> to vector<8x512xi32>
    %41 = arith.sitofp %40 : vector<8x512xi32> to vector<8x512xf32>
    %cst_22 = arith.constant dense<0.000000e+00> : vector<512xf32>
    %42 = vector.multi_reduction <add>, %41, %cst_22 [0] : vector<8x512xf32> to vector<512xf32>
    %43 = vector.shape_cast %42 : vector<512xf32> to vector<1x512xf32>
    %c2_23 = arith.constant 2 : index
    %c0_24 = arith.constant 0 : index
    %c0_25 = arith.constant 0 : index
    %44 = vector.load %arg5[%c2_23, %c0_24, %c0_25] : memref<4x16x512xf32, #tpu.memory_space<vmem>>, vector<1x1x512xf32>
    %45 = vector.shape_cast %44 : vector<1x1x512xf32> to vector<1x512xf32>
    %46 = vector.shape_cast %43 : vector<1x512xf32> to vector<1x1x512xf32>
    tpu.vector_store %arg5[%c2_23, %c0_24, %c0_25], %46 {strides = array<i32>} : memref<4x16x512xf32, #tpu.memory_space<vmem>>, vector<1x1x512xf32>,
    %c3_i32_26 = arith.constant 3 : i32
    %47 = vector.broadcast %c3_i32_26 : i32 to vector<8x512xi32>
    %48 = arith.cmpi eq, %19, %47 : vector<8x512xi32>
    %49 = arith.extui %48 : vector<8x512xi1> to vector<8x512xi32>
    %50 = arith.sitofp %49 : vector<8x512xi32> to vector<8x512xf32>
    %cst_27 = arith.constant dense<0.000000e+00> : vector<512xf32>
    %51 = vector.multi_reduction <add>, %50, %cst_27 [0] : vector<8x512xf32> to vector<512xf32>
    %52 = vector.shape_cast %51 : vector<512xf32> to vector<1x512xf32>
    %c3_28 = arith.constant 3 : index
    %c0_29 = arith.constant 0 : index
    %c0_30 = arith.constant 0 : index
    %53 = vector.load %arg5[%c3_28, %c0_29, %c0_30] : memref<4x16x512xf32, #tpu.memory_space<vmem>>, vector<1x1x512xf32>
    %54 = vector.shape_cast %53 : vector<1x1x512xf32> to vector<1x512xf32>
    %55 = vector.shape_cast %52 : vector<1x512xf32> to vector<1x1x512xf32>
    tpu.vector_store %arg5[%c3_28, %c0_29, %c0_30], %55 {strides = array<i32>} : memref<4x16x512xf32, #tpu.memory_space<vmem>>, vector<1x1x512xf32>,
    %c0_31 = arith.constant 0 : index
    %c0_32 = arith.constant 0 : index
    %c8 = arith.constant 8 : index
    %c0_33 = arith.constant 0 : index
    %56 = vector.load %arg2[%c0_31, %c0_32, %c8, %c0_33] : memref<1x4x128x512xf32, #tpu.memory_space<vmem>>, vector<1x1x8x512xf32>
    %57 = vector.shape_cast %56 : vector<1x1x8x512xf32> to vector<8x512xf32>
    %c0_i32_34 = arith.constant 0 : i32
    %58 = vector.broadcast %c0_i32_34 : i32 to vector<8x512xi32>
    %c0_35 = arith.constant 0 : index
    %c1_36 = arith.constant 1 : index
    %c8_37 = arith.constant 8 : index
    %c0_38 = arith.constant 0 : index
    %59 = vector.load %arg2[%c0_35, %c1_36, %c8_37, %c0_38] : memref<1x4x128x512xf32, #tpu.memory_space<vmem>>, vector<1x1x8x512xf32>
    %60 = vector.shape_cast %59 : vector<1x1x8x512xf32> to vector<8x512xf32>
    %61 = arith.cmpf ogt, %60, %57 : vector<8x512xf32>
    %62 = arith.select %61, %60, %57 : vector<8x512xi1>, vector<8x512xf32>
    %c1_i32_39 = arith.constant 1 : i32
    %63 = vector.broadcast %c1_i32_39 : i32 to vector<8x512xi32>
    %64 = arith.select %61, %63, %58 : vector<8x512xi1>, vector<8x512xi32>
    %c0_40 = arith.constant 0 : index
    %c2_41 = arith.constant 2 : index
    %c8_42 = arith.constant 8 : index
    %c0_43 = arith.constant 0 : index
    %65 = vector.load %arg2[%c0_40, %c2_41, %c8_42, %c0_43] : memref<1x4x128x512xf32, #tpu.memory_space<vmem>>, vector<1x1x8x512xf32>
    %66 = vector.shape_cast %65 : vector<1x1x8x512xf32> to vector<8x512xf32>
    %67 = arith.cmpf ogt, %66, %62 : vector<8x512xf32>
    %68 = arith.select %67, %66, %62 : vector<8x512xi1>, vector<8x512xf32>
    %c2_i32_44 = arith.constant 2 : i32
    %69 = vector.broadcast %c2_i32_44 : i32 to vector<8x512xi32>
    %70 = arith.select %67, %69, %64 : vector<8x512xi1>, vector<8x512xi32>
    %c0_45 = arith.constant 0 : index
    %c3_46 = arith.constant 3 : index
    %c8_47 = arith.constant 8 : index
    %c0_48 = arith.constant 0 : index
    %71 = vector.load %arg2[%c0_45, %c3_46, %c8_47, %c0_48] : memref<1x4x128x512xf32, #tpu.memory_space<vmem>>, vector<1x1x8x512xf32>
    %72 = vector.shape_cast %71 : vector<1x1x8x512xf32> to vector<8x512xf32>
    %73 = arith.cmpf ogt, %72, %68 : vector<8x512xf32>
    %c3_i32_49 = arith.constant 3 : i32
    %74 = vector.broadcast %c3_i32_49 : i32 to vector<8x512xi32>
    %75 = arith.select %73, %74, %70 : vector<8x512xi1>, vector<8x512xi32>
    %c0_i32_50 = arith.constant 0 : i32
    %76 = vector.broadcast %c0_i32_50 : i32 to vector<8x512xi32>
    %77 = arith.cmpi eq, %75, %76 : vector<8x512xi32>
    %78 = arith.extui %77 : vector<8x512xi1> to vector<8x512xi32>
    %79 = arith.sitofp %78 : vector<8x512xi32> to vector<8x512xf32>
    %cst_51 = arith.constant dense<0.000000e+00> : vector<512xf32>
    %80 = vector.multi_reduction <add>, %79, %cst_51 [0] : vector<8x512xf32> to vector<512xf32>
    %81 = vector.shape_cast %80 : vector<512xf32> to vector<1x512xf32>
    %c0_52 = arith.constant 0 : index
    %c1_53 = arith.constant 1 : index
    %c0_54 = arith.constant 0 : index
    %82 = vector.load %arg5[%c0_52, %c1_53, %c0_54] : memref<4x16x512xf32, #tpu.memory_space<vmem>>, vector<1x1x512xf32>
    %83 = vector.shape_cast %82 : vector<1x1x512xf32> to vector<1x512xf32>
    %84 = vector.shape_cast %81 : vector<1x512xf32> to vector<1x1x512xf32>
    tpu.vector_store %arg5[%c0_52, %c1_53, %c0_54], %84 {strides = array<i32>} : memref<4x16x512xf32, #tpu.memory_space<vmem>>, vector<1x1x512xf32>,
    %c1_i32_55 = arith.constant 1 : i32
    %85 = vector.broadcast %c1_i32_55 : i32 to vector<8x512xi32>
    %86 = arith.cmpi eq, %75, %85 : vector<8x512xi32>
    %87 = arith.extui %86 : vector<8x512xi1> to vector<8x512xi32>
    %88 = arith.sitofp %87 : vector<8x512xi32> to vector<8x512xf32>
    %cst_56 = arith.constant dense<0.000000e+00> : vector<512xf32>
    %89 = vector.multi_reduction <add>, %88, %cst_56 [0] : vector<8x512xf32> to vector<512xf32>
    %90 = vector.shape_cast %89 : vector<512xf32> to vector<1x512xf32>
    %c1_57 = arith.constant 1 : index
    %c1_58 = arith.constant 1 : index
    %c0_59 = arith.constant 0 : index
    %91 = vector.load %arg5[%c1_57, %c1_58, %c0_59] : memref<4x16x512xf32, #tpu.memory_space<vmem>>, vector<1x1x512xf32>
    %92 = vector.shape_cast %91 : vector<1x1x512xf32> to vector<1x512xf32>
    %93 = vector.shape_cast %90 : vector<1x512xf32> to vector<1x1x512xf32>
    tpu.vector_store %arg5[%c1_57, %c1_58, %c0_59], %93 {strides = array<i32>} : memref<4x16x512xf32, #tpu.memory_space<vmem>>, vector<1x1x512xf32>,
    %c2_i32_60 = arith.constant 2 : i32
    %94 = vector.broadcast %c2_i32_60 : i32 to vector<8x512xi32>
    %95 = arith.cmpi eq, %75, %94 : vector<8x512xi32>
    %96 = arith.extui %95 : vector<8x512xi1> to vector<8x512xi32>
    %97 = arith.sitofp %96 : vector<8x512xi32> to vector<8x512xf32>
    %cst_61 = arith.constant dense<0.000000e+00> : vector<512xf32>
    %98 = vector.multi_reduction <add>, %97, %cst_61 [0] : vector<8x512xf32> to vector<512xf32>
    %99 = vector.shape_cast %98 : vector<512xf32> to vector<1x512xf32>
    %c2_62 = arith.constant 2 : index
    %c1_63 = arith.constant 1 : index
    %c0_64 = arith.constant 0 : index
    %100 = vector.load %arg5[%c2_62, %c1_63, %c0_64] : memref<4x16x512xf32, #tpu.memory_space<vmem>>, vector<1x1x512xf32>
    %101 = vector.shape_cast %100 : vector<1x1x512xf32> to vector<1x512xf32>
    %102 = vector.shape_cast %99 : vector<1x512xf32> to vector<1x1x512xf32>
    tpu.vector_store %arg5[%c2_62, %c1_63, %c0_64], %102 {strides = array<i32>} : memref<4x16x512xf32, #tpu.memory_space<vmem>>, vector<1x1x512xf32>,
    %c3_i32_65 = arith.constant 3 : i32
    %103 = vector.broadcast %c3_i32_65 : i32 to vector<8x512xi32>
    %104 = arith.cmpi eq, %75, %103 : vector<8x512xi32>
    %105 = arith.extui %104 : vector<8x512xi1> to vector<8x512xi32>
    %106 = arith.sitofp %105 : vector<8x512xi32> to vector<8x512xf32>
    %cst_66 = arith.constant dense<0.000000e+00> : vector<512xf32>
    %107 = vector.multi_reduction <add>, %106, %cst_66 [0] : vector<8x512xf32> to vector<512xf32>
    %108 = vector.shape_cast %107 : vector<512xf32> to vector<1x512xf32>
    %c3_67 = arith.constant 3 : index
    %c1_68 = arith.constant 1 : index
    %c0_69 = arith.constant 0 : index
    %109 = vector.load %arg5[%c3_67, %c1_68, %c0_69] : memref<4x16x512xf32, #tpu.memory_space<vmem>>, vector<1x1x512xf32>
    %110 = vector.shape_cast %109 : vector<1x1x512xf32> to vector<1x512xf32>
    %111 = vector.shape_cast %108 : vector<1x512xf32> to vector<1x1x512xf32>
    tpu.vector_store %arg5[%c3_67, %c1_68, %c0_69], %111 {strides = array<i32>} : memref<4x16x512xf32, #tpu.memory_space<vmem>>, vector<1x1x512xf32>,
    %c0_70 = arith.constant 0 : index
    %c0_71 = arith.constant 0 : index
    %c16 = arith.constant 16 : index
    %c0_72 = arith.constant 0 : index
    %112 = vector.load %arg2[%c0_70, %c0_71, %c16, %c0_72] : memref<1x4x128x512xf32, #tpu.memory_space<vmem>>, vector<1x1x8x512xf32>
    %113 = vector.shape_cast %112 : vector<1x1x8x512xf32> to vector<8x512xf32>
    %c0_i32_73 = arith.constant 0 : i32
    %114 = vector.broadcast %c0_i32_73 : i32 to vector<8x512xi32>
    %c0_74 = arith.constant 0 : index
    %c1_75 = arith.constant 1 : index
    %c16_76 = arith.constant 16 : index
    %c0_77 = arith.constant 0 : index
    %115 = vector.load %arg2[%c0_74, %c1_75, %c16_76, %c0_77] : memref<1x4x128x512xf32, #tpu.memory_space<vmem>>, vector<1x1x8x512xf32>
    %116 = vector.shape_cast %115 : vector<1x1x8x512xf32> to vector<8x512xf32>
    %117 = arith.cmpf ogt, %116, %113 : vector<8x512xf32>
    %118 = arith.select %117, %116, %113 : vector<8x512xi1>, vector<8x512xf32>
    %c1_i32_78 = arith.constant 1 : i32
    %119 = vector.broadcast %c1_i32_78 : i32 to vector<8x512xi32>
    %120 = arith.select %117, %119, %114 : vector<8x512xi1>, vector<8x512xi32>
    %c0_79 = arith.constant 0 : index
    %c2_80 = arith.constant 2 : index
    %c16_81 = arith.constant 16 : index
    %c0_82 = arith.constant 0 : index
    %121 = vector.load %arg2[%c0_79, %c2_80, %c16_81, %c0_82] : memref<1x4x128x512xf32, #tpu.memory_space<vmem>>, vector<1x1x8x512xf32>
    %122 = vector.shape_cast %121 : vector<1x1x8x512xf32> to vector<8x512xf32>
    %123 = arith.cmpf ogt, %122, %118 : vector<8x512xf32>
    %124 = arith.select %123, %122, %118 : vector<8x512xi1>, vector<8x512xf32>
    %c2_i32_83 = arith.constant 2 : i32
    %125 = vector.broadcast %c2_i32_83 : i32 to vector<8x512xi32>
    %126 = arith.select %123, %125, %120 : vector<8x512xi1>, vector<8x512xi32>
    %c0_84 = arith.constant 0 : index
    %c3_85 = arith.constant 3 : index
    %c16_86 = arith.constant 16 : index
    %c0_87 = arith.constant 0 : index
    %127 = vector.load %arg2[%c0_84, %c3_85, %c16_86, %c0_87] : memref<1x4x128x512xf32, #tpu.memory_space<vmem>>, vector<1x1x8x512xf32>
    %128 = vector.shape_cast %127 : vector<1x1x8x512xf32> to vector<8x512xf32>
    %129 = arith.cmpf ogt, %128, %124 : vector<8x512xf32>
    %c3_i32_88 = arith.constant 3 : i32
    %130 = vector.broadcast %c3_i32_88 : i32 to vector<8x512xi32>
    %131 = arith.select %129, %130, %126 : vector<8x512xi1>, vector<8x512xi32>
    %c0_i32_89 = arith.constant 0 : i32
    %132 = vector.broadcast %c0_i32_89 : i32 to vector<8x512xi32>
    %133 = arith.cmpi eq, %131, %132 : vector<8x512xi32>
    %134 = arith.extui %133 : vector<8x512xi1> to vector<8x512xi32>
    %135 = arith.sitofp %134 : vector<8x512xi32> to vector<8x512xf32>
    %cst_90 = arith.constant dense<0.000000e+00> : vector<512xf32>
    %136 = vector.multi_reduction <add>, %135, %cst_90 [0] : vector<8x512xf32> to vector<512xf32>
    %137 = vector.shape_cast %136 : vector<512xf32> to vector<1x512xf32>
    %c0_91 = arith.constant 0 : index
    %c2_92 = arith.constant 2 : index
    %c0_93 = arith.constant 0 : index
    %138 = vector.load %arg5[%c0_91, %c2_92, %c0_93] : memref<4x16x512xf32, #tpu.memory_space<vmem>>, vector<1x1x512xf32>
    %139 = vector.shape_cast %138 : vector<1x1x512xf32> to vector<1x512xf32>
    %140 = vector.shape_cast %137 : vector<1x512xf32> to vector<1x1x512xf32>
    tpu.vector_store %arg5[%c0_91, %c2_92, %c0_93], %140 {strides = array<i32>} : memref<4x16x512xf32, #tpu.memory_space<vmem>>, vector<1x1x512xf32>,
    %c1_i32_94 = arith.constant 1 : i32
    %141 = vector.broadcast %c1_i32_94 : i32 to vector<8x512xi32>
    %142 = arith.cmpi eq, %131, %141 : vector<8x512xi32>
    %143 = arith.extui %142 : vector<8x512xi1> to vector<8x512xi32>
    %144 = arith.sitofp %143 : vector<8x512xi32> to vector<8x512xf32>
    %cst_95 = arith.constant dense<0.000000e+00> : vector<512xf32>
    %145 = vector.multi_reduction <add>, %144, %cst_95 [0] : vector<8x512xf32> to vector<512xf32>
    %146 = vector.shape_cast %145 : vector<512xf32> to vector<1x512xf32>
    %c1_96 = arith.constant 1 : index
    %c2_97 = arith.constant 2 : index
    %c0_98 = arith.constant 0 : index
    %147 = vector.load %arg5[%c1_96, %c2_97, %c0_98] : memref<4x16x512xf32, #tpu.memory_space<vmem>>, vector<1x1x512xf32>
    %148 = vector.shape_cast %147 : vector<1x1x512xf32> to vector<1x512xf32>
    %149 = vector.shape_cast %146 : vector<1x512xf32> to vector<1x1x512xf32>
    tpu.vector_store %arg5[%c1_96, %c2_97, %c0_98], %149 {strides = array<i32>} : memref<4x16x512xf32, #tpu.memory_space<vmem>>, vector<1x1x512xf32>,
    %c2_i32_99 = arith.constant 2 : i32
    %150 = vector.broadcast %c2_i32_99 : i32 to vector<8x512xi32>
    %151 = arith.cmpi eq, %131, %150 : vector<8x512xi32>
    %152 = arith.extui %151 : vector<8x512xi1> to vector<8x512xi32>
    %153 = arith.sitofp %152 : vector<8x512xi32> to vector<8x512xf32>
    %cst_100 = arith.constant dense<0.000000e+00> : vector<512xf32>
    %154 = vector.multi_reduction <add>, %153, %cst_100 [0] : vector<8x512xf32> to vector<512xf32>
    %155 = vector.shape_cast %154 : vector<512xf32> to vector<1x512xf32>
    %c2_101 = arith.constant 2 : index
    %c2_102 = arith.constant 2 : index
    %c0_103 = arith.constant 0 : index
    %156 = vector.load %arg5[%c2_101, %c2_102, %c0_103] : memref<4x16x512xf32, #tpu.memory_space<vmem>>, vector<1x1x512xf32>
    %157 = vector.shape_cast %156 : vector<1x1x512xf32> to vector<1x512xf32>
    %158 = vector.shape_cast %155 : vector<1x512xf32> to vector<1x1x512xf32>
    tpu.vector_store %arg5[%c2_101, %c2_102, %c0_103], %158 {strides = array<i32>} : memref<4x16x512xf32, #tpu.memory_space<vmem>>, vector<1x1x512xf32>,
    %c3_i32_104 = arith.constant 3 : i32
    %159 = vector.broadcast %c3_i32_104 : i32 to vector<8x512xi32>
    %160 = arith.cmpi eq, %131, %159 : vector<8x512xi32>
    %161 = arith.extui %160 : vector<8x512xi1> to vector<8x512xi32>
    %162 = arith.sitofp %161 : vector<8x512xi32> to vector<8x512xf32>
    %cst_105 = arith.constant dense<0.000000e+00> : vector<512xf32>
    %163 = vector.multi_reduction <add>, %162, %cst_105 [0] : vector<8x512xf32> to vector<512xf32>
    %164 = vector.shape_cast %163 : vector<512xf32> to vector<1x512xf32>
    %c3_106 = arith.constant 3 : index
    %c2_107 = arith.constant 2 : index
    %c0_108 = arith.constant 0 : index
    %165 = vector.load %arg5[%c3_106, %c2_107, %c0_108] : memref<4x16x512xf32, #tpu.memory_space<vmem>>, vector<1x1x512xf32>
    %166 = vector.shape_cast %165 : vector<1x1x512xf32> to vector<1x512xf32>
    %167 = vector.shape_cast %164 : vector<1x512xf32> to vector<1x1x512xf32>
    tpu.vector_store %arg5[%c3_106, %c2_107, %c0_108], %167 {strides = array<i32>} : memref<4x16x512xf32, #tpu.memory_space<vmem>>, vector<1x1x512xf32>,
    %c0_109 = arith.constant 0 : index
    %c0_110 = arith.constant 0 : index
    %c24 = arith.constant 24 : index
    %c0_111 = arith.constant 0 : index
    %168 = vector.load %arg2[%c0_109, %c0_110, %c24, %c0_111] : memref<1x4x128x512xf32, #tpu.memory_space<vmem>>, vector<1x1x8x512xf32>
    %169 = vector.shape_cast %168 : vector<1x1x8x512xf32> to vector<8x512xf32>
    %c0_i32_112 = arith.constant 0 : i32
    %170 = vector.broadcast %c0_i32_112 : i32 to vector<8x512xi32>
    %c0_113 = arith.constant 0 : index
    %c1_114 = arith.constant 1 : index
    %c24_115 = arith.constant 24 : index
    %c0_116 = arith.constant 0 : index
    %171 = vector.load %arg2[%c0_113, %c1_114, %c24_115, %c0_116] : memref<1x4x128x512xf32, #tpu.memory_space<vmem>>, vector<1x1x8x512xf32>
    %172 = vector.shape_cast %171 : vector<1x1x8x512xf32> to vector<8x512xf32>
    %173 = arith.cmpf ogt, %172, %169 : vector<8x512xf32>
    %174 = arith.select %173, %172, %169 : vector<8x512xi1>, vector<8x512xf32>
    %c1_i32_117 = arith.constant 1 : i32
    %175 = vector.broadcast %c1_i32_117 : i32 to vector<8x512xi32>
    %176 = arith.select %173, %175, %170 : vector<8x512xi1>, vector<8x512xi32>
    %c0_118 = arith.constant 0 : index
    %c2_119 = arith.constant 2 : index
    %c24_120 = arith.constant 24 : index
    %c0_121 = arith.constant 0 : index
    %177 = vector.load %arg2[%c0_118, %c2_119, %c24_120, %c0_121] : memref<1x4x128x512xf32, #tpu.memory_space<vmem>>, vector<1x1x8x512xf32>
    %178 = vector.shape_cast %177 : vector<1x1x8x512xf32> to vector<8x512xf32>
    %179 = arith.cmpf ogt, %178, %174 : vector<8x512xf32>
    %180 = arith.select %179, %178, %174 : vector<8x512xi1>, vector<8x512xf32>
    %c2_i32_122 = arith.constant 2 : i32
    %181 = vector.broadcast %c2_i32_122 : i32 to vector<8x512xi32>
    %182 = arith.select %179, %181, %176 : vector<8x512xi1>, vector<8x512xi32>
    %c0_123 = arith.constant 0 : index
    %c3_124 = arith.constant 3 : index
    %c24_125 = arith.constant 24 : index
    %c0_126 = arith.constant 0 : index
    %183 = vector.load %arg2[%c0_123, %c3_124, %c24_125, %c0_126] : memref<1x4x128x512xf32, #tpu.memory_space<vmem>>, vector<1x1x8x512xf32>
    %184 = vector.shape_cast %183 : vector<1x1x8x512xf32> to vector<8x512xf32>
    %185 = arith.cmpf ogt, %184, %180 : vector<8x512xf32>
    %c3_i32_127 = arith.constant 3 : i32
    %186 = vector.broadcast %c3_i32_127 : i32 to vector<8x512xi32>
    %187 = arith.select %185, %186, %182 : vector<8x512xi1>, vector<8x512xi32>
    %c0_i32_128 = arith.constant 0 : i32
    %188 = vector.broadcast %c0_i32_128 : i32 to vector<8x512xi32>
    %189 = arith.cmpi eq, %187, %188 : vector<8x512xi32>
    %190 = arith.extui %189 : vector<8x512xi1> to vector<8x512xi32>
    %191 = arith.sitofp %190 : vector<8x512xi32> to vector<8x512xf32>
    %cst_129 = arith.constant dense<0.000000e+00> : vector<512xf32>
    %192 = vector.multi_reduction <add>, %191, %cst_129 [0] : vector<8x512xf32> to vector<512xf32>
    %193 = vector.shape_cast %192 : vector<512xf32> to vector<1x512xf32>
    %c0_130 = arith.constant 0 : index
    %c3_131 = arith.constant 3 : index
    %c0_132 = arith.constant 0 : index
    %194 = vector.load %arg5[%c0_130, %c3_131, %c0_132] : memref<4x16x512xf32, #tpu.memory_space<vmem>>, vector<1x1x512xf32>
    %195 = vector.shape_cast %194 : vector<1x1x512xf32> to vector<1x512xf32>
    %196 = vector.shape_cast %193 : vector<1x512xf32> to vector<1x1x512xf32>
    tpu.vector_store %arg5[%c0_130, %c3_131, %c0_132], %196 {strides = array<i32>} : memref<4x16x512xf32, #tpu.memory_space<vmem>>, vector<1x1x512xf32>,
    %c1_i32_133 = arith.constant 1 : i32
    %197 = vector.broadcast %c1_i32_133 : i32 to vector<8x512xi32>
    %198 = arith.cmpi eq, %187, %197 : vector<8x512xi32>
    %199 = arith.extui %198 : vector<8x512xi1> to vector<8x512xi32>
    %200 = arith.sitofp %199 : vector<8x512xi32> to vector<8x512xf32>
    %cst_134 = arith.constant dense<0.000000e+00> : vector<512xf32>
    %201 = vector.multi_reduction <add>, %200, %cst_134 [0] : vector<8x512xf32> to vector<512xf32>
    %202 = vector.shape_cast %201 : vector<512xf32> to vector<1x512xf32>
    %c1_135 = arith.constant 1 : index
    %c3_136 = arith.constant 3 : index
    %c0_137 = arith.constant 0 : index
    %203 = vector.load %arg5[%c1_135, %c3_136, %c0_137] : memref<4x16x512xf32, #tpu.memory_space<vmem>>, vector<1x1x512xf32>
    %204 = vector.shape_cast %203 : vector<1x1x512xf32> to vector<1x512xf32>
    %205 = vector.shape_cast %202 : vector<1x512xf32> to vector<1x1x512xf32>
    tpu.vector_store %arg5[%c1_135, %c3_136, %c0_137], %205 {strides = array<i32>} : memref<4x16x512xf32, #tpu.memory_space<vmem>>, vector<1x1x512xf32>,
    %c2_i32_138 = arith.constant 2 : i32
    %206 = vector.broadcast %c2_i32_138 : i32 to vector<8x512xi32>
    %207 = arith.cmpi eq, %187, %206 : vector<8x512xi32>
    %208 = arith.extui %207 : vector<8x512xi1> to vector<8x512xi32>
    %209 = arith.sitofp %208 : vector<8x512xi32> to vector<8x512xf32>
    %cst_139 = arith.constant dense<0.000000e+00> : vector<512xf32>
    %210 = vector.multi_reduction <add>, %209, %cst_139 [0] : vector<8x512xf32> to vector<512xf32>
    %211 = vector.shape_cast %210 : vector<512xf32> to vector<1x512xf32>
    %c2_140 = arith.constant 2 : index
    %c3_141 = arith.constant 3 : index
    %c0_142 = arith.constant 0 : index
    %212 = vector.load %arg5[%c2_140, %c3_141, %c0_142] : memref<4x16x512xf32, #tpu.memory_space<vmem>>, vector<1x1x512xf32>
    %213 = vector.shape_cast %212 : vector<1x1x512xf32> to vector<1x512xf32>
    %214 = vector.shape_cast %211 : vector<1x512xf32> to vector<1x1x512xf32>
    tpu.vector_store %arg5[%c2_140, %c3_141, %c0_142], %214 {strides = array<i32>} : memref<4x16x512xf32, #tpu.memory_space<vmem>>, vector<1x1x512xf32>,
    %c3_i32_143 = arith.constant 3 : i32
    %215 = vector.broadcast %c3_i32_143 : i32 to vector<8x512xi32>
    %216 = arith.cmpi eq, %187, %215 : vector<8x512xi32>
    %217 = arith.extui %216 : vector<8x512xi1> to vector<8x512xi32>
    %218 = arith.sitofp %217 : vector<8x512xi32> to vector<8x512xf32>
    %cst_144 = arith.constant dense<0.000000e+00> : vector<512xf32>
    %219 = vector.multi_reduction <add>, %218, %cst_144 [0] : vector<8x512xf32> to vector<512xf32>
    %220 = vector.shape_cast %219 : vector<512xf32> to vector<1x512xf32>
    %c3_145 = arith.constant 3 : index
    %c3_146 = arith.constant 3 : index
    %c0_147 = arith.constant 0 : index
    %221 = vector.load %arg5[%c3_145, %c3_146, %c0_147] : memref<4x16x512xf32, #tpu.memory_space<vmem>>, vector<1x1x512xf32>
    %222 = vector.shape_cast %221 : vector<1x1x512xf32> to vector<1x512xf32>
    %223 = vector.shape_cast %220 : vector<1x512xf32> to vector<1x1x512xf32>
    tpu.vector_store %arg5[%c3_145, %c3_146, %c0_147], %223 {strides = array<i32>} : memref<4x16x512xf32, #tpu.memory_space<vmem>>, vector<1x1x512xf32>,
    %c0_148 = arith.constant 0 : index
    %c0_149 = arith.constant 0 : index
    %c32 = arith.constant 32 : index
    %c0_150 = arith.constant 0 : index
    %224 = vector.load %arg2[%c0_148, %c0_149, %c32, %c0_150] : memref<1x4x128x512xf32, #tpu.memory_space<vmem>>, vector<1x1x8x512xf32>
    %225 = vector.shape_cast %224 : vector<1x1x8x512xf32> to vector<8x512xf32>
    %c0_i32_151 = arith.constant 0 : i32
    %226 = vector.broadcast %c0_i32_151 : i32 to vector<8x512xi32>
    %c0_152 = arith.constant 0 : index
    %c1_153 = arith.constant 1 : index
    %c32_154 = arith.constant 32 : index
    %c0_155 = arith.constant 0 : index
    %227 = vector.load %arg2[%c0_152, %c1_153, %c32_154, %c0_155] : memref<1x4x128x512xf32, #tpu.memory_space<vmem>>, vector<1x1x8x512xf32>
    %228 = vector.shape_cast %227 : vector<1x1x8x512xf32> to vector<8x512xf32>
    %229 = arith.cmpf ogt, %228, %225 : vector<8x512xf32>
    %230 = arith.select %229, %228, %225 : vector<8x512xi1>, vector<8x512xf32>
    %c1_i32_156 = arith.constant 1 : i32
    %231 = vector.broadcast %c1_i32_156 : i32 to vector<8x512xi32>
    %232 = arith.select %229, %231, %226 : vector<8x512xi1>, vector<8x512xi32>
    %c0_157 = arith.constant 0 : index
    %c2_158 = arith.constant 2 : index
    %c32_159 = arith.constant 32 : index
    %c0_160 = arith.constant 0 : index
    %233 = vector.load %arg2[%c0_157, %c2_158, %c32_159, %c0_160] : memref<1x4x128x512xf32, #tpu.memory_space<vmem>>, vector<1x1x8x512xf32>
    %234 = vector.shape_cast %233 : vector<1x1x8x512xf32> to vector<8x512xf32>
    %235 = arith.cmpf ogt, %234, %230 : vector<8x512xf32>
    %236 = arith.select %235, %234, %230 : vector<8x512xi1>, vector<8x512xf32>
    %c2_i32_161 = arith.constant 2 : i32
    %237 = vector.broadcast %c2_i32_161 : i32 to vector<8x512xi32>
    %238 = arith.select %235, %237, %232 : vector<8x512xi1>, vector<8x512xi32>
    %c0_162 = arith.constant 0 : index
    %c3_163 = arith.constant 3 : index
    %c32_164 = arith.constant 32 : index
    %c0_165 = arith.constant 0 : index
    %239 = vector.load %arg2[%c0_162, %c3_163, %c32_164, %c0_165] : memref<1x4x128x512xf32, #tpu.memory_space<vmem>>, vector<1x1x8x512xf32>
    %240 = vector.shape_cast %239 : vector<1x1x8x512xf32> to vector<8x512xf32>
    %241 = arith.cmpf ogt, %240, %236 : vector<8x512xf32>
    %c3_i32_166 = arith.constant 3 : i32
    %242 = vector.broadcast %c3_i32_166 : i32 to vector<8x512xi32>
    %243 = arith.select %241, %242, %238 : vector<8x512xi1>, vector<8x512xi32>
    %c0_i32_167 = arith.constant 0 : i32
    %244 = vector.broadcast %c0_i32_167 : i32 to vector<8x512xi32>
    %245 = arith.cmpi eq, %243, %244 : vector<8x512xi32>
    %246 = arith.extui %245 : vector<8x512xi1> to vector<8x512xi32>
    %247 = arith.sitofp %246 : vector<8x512xi32> to vector<8x512xf32>
    %cst_168 = arith.constant dense<0.000000e+00> : vector<512xf32>
    %248 = vector.multi_reduction <add>, %247, %cst_168 [0] : vector<8x512xf32> to vector<512xf32>
    %249 = vector.shape_cast %248 : vector<512xf32> to vector<1x512xf32>
    %c0_169 = arith.constant 0 : index
    %c4 = arith.constant 4 : index
    %c0_170 = arith.constant 0 : index
    %250 = vector.load %arg5[%c0_169, %c4, %c0_170] : memref<4x16x512xf32, #tpu.memory_space<vmem>>, vector<1x1x512xf32>
    %251 = vector.shape_cast %250 : vector<1x1x512xf32> to vector<1x512xf32>
    %252 = vector.shape_cast %249 : vector<1x512xf32> to vector<1x1x512xf32>
    tpu.vector_store %arg5[%c0_169, %c4, %c0_170], %252 {strides = array<i32>} : memref<4x16x512xf32, #tpu.memory_space<vmem>>, vector<1x1x512xf32>,
    %c1_i32_171 = arith.constant 1 : i32
    %253 = vector.broadcast %c1_i32_171 : i32 to vector<8x512xi32>
    %254 = arith.cmpi eq, %243, %253 : vector<8x512xi32>
    %255 = arith.extui %254 : vector<8x512xi1> to vector<8x512xi32>
    %256 = arith.sitofp %255 : vector<8x512xi32> to vector<8x512xf32>
    %cst_172 = arith.constant dense<0.000000e+00> : vector<512xf32>
    %257 = vector.multi_reduction <add>, %256, %cst_172 [0] : vector<8x512xf32> to vector<512xf32>
    %258 = vector.shape_cast %257 : vector<512xf32> to vector<1x512xf32>
    %c1_173 = arith.constant 1 : index
    %c4_174 = arith.constant 4 : index
    %c0_175 = arith.constant 0 : index
    %259 = vector.load %arg5[%c1_173, %c4_174, %c0_175] : memref<4x16x512xf32, #tpu.memory_space<vmem>>, vector<1x1x512xf32>
    %260 = vector.shape_cast %259 : vector<1x1x512xf32> to vector<1x512xf32>
    %261 = vector.shape_cast %258 : vector<1x512xf32> to vector<1x1x512xf32>
    tpu.vector_store %arg5[%c1_173, %c4_174, %c0_175], %261 {strides = array<i32>} : memref<4x16x512xf32, #tpu.memory_space<vmem>>, vector<1x1x512xf32>,
    %c2_i32_176 = arith.constant 2 : i32
    %262 = vector.broadcast %c2_i32_176 : i32 to vector<8x512xi32>
    %263 = arith.cmpi eq, %243, %262 : vector<8x512xi32>
    %264 = arith.extui %263 : vector<8x512xi1> to vector<8x512xi32>
    %265 = arith.sitofp %264 : vector<8x512xi32> to vector<8x512xf32>
    %cst_177 = arith.constant dense<0.000000e+00> : vector<512xf32>
    %266 = vector.multi_reduction <add>, %265, %cst_177 [0] : vector<8x512xf32> to vector<512xf32>
    %267 = vector.shape_cast %266 : vector<512xf32> to vector<1x512xf32>
    %c2_178 = arith.constant 2 : index
    %c4_179 = arith.constant 4 : index
    %c0_180 = arith.constant 0 : index
    %268 = vector.load %arg5[%c2_178, %c4_179, %c0_180] : memref<4x16x512xf32, #tpu.memory_space<vmem>>, vector<1x1x512xf32>
    %269 = vector.shape_cast %268 : vector<1x1x512xf32> to vector<1x512xf32>
    %270 = vector.shape_cast %267 : vector<1x512xf32> to vector<1x1x512xf32>
    tpu.vector_store %arg5[%c2_178, %c4_179, %c0_180], %270 {strides = array<i32>} : memref<4x16x512xf32, #tpu.memory_space<vmem>>, vector<1x1x512xf32>,
    %c3_i32_181 = arith.constant 3 : i32
    %271 = vector.broadcast %c3_i32_181 : i32 to vector<8x512xi32>
    %272 = arith.cmpi eq, %243, %271 : vector<8x512xi32>
    %273 = arith.extui %272 : vector<8x512xi1> to vector<8x512xi32>
    %274 = arith.sitofp %273 : vector<8x512xi32> to vector<8x512xf32>
    %cst_182 = arith.constant dense<0.000000e+00> : vector<512xf32>
    %275 = vector.multi_reduction <add>, %274, %cst_182 [0] : vector<8x512xf32> to vector<512xf32>
    %276 = vector.shape_cast %275 : vector<512xf32> to vector<1x512xf32>
    %c3_183 = arith.constant 3 : index
    %c4_184 = arith.constant 4 : index
    %c0_185 = arith.constant 0 : index
    %277 = vector.load %arg5[%c3_183, %c4_184, %c0_185] : memref<4x16x512xf32, #tpu.memory_space<vmem>>, vector<1x1x512xf32>
    %278 = vector.shape_cast %277 : vector<1x1x512xf32> to vector<1x512xf32>
    %279 = vector.shape_cast %276 : vector<1x512xf32> to vector<1x1x512xf32>
    tpu.vector_store %arg5[%c3_183, %c4_184, %c0_185], %279 {strides = array<i32>} : memref<4x16x512xf32, #tpu.memory_space<vmem>>, vector<1x1x512xf32>,
    %c0_186 = arith.constant 0 : index
    %c0_187 = arith.constant 0 : index
    %c40 = arith.constant 40 : index
    %c0_188 = arith.constant 0 : index
    %280 = vector.load %arg2[%c0_186, %c0_187, %c40, %c0_188] : memref<1x4x128x512xf32, #tpu.memory_space<vmem>>, vector<1x1x8x512xf32>
    %281 = vector.shape_cast %280 : vector<1x1x8x512xf32> to vector<8x512xf32>
    %c0_i32_189 = arith.constant 0 : i32
    %282 = vector.broadcast %c0_i32_189 : i32 to vector<8x512xi32>
    %c0_190 = arith.constant 0 : index
    %c1_191 = arith.constant 1 : index
    %c40_192 = arith.constant 40 : index
    %c0_193 = arith.constant 0 : index
    %283 = vector.load %arg2[%c0_190, %c1_191, %c40_192, %c0_193] : memref<1x4x128x512xf32, #tpu.memory_space<vmem>>, vector<1x1x8x512xf32>
    %284 = vector.shape_cast %283 : vector<1x1x8x512xf32> to vector<8x512xf32>
    %285 = arith.cmpf ogt, %284, %281 : vector<8x512xf32>
    %286 = arith.select %285, %284, %281 : vector<8x512xi1>, vector<8x512xf32>
    %c1_i32_194 = arith.constant 1 : i32
    %287 = vector.broadcast %c1_i32_194 : i32 to vector<8x512xi32>
    %288 = arith.select %285, %287, %282 : vector<8x512xi1>, vector<8x512xi32>
    %c0_195 = arith.constant 0 : index
    %c2_196 = arith.constant 2 : index
    %c40_197 = arith.constant 40 : index
    %c0_198 = arith.constant 0 : index
    %289 = vector.load %arg2[%c0_195, %c2_196, %c40_197, %c0_198] : memref<1x4x128x512xf32, #tpu.memory_space<vmem>>, vector<1x1x8x512xf32>
    %290 = vector.shape_cast %289 : vector<1x1x8x512xf32> to vector<8x512xf32>
    %291 = arith.cmpf ogt, %290, %286 : vector<8x512xf32>
    %292 = arith.select %291, %290, %286 : vector<8x512xi1>, vector<8x512xf32>
    %c2_i32_199 = arith.constant 2 : i32
    %293 = vector.broadcast %c2_i32_199 : i32 to vector<8x512xi32>
    %294 = arith.select %291, %293, %288 : vector<8x512xi1>, vector<8x512xi32>
    %c0_200 = arith.constant 0 : index
    %c3_201 = arith.constant 3 : index
    %c40_202 = arith.constant 40 : index
    %c0_203 = arith.constant 0 : index
    %295 = vector.load %arg2[%c0_200, %c3_201, %c40_202, %c0_203] : memref<1x4x128x512xf32, #tpu.memory_space<vmem>>, vector<1x1x8x512xf32>
    %296 = vector.shape_cast %295 : vector<1x1x8x512xf32> to vector<8x512xf32>
    %297 = arith.cmpf ogt, %296, %292 : vector<8x512xf32>
    %c3_i32_204 = arith.constant 3 : i32
    %298 = vector.broadcast %c3_i32_204 : i32 to vector<8x512xi32>
    %299 = arith.select %297, %298, %294 : vector<8x512xi1>, vector<8x512xi32>
    %c0_i32_205 = arith.constant 0 : i32
    %300 = vector.broadcast %c0_i32_205 : i32 to vector<8x512xi32>
    %301 = arith.cmpi eq, %299, %300 : vector<8x512xi32>
    %302 = arith.extui %301 : vector<8x512xi1> to vector<8x512xi32>
    %303 = arith.sitofp %302 : vector<8x512xi32> to vector<8x512xf32>
    %cst_206 = arith.constant dense<0.000000e+00> : vector<512xf32>
    %304 = vector.multi_reduction <add>, %303, %cst_206 [0] : vector<8x512xf32> to vector<512xf32>
    %305 = vector.shape_cast %304 : vector<512xf32> to vector<1x512xf32>
    %c0_207 = arith.constant 0 : index
    %c5 = arith.constant 5 : index
    %c0_208 = arith.constant 0 : index
    %306 = vector.load %arg5[%c0_207, %c5, %c0_208] : memref<4x16x512xf32, #tpu.memory_space<vmem>>, vector<1x1x512xf32>
    %307 = vector.shape_cast %306 : vector<1x1x512xf32> to vector<1x512xf32>
    %308 = vector.shape_cast %305 : vector<1x512xf32> to vector<1x1x512xf32>
    tpu.vector_store %arg5[%c0_207, %c5, %c0_208], %308 {strides = array<i32>} : memref<4x16x512xf32, #tpu.memory_space<vmem>>, vector<1x1x512xf32>,
    %c1_i32_209 = arith.constant 1 : i32
    %309 = vector.broadcast %c1_i32_209 : i32 to vector<8x512xi32>
    %310 = arith.cmpi eq, %299, %309 : vector<8x512xi32>
    %311 = arith.extui %310 : vector<8x512xi1> to vector<8x512xi32>
    %312 = arith.sitofp %311 : vector<8x512xi32> to vector<8x512xf32>
    %cst_210 = arith.constant dense<0.000000e+00> : vector<512xf32>
    %313 = vector.multi_reduction <add>, %312, %cst_210 [0] : vector<8x512xf32> to vector<512xf32>
    %314 = vector.shape_cast %313 : vector<512xf32> to vector<1x512xf32>
    %c1_211 = arith.constant 1 : index
    %c5_212 = arith.constant 5 : index
    %c0_213 = arith.constant 0 : index
    %315 = vector.load %arg5[%c1_211, %c5_212, %c0_213] : memref<4x16x512xf32, #tpu.memory_space<vmem>>, vector<1x1x512xf32>
    %316 = vector.shape_cast %315 : vector<1x1x512xf32> to vector<1x512xf32>
    %317 = vector.shape_cast %314 : vector<1x512xf32> to vector<1x1x512xf32>
    tpu.vector_store %arg5[%c1_211, %c5_212, %c0_213], %317 {strides = array<i32>} : memref<4x16x512xf32, #tpu.memory_space<vmem>>, vector<1x1x512xf32>,
    %c2_i32_214 = arith.constant 2 : i32
    %318 = vector.broadcast %c2_i32_214 : i32 to vector<8x512xi32>
    %319 = arith.cmpi eq, %299, %318 : vector<8x512xi32>
    %320 = arith.extui %319 : vector<8x512xi1> to vector<8x512xi32>
    %321 = arith.sitofp %320 : vector<8x512xi32> to vector<8x512xf32>
    %cst_215 = arith.constant dense<0.000000e+00> : vector<512xf32>
    %322 = vector.multi_reduction <add>, %321, %cst_215 [0] : vector<8x512xf32> to vector<512xf32>
    %323 = vector.shape_cast %322 : vector<512xf32> to vector<1x512xf32>
    %c2_216 = arith.constant 2 : index
    %c5_217 = arith.constant 5 : index
    %c0_218 = arith.constant 0 : index
    %324 = vector.load %arg5[%c2_216, %c5_217, %c0_218] : memref<4x16x512xf32, #tpu.memory_space<vmem>>, vector<1x1x512xf32>
    %325 = vector.shape_cast %324 : vector<1x1x512xf32> to vector<1x512xf32>
    %326 = vector.shape_cast %323 : vector<1x512xf32> to vector<1x1x512xf32>
    tpu.vector_store %arg5[%c2_216, %c5_217, %c0_218], %326 {strides = array<i32>} : memref<4x16x512xf32, #tpu.memory_space<vmem>>, vector<1x1x512xf32>,
    %c3_i32_219 = arith.constant 3 : i32
    %327 = vector.broadcast %c3_i32_219 : i32 to vector<8x512xi32>
    %328 = arith.cmpi eq, %299, %327 : vector<8x512xi32>
    %329 = arith.extui %328 : vector<8x512xi1> to vector<8x512xi32>
    %330 = arith.sitofp %329 : vector<8x512xi32> to vector<8x512xf32>
    %cst_220 = arith.constant dense<0.000000e+00> : vector<512xf32>
    %331 = vector.multi_reduction <add>, %330, %cst_220 [0] : vector<8x512xf32> to vector<512xf32>
    %332 = vector.shape_cast %331 : vector<512xf32> to vector<1x512xf32>
    %c3_221 = arith.constant 3 : index
    %c5_222 = arith.constant 5 : index
    %c0_223 = arith.constant 0 : index
    %333 = vector.load %arg5[%c3_221, %c5_222, %c0_223] : memref<4x16x512xf32, #tpu.memory_space<vmem>>, vector<1x1x512xf32>
    %334 = vector.shape_cast %333 : vector<1x1x512xf32> to vector<1x512xf32>
    %335 = vector.shape_cast %332 : vector<1x512xf32> to vector<1x1x512xf32>
    tpu.vector_store %arg5[%c3_221, %c5_222, %c0_223], %335 {strides = array<i32>} : memref<4x16x512xf32, #tpu.memory_space<vmem>>, vector<1x1x512xf32>,
    %c0_224 = arith.constant 0 : index
    %c0_225 = arith.constant 0 : index
    %c48 = arith.constant 48 : index
    %c0_226 = arith.constant 0 : index
    %336 = vector.load %arg2[%c0_224, %c0_225, %c48, %c0_226] : memref<1x4x128x512xf32, #tpu.memory_space<vmem>>, vector<1x1x8x512xf32>
    %337 = vector.shape_cast %336 : vector<1x1x8x512xf32> to vector<8x512xf32>
    %c0_i32_227 = arith.constant 0 : i32
    %338 = vector.broadcast %c0_i32_227 : i32 to vector<8x512xi32>
    %c0_228 = arith.constant 0 : index
    %c1_229 = arith.constant 1 : index
    %c48_230 = arith.constant 48 : index
    %c0_231 = arith.constant 0 : index
    %339 = vector.load %arg2[%c0_228, %c1_229, %c48_230, %c0_231] : memref<1x4x128x512xf32, #tpu.memory_space<vmem>>, vector<1x1x8x512xf32>
    %340 = vector.shape_cast %339 : vector<1x1x8x512xf32> to vector<8x512xf32>
    %341 = arith.cmpf ogt, %340, %337 : vector<8x512xf32>
    %342 = arith.select %341, %340, %337 : vector<8x512xi1>, vector<8x512xf32>
    %c1_i32_232 = arith.constant 1 : i32
    %343 = vector.broadcast %c1_i32_232 : i32 to vector<8x512xi32>
    %344 = arith.select %341, %343, %338 : vector<8x512xi1>, vector<8x512xi32>
    %c0_233 = arith.constant 0 : index
    %c2_234 = arith.constant 2 : index
    %c48_235 = arith.constant 48 : index
    %c0_236 = arith.constant 0 : index
    %345 = vector.load %arg2[%c0_233, %c2_234, %c48_235, %c0_236] : memref<1x4x128x512xf32, #tpu.memory_space<vmem>>, vector<1x1x8x512xf32>
    %346 = vector.shape_cast %345 : vector<1x1x8x512xf32> to vector<8x512xf32>
    %347 = arith.cmpf ogt, %346, %342 : vector<8x512xf32>
    %348 = arith.select %347, %346, %342 : vector<8x512xi1>, vector<8x512xf32>
    %c2_i32_237 = arith.constant 2 : i32
    %349 = vector.broadcast %c2_i32_237 : i32 to vector<8x512xi32>
    %350 = arith.select %347, %349, %344 : vector<8x512xi1>, vector<8x512xi32>
    %c0_238 = arith.constant 0 : index
    %c3_239 = arith.constant 3 : index
    %c48_240 = arith.constant 48 : index
    %c0_241 = arith.constant 0 : index
    %351 = vector.load %arg2[%c0_238, %c3_239, %c48_240, %c0_241] : memref<1x4x128x512xf32, #tpu.memory_space<vmem>>, vector<1x1x8x512xf32>
    %352 = vector.shape_cast %351 : vector<1x1x8x512xf32> to vector<8x512xf32>
    %353 = arith.cmpf ogt, %352, %348 : vector<8x512xf32>
    %c3_i32_242 = arith.constant 3 : i32
    %354 = vector.broadcast %c3_i32_242 : i32 to vector<8x512xi32>
    %355 = arith.select %353, %354, %350 : vector<8x512xi1>, vector<8x512xi32>
    %c0_i32_243 = arith.constant 0 : i32
    %356 = vector.broadcast %c0_i32_243 : i32 to vector<8x512xi32>
    %357 = arith.cmpi eq, %355, %356 : vector<8x512xi32>
    %358 = arith.extui %357 : vector<8x512xi1> to vector<8x512xi32>
    %359 = arith.sitofp %358 : vector<8x512xi32> to vector<8x512xf32>
    %cst_244 = arith.constant dense<0.000000e+00> : vector<512xf32>
    %360 = vector.multi_reduction <add>, %359, %cst_244 [0] : vector<8x512xf32> to vector<512xf32>
    %361 = vector.shape_cast %360 : vector<512xf32> to vector<1x512xf32>
    %c0_245 = arith.constant 0 : index
    %c6 = arith.constant 6 : index
    %c0_246 = arith.constant 0 : index
    %362 = vector.load %arg5[%c0_245, %c6, %c0_246] : memref<4x16x512xf32, #tpu.memory_space<vmem>>, vector<1x1x512xf32>
    %363 = vector.shape_cast %362 : vector<1x1x512xf32> to vector<1x512xf32>
    %364 = vector.shape_cast %361 : vector<1x512xf32> to vector<1x1x512xf32>
    tpu.vector_store %arg5[%c0_245, %c6, %c0_246], %364 {strides = array<i32>} : memref<4x16x512xf32, #tpu.memory_space<vmem>>, vector<1x1x512xf32>,
    %c1_i32_247 = arith.constant 1 : i32
    %365 = vector.broadcast %c1_i32_247 : i32 to vector<8x512xi32>
    %366 = arith.cmpi eq, %355, %365 : vector<8x512xi32>
    %367 = arith.extui %366 : vector<8x512xi1> to vector<8x512xi32>
    %368 = arith.sitofp %367 : vector<8x512xi32> to vector<8x512xf32>
    %cst_248 = arith.constant dense<0.000000e+00> : vector<512xf32>
    %369 = vector.multi_reduction <add>, %368, %cst_248 [0] : vector<8x512xf32> to vector<512xf32>
    %370 = vector.shape_cast %369 : vector<512xf32> to vector<1x512xf32>
    %c1_249 = arith.constant 1 : index
    %c6_250 = arith.constant 6 : index
    %c0_251 = arith.constant 0 : index
    %371 = vector.load %arg5[%c1_249, %c6_250, %c0_251] : memref<4x16x512xf32, #tpu.memory_space<vmem>>, vector<1x1x512xf32>
    %372 = vector.shape_cast %371 : vector<1x1x512xf32> to vector<1x512xf32>
    %373 = vector.shape_cast %370 : vector<1x512xf32> to vector<1x1x512xf32>
    tpu.vector_store %arg5[%c1_249, %c6_250, %c0_251], %373 {strides = array<i32>} : memref<4x16x512xf32, #tpu.memory_space<vmem>>, vector<1x1x512xf32>,
    %c2_i32_252 = arith.constant 2 : i32
    %374 = vector.broadcast %c2_i32_252 : i32 to vector<8x512xi32>
    %375 = arith.cmpi eq, %355, %374 : vector<8x512xi32>
    %376 = arith.extui %375 : vector<8x512xi1> to vector<8x512xi32>
    %377 = arith.sitofp %376 : vector<8x512xi32> to vector<8x512xf32>
    %cst_253 = arith.constant dense<0.000000e+00> : vector<512xf32>
    %378 = vector.multi_reduction <add>, %377, %cst_253 [0] : vector<8x512xf32> to vector<512xf32>
    %379 = vector.shape_cast %378 : vector<512xf32> to vector<1x512xf32>
    %c2_254 = arith.constant 2 : index
    %c6_255 = arith.constant 6 : index
    %c0_256 = arith.constant 0 : index
    %380 = vector.load %arg5[%c2_254, %c6_255, %c0_256] : memref<4x16x512xf32, #tpu.memory_space<vmem>>, vector<1x1x512xf32>
    %381 = vector.shape_cast %380 : vector<1x1x512xf32> to vector<1x512xf32>
    %382 = vector.shape_cast %379 : vector<1x512xf32> to vector<1x1x512xf32>
    tpu.vector_store %arg5[%c2_254, %c6_255, %c0_256], %382 {strides = array<i32>} : memref<4x16x512xf32, #tpu.memory_space<vmem>>, vector<1x1x512xf32>,
    %c3_i32_257 = arith.constant 3 : i32
    %383 = vector.broadcast %c3_i32_257 : i32 to vector<8x512xi32>
    %384 = arith.cmpi eq, %355, %383 : vector<8x512xi32>
    %385 = arith.extui %384 : vector<8x512xi1> to vector<8x512xi32>
    %386 = arith.sitofp %385 : vector<8x512xi32> to vector<8x512xf32>
    %cst_258 = arith.constant dense<0.000000e+00> : vector<512xf32>
    %387 = vector.multi_reduction <add>, %386, %cst_258 [0] : vector<8x512xf32> to vector<512xf32>
    %388 = vector.shape_cast %387 : vector<512xf32> to vector<1x512xf32>
    %c3_259 = arith.constant 3 : index
    %c6_260 = arith.constant 6 : index
    %c0_261 = arith.constant 0 : index
    %389 = vector.load %arg5[%c3_259, %c6_260, %c0_261] : memref<4x16x512xf32, #tpu.memory_space<vmem>>, vector<1x1x512xf32>
    %390 = vector.shape_cast %389 : vector<1x1x512xf32> to vector<1x512xf32>
    %391 = vector.shape_cast %388 : vector<1x512xf32> to vector<1x1x512xf32>
    tpu.vector_store %arg5[%c3_259, %c6_260, %c0_261], %391 {strides = array<i32>} : memref<4x16x512xf32, #tpu.memory_space<vmem>>, vector<1x1x512xf32>,
    %c0_262 = arith.constant 0 : index
    %c0_263 = arith.constant 0 : index
    %c56 = arith.constant 56 : index
    %c0_264 = arith.constant 0 : index
    %392 = vector.load %arg2[%c0_262, %c0_263, %c56, %c0_264] : memref<1x4x128x512xf32, #tpu.memory_space<vmem>>, vector<1x1x8x512xf32>
    %393 = vector.shape_cast %392 : vector<1x1x8x512xf32> to vector<8x512xf32>
    %c0_i32_265 = arith.constant 0 : i32
    %394 = vector.broadcast %c0_i32_265 : i32 to vector<8x512xi32>
    %c0_266 = arith.constant 0 : index
    %c1_267 = arith.constant 1 : index
    %c56_268 = arith.constant 56 : index
    %c0_269 = arith.constant 0 : index
    %395 = vector.load %arg2[%c0_266, %c1_267, %c56_268, %c0_269] : memref<1x4x128x512xf32, #tpu.memory_space<vmem>>, vector<1x1x8x512xf32>
    %396 = vector.shape_cast %395 : vector<1x1x8x512xf32> to vector<8x512xf32>
    %397 = arith.cmpf ogt, %396, %393 : vector<8x512xf32>
    %398 = arith.select %397, %396, %393 : vector<8x512xi1>, vector<8x512xf32>
    %c1_i32_270 = arith.constant 1 : i32
    %399 = vector.broadcast %c1_i32_270 : i32 to vector<8x512xi32>
    %400 = arith.select %397, %399, %394 : vector<8x512xi1>, vector<8x512xi32>
    %c0_271 = arith.constant 0 : index
    %c2_272 = arith.constant 2 : index
    %c56_273 = arith.constant 56 : index
    %c0_274 = arith.constant 0 : index
    %401 = vector.load %arg2[%c0_271, %c2_272, %c56_273, %c0_274] : memref<1x4x128x512xf32, #tpu.memory_space<vmem>>, vector<1x1x8x512xf32>
    %402 = vector.shape_cast %401 : vector<1x1x8x512xf32> to vector<8x512xf32>
    %403 = arith.cmpf ogt, %402, %398 : vector<8x512xf32>
    %404 = arith.select %403, %402, %398 : vector<8x512xi1>, vector<8x512xf32>
    %c2_i32_275 = arith.constant 2 : i32
    %405 = vector.broadcast %c2_i32_275 : i32 to vector<8x512xi32>
    %406 = arith.select %403, %405, %400 : vector<8x512xi1>, vector<8x512xi32>
    %c0_276 = arith.constant 0 : index
    %c3_277 = arith.constant 3 : index
    %c56_278 = arith.constant 56 : index
    %c0_279 = arith.constant 0 : index
    %407 = vector.load %arg2[%c0_276, %c3_277, %c56_278, %c0_279] : memref<1x4x128x512xf32, #tpu.memory_space<vmem>>, vector<1x1x8x512xf32>
    %408 = vector.shape_cast %407 : vector<1x1x8x512xf32> to vector<8x512xf32>
    %409 = arith.cmpf ogt, %408, %404 : vector<8x512xf32>
    %c3_i32_280 = arith.constant 3 : i32
    %410 = vector.broadcast %c3_i32_280 : i32 to vector<8x512xi32>
    %411 = arith.select %409, %410, %406 : vector<8x512xi1>, vector<8x512xi32>
    %c0_i32_281 = arith.constant 0 : i32
    %412 = vector.broadcast %c0_i32_281 : i32 to vector<8x512xi32>
    %413 = arith.cmpi eq, %411, %412 : vector<8x512xi32>
    %414 = arith.extui %413 : vector<8x512xi1> to vector<8x512xi32>
    %415 = arith.sitofp %414 : vector<8x512xi32> to vector<8x512xf32>
    %cst_282 = arith.constant dense<0.000000e+00> : vector<512xf32>
    %416 = vector.multi_reduction <add>, %415, %cst_282 [0] : vector<8x512xf32> to vector<512xf32>
    %417 = vector.shape_cast %416 : vector<512xf32> to vector<1x512xf32>
    %c0_283 = arith.constant 0 : index
    %c7 = arith.constant 7 : index
    %c0_284 = arith.constant 0 : index
    %418 = vector.load %arg5[%c0_283, %c7, %c0_284] : memref<4x16x512xf32, #tpu.memory_space<vmem>>, vector<1x1x512xf32>
    %419 = vector.shape_cast %418 : vector<1x1x512xf32> to vector<1x512xf32>
    %420 = vector.shape_cast %417 : vector<1x512xf32> to vector<1x1x512xf32>
    tpu.vector_store %arg5[%c0_283, %c7, %c0_284], %420 {strides = array<i32>} : memref<4x16x512xf32, #tpu.memory_space<vmem>>, vector<1x1x512xf32>,
    %c1_i32_285 = arith.constant 1 : i32
    %421 = vector.broadcast %c1_i32_285 : i32 to vector<8x512xi32>
    %422 = arith.cmpi eq, %411, %421 : vector<8x512xi32>
    %423 = arith.extui %422 : vector<8x512xi1> to vector<8x512xi32>
    %424 = arith.sitofp %423 : vector<8x512xi32> to vector<8x512xf32>
    %cst_286 = arith.constant dense<0.000000e+00> : vector<512xf32>
    %425 = vector.multi_reduction <add>, %424, %cst_286 [0] : vector<8x512xf32> to vector<512xf32>
    %426 = vector.shape_cast %425 : vector<512xf32> to vector<1x512xf32>
    %c1_287 = arith.constant 1 : index
    %c7_288 = arith.constant 7 : index
    %c0_289 = arith.constant 0 : index
    %427 = vector.load %arg5[%c1_287, %c7_288, %c0_289] : memref<4x16x512xf32, #tpu.memory_space<vmem>>, vector<1x1x512xf32>
    %428 = vector.shape_cast %427 : vector<1x1x512xf32> to vector<1x512xf32>
    %429 = vector.shape_cast %426 : vector<1x512xf32> to vector<1x1x512xf32>
    tpu.vector_store %arg5[%c1_287, %c7_288, %c0_289], %429 {strides = array<i32>} : memref<4x16x512xf32, #tpu.memory_space<vmem>>, vector<1x1x512xf32>,
    %c2_i32_290 = arith.constant 2 : i32
    %430 = vector.broadcast %c2_i32_290 : i32 to vector<8x512xi32>
    %431 = arith.cmpi eq, %411, %430 : vector<8x512xi32>
    %432 = arith.extui %431 : vector<8x512xi1> to vector<8x512xi32>
    %433 = arith.sitofp %432 : vector<8x512xi32> to vector<8x512xf32>
    %cst_291 = arith.constant dense<0.000000e+00> : vector<512xf32>
    %434 = vector.multi_reduction <add>, %433, %cst_291 [0] : vector<8x512xf32> to vector<512xf32>
    %435 = vector.shape_cast %434 : vector<512xf32> to vector<1x512xf32>
    %c2_292 = arith.constant 2 : index
    %c7_293 = arith.constant 7 : index
    %c0_294 = arith.constant 0 : index
    %436 = vector.load %arg5[%c2_292, %c7_293, %c0_294] : memref<4x16x512xf32, #tpu.memory_space<vmem>>, vector<1x1x512xf32>
    %437 = vector.shape_cast %436 : vector<1x1x512xf32> to vector<1x512xf32>
    %438 = vector.shape_cast %435 : vector<1x512xf32> to vector<1x1x512xf32>
    tpu.vector_store %arg5[%c2_292, %c7_293, %c0_294], %438 {strides = array<i32>} : memref<4x16x512xf32, #tpu.memory_space<vmem>>, vector<1x1x512xf32>,
    %c3_i32_295 = arith.constant 3 : i32
    %439 = vector.broadcast %c3_i32_295 : i32 to vector<8x512xi32>
    %440 = arith.cmpi eq, %411, %439 : vector<8x512xi32>
    %441 = arith.extui %440 : vector<8x512xi1> to vector<8x512xi32>
    %442 = arith.sitofp %441 : vector<8x512xi32> to vector<8x512xf32>
    %cst_296 = arith.constant dense<0.000000e+00> : vector<512xf32>
    %443 = vector.multi_reduction <add>, %442, %cst_296 [0] : vector<8x512xf32> to vector<512xf32>
    %444 = vector.shape_cast %443 : vector<512xf32> to vector<1x512xf32>
    %c3_297 = arith.constant 3 : index
    %c7_298 = arith.constant 7 : index
    %c0_299 = arith.constant 0 : index
    %445 = vector.load %arg5[%c3_297, %c7_298, %c0_299] : memref<4x16x512xf32, #tpu.memory_space<vmem>>, vector<1x1x512xf32>
    %446 = vector.shape_cast %445 : vector<1x1x512xf32> to vector<1x512xf32>
    %447 = vector.shape_cast %444 : vector<1x512xf32> to vector<1x1x512xf32>
    tpu.vector_store %arg5[%c3_297, %c7_298, %c0_299], %447 {strides = array<i32>} : memref<4x16x512xf32, #tpu.memory_space<vmem>>, vector<1x1x512xf32>,
    %c0_300 = arith.constant 0 : index
    %c0_301 = arith.constant 0 : index
    %c64 = arith.constant 64 : index
    %c0_302 = arith.constant 0 : index
    %448 = vector.load %arg2[%c0_300, %c0_301, %c64, %c0_302] : memref<1x4x128x512xf32, #tpu.memory_space<vmem>>, vector<1x1x8x512xf32>
    %449 = vector.shape_cast %448 : vector<1x1x8x512xf32> to vector<8x512xf32>
    %c0_i32_303 = arith.constant 0 : i32
    %450 = vector.broadcast %c0_i32_303 : i32 to vector<8x512xi32>
    %c0_304 = arith.constant 0 : index
    %c1_305 = arith.constant 1 : index
    %c64_306 = arith.constant 64 : index
    %c0_307 = arith.constant 0 : index
    %451 = vector.load %arg2[%c0_304, %c1_305, %c64_306, %c0_307] : memref<1x4x128x512xf32, #tpu.memory_space<vmem>>, vector<1x1x8x512xf32>
    %452 = vector.shape_cast %451 : vector<1x1x8x512xf32> to vector<8x512xf32>
    %453 = arith.cmpf ogt, %452, %449 : vector<8x512xf32>
    %454 = arith.select %453, %452, %449 : vector<8x512xi1>, vector<8x512xf32>
    %c1_i32_308 = arith.constant 1 : i32
    %455 = vector.broadcast %c1_i32_308 : i32 to vector<8x512xi32>
    %456 = arith.select %453, %455, %450 : vector<8x512xi1>, vector<8x512xi32>
    %c0_309 = arith.constant 0 : index
    %c2_310 = arith.constant 2 : index
    %c64_311 = arith.constant 64 : index
    %c0_312 = arith.constant 0 : index
    %457 = vector.load %arg2[%c0_309, %c2_310, %c64_311, %c0_312] : memref<1x4x128x512xf32, #tpu.memory_space<vmem>>, vector<1x1x8x512xf32>
    %458 = vector.shape_cast %457 : vector<1x1x8x512xf32> to vector<8x512xf32>
    %459 = arith.cmpf ogt, %458, %454 : vector<8x512xf32>
    %460 = arith.select %459, %458, %454 : vector<8x512xi1>, vector<8x512xf32>
    %c2_i32_313 = arith.constant 2 : i32
    %461 = vector.broadcast %c2_i32_313 : i32 to vector<8x512xi32>
    %462 = arith.select %459, %461, %456 : vector<8x512xi1>, vector<8x512xi32>
    %c0_314 = arith.constant 0 : index
    %c3_315 = arith.constant 3 : index
    %c64_316 = arith.constant 64 : index
    %c0_317 = arith.constant 0 : index
    %463 = vector.load %arg2[%c0_314, %c3_315, %c64_316, %c0_317] : memref<1x4x128x512xf32, #tpu.memory_space<vmem>>, vector<1x1x8x512xf32>
    %464 = vector.shape_cast %463 : vector<1x1x8x512xf32> to vector<8x512xf32>
    %465 = arith.cmpf ogt, %464, %460 : vector<8x512xf32>
    %c3_i32_318 = arith.constant 3 : i32
    %466 = vector.broadcast %c3_i32_318 : i32 to vector<8x512xi32>
    %467 = arith.select %465, %466, %462 : vector<8x512xi1>, vector<8x512xi32>
    %c0_i32_319 = arith.constant 0 : i32
    %468 = vector.broadcast %c0_i32_319 : i32 to vector<8x512xi32>
    %469 = arith.cmpi eq, %467, %468 : vector<8x512xi32>
    %470 = arith.extui %469 : vector<8x512xi1> to vector<8x512xi32>
    %471 = arith.sitofp %470 : vector<8x512xi32> to vector<8x512xf32>
    %cst_320 = arith.constant dense<0.000000e+00> : vector<512xf32>
    %472 = vector.multi_reduction <add>, %471, %cst_320 [0] : vector<8x512xf32> to vector<512xf32>
    %473 = vector.shape_cast %472 : vector<512xf32> to vector<1x512xf32>
    %c0_321 = arith.constant 0 : index
    %c8_322 = arith.constant 8 : index
    %c0_323 = arith.constant 0 : index
    %474 = vector.load %arg5[%c0_321, %c8_322, %c0_323] : memref<4x16x512xf32, #tpu.memory_space<vmem>>, vector<1x1x512xf32>
    %475 = vector.shape_cast %474 : vector<1x1x512xf32> to vector<1x512xf32>
    %476 = vector.shape_cast %473 : vector<1x512xf32> to vector<1x1x512xf32>
    tpu.vector_store %arg5[%c0_321, %c8_322, %c0_323], %476 {strides = array<i32>} : memref<4x16x512xf32, #tpu.memory_space<vmem>>, vector<1x1x512xf32>,
    %c1_i32_324 = arith.constant 1 : i32
    %477 = vector.broadcast %c1_i32_324 : i32 to vector<8x512xi32>
    %478 = arith.cmpi eq, %467, %477 : vector<8x512xi32>
    %479 = arith.extui %478 : vector<8x512xi1> to vector<8x512xi32>
    %480 = arith.sitofp %479 : vector<8x512xi32> to vector<8x512xf32>
    %cst_325 = arith.constant dense<0.000000e+00> : vector<512xf32>
    %481 = vector.multi_reduction <add>, %480, %cst_325 [0] : vector<8x512xf32> to vector<512xf32>
    %482 = vector.shape_cast %481 : vector<512xf32> to vector<1x512xf32>
    %c1_326 = arith.constant 1 : index
    %c8_327 = arith.constant 8 : index
    %c0_328 = arith.constant 0 : index
    %483 = vector.load %arg5[%c1_326, %c8_327, %c0_328] : memref<4x16x512xf32, #tpu.memory_space<vmem>>, vector<1x1x512xf32>
    %484 = vector.shape_cast %483 : vector<1x1x512xf32> to vector<1x512xf32>
    %485 = vector.shape_cast %482 : vector<1x512xf32> to vector<1x1x512xf32>
    tpu.vector_store %arg5[%c1_326, %c8_327, %c0_328], %485 {strides = array<i32>} : memref<4x16x512xf32, #tpu.memory_space<vmem>>, vector<1x1x512xf32>,
    %c2_i32_329 = arith.constant 2 : i32
    %486 = vector.broadcast %c2_i32_329 : i32 to vector<8x512xi32>
    %487 = arith.cmpi eq, %467, %486 : vector<8x512xi32>
    %488 = arith.extui %487 : vector<8x512xi1> to vector<8x512xi32>
    %489 = arith.sitofp %488 : vector<8x512xi32> to vector<8x512xf32>
    %cst_330 = arith.constant dense<0.000000e+00> : vector<512xf32>
    %490 = vector.multi_reduction <add>, %489, %cst_330 [0] : vector<8x512xf32> to vector<512xf32>
    %491 = vector.shape_cast %490 : vector<512xf32> to vector<1x512xf32>
    %c2_331 = arith.constant 2 : index
    %c8_332 = arith.constant 8 : index
    %c0_333 = arith.constant 0 : index
    %492 = vector.load %arg5[%c2_331, %c8_332, %c0_333] : memref<4x16x512xf32, #tpu.memory_space<vmem>>, vector<1x1x512xf32>
    %493 = vector.shape_cast %492 : vector<1x1x512xf32> to vector<1x512xf32>
    %494 = vector.shape_cast %491 : vector<1x512xf32> to vector<1x1x512xf32>
    tpu.vector_store %arg5[%c2_331, %c8_332, %c0_333], %494 {strides = array<i32>} : memref<4x16x512xf32, #tpu.memory_space<vmem>>, vector<1x1x512xf32>,
    %c3_i32_334 = arith.constant 3 : i32
    %495 = vector.broadcast %c3_i32_334 : i32 to vector<8x512xi32>
    %496 = arith.cmpi eq, %467, %495 : vector<8x512xi32>
    %497 = arith.extui %496 : vector<8x512xi1> to vector<8x512xi32>
    %498 = arith.sitofp %497 : vector<8x512xi32> to vector<8x512xf32>
    %cst_335 = arith.constant dense<0.000000e+00> : vector<512xf32>
    %499 = vector.multi_reduction <add>, %498, %cst_335 [0] : vector<8x512xf32> to vector<512xf32>
    %500 = vector.shape_cast %499 : vector<512xf32> to vector<1x512xf32>
    %c3_336 = arith.constant 3 : index
    %c8_337 = arith.constant 8 : index
    %c0_338 = arith.constant 0 : index
    %501 = vector.load %arg5[%c3_336, %c8_337, %c0_338] : memref<4x16x512xf32, #tpu.memory_space<vmem>>, vector<1x1x512xf32>
    %502 = vector.shape_cast %501 : vector<1x1x512xf32> to vector<1x512xf32>
    %503 = vector.shape_cast %500 : vector<1x512xf32> to vector<1x1x512xf32>
    tpu.vector_store %arg5[%c3_336, %c8_337, %c0_338], %503 {strides = array<i32>} : memref<4x16x512xf32, #tpu.memory_space<vmem>>, vector<1x1x512xf32>,
    %c0_339 = arith.constant 0 : index
    %c0_340 = arith.constant 0 : index
    %c72 = arith.constant 72 : index
    %c0_341 = arith.constant 0 : index
    %504 = vector.load %arg2[%c0_339, %c0_340, %c72, %c0_341] : memref<1x4x128x512xf32, #tpu.memory_space<vmem>>, vector<1x1x8x512xf32>
    %505 = vector.shape_cast %504 : vector<1x1x8x512xf32> to vector<8x512xf32>
    %c0_i32_342 = arith.constant 0 : i32
    %506 = vector.broadcast %c0_i32_342 : i32 to vector<8x512xi32>
    %c0_343 = arith.constant 0 : index
    %c1_344 = arith.constant 1 : index
    %c72_345 = arith.constant 72 : index
    %c0_346 = arith.constant 0 : index
    %507 = vector.load %arg2[%c0_343, %c1_344, %c72_345, %c0_346] : memref<1x4x128x512xf32, #tpu.memory_space<vmem>>, vector<1x1x8x512xf32>
    %508 = vector.shape_cast %507 : vector<1x1x8x512xf32> to vector<8x512xf32>
    %509 = arith.cmpf ogt, %508, %505 : vector<8x512xf32>
    %510 = arith.select %509, %508, %505 : vector<8x512xi1>, vector<8x512xf32>
    %c1_i32_347 = arith.constant 1 : i32
    %511 = vector.broadcast %c1_i32_347 : i32 to vector<8x512xi32>
    %512 = arith.select %509, %511, %506 : vector<8x512xi1>, vector<8x512xi32>
    %c0_348 = arith.constant 0 : index
    %c2_349 = arith.constant 2 : index
    %c72_350 = arith.constant 72 : index
    %c0_351 = arith.constant 0 : index
    %513 = vector.load %arg2[%c0_348, %c2_349, %c72_350, %c0_351] : memref<1x4x128x512xf32, #tpu.memory_space<vmem>>, vector<1x1x8x512xf32>
    %514 = vector.shape_cast %513 : vector<1x1x8x512xf32> to vector<8x512xf32>
    %515 = arith.cmpf ogt, %514, %510 : vector<8x512xf32>
    %516 = arith.select %515, %514, %510 : vector<8x512xi1>, vector<8x512xf32>
    %c2_i32_352 = arith.constant 2 : i32
    %517 = vector.broadcast %c2_i32_352 : i32 to vector<8x512xi32>
    %518 = arith.select %515, %517, %512 : vector<8x512xi1>, vector<8x512xi32>
    %c0_353 = arith.constant 0 : index
    %c3_354 = arith.constant 3 : index
    %c72_355 = arith.constant 72 : index
    %c0_356 = arith.constant 0 : index
    %519 = vector.load %arg2[%c0_353, %c3_354, %c72_355, %c0_356] : memref<1x4x128x512xf32, #tpu.memory_space<vmem>>, vector<1x1x8x512xf32>
    %520 = vector.shape_cast %519 : vector<1x1x8x512xf32> to vector<8x512xf32>
    %521 = arith.cmpf ogt, %520, %516 : vector<8x512xf32>
    %c3_i32_357 = arith.constant 3 : i32
    %522 = vector.broadcast %c3_i32_357 : i32 to vector<8x512xi32>
    %523 = arith.select %521, %522, %518 : vector<8x512xi1>, vector<8x512xi32>
    %c0_i32_358 = arith.constant 0 : i32
    %524 = vector.broadcast %c0_i32_358 : i32 to vector<8x512xi32>
    %525 = arith.cmpi eq, %523, %524 : vector<8x512xi32>
    %526 = arith.extui %525 : vector<8x512xi1> to vector<8x512xi32>
    %527 = arith.sitofp %526 : vector<8x512xi32> to vector<8x512xf32>
    %cst_359 = arith.constant dense<0.000000e+00> : vector<512xf32>
    %528 = vector.multi_reduction <add>, %527, %cst_359 [0] : vector<8x512xf32> to vector<512xf32>
    %529 = vector.shape_cast %528 : vector<512xf32> to vector<1x512xf32>
    %c0_360 = arith.constant 0 : index
    %c9 = arith.constant 9 : index
    %c0_361 = arith.constant 0 : index
    %530 = vector.load %arg5[%c0_360, %c9, %c0_361] : memref<4x16x512xf32, #tpu.memory_space<vmem>>, vector<1x1x512xf32>
    %531 = vector.shape_cast %530 : vector<1x1x512xf32> to vector<1x512xf32>
    %532 = vector.shape_cast %529 : vector<1x512xf32> to vector<1x1x512xf32>
    tpu.vector_store %arg5[%c0_360, %c9, %c0_361], %532 {strides = array<i32>} : memref<4x16x512xf32, #tpu.memory_space<vmem>>, vector<1x1x512xf32>,
    %c1_i32_362 = arith.constant 1 : i32
    %533 = vector.broadcast %c1_i32_362 : i32 to vector<8x512xi32>
    %534 = arith.cmpi eq, %523, %533 : vector<8x512xi32>
    %535 = arith.extui %534 : vector<8x512xi1> to vector<8x512xi32>
    %536 = arith.sitofp %535 : vector<8x512xi32> to vector<8x512xf32>
    %cst_363 = arith.constant dense<0.000000e+00> : vector<512xf32>
    %537 = vector.multi_reduction <add>, %536, %cst_363 [0] : vector<8x512xf32> to vector<512xf32>
    %538 = vector.shape_cast %537 : vector<512xf32> to vector<1x512xf32>
    %c1_364 = arith.constant 1 : index
    %c9_365 = arith.constant 9 : index
    %c0_366 = arith.constant 0 : index
    %539 = vector.load %arg5[%c1_364, %c9_365, %c0_366] : memref<4x16x512xf32, #tpu.memory_space<vmem>>, vector<1x1x512xf32>
    %540 = vector.shape_cast %539 : vector<1x1x512xf32> to vector<1x512xf32>
    %541 = vector.shape_cast %538 : vector<1x512xf32> to vector<1x1x512xf32>
    tpu.vector_store %arg5[%c1_364, %c9_365, %c0_366], %541 {strides = array<i32>} : memref<4x16x512xf32, #tpu.memory_space<vmem>>, vector<1x1x512xf32>,
    %c2_i32_367 = arith.constant 2 : i32
    %542 = vector.broadcast %c2_i32_367 : i32 to vector<8x512xi32>
    %543 = arith.cmpi eq, %523, %542 : vector<8x512xi32>
    %544 = arith.extui %543 : vector<8x512xi1> to vector<8x512xi32>
    %545 = arith.sitofp %544 : vector<8x512xi32> to vector<8x512xf32>
    %cst_368 = arith.constant dense<0.000000e+00> : vector<512xf32>
    %546 = vector.multi_reduction <add>, %545, %cst_368 [0] : vector<8x512xf32> to vector<512xf32>
    %547 = vector.shape_cast %546 : vector<512xf32> to vector<1x512xf32>
    %c2_369 = arith.constant 2 : index
    %c9_370 = arith.constant 9 : index
    %c0_371 = arith.constant 0 : index
    %548 = vector.load %arg5[%c2_369, %c9_370, %c0_371] : memref<4x16x512xf32, #tpu.memory_space<vmem>>, vector<1x1x512xf32>
    %549 = vector.shape_cast %548 : vector<1x1x512xf32> to vector<1x512xf32>
    %550 = vector.shape_cast %547 : vector<1x512xf32> to vector<1x1x512xf32>
    tpu.vector_store %arg5[%c2_369, %c9_370, %c0_371], %550 {strides = array<i32>} : memref<4x16x512xf32, #tpu.memory_space<vmem>>, vector<1x1x512xf32>,
    %c3_i32_372 = arith.constant 3 : i32
    %551 = vector.broadcast %c3_i32_372 : i32 to vector<8x512xi32>
    %552 = arith.cmpi eq, %523, %551 : vector<8x512xi32>
    %553 = arith.extui %552 : vector<8x512xi1> to vector<8x512xi32>
    %554 = arith.sitofp %553 : vector<8x512xi32> to vector<8x512xf32>
    %cst_373 = arith.constant dense<0.000000e+00> : vector<512xf32>
    %555 = vector.multi_reduction <add>, %554, %cst_373 [0] : vector<8x512xf32> to vector<512xf32>
    %556 = vector.shape_cast %555 : vector<512xf32> to vector<1x512xf32>
    %c3_374 = arith.constant 3 : index
    %c9_375 = arith.constant 9 : index
    %c0_376 = arith.constant 0 : index
    %557 = vector.load %arg5[%c3_374, %c9_375, %c0_376] : memref<4x16x512xf32, #tpu.memory_space<vmem>>, vector<1x1x512xf32>
    %558 = vector.shape_cast %557 : vector<1x1x512xf32> to vector<1x512xf32>
    %559 = vector.shape_cast %556 : vector<1x512xf32> to vector<1x1x512xf32>
    tpu.vector_store %arg5[%c3_374, %c9_375, %c0_376], %559 {strides = array<i32>} : memref<4x16x512xf32, #tpu.memory_space<vmem>>, vector<1x1x512xf32>,
    %c0_377 = arith.constant 0 : index
    %c0_378 = arith.constant 0 : index
    %c80 = arith.constant 80 : index
    %c0_379 = arith.constant 0 : index
    %560 = vector.load %arg2[%c0_377, %c0_378, %c80, %c0_379] : memref<1x4x128x512xf32, #tpu.memory_space<vmem>>, vector<1x1x8x512xf32>
    %561 = vector.shape_cast %560 : vector<1x1x8x512xf32> to vector<8x512xf32>
    %c0_i32_380 = arith.constant 0 : i32
    %562 = vector.broadcast %c0_i32_380 : i32 to vector<8x512xi32>
    %c0_381 = arith.constant 0 : index
    %c1_382 = arith.constant 1 : index
    %c80_383 = arith.constant 80 : index
    %c0_384 = arith.constant 0 : index
    %563 = vector.load %arg2[%c0_381, %c1_382, %c80_383, %c0_384] : memref<1x4x128x512xf32, #tpu.memory_space<vmem>>, vector<1x1x8x512xf32>
    %564 = vector.shape_cast %563 : vector<1x1x8x512xf32> to vector<8x512xf32>
    %565 = arith.cmpf ogt, %564, %561 : vector<8x512xf32>
    %566 = arith.select %565, %564, %561 : vector<8x512xi1>, vector<8x512xf32>
    %c1_i32_385 = arith.constant 1 : i32
    %567 = vector.broadcast %c1_i32_385 : i32 to vector<8x512xi32>
    %568 = arith.select %565, %567, %562 : vector<8x512xi1>, vector<8x512xi32>
    %c0_386 = arith.constant 0 : index
    %c2_387 = arith.constant 2 : index
    %c80_388 = arith.constant 80 : index
    %c0_389 = arith.constant 0 : index
    %569 = vector.load %arg2[%c0_386, %c2_387, %c80_388, %c0_389] : memref<1x4x128x512xf32, #tpu.memory_space<vmem>>, vector<1x1x8x512xf32>
    %570 = vector.shape_cast %569 : vector<1x1x8x512xf32> to vector<8x512xf32>
    %571 = arith.cmpf ogt, %570, %566 : vector<8x512xf32>
    %572 = arith.select %571, %570, %566 : vector<8x512xi1>, vector<8x512xf32>
    %c2_i32_390 = arith.constant 2 : i32
    %573 = vector.broadcast %c2_i32_390 : i32 to vector<8x512xi32>
    %574 = arith.select %571, %573, %568 : vector<8x512xi1>, vector<8x512xi32>
    %c0_391 = arith.constant 0 : index
    %c3_392 = arith.constant 3 : index
    %c80_393 = arith.constant 80 : index
    %c0_394 = arith.constant 0 : index
    %575 = vector.load %arg2[%c0_391, %c3_392, %c80_393, %c0_394] : memref<1x4x128x512xf32, #tpu.memory_space<vmem>>, vector<1x1x8x512xf32>
    %576 = vector.shape_cast %575 : vector<1x1x8x512xf32> to vector<8x512xf32>
    %577 = arith.cmpf ogt, %576, %572 : vector<8x512xf32>
    %c3_i32_395 = arith.constant 3 : i32
    %578 = vector.broadcast %c3_i32_395 : i32 to vector<8x512xi32>
    %579 = arith.select %577, %578, %574 : vector<8x512xi1>, vector<8x512xi32>
    %c0_i32_396 = arith.constant 0 : i32
    %580 = vector.broadcast %c0_i32_396 : i32 to vector<8x512xi32>
    %581 = arith.cmpi eq, %579, %580 : vector<8x512xi32>
    %582 = arith.extui %581 : vector<8x512xi1> to vector<8x512xi32>
    %583 = arith.sitofp %582 : vector<8x512xi32> to vector<8x512xf32>
    %cst_397 = arith.constant dense<0.000000e+00> : vector<512xf32>
    %584 = vector.multi_reduction <add>, %583, %cst_397 [0] : vector<8x512xf32> to vector<512xf32>
    %585 = vector.shape_cast %584 : vector<512xf32> to vector<1x512xf32>
    %c0_398 = arith.constant 0 : index
    %c10 = arith.constant 10 : index
    %c0_399 = arith.constant 0 : index
    %586 = vector.load %arg5[%c0_398, %c10, %c0_399] : memref<4x16x512xf32, #tpu.memory_space<vmem>>, vector<1x1x512xf32>
    %587 = vector.shape_cast %586 : vector<1x1x512xf32> to vector<1x512xf32>
    %588 = vector.shape_cast %585 : vector<1x512xf32> to vector<1x1x512xf32>
    tpu.vector_store %arg5[%c0_398, %c10, %c0_399], %588 {strides = array<i32>} : memref<4x16x512xf32, #tpu.memory_space<vmem>>, vector<1x1x512xf32>,
    %c1_i32_400 = arith.constant 1 : i32
    %589 = vector.broadcast %c1_i32_400 : i32 to vector<8x512xi32>
    %590 = arith.cmpi eq, %579, %589 : vector<8x512xi32>
    %591 = arith.extui %590 : vector<8x512xi1> to vector<8x512xi32>
    %592 = arith.sitofp %591 : vector<8x512xi32> to vector<8x512xf32>
    %cst_401 = arith.constant dense<0.000000e+00> : vector<512xf32>
    %593 = vector.multi_reduction <add>, %592, %cst_401 [0] : vector<8x512xf32> to vector<512xf32>
    %594 = vector.shape_cast %593 : vector<512xf32> to vector<1x512xf32>
    %c1_402 = arith.constant 1 : index
    %c10_403 = arith.constant 10 : index
    %c0_404 = arith.constant 0 : index
    %595 = vector.load %arg5[%c1_402, %c10_403, %c0_404] : memref<4x16x512xf32, #tpu.memory_space<vmem>>, vector<1x1x512xf32>
    %596 = vector.shape_cast %595 : vector<1x1x512xf32> to vector<1x512xf32>
    %597 = vector.shape_cast %594 : vector<1x512xf32> to vector<1x1x512xf32>
    tpu.vector_store %arg5[%c1_402, %c10_403, %c0_404], %597 {strides = array<i32>} : memref<4x16x512xf32, #tpu.memory_space<vmem>>, vector<1x1x512xf32>,
    %c2_i32_405 = arith.constant 2 : i32
    %598 = vector.broadcast %c2_i32_405 : i32 to vector<8x512xi32>
    %599 = arith.cmpi eq, %579, %598 : vector<8x512xi32>
    %600 = arith.extui %599 : vector<8x512xi1> to vector<8x512xi32>
    %601 = arith.sitofp %600 : vector<8x512xi32> to vector<8x512xf32>
    %cst_406 = arith.constant dense<0.000000e+00> : vector<512xf32>
    %602 = vector.multi_reduction <add>, %601, %cst_406 [0] : vector<8x512xf32> to vector<512xf32>
    %603 = vector.shape_cast %602 : vector<512xf32> to vector<1x512xf32>
    %c2_407 = arith.constant 2 : index
    %c10_408 = arith.constant 10 : index
    %c0_409 = arith.constant 0 : index
    %604 = vector.load %arg5[%c2_407, %c10_408, %c0_409] : memref<4x16x512xf32, #tpu.memory_space<vmem>>, vector<1x1x512xf32>
    %605 = vector.shape_cast %604 : vector<1x1x512xf32> to vector<1x512xf32>
    %606 = vector.shape_cast %603 : vector<1x512xf32> to vector<1x1x512xf32>
    tpu.vector_store %arg5[%c2_407, %c10_408, %c0_409], %606 {strides = array<i32>} : memref<4x16x512xf32, #tpu.memory_space<vmem>>, vector<1x1x512xf32>,
    %c3_i32_410 = arith.constant 3 : i32
    %607 = vector.broadcast %c3_i32_410 : i32 to vector<8x512xi32>
    %608 = arith.cmpi eq, %579, %607 : vector<8x512xi32>
    %609 = arith.extui %608 : vector<8x512xi1> to vector<8x512xi32>
    %610 = arith.sitofp %609 : vector<8x512xi32> to vector<8x512xf32>
    %cst_411 = arith.constant dense<0.000000e+00> : vector<512xf32>
    %611 = vector.multi_reduction <add>, %610, %cst_411 [0] : vector<8x512xf32> to vector<512xf32>
    %612 = vector.shape_cast %611 : vector<512xf32> to vector<1x512xf32>
    %c3_412 = arith.constant 3 : index
    %c10_413 = arith.constant 10 : index
    %c0_414 = arith.constant 0 : index
    %613 = vector.load %arg5[%c3_412, %c10_413, %c0_414] : memref<4x16x512xf32, #tpu.memory_space<vmem>>, vector<1x1x512xf32>
    %614 = vector.shape_cast %613 : vector<1x1x512xf32> to vector<1x512xf32>
    %615 = vector.shape_cast %612 : vector<1x512xf32> to vector<1x1x512xf32>
    tpu.vector_store %arg5[%c3_412, %c10_413, %c0_414], %615 {strides = array<i32>} : memref<4x16x512xf32, #tpu.memory_space<vmem>>, vector<1x1x512xf32>,
    %c0_415 = arith.constant 0 : index
    %c0_416 = arith.constant 0 : index
    %c88 = arith.constant 88 : index
    %c0_417 = arith.constant 0 : index
    %616 = vector.load %arg2[%c0_415, %c0_416, %c88, %c0_417] : memref<1x4x128x512xf32, #tpu.memory_space<vmem>>, vector<1x1x8x512xf32>
    %617 = vector.shape_cast %616 : vector<1x1x8x512xf32> to vector<8x512xf32>
    %c0_i32_418 = arith.constant 0 : i32
    %618 = vector.broadcast %c0_i32_418 : i32 to vector<8x512xi32>
    %c0_419 = arith.constant 0 : index
    %c1_420 = arith.constant 1 : index
    %c88_421 = arith.constant 88 : index
    %c0_422 = arith.constant 0 : index
    %619 = vector.load %arg2[%c0_419, %c1_420, %c88_421, %c0_422] : memref<1x4x128x512xf32, #tpu.memory_space<vmem>>, vector<1x1x8x512xf32>
    %620 = vector.shape_cast %619 : vector<1x1x8x512xf32> to vector<8x512xf32>
    %621 = arith.cmpf ogt, %620, %617 : vector<8x512xf32>
    %622 = arith.select %621, %620, %617 : vector<8x512xi1>, vector<8x512xf32>
    %c1_i32_423 = arith.constant 1 : i32
    %623 = vector.broadcast %c1_i32_423 : i32 to vector<8x512xi32>
    %624 = arith.select %621, %623, %618 : vector<8x512xi1>, vector<8x512xi32>
    %c0_424 = arith.constant 0 : index
    %c2_425 = arith.constant 2 : index
    %c88_426 = arith.constant 88 : index
    %c0_427 = arith.constant 0 : index
    %625 = vector.load %arg2[%c0_424, %c2_425, %c88_426, %c0_427] : memref<1x4x128x512xf32, #tpu.memory_space<vmem>>, vector<1x1x8x512xf32>
    %626 = vector.shape_cast %625 : vector<1x1x8x512xf32> to vector<8x512xf32>
    %627 = arith.cmpf ogt, %626, %622 : vector<8x512xf32>
    %628 = arith.select %627, %626, %622 : vector<8x512xi1>, vector<8x512xf32>
    %c2_i32_428 = arith.constant 2 : i32
    %629 = vector.broadcast %c2_i32_428 : i32 to vector<8x512xi32>
    %630 = arith.select %627, %629, %624 : vector<8x512xi1>, vector<8x512xi32>
    %c0_429 = arith.constant 0 : index
    %c3_430 = arith.constant 3 : index
    %c88_431 = arith.constant 88 : index
    %c0_432 = arith.constant 0 : index
    %631 = vector.load %arg2[%c0_429, %c3_430, %c88_431, %c0_432] : memref<1x4x128x512xf32, #tpu.memory_space<vmem>>, vector<1x1x8x512xf32>
    %632 = vector.shape_cast %631 : vector<1x1x8x512xf32> to vector<8x512xf32>
    %633 = arith.cmpf ogt, %632, %628 : vector<8x512xf32>
    %c3_i32_433 = arith.constant 3 : i32
    %634 = vector.broadcast %c3_i32_433 : i32 to vector<8x512xi32>
    %635 = arith.select %633, %634, %630 : vector<8x512xi1>, vector<8x512xi32>
    %c0_i32_434 = arith.constant 0 : i32
    %636 = vector.broadcast %c0_i32_434 : i32 to vector<8x512xi32>
    %637 = arith.cmpi eq, %635, %636 : vector<8x512xi32>
    %638 = arith.extui %637 : vector<8x512xi1> to vector<8x512xi32>
    %639 = arith.sitofp %638 : vector<8x512xi32> to vector<8x512xf32>
    %cst_435 = arith.constant dense<0.000000e+00> : vector<512xf32>
    %640 = vector.multi_reduction <add>, %639, %cst_435 [0] : vector<8x512xf32> to vector<512xf32>
    %641 = vector.shape_cast %640 : vector<512xf32> to vector<1x512xf32>
    %c0_436 = arith.constant 0 : index
    %c11 = arith.constant 11 : index
    %c0_437 = arith.constant 0 : index
    %642 = vector.load %arg5[%c0_436, %c11, %c0_437] : memref<4x16x512xf32, #tpu.memory_space<vmem>>, vector<1x1x512xf32>
    %643 = vector.shape_cast %642 : vector<1x1x512xf32> to vector<1x512xf32>
    %644 = vector.shape_cast %641 : vector<1x512xf32> to vector<1x1x512xf32>
    tpu.vector_store %arg5[%c0_436, %c11, %c0_437], %644 {strides = array<i32>} : memref<4x16x512xf32, #tpu.memory_space<vmem>>, vector<1x1x512xf32>,
    %c1_i32_438 = arith.constant 1 : i32
    %645 = vector.broadcast %c1_i32_438 : i32 to vector<8x512xi32>
    %646 = arith.cmpi eq, %635, %645 : vector<8x512xi32>
    %647 = arith.extui %646 : vector<8x512xi1> to vector<8x512xi32>
    %648 = arith.sitofp %647 : vector<8x512xi32> to vector<8x512xf32>
    %cst_439 = arith.constant dense<0.000000e+00> : vector<512xf32>
    %649 = vector.multi_reduction <add>, %648, %cst_439 [0] : vector<8x512xf32> to vector<512xf32>
    %650 = vector.shape_cast %649 : vector<512xf32> to vector<1x512xf32>
    %c1_440 = arith.constant 1 : index
    %c11_441 = arith.constant 11 : index
    %c0_442 = arith.constant 0 : index
    %651 = vector.load %arg5[%c1_440, %c11_441, %c0_442] : memref<4x16x512xf32, #tpu.memory_space<vmem>>, vector<1x1x512xf32>
    %652 = vector.shape_cast %651 : vector<1x1x512xf32> to vector<1x512xf32>
    %653 = vector.shape_cast %650 : vector<1x512xf32> to vector<1x1x512xf32>
    tpu.vector_store %arg5[%c1_440, %c11_441, %c0_442], %653 {strides = array<i32>} : memref<4x16x512xf32, #tpu.memory_space<vmem>>, vector<1x1x512xf32>,
    %c2_i32_443 = arith.constant 2 : i32
    %654 = vector.broadcast %c2_i32_443 : i32 to vector<8x512xi32>
    %655 = arith.cmpi eq, %635, %654 : vector<8x512xi32>
    %656 = arith.extui %655 : vector<8x512xi1> to vector<8x512xi32>
    %657 = arith.sitofp %656 : vector<8x512xi32> to vector<8x512xf32>
    %cst_444 = arith.constant dense<0.000000e+00> : vector<512xf32>
    %658 = vector.multi_reduction <add>, %657, %cst_444 [0] : vector<8x512xf32> to vector<512xf32>
    %659 = vector.shape_cast %658 : vector<512xf32> to vector<1x512xf32>
    %c2_445 = arith.constant 2 : index
    %c11_446 = arith.constant 11 : index
    %c0_447 = arith.constant 0 : index
    %660 = vector.load %arg5[%c2_445, %c11_446, %c0_447] : memref<4x16x512xf32, #tpu.memory_space<vmem>>, vector<1x1x512xf32>
    %661 = vector.shape_cast %660 : vector<1x1x512xf32> to vector<1x512xf32>
    %662 = vector.shape_cast %659 : vector<1x512xf32> to vector<1x1x512xf32>
    tpu.vector_store %arg5[%c2_445, %c11_446, %c0_447], %662 {strides = array<i32>} : memref<4x16x512xf32, #tpu.memory_space<vmem>>, vector<1x1x512xf32>,
    %c3_i32_448 = arith.constant 3 : i32
    %663 = vector.broadcast %c3_i32_448 : i32 to vector<8x512xi32>
    %664 = arith.cmpi eq, %635, %663 : vector<8x512xi32>
    %665 = arith.extui %664 : vector<8x512xi1> to vector<8x512xi32>
    %666 = arith.sitofp %665 : vector<8x512xi32> to vector<8x512xf32>
    %cst_449 = arith.constant dense<0.000000e+00> : vector<512xf32>
    %667 = vector.multi_reduction <add>, %666, %cst_449 [0] : vector<8x512xf32> to vector<512xf32>
    %668 = vector.shape_cast %667 : vector<512xf32> to vector<1x512xf32>
    %c3_450 = arith.constant 3 : index
    %c11_451 = arith.constant 11 : index
    %c0_452 = arith.constant 0 : index
    %669 = vector.load %arg5[%c3_450, %c11_451, %c0_452] : memref<4x16x512xf32, #tpu.memory_space<vmem>>, vector<1x1x512xf32>
    %670 = vector.shape_cast %669 : vector<1x1x512xf32> to vector<1x512xf32>
    %671 = vector.shape_cast %668 : vector<1x512xf32> to vector<1x1x512xf32>
    tpu.vector_store %arg5[%c3_450, %c11_451, %c0_452], %671 {strides = array<i32>} : memref<4x16x512xf32, #tpu.memory_space<vmem>>, vector<1x1x512xf32>,
    %c0_453 = arith.constant 0 : index
    %c0_454 = arith.constant 0 : index
    %c96 = arith.constant 96 : index
    %c0_455 = arith.constant 0 : index
    %672 = vector.load %arg2[%c0_453, %c0_454, %c96, %c0_455] : memref<1x4x128x512xf32, #tpu.memory_space<vmem>>, vector<1x1x8x512xf32>
    %673 = vector.shape_cast %672 : vector<1x1x8x512xf32> to vector<8x512xf32>
    %c0_i32_456 = arith.constant 0 : i32
    %674 = vector.broadcast %c0_i32_456 : i32 to vector<8x512xi32>
    %c0_457 = arith.constant 0 : index
    %c1_458 = arith.constant 1 : index
    %c96_459 = arith.constant 96 : index
    %c0_460 = arith.constant 0 : index
    %675 = vector.load %arg2[%c0_457, %c1_458, %c96_459, %c0_460] : memref<1x4x128x512xf32, #tpu.memory_space<vmem>>, vector<1x1x8x512xf32>
    %676 = vector.shape_cast %675 : vector<1x1x8x512xf32> to vector<8x512xf32>
    %677 = arith.cmpf ogt, %676, %673 : vector<8x512xf32>
    %678 = arith.select %677, %676, %673 : vector<8x512xi1>, vector<8x512xf32>
    %c1_i32_461 = arith.constant 1 : i32
    %679 = vector.broadcast %c1_i32_461 : i32 to vector<8x512xi32>
    %680 = arith.select %677, %679, %674 : vector<8x512xi1>, vector<8x512xi32>
    %c0_462 = arith.constant 0 : index
    %c2_463 = arith.constant 2 : index
    %c96_464 = arith.constant 96 : index
    %c0_465 = arith.constant 0 : index
    %681 = vector.load %arg2[%c0_462, %c2_463, %c96_464, %c0_465] : memref<1x4x128x512xf32, #tpu.memory_space<vmem>>, vector<1x1x8x512xf32>
    %682 = vector.shape_cast %681 : vector<1x1x8x512xf32> to vector<8x512xf32>
    %683 = arith.cmpf ogt, %682, %678 : vector<8x512xf32>
    %684 = arith.select %683, %682, %678 : vector<8x512xi1>, vector<8x512xf32>
    %c2_i32_466 = arith.constant 2 : i32
    %685 = vector.broadcast %c2_i32_466 : i32 to vector<8x512xi32>
    %686 = arith.select %683, %685, %680 : vector<8x512xi1>, vector<8x512xi32>
    %c0_467 = arith.constant 0 : index
    %c3_468 = arith.constant 3 : index
    %c96_469 = arith.constant 96 : index
    %c0_470 = arith.constant 0 : index
    %687 = vector.load %arg2[%c0_467, %c3_468, %c96_469, %c0_470] : memref<1x4x128x512xf32, #tpu.memory_space<vmem>>, vector<1x1x8x512xf32>
    %688 = vector.shape_cast %687 : vector<1x1x8x512xf32> to vector<8x512xf32>
    %689 = arith.cmpf ogt, %688, %684 : vector<8x512xf32>
    %c3_i32_471 = arith.constant 3 : i32
    %690 = vector.broadcast %c3_i32_471 : i32 to vector<8x512xi32>
    %691 = arith.select %689, %690, %686 : vector<8x512xi1>, vector<8x512xi32>
    %c0_i32_472 = arith.constant 0 : i32
    %692 = vector.broadcast %c0_i32_472 : i32 to vector<8x512xi32>
    %693 = arith.cmpi eq, %691, %692 : vector<8x512xi32>
    %694 = arith.extui %693 : vector<8x512xi1> to vector<8x512xi32>
    %695 = arith.sitofp %694 : vector<8x512xi32> to vector<8x512xf32>
    %cst_473 = arith.constant dense<0.000000e+00> : vector<512xf32>
    %696 = vector.multi_reduction <add>, %695, %cst_473 [0] : vector<8x512xf32> to vector<512xf32>
    %697 = vector.shape_cast %696 : vector<512xf32> to vector<1x512xf32>
    %c0_474 = arith.constant 0 : index
    %c12 = arith.constant 12 : index
    %c0_475 = arith.constant 0 : index
    %698 = vector.load %arg5[%c0_474, %c12, %c0_475] : memref<4x16x512xf32, #tpu.memory_space<vmem>>, vector<1x1x512xf32>
    %699 = vector.shape_cast %698 : vector<1x1x512xf32> to vector<1x512xf32>
    %700 = vector.shape_cast %697 : vector<1x512xf32> to vector<1x1x512xf32>
    tpu.vector_store %arg5[%c0_474, %c12, %c0_475], %700 {strides = array<i32>} : memref<4x16x512xf32, #tpu.memory_space<vmem>>, vector<1x1x512xf32>,
    %c1_i32_476 = arith.constant 1 : i32
    %701 = vector.broadcast %c1_i32_476 : i32 to vector<8x512xi32>
    %702 = arith.cmpi eq, %691, %701 : vector<8x512xi32>
    %703 = arith.extui %702 : vector<8x512xi1> to vector<8x512xi32>
    %704 = arith.sitofp %703 : vector<8x512xi32> to vector<8x512xf32>
    %cst_477 = arith.constant dense<0.000000e+00> : vector<512xf32>
    %705 = vector.multi_reduction <add>, %704, %cst_477 [0] : vector<8x512xf32> to vector<512xf32>
    %706 = vector.shape_cast %705 : vector<512xf32> to vector<1x512xf32>
    %c1_478 = arith.constant 1 : index
    %c12_479 = arith.constant 12 : index
    %c0_480 = arith.constant 0 : index
    %707 = vector.load %arg5[%c1_478, %c12_479, %c0_480] : memref<4x16x512xf32, #tpu.memory_space<vmem>>, vector<1x1x512xf32>
    %708 = vector.shape_cast %707 : vector<1x1x512xf32> to vector<1x512xf32>
    %709 = vector.shape_cast %706 : vector<1x512xf32> to vector<1x1x512xf32>
    tpu.vector_store %arg5[%c1_478, %c12_479, %c0_480], %709 {strides = array<i32>} : memref<4x16x512xf32, #tpu.memory_space<vmem>>, vector<1x1x512xf32>,
    %c2_i32_481 = arith.constant 2 : i32
    %710 = vector.broadcast %c2_i32_481 : i32 to vector<8x512xi32>
    %711 = arith.cmpi eq, %691, %710 : vector<8x512xi32>
    %712 = arith.extui %711 : vector<8x512xi1> to vector<8x512xi32>
    %713 = arith.sitofp %712 : vector<8x512xi32> to vector<8x512xf32>
    %cst_482 = arith.constant dense<0.000000e+00> : vector<512xf32>
    %714 = vector.multi_reduction <add>, %713, %cst_482 [0] : vector<8x512xf32> to vector<512xf32>
    %715 = vector.shape_cast %714 : vector<512xf32> to vector<1x512xf32>
    %c2_483 = arith.constant 2 : index
    %c12_484 = arith.constant 12 : index
    %c0_485 = arith.constant 0 : index
    %716 = vector.load %arg5[%c2_483, %c12_484, %c0_485] : memref<4x16x512xf32, #tpu.memory_space<vmem>>, vector<1x1x512xf32>
    %717 = vector.shape_cast %716 : vector<1x1x512xf32> to vector<1x512xf32>
    %718 = vector.shape_cast %715 : vector<1x512xf32> to vector<1x1x512xf32>
    tpu.vector_store %arg5[%c2_483, %c12_484, %c0_485], %718 {strides = array<i32>} : memref<4x16x512xf32, #tpu.memory_space<vmem>>, vector<1x1x512xf32>,
    %c3_i32_486 = arith.constant 3 : i32
    %719 = vector.broadcast %c3_i32_486 : i32 to vector<8x512xi32>
    %720 = arith.cmpi eq, %691, %719 : vector<8x512xi32>
    %721 = arith.extui %720 : vector<8x512xi1> to vector<8x512xi32>
    %722 = arith.sitofp %721 : vector<8x512xi32> to vector<8x512xf32>
    %cst_487 = arith.constant dense<0.000000e+00> : vector<512xf32>
    %723 = vector.multi_reduction <add>, %722, %cst_487 [0] : vector<8x512xf32> to vector<512xf32>
    %724 = vector.shape_cast %723 : vector<512xf32> to vector<1x512xf32>
    %c3_488 = arith.constant 3 : index
    %c12_489 = arith.constant 12 : index
    %c0_490 = arith.constant 0 : index
    %725 = vector.load %arg5[%c3_488, %c12_489, %c0_490] : memref<4x16x512xf32, #tpu.memory_space<vmem>>, vector<1x1x512xf32>
    %726 = vector.shape_cast %725 : vector<1x1x512xf32> to vector<1x512xf32>
    %727 = vector.shape_cast %724 : vector<1x512xf32> to vector<1x1x512xf32>
    tpu.vector_store %arg5[%c3_488, %c12_489, %c0_490], %727 {strides = array<i32>} : memref<4x16x512xf32, #tpu.memory_space<vmem>>, vector<1x1x512xf32>,
    %c0_491 = arith.constant 0 : index
    %c0_492 = arith.constant 0 : index
    %c104 = arith.constant 104 : index
    %c0_493 = arith.constant 0 : index
    %728 = vector.load %arg2[%c0_491, %c0_492, %c104, %c0_493] : memref<1x4x128x512xf32, #tpu.memory_space<vmem>>, vector<1x1x8x512xf32>
    %729 = vector.shape_cast %728 : vector<1x1x8x512xf32> to vector<8x512xf32>
    %c0_i32_494 = arith.constant 0 : i32
    %730 = vector.broadcast %c0_i32_494 : i32 to vector<8x512xi32>
    %c0_495 = arith.constant 0 : index
    %c1_496 = arith.constant 1 : index
    %c104_497 = arith.constant 104 : index
    %c0_498 = arith.constant 0 : index
    %731 = vector.load %arg2[%c0_495, %c1_496, %c104_497, %c0_498] : memref<1x4x128x512xf32, #tpu.memory_space<vmem>>, vector<1x1x8x512xf32>
    %732 = vector.shape_cast %731 : vector<1x1x8x512xf32> to vector<8x512xf32>
    %733 = arith.cmpf ogt, %732, %729 : vector<8x512xf32>
    %734 = arith.select %733, %732, %729 : vector<8x512xi1>, vector<8x512xf32>
    %c1_i32_499 = arith.constant 1 : i32
    %735 = vector.broadcast %c1_i32_499 : i32 to vector<8x512xi32>
    %736 = arith.select %733, %735, %730 : vector<8x512xi1>, vector<8x512xi32>
    %c0_500 = arith.constant 0 : index
    %c2_501 = arith.constant 2 : index
    %c104_502 = arith.constant 104 : index
    %c0_503 = arith.constant 0 : index
    %737 = vector.load %arg2[%c0_500, %c2_501, %c104_502, %c0_503] : memref<1x4x128x512xf32, #tpu.memory_space<vmem>>, vector<1x1x8x512xf32>
    %738 = vector.shape_cast %737 : vector<1x1x8x512xf32> to vector<8x512xf32>
    %739 = arith.cmpf ogt, %738, %734 : vector<8x512xf32>
    %740 = arith.select %739, %738, %734 : vector<8x512xi1>, vector<8x512xf32>
    %c2_i32_504 = arith.constant 2 : i32
    %741 = vector.broadcast %c2_i32_504 : i32 to vector<8x512xi32>
    %742 = arith.select %739, %741, %736 : vector<8x512xi1>, vector<8x512xi32>
    %c0_505 = arith.constant 0 : index
    %c3_506 = arith.constant 3 : index
    %c104_507 = arith.constant 104 : index
    %c0_508 = arith.constant 0 : index
    %743 = vector.load %arg2[%c0_505, %c3_506, %c104_507, %c0_508] : memref<1x4x128x512xf32, #tpu.memory_space<vmem>>, vector<1x1x8x512xf32>
    %744 = vector.shape_cast %743 : vector<1x1x8x512xf32> to vector<8x512xf32>
    %745 = arith.cmpf ogt, %744, %740 : vector<8x512xf32>
    %c3_i32_509 = arith.constant 3 : i32
    %746 = vector.broadcast %c3_i32_509 : i32 to vector<8x512xi32>
    %747 = arith.select %745, %746, %742 : vector<8x512xi1>, vector<8x512xi32>
    %c0_i32_510 = arith.constant 0 : i32
    %748 = vector.broadcast %c0_i32_510 : i32 to vector<8x512xi32>
    %749 = arith.cmpi eq, %747, %748 : vector<8x512xi32>
    %750 = arith.extui %749 : vector<8x512xi1> to vector<8x512xi32>
    %751 = arith.sitofp %750 : vector<8x512xi32> to vector<8x512xf32>
    %cst_511 = arith.constant dense<0.000000e+00> : vector<512xf32>
    %752 = vector.multi_reduction <add>, %751, %cst_511 [0] : vector<8x512xf32> to vector<512xf32>
    %753 = vector.shape_cast %752 : vector<512xf32> to vector<1x512xf32>
    %c0_512 = arith.constant 0 : index
    %c13 = arith.constant 13 : index
    %c0_513 = arith.constant 0 : index
    %754 = vector.load %arg5[%c0_512, %c13, %c0_513] : memref<4x16x512xf32, #tpu.memory_space<vmem>>, vector<1x1x512xf32>
    %755 = vector.shape_cast %754 : vector<1x1x512xf32> to vector<1x512xf32>
    %756 = vector.shape_cast %753 : vector<1x512xf32> to vector<1x1x512xf32>
    tpu.vector_store %arg5[%c0_512, %c13, %c0_513], %756 {strides = array<i32>} : memref<4x16x512xf32, #tpu.memory_space<vmem>>, vector<1x1x512xf32>,
    %c1_i32_514 = arith.constant 1 : i32
    %757 = vector.broadcast %c1_i32_514 : i32 to vector<8x512xi32>
    %758 = arith.cmpi eq, %747, %757 : vector<8x512xi32>
    %759 = arith.extui %758 : vector<8x512xi1> to vector<8x512xi32>
    %760 = arith.sitofp %759 : vector<8x512xi32> to vector<8x512xf32>
    %cst_515 = arith.constant dense<0.000000e+00> : vector<512xf32>
    %761 = vector.multi_reduction <add>, %760, %cst_515 [0] : vector<8x512xf32> to vector<512xf32>
    %762 = vector.shape_cast %761 : vector<512xf32> to vector<1x512xf32>
    %c1_516 = arith.constant 1 : index
    %c13_517 = arith.constant 13 : index
    %c0_518 = arith.constant 0 : index
    %763 = vector.load %arg5[%c1_516, %c13_517, %c0_518] : memref<4x16x512xf32, #tpu.memory_space<vmem>>, vector<1x1x512xf32>
    %764 = vector.shape_cast %763 : vector<1x1x512xf32> to vector<1x512xf32>
    %765 = vector.shape_cast %762 : vector<1x512xf32> to vector<1x1x512xf32>
    tpu.vector_store %arg5[%c1_516, %c13_517, %c0_518], %765 {strides = array<i32>} : memref<4x16x512xf32, #tpu.memory_space<vmem>>, vector<1x1x512xf32>,
    %c2_i32_519 = arith.constant 2 : i32
    %766 = vector.broadcast %c2_i32_519 : i32 to vector<8x512xi32>
    %767 = arith.cmpi eq, %747, %766 : vector<8x512xi32>
    %768 = arith.extui %767 : vector<8x512xi1> to vector<8x512xi32>
    %769 = arith.sitofp %768 : vector<8x512xi32> to vector<8x512xf32>
    %cst_520 = arith.constant dense<0.000000e+00> : vector<512xf32>
    %770 = vector.multi_reduction <add>, %769, %cst_520 [0] : vector<8x512xf32> to vector<512xf32>
    %771 = vector.shape_cast %770 : vector<512xf32> to vector<1x512xf32>
    %c2_521 = arith.constant 2 : index
    %c13_522 = arith.constant 13 : index
    %c0_523 = arith.constant 0 : index
    %772 = vector.load %arg5[%c2_521, %c13_522, %c0_523] : memref<4x16x512xf32, #tpu.memory_space<vmem>>, vector<1x1x512xf32>
    %773 = vector.shape_cast %772 : vector<1x1x512xf32> to vector<1x512xf32>
    %774 = vector.shape_cast %771 : vector<1x512xf32> to vector<1x1x512xf32>
    tpu.vector_store %arg5[%c2_521, %c13_522, %c0_523], %774 {strides = array<i32>} : memref<4x16x512xf32, #tpu.memory_space<vmem>>, vector<1x1x512xf32>,
    %c3_i32_524 = arith.constant 3 : i32
    %775 = vector.broadcast %c3_i32_524 : i32 to vector<8x512xi32>
    %776 = arith.cmpi eq, %747, %775 : vector<8x512xi32>
    %777 = arith.extui %776 : vector<8x512xi1> to vector<8x512xi32>
    %778 = arith.sitofp %777 : vector<8x512xi32> to vector<8x512xf32>
    %cst_525 = arith.constant dense<0.000000e+00> : vector<512xf32>
    %779 = vector.multi_reduction <add>, %778, %cst_525 [0] : vector<8x512xf32> to vector<512xf32>
    %780 = vector.shape_cast %779 : vector<512xf32> to vector<1x512xf32>
    %c3_526 = arith.constant 3 : index
    %c13_527 = arith.constant 13 : index
    %c0_528 = arith.constant 0 : index
    %781 = vector.load %arg5[%c3_526, %c13_527, %c0_528] : memref<4x16x512xf32, #tpu.memory_space<vmem>>, vector<1x1x512xf32>
    %782 = vector.shape_cast %781 : vector<1x1x512xf32> to vector<1x512xf32>
    %783 = vector.shape_cast %780 : vector<1x512xf32> to vector<1x1x512xf32>
    tpu.vector_store %arg5[%c3_526, %c13_527, %c0_528], %783 {strides = array<i32>} : memref<4x16x512xf32, #tpu.memory_space<vmem>>, vector<1x1x512xf32>,
    %c0_529 = arith.constant 0 : index
    %c0_530 = arith.constant 0 : index
    %c112 = arith.constant 112 : index
    %c0_531 = arith.constant 0 : index
    %784 = vector.load %arg2[%c0_529, %c0_530, %c112, %c0_531] : memref<1x4x128x512xf32, #tpu.memory_space<vmem>>, vector<1x1x8x512xf32>
    %785 = vector.shape_cast %784 : vector<1x1x8x512xf32> to vector<8x512xf32>
    %c0_i32_532 = arith.constant 0 : i32
    %786 = vector.broadcast %c0_i32_532 : i32 to vector<8x512xi32>
    %c0_533 = arith.constant 0 : index
    %c1_534 = arith.constant 1 : index
    %c112_535 = arith.constant 112 : index
    %c0_536 = arith.constant 0 : index
    %787 = vector.load %arg2[%c0_533, %c1_534, %c112_535, %c0_536] : memref<1x4x128x512xf32, #tpu.memory_space<vmem>>, vector<1x1x8x512xf32>
    %788 = vector.shape_cast %787 : vector<1x1x8x512xf32> to vector<8x512xf32>
    %789 = arith.cmpf ogt, %788, %785 : vector<8x512xf32>
    %790 = arith.select %789, %788, %785 : vector<8x512xi1>, vector<8x512xf32>
    %c1_i32_537 = arith.constant 1 : i32
    %791 = vector.broadcast %c1_i32_537 : i32 to vector<8x512xi32>
    %792 = arith.select %789, %791, %786 : vector<8x512xi1>, vector<8x512xi32>
    %c0_538 = arith.constant 0 : index
    %c2_539 = arith.constant 2 : index
    %c112_540 = arith.constant 112 : index
    %c0_541 = arith.constant 0 : index
    %793 = vector.load %arg2[%c0_538, %c2_539, %c112_540, %c0_541] : memref<1x4x128x512xf32, #tpu.memory_space<vmem>>, vector<1x1x8x512xf32>
    %794 = vector.shape_cast %793 : vector<1x1x8x512xf32> to vector<8x512xf32>
    %795 = arith.cmpf ogt, %794, %790 : vector<8x512xf32>
    %796 = arith.select %795, %794, %790 : vector<8x512xi1>, vector<8x512xf32>
    %c2_i32_542 = arith.constant 2 : i32
    %797 = vector.broadcast %c2_i32_542 : i32 to vector<8x512xi32>
    %798 = arith.select %795, %797, %792 : vector<8x512xi1>, vector<8x512xi32>
    %c0_543 = arith.constant 0 : index
    %c3_544 = arith.constant 3 : index
    %c112_545 = arith.constant 112 : index
    %c0_546 = arith.constant 0 : index
    %799 = vector.load %arg2[%c0_543, %c3_544, %c112_545, %c0_546] : memref<1x4x128x512xf32, #tpu.memory_space<vmem>>, vector<1x1x8x512xf32>
    %800 = vector.shape_cast %799 : vector<1x1x8x512xf32> to vector<8x512xf32>
    %801 = arith.cmpf ogt, %800, %796 : vector<8x512xf32>
    %c3_i32_547 = arith.constant 3 : i32
    %802 = vector.broadcast %c3_i32_547 : i32 to vector<8x512xi32>
    %803 = arith.select %801, %802, %798 : vector<8x512xi1>, vector<8x512xi32>
    %c0_i32_548 = arith.constant 0 : i32
    %804 = vector.broadcast %c0_i32_548 : i32 to vector<8x512xi32>
    %805 = arith.cmpi eq, %803, %804 : vector<8x512xi32>
    %806 = arith.extui %805 : vector<8x512xi1> to vector<8x512xi32>
    %807 = arith.sitofp %806 : vector<8x512xi32> to vector<8x512xf32>
    %cst_549 = arith.constant dense<0.000000e+00> : vector<512xf32>
    %808 = vector.multi_reduction <add>, %807, %cst_549 [0] : vector<8x512xf32> to vector<512xf32>
    %809 = vector.shape_cast %808 : vector<512xf32> to vector<1x512xf32>
    %c0_550 = arith.constant 0 : index
    %c14 = arith.constant 14 : index
    %c0_551 = arith.constant 0 : index
    %810 = vector.load %arg5[%c0_550, %c14, %c0_551] : memref<4x16x512xf32, #tpu.memory_space<vmem>>, vector<1x1x512xf32>
    %811 = vector.shape_cast %810 : vector<1x1x512xf32> to vector<1x512xf32>
    %812 = vector.shape_cast %809 : vector<1x512xf32> to vector<1x1x512xf32>
    tpu.vector_store %arg5[%c0_550, %c14, %c0_551], %812 {strides = array<i32>} : memref<4x16x512xf32, #tpu.memory_space<vmem>>, vector<1x1x512xf32>,
    %c1_i32_552 = arith.constant 1 : i32
    %813 = vector.broadcast %c1_i32_552 : i32 to vector<8x512xi32>
    %814 = arith.cmpi eq, %803, %813 : vector<8x512xi32>
    %815 = arith.extui %814 : vector<8x512xi1> to vector<8x512xi32>
    %816 = arith.sitofp %815 : vector<8x512xi32> to vector<8x512xf32>
    %cst_553 = arith.constant dense<0.000000e+00> : vector<512xf32>
    %817 = vector.multi_reduction <add>, %816, %cst_553 [0] : vector<8x512xf32> to vector<512xf32>
    %818 = vector.shape_cast %817 : vector<512xf32> to vector<1x512xf32>
    %c1_554 = arith.constant 1 : index
    %c14_555 = arith.constant 14 : index
    %c0_556 = arith.constant 0 : index
    %819 = vector.load %arg5[%c1_554, %c14_555, %c0_556] : memref<4x16x512xf32, #tpu.memory_space<vmem>>, vector<1x1x512xf32>
    %820 = vector.shape_cast %819 : vector<1x1x512xf32> to vector<1x512xf32>
    %821 = vector.shape_cast %818 : vector<1x512xf32> to vector<1x1x512xf32>
    tpu.vector_store %arg5[%c1_554, %c14_555, %c0_556], %821 {strides = array<i32>} : memref<4x16x512xf32, #tpu.memory_space<vmem>>, vector<1x1x512xf32>,
    %c2_i32_557 = arith.constant 2 : i32
    %822 = vector.broadcast %c2_i32_557 : i32 to vector<8x512xi32>
    %823 = arith.cmpi eq, %803, %822 : vector<8x512xi32>
    %824 = arith.extui %823 : vector<8x512xi1> to vector<8x512xi32>
    %825 = arith.sitofp %824 : vector<8x512xi32> to vector<8x512xf32>
    %cst_558 = arith.constant dense<0.000000e+00> : vector<512xf32>
    %826 = vector.multi_reduction <add>, %825, %cst_558 [0] : vector<8x512xf32> to vector<512xf32>
    %827 = vector.shape_cast %826 : vector<512xf32> to vector<1x512xf32>
    %c2_559 = arith.constant 2 : index
    %c14_560 = arith.constant 14 : index
    %c0_561 = arith.constant 0 : index
    %828 = vector.load %arg5[%c2_559, %c14_560, %c0_561] : memref<4x16x512xf32, #tpu.memory_space<vmem>>, vector<1x1x512xf32>
    %829 = vector.shape_cast %828 : vector<1x1x512xf32> to vector<1x512xf32>
    %830 = vector.shape_cast %827 : vector<1x512xf32> to vector<1x1x512xf32>
    tpu.vector_store %arg5[%c2_559, %c14_560, %c0_561], %830 {strides = array<i32>} : memref<4x16x512xf32, #tpu.memory_space<vmem>>, vector<1x1x512xf32>,
    %c3_i32_562 = arith.constant 3 : i32
    %831 = vector.broadcast %c3_i32_562 : i32 to vector<8x512xi32>
    %832 = arith.cmpi eq, %803, %831 : vector<8x512xi32>
    %833 = arith.extui %832 : vector<8x512xi1> to vector<8x512xi32>
    %834 = arith.sitofp %833 : vector<8x512xi32> to vector<8x512xf32>
    %cst_563 = arith.constant dense<0.000000e+00> : vector<512xf32>
    %835 = vector.multi_reduction <add>, %834, %cst_563 [0] : vector<8x512xf32> to vector<512xf32>
    %836 = vector.shape_cast %835 : vector<512xf32> to vector<1x512xf32>
    %c3_564 = arith.constant 3 : index
    %c14_565 = arith.constant 14 : index
    %c0_566 = arith.constant 0 : index
    %837 = vector.load %arg5[%c3_564, %c14_565, %c0_566] : memref<4x16x512xf32, #tpu.memory_space<vmem>>, vector<1x1x512xf32>
    %838 = vector.shape_cast %837 : vector<1x1x512xf32> to vector<1x512xf32>
    %839 = vector.shape_cast %836 : vector<1x512xf32> to vector<1x1x512xf32>
    tpu.vector_store %arg5[%c3_564, %c14_565, %c0_566], %839 {strides = array<i32>} : memref<4x16x512xf32, #tpu.memory_space<vmem>>, vector<1x1x512xf32>,
    %c0_567 = arith.constant 0 : index
    %c0_568 = arith.constant 0 : index
    %c120 = arith.constant 120 : index
    %c0_569 = arith.constant 0 : index
    %840 = vector.load %arg2[%c0_567, %c0_568, %c120, %c0_569] : memref<1x4x128x512xf32, #tpu.memory_space<vmem>>, vector<1x1x8x512xf32>
    %841 = vector.shape_cast %840 : vector<1x1x8x512xf32> to vector<8x512xf32>
    %c0_i32_570 = arith.constant 0 : i32
    %842 = vector.broadcast %c0_i32_570 : i32 to vector<8x512xi32>
    %c0_571 = arith.constant 0 : index
    %c1_572 = arith.constant 1 : index
    %c120_573 = arith.constant 120 : index
    %c0_574 = arith.constant 0 : index
    %843 = vector.load %arg2[%c0_571, %c1_572, %c120_573, %c0_574] : memref<1x4x128x512xf32, #tpu.memory_space<vmem>>, vector<1x1x8x512xf32>
    %844 = vector.shape_cast %843 : vector<1x1x8x512xf32> to vector<8x512xf32>
    %845 = arith.cmpf ogt, %844, %841 : vector<8x512xf32>
    %846 = arith.select %845, %844, %841 : vector<8x512xi1>, vector<8x512xf32>
    %c1_i32_575 = arith.constant 1 : i32
    %847 = vector.broadcast %c1_i32_575 : i32 to vector<8x512xi32>
    %848 = arith.select %845, %847, %842 : vector<8x512xi1>, vector<8x512xi32>
    %c0_576 = arith.constant 0 : index
    %c2_577 = arith.constant 2 : index
    %c120_578 = arith.constant 120 : index
    %c0_579 = arith.constant 0 : index
    %849 = vector.load %arg2[%c0_576, %c2_577, %c120_578, %c0_579] : memref<1x4x128x512xf32, #tpu.memory_space<vmem>>, vector<1x1x8x512xf32>
    %850 = vector.shape_cast %849 : vector<1x1x8x512xf32> to vector<8x512xf32>
    %851 = arith.cmpf ogt, %850, %846 : vector<8x512xf32>
    %852 = arith.select %851, %850, %846 : vector<8x512xi1>, vector<8x512xf32>
    %c2_i32_580 = arith.constant 2 : i32
    %853 = vector.broadcast %c2_i32_580 : i32 to vector<8x512xi32>
    %854 = arith.select %851, %853, %848 : vector<8x512xi1>, vector<8x512xi32>
    %c0_581 = arith.constant 0 : index
    %c3_582 = arith.constant 3 : index
    %c120_583 = arith.constant 120 : index
    %c0_584 = arith.constant 0 : index
    %855 = vector.load %arg2[%c0_581, %c3_582, %c120_583, %c0_584] : memref<1x4x128x512xf32, #tpu.memory_space<vmem>>, vector<1x1x8x512xf32>
    %856 = vector.shape_cast %855 : vector<1x1x8x512xf32> to vector<8x512xf32>
    %857 = arith.cmpf ogt, %856, %852 : vector<8x512xf32>
    %c3_i32_585 = arith.constant 3 : i32
    %858 = vector.broadcast %c3_i32_585 : i32 to vector<8x512xi32>
    %859 = arith.select %857, %858, %854 : vector<8x512xi1>, vector<8x512xi32>
    %c0_i32_586 = arith.constant 0 : i32
    %860 = vector.broadcast %c0_i32_586 : i32 to vector<8x512xi32>
    %861 = arith.cmpi eq, %859, %860 : vector<8x512xi32>
    %862 = arith.extui %861 : vector<8x512xi1> to vector<8x512xi32>
    %863 = arith.sitofp %862 : vector<8x512xi32> to vector<8x512xf32>
    %cst_587 = arith.constant dense<0.000000e+00> : vector<512xf32>
    %864 = vector.multi_reduction <add>, %863, %cst_587 [0] : vector<8x512xf32> to vector<512xf32>
    %865 = vector.shape_cast %864 : vector<512xf32> to vector<1x512xf32>
    %c0_588 = arith.constant 0 : index
    %c15 = arith.constant 15 : index
    %c0_589 = arith.constant 0 : index
    %866 = vector.load %arg5[%c0_588, %c15, %c0_589] : memref<4x16x512xf32, #tpu.memory_space<vmem>>, vector<1x1x512xf32>
    %867 = vector.shape_cast %866 : vector<1x1x512xf32> to vector<1x512xf32>
    %868 = vector.shape_cast %865 : vector<1x512xf32> to vector<1x1x512xf32>
    tpu.vector_store %arg5[%c0_588, %c15, %c0_589], %868 {strides = array<i32>} : memref<4x16x512xf32, #tpu.memory_space<vmem>>, vector<1x1x512xf32>,
    %c1_i32_590 = arith.constant 1 : i32
    %869 = vector.broadcast %c1_i32_590 : i32 to vector<8x512xi32>
    %870 = arith.cmpi eq, %859, %869 : vector<8x512xi32>
    %871 = arith.extui %870 : vector<8x512xi1> to vector<8x512xi32>
    %872 = arith.sitofp %871 : vector<8x512xi32> to vector<8x512xf32>
    %cst_591 = arith.constant dense<0.000000e+00> : vector<512xf32>
    %873 = vector.multi_reduction <add>, %872, %cst_591 [0] : vector<8x512xf32> to vector<512xf32>
    %874 = vector.shape_cast %873 : vector<512xf32> to vector<1x512xf32>
    %c1_592 = arith.constant 1 : index
    %c15_593 = arith.constant 15 : index
    %c0_594 = arith.constant 0 : index
    %875 = vector.load %arg5[%c1_592, %c15_593, %c0_594] : memref<4x16x512xf32, #tpu.memory_space<vmem>>, vector<1x1x512xf32>
    %876 = vector.shape_cast %875 : vector<1x1x512xf32> to vector<1x512xf32>
    %877 = vector.shape_cast %874 : vector<1x512xf32> to vector<1x1x512xf32>
    tpu.vector_store %arg5[%c1_592, %c15_593, %c0_594], %877 {strides = array<i32>} : memref<4x16x512xf32, #tpu.memory_space<vmem>>, vector<1x1x512xf32>,
    %c2_i32_595 = arith.constant 2 : i32
    %878 = vector.broadcast %c2_i32_595 : i32 to vector<8x512xi32>
    %879 = arith.cmpi eq, %859, %878 : vector<8x512xi32>
    %880 = arith.extui %879 : vector<8x512xi1> to vector<8x512xi32>
    %881 = arith.sitofp %880 : vector<8x512xi32> to vector<8x512xf32>
    %cst_596 = arith.constant dense<0.000000e+00> : vector<512xf32>
    %882 = vector.multi_reduction <add>, %881, %cst_596 [0] : vector<8x512xf32> to vector<512xf32>
    %883 = vector.shape_cast %882 : vector<512xf32> to vector<1x512xf32>
    %c2_597 = arith.constant 2 : index
    %c15_598 = arith.constant 15 : index
    %c0_599 = arith.constant 0 : index
    %884 = vector.load %arg5[%c2_597, %c15_598, %c0_599] : memref<4x16x512xf32, #tpu.memory_space<vmem>>, vector<1x1x512xf32>
    %885 = vector.shape_cast %884 : vector<1x1x512xf32> to vector<1x512xf32>
    %886 = vector.shape_cast %883 : vector<1x512xf32> to vector<1x1x512xf32>
    tpu.vector_store %arg5[%c2_597, %c15_598, %c0_599], %886 {strides = array<i32>} : memref<4x16x512xf32, #tpu.memory_space<vmem>>, vector<1x1x512xf32>,
    %c3_i32_600 = arith.constant 3 : i32
    %887 = vector.broadcast %c3_i32_600 : i32 to vector<8x512xi32>
    %888 = arith.cmpi eq, %859, %887 : vector<8x512xi32>
    %889 = arith.extui %888 : vector<8x512xi1> to vector<8x512xi32>
    %890 = arith.sitofp %889 : vector<8x512xi32> to vector<8x512xf32>
    %cst_601 = arith.constant dense<0.000000e+00> : vector<512xf32>
    %891 = vector.multi_reduction <add>, %890, %cst_601 [0] : vector<8x512xf32> to vector<512xf32>
    %892 = vector.shape_cast %891 : vector<512xf32> to vector<1x512xf32>
    %c3_602 = arith.constant 3 : index
    %c15_603 = arith.constant 15 : index
    %c0_604 = arith.constant 0 : index
    %893 = vector.load %arg5[%c3_602, %c15_603, %c0_604] : memref<4x16x512xf32, #tpu.memory_space<vmem>>, vector<1x1x512xf32>
    %894 = vector.shape_cast %893 : vector<1x1x512xf32> to vector<1x512xf32>
    %895 = vector.shape_cast %892 : vector<1x512xf32> to vector<1x1x512xf32>
    tpu.vector_store %arg5[%c3_602, %c15_603, %c0_604], %895 {strides = array<i32>} : memref<4x16x512xf32, #tpu.memory_space<vmem>>, vector<1x1x512xf32>,
    %c0_605 = arith.constant 0 : index
    %c0_606 = arith.constant 0 : index
    %896 = vector.load %arg3[%c0_605, %c0_606] : memref<512x64xf32, #tpu.memory_space<vmem>>, vector<512x64xf32>
    %c0_607 = arith.constant 0 : index
    %c0_608 = arith.constant 0 : index
    %c0_609 = arith.constant 0 : index
    %897 = vector.load %arg5[%c0_607, %c0_608, %c0_609] : memref<4x16x512xf32, #tpu.memory_space<vmem>>, vector<1x16x512xf32>
    %898 = vector.shape_cast %897 : vector<1x16x512xf32> to vector<16x512xf32>
    %cst_610 = arith.constant dense<0.000000e+00> : vector<16x64xf32>
    %899 = tpu.matmul %898, %896, %cst_610 {dimension_numbers = #tpu.dot_dimension_numbers<[1], [0], [0], [1], [0, 0, 1, 1], [], []>} : vector<16x512xf32>, vector<512x64xf32>, vector<16x64xf32> -> vector<16x64xf32>
    %c0_611 = arith.constant 0 : index
    %c0_612 = arith.constant 0 : index
    %c0_613 = arith.constant 0 : index
    %c0_614 = arith.constant 0 : index
    %900 = vector.load %arg4[%c0_611, %c0_612, %c0_613, %c0_614] : memref<1x4x16x64xf32, #tpu.memory_space<vmem>>, vector<1x1x16x64xf32>
    %901 = vector.shape_cast %900 : vector<1x1x16x64xf32> to vector<16x64xf32>
    %902 = vector.shape_cast %899 : vector<16x64xf32> to vector<1x1x16x64xf32>
    tpu.vector_store %arg4[%c0_611, %c0_612, %c0_613, %c0_614], %902 {strides = array<i32>} : memref<1x4x16x64xf32, #tpu.memory_space<vmem>>, vector<1x1x16x64xf32>,
    %c1_615 = arith.constant 1 : index
    %c0_616 = arith.constant 0 : index
    %c0_617 = arith.constant 0 : index
    %903 = vector.load %arg5[%c1_615, %c0_616, %c0_617] : memref<4x16x512xf32, #tpu.memory_space<vmem>>, vector<1x16x512xf32>
    %904 = vector.shape_cast %903 : vector<1x16x512xf32> to vector<16x512xf32>
    %cst_618 = arith.constant dense<0.000000e+00> : vector<16x64xf32>
    %905 = tpu.matmul %904, %896, %cst_618 {dimension_numbers = #tpu.dot_dimension_numbers<[1], [0], [0], [1], [0, 0, 1, 1], [], []>} : vector<16x512xf32>, vector<512x64xf32>, vector<16x64xf32> -> vector<16x64xf32>
    %c0_619 = arith.constant 0 : index
    %c1_620 = arith.constant 1 : index
    %c0_621 = arith.constant 0 : index
    %c0_622 = arith.constant 0 : index
    %906 = vector.load %arg4[%c0_619, %c1_620, %c0_621, %c0_622] : memref<1x4x16x64xf32, #tpu.memory_space<vmem>>, vector<1x1x16x64xf32>
    %907 = vector.shape_cast %906 : vector<1x1x16x64xf32> to vector<16x64xf32>
    %908 = vector.shape_cast %905 : vector<16x64xf32> to vector<1x1x16x64xf32>
    tpu.vector_store %arg4[%c0_619, %c1_620, %c0_621, %c0_622], %908 {strides = array<i32>} : memref<1x4x16x64xf32, #tpu.memory_space<vmem>>, vector<1x1x16x64xf32>,
    %c2_623 = arith.constant 2 : index
    %c0_624 = arith.constant 0 : index
    %c0_625 = arith.constant 0 : index
    %909 = vector.load %arg5[%c2_623, %c0_624, %c0_625] : memref<4x16x512xf32, #tpu.memory_space<vmem>>, vector<1x16x512xf32>
    %910 = vector.shape_cast %909 : vector<1x16x512xf32> to vector<16x512xf32>
    %cst_626 = arith.constant dense<0.000000e+00> : vector<16x64xf32>
    %911 = tpu.matmul %910, %896, %cst_626 {dimension_numbers = #tpu.dot_dimension_numbers<[1], [0], [0], [1], [0, 0, 1, 1], [], []>} : vector<16x512xf32>, vector<512x64xf32>, vector<16x64xf32> -> vector<16x64xf32>
    %c0_627 = arith.constant 0 : index
    %c2_628 = arith.constant 2 : index
    %c0_629 = arith.constant 0 : index
    %c0_630 = arith.constant 0 : index
    %912 = vector.load %arg4[%c0_627, %c2_628, %c0_629, %c0_630] : memref<1x4x16x64xf32, #tpu.memory_space<vmem>>, vector<1x1x16x64xf32>
    %913 = vector.shape_cast %912 : vector<1x1x16x64xf32> to vector<16x64xf32>
    %914 = vector.shape_cast %911 : vector<16x64xf32> to vector<1x1x16x64xf32>
    tpu.vector_store %arg4[%c0_627, %c2_628, %c0_629, %c0_630], %914 {strides = array<i32>} : memref<1x4x16x64xf32, #tpu.memory_space<vmem>>, vector<1x1x16x64xf32>,
    %c3_631 = arith.constant 3 : index
    %c0_632 = arith.constant 0 : index
    %c0_633 = arith.constant 0 : index
    %915 = vector.load %arg5[%c3_631, %c0_632, %c0_633] : memref<4x16x512xf32, #tpu.memory_space<vmem>>, vector<1x16x512xf32>
    %916 = vector.shape_cast %915 : vector<1x16x512xf32> to vector<16x512xf32>
    %cst_634 = arith.constant dense<0.000000e+00> : vector<16x64xf32>
    %917 = tpu.matmul %916, %896, %cst_634 {dimension_numbers = #tpu.dot_dimension_numbers<[1], [0], [0], [1], [0, 0, 1, 1], [], []>} : vector<16x512xf32>, vector<512x64xf32>, vector<16x64xf32> -> vector<16x64xf32>
    %c0_635 = arith.constant 0 : index
    %c3_636 = arith.constant 3 : index
    %c0_637 = arith.constant 0 : index
    %c0_638 = arith.constant 0 : index
    %918 = vector.load %arg4[%c0_635, %c3_636, %c0_637, %c0_638] : memref<1x4x16x64xf32, #tpu.memory_space<vmem>>, vector<1x1x16x64xf32>
    %919 = vector.shape_cast %918 : vector<1x1x16x64xf32> to vector<16x64xf32>
    %920 = vector.shape_cast %917 : vector<16x64xf32> to vector<1x1x16x64xf32>
    tpu.vector_store %arg4[%c0_635, %c3_636, %c0_637, %c0_638], %920 {strides = array<i32>} : memref<1x4x16x64xf32, #tpu.memory_space<vmem>>, vector<1x1x16x64xf32>,
    return
  }
  func.func @transform_0(%arg0: i32, %arg1: i32) -> (i32, i32, i32, i32) {
    %c0_i32 = arith.constant 0 : i32
    %c0_i32_0 = arith.constant 0 : i32
    %c0_i32_1 = arith.constant 0 : i32
    return %arg0, %c0_i32, %arg1, %c0_i32_0 : i32, i32, i32, i32
  }
  func.func @transform_1(%arg0: i32, %arg1: i32) -> (i32, i32) {
    %c0_i32 = arith.constant 0 : i32
    %c0_i32_0 = arith.constant 0 : i32
    %c0_i32_1 = arith.constant 0 : i32
    return %c0_i32, %c0_i32_0 : i32, i32
  }
  func.func @transform_2(%arg0: i32, %arg1: i32) -> (i32, i32, i32, i32) {
    %c0_i32 = arith.constant 0 : i32
    %c0_i32_0 = arith.constant 0 : i32
    %c0_i32_1 = arith.constant 0 : i32
    return %arg0, %c0_i32, %arg1, %c0_i32_0 : i32, i32, i32, i32
  }
}

module attributes {stable_mosaic.version = 11 : i64} {
  func.func @_bmm_kernel(%arg0: i32, %arg1: i32, %arg2: memref<1x1x256x16xf32, #tpu.memory_space<vmem>>, %arg3: memref<1x1x16x1024xf32, #tpu.memory_space<vmem>>, %arg4: memref<1x1x256x1024xf32, #tpu.memory_space<vmem>>) attributes {dimension_semantics = [#tpu.dimension_semantics<parallel>, #tpu.dimension_semantics<parallel>], iteration_bounds = array<i64: 2, 4>, scalar_prefetch = 0 : i64, scratch_operands = 0 : i64, tpu.core_type = #tpu.core_type<tc>, window_params = [{transform_indices = @transform_0, window_bounds = array<i64: 1, 1, 256, 16>}, {transform_indices = @transform_1, window_bounds = array<i64: 1, 1, 16, 1024>}, {transform_indices = @transform_2, window_bounds = array<i64: 1, 1, 256, 1024>}]} {
    %c0 = arith.constant 0 : index
    %c0_0 = arith.constant 0 : index
    %c0_1 = arith.constant 0 : index
    %c0_2 = arith.constant 0 : index
    %0 = vector.load %arg2[%c0, %c0_0, %c0_1, %c0_2] : memref<1x1x256x16xf32, #tpu.memory_space<vmem>>, vector<1x1x256x16xf32>
    %1 = vector.shape_cast %0 : vector<1x1x256x16xf32> to vector<256x16xf32>
    %c0_3 = arith.constant 0 : index
    %c0_4 = arith.constant 0 : index
    %c0_5 = arith.constant 0 : index
    %c0_6 = arith.constant 0 : index
    %2 = vector.load %arg3[%c0_3, %c0_4, %c0_5, %c0_6] : memref<1x1x16x1024xf32, #tpu.memory_space<vmem>>, vector<1x1x16x1024xf32>
    %3 = vector.shape_cast %2 : vector<1x1x16x1024xf32> to vector<16x1024xf32>
    %cst = arith.constant dense<0.000000e+00> : vector<256x1024xf32>
    %4 = tpu.matmul %1, %3, %cst {dimension_numbers = #tpu.dot_dimension_numbers<[1], [0], [0], [1], [0, 0, 1, 1], [], []>} : vector<256x16xf32>, vector<16x1024xf32>, vector<256x1024xf32> -> vector<256x1024xf32>
    %c0_7 = arith.constant 0 : index
    %c0_8 = arith.constant 0 : index
    %c0_9 = arith.constant 0 : index
    %c0_10 = arith.constant 0 : index
    %5 = vector.load %arg4[%c0_7, %c0_8, %c0_9, %c0_10] : memref<1x1x256x1024xf32, #tpu.memory_space<vmem>>, vector<1x1x256x1024xf32>
    %6 = vector.shape_cast %5 : vector<1x1x256x1024xf32> to vector<256x1024xf32>
    %7 = vector.shape_cast %4 : vector<256x1024xf32> to vector<1x1x256x1024xf32>
    tpu.vector_store %arg4[%c0_7, %c0_8, %c0_9, %c0_10], %7 {strides = array<i32>} : memref<1x1x256x1024xf32, #tpu.memory_space<vmem>>, vector<1x1x256x1024xf32>,
    return
  }
  func.func @transform_0(%arg0: i32, %arg1: i32) -> (i32, i32, i32, i32) {
    %c0_i32 = arith.constant 0 : i32
    %c0_i32_0 = arith.constant 0 : i32
    %c0_i32_1 = arith.constant 0 : i32
    return %arg0, %arg1, %c0_i32, %c0_i32_0 : i32, i32, i32, i32
  }
  func.func @transform_1(%arg0: i32, %arg1: i32) -> (i32, i32, i32, i32) {
    %c0_i32 = arith.constant 0 : i32
    %c0_i32_0 = arith.constant 0 : i32
    %c0_i32_1 = arith.constant 0 : i32
    return %arg0, %arg1, %c0_i32, %c0_i32_0 : i32, i32, i32, i32
  }
  func.func @transform_2(%arg0: i32, %arg1: i32) -> (i32, i32, i32, i32) {
    %c0_i32 = arith.constant 0 : i32
    %c0_i32_0 = arith.constant 0 : i32
    %c0_i32_1 = arith.constant 0 : i32
    return %arg0, %arg1, %c0_i32, %c0_i32_0 : i32, i32, i32, i32
  }
}

</mosaic_0001>

<bundles_post_ra>
// kernel: dpaa_user2d_forward.3
= control target key start
LH: loop header
LB: loop body
LE: loop exit
PB: predicated region body
PF: predicated region fallthrough
CT: control target
= control target key end

     0   :  { %s2000_s9 = smov 0   ;;  %s2002_s10 = smov 0   ;;  %s2815_s0 = inlined_call_operand.vmem [shape: f32[2,4,256,16], index: 0, kind: input, shape index: {}]   ;;  %s2816_s1 = inlined_call_operand.vmem [shape: f32[2,4,16,1024], index: 1, kind: input, shape index: {}]   ;;  %s2817_s2 = inlined_call_operand.vmem [shape: f32[2,4,256,1024], index: 2, kind: output, shape index: {}]  }
   0x1   :  { %s2004_s11 = smov 0   ;;  %s2006_s12 = smov 0  }
   0x2   :  { %s2008_s13 = smov 0  }
   0x3 LB: > { %s21_s14 = sadd.s32 1, %s1974_s11  ;;  %s24_s15 = sadd.s32 1, %s1978_s12  ;;  %s1982_s13 = sphi %s2008_s13, %s12_s13   ;;  %s1978_s12 = sphi %s2006_s12, %s2821_s12   ;;  %s1974_s11 = sphi %s2004_s11, %s2820_s11   ;;  %s1970_s10 = sphi %s2002_s10, %s2819_s10   ;;  %s1966_s9 = sphi %s2000_s9, %s2818_s9  }
   0x4   : > { %p22_p0 = scmp.ge.s32.totalorder %s21_s14, 4  ;;  %p1763_p1 = scmp.ge.s32.totalorder %s1982_s13, 1 }
   0x5   : > { %p148_p2 = scmp.lt.s32.totalorder %s1982_s13, 9 }
   0x6   : > { %s2823_s14 = smov (%p22_p0, %s21_s14), 0  ;;  %s2825_s15 = smov (!%p22_p0, %s24_s15), %s1978_s12 }
   0x7   : > { %p149_p3 = pnand %p1763_p1, %p148_p2  ;;  %p26_p4 = scmp.ge.s32.totalorder %s2825_s15, 2 }
   0x8   : > { %p187_p5 = scmp.lt.s32.totalorder (!%p149_p3), %s1970_s10, 1  ;;  %p189_p6 = scmp.lt.s32.totalorder (!%p149_p3), %s1966_s9, 3 }
   0x9   : > { %s2827_s15 = smov (%p26_p4, %s2825_s15), 0  ;;  %152 = sbr.rel (%p149_p3) target bundleno = 473 (0x1d9), region = 28 }
   0xe   : > { %v1984_v0 = vmov 0.0   ;;  %s2829_s10 = smov (!%p187_p5, %s1970_s10), 1  ;;  %s2831_s9 = smov (!%p189_p6, %s1966_s9), 3  ;;  %vm262_vm0 = vcmask 130048  }
   0xf   : > { %423 = vmatprep.mubr.f32.mxu0 %v1984_v0  ;;  %680 = vmatprep.mubr.f32.mxu1 %v1984_v0  ;;  %s1765_s16 = sshll.u32 %s2829_s10, 7  ;;  %s1768_s17 = sshll.u32 %s2829_s10, 6 }
  0x10   : > { %s1764_s18 = sshll.u32 %s2831_s9, 5  ;;  %s1767_s19 = sshll.u32 %s2831_s9, 4 }
  0x11   : > { %s193_s20 = sadd.s32 %s1765_s16, %s1764_s18  ;;  %s202_s21 = sadd.s32 %s1768_s17, %s1767_s19 }
  0x12   : > { %s1766_s22 = sshll.u32 %s193_s20, 3  ;;  %s1769_s23 = sshll.u32 %s202_s21, 3 }
  0x13   : > { %s2035_s26 = scalar_lea.vmem %s2815_s0, %s1766_s22  ;;  %s2040_s29 = scalar_lea.vmem %s2816_s1, %s1769_s23 }
  0x14   : > { %s1770_s30 = sshll.u32 %s2831_s9, 8  ;;  %s1771_s3 = sshll.u32 %s2829_s10, 10  ;;  %v255_v1 = vld [vmem:[%s2040_s29 + $0x48] sm:$0xff]  ;;  %v257_v2 = vld [vmem:[%s2040_s29 + $0x58] sm:$0xff]  ;;  %v254_v3 = vld [vmem:[%s2040_s29 + $0x40] sm:$0xff] }
  0x15   : > { %s2045_s4 = sadd.s32 %s1771_s3, %s1770_s30  ;;  %387 = vmatprep.subr.mxu0 %v255_v1  ;;  %644 = vmatprep.subr.mxu1 %v257_v2  ;;  %v256_v4 = vld [vmem:[%s2040_s29 + $0x50] sm:$0xff]  ;;  %v247_v5 = vld [vmem:[%s2040_s29 + $0x8] sm:$0xff]  ;;  %v249_v6 = vld [vmem:[%s2040_s29 + $0x18] sm:$0xff] }
  0x16   : > { %388 = vmatpush1.msra.mxu0 %v254_v3  ;;  %645 = vmatpush1.msra.mxu1 %v256_v4  ;;  %v246_v7 = vld [vmem:[%s2040_s29] sm:$0xff]  ;;  %v248_v8 = vld [vmem:[%s2040_s29 + $0x10] sm:$0xff]  ;;  %v259_v10 = vld [vmem:[%s2040_s29 + $0x68] sm:$0xff]  ;;  %s1772_s5 = sshll.u32 %s2045_s4, 3 }
  0x17   : > { %v2053_v9 = vld [vmem:[%s2035_s26] sm:$0xff]  ;;  %389 = vmatprep.subr.mxu0 %v247_v5  ;;  %646 = vmatprep.subr.mxu1 %v249_v6  ;;  %v261_v11 = vld [vmem:[%s2040_s29 + $0x78] sm:$0xff]  ;;  %v260_v13 = vld [vmem:[%s2040_s29 + $0x70] sm:$0xff]  ;;  %s2448_s8 = scalar_lea.vmem %s2817_s2, %s1772_s5 }
  0x18   : > { %390 = vmatpush1.msra.mxu0 %v246_v7  ;;  %647 = vmatpush1.msra.mxu1 %v248_v8  ;;  %v258_v12 = vld [vmem:[%s2040_s29 + $0x60] sm:$0xff]  ;;  %v2064_v14 = vld [vmem:[%s2035_s26 + $0x8] sm:$0xff]  ;;  %v2073_v15 = vld [vmem:[%s2035_s26 + $0x10] sm:$0xff] }
  0x19   : > { %1773 = vmatmul.mubr.msk.f32.vlgmr.msra.gmra.mxu0 %vm262_vm0, %v2053_v9  ;;  %1805 = vmatmul.mubr.msk.f32.vlgmr.msra.gmra.mxu1 %vm262_vm0, %v2053_v9  ;;  %v251_v16 = vld [vmem:[%s2040_s29 + $0x28] sm:$0xff]  ;;  %v253_v17 = vld [vmem:[%s2040_s29 + $0x38] sm:$0xff]  ;;  %v250_v18 = vld [vmem:[%s2040_s29 + $0x20] sm:$0xff] }
  0x1a   : > { %901 = vmatprep.subr.mxu0 %v259_v10  ;;  %1158 = vmatprep.subr.mxu1 %v261_v11  ;;  %v252_v19 = vld [vmem:[%s2040_s29 + $0x30] sm:$0xff]  ;;  %v2088_v20 = vld [vmem:[%s2035_s26 + $0x18] sm:$0xff]  ;;  %v2097_v21 = vld [vmem:[%s2035_s26 + $0x20] sm:$0xff] }
  0x1b   : > { %902 = vmatpush1.msra.mxu0 %v258_v12  ;;  %1159 = vmatpush1.msra.mxu1 %v260_v13  ;;  %v2106_v22 = vld [vmem:[%s2035_s26 + $0x28] sm:$0xff]  ;;  %v2115_v23 = vld [vmem:[%s2035_s26 + $0x30] sm:$0xff]  ;;  %v2124_v24 = vld [vmem:[%s2035_s26 + $0x38] sm:$0xff] }
  0x1c   : > { %429 = vmatprep.mubr.f32.mxu0 %v1984_v0  ;;  %686 = vmatprep.mubr.f32.mxu1 %v1984_v0  ;;  %v2133_v25 = vld [vmem:[%s2035_s26 + $0x40] sm:$0xff]  ;;  %v2142_v26 = vld [vmem:[%s2035_s26 + $0x48] sm:$0xff]  ;;  %v2151_v27 = vld [vmem:[%s2035_s26 + $0x50] sm:$0xff] }
  0x1d   : > { %1774 = vmatmul.mubr.msk.f32.gmra.mxu0 %vm262_vm0, %v2064_v14  ;;  %1806 = vmatmul.mubr.msk.f32.gmra.mxu1 %vm262_vm0, %v2064_v14  ;;  %v2160_v28 = vld [vmem:[%s2035_s26 + $0x58] sm:$0xff]  ;;  %v2169_v29 = vld [vmem:[%s2035_s26 + $0x60] sm:$0xff]  ;;  %v2178_v30 = vld [vmem:[%s2035_s26 + $0x68] sm:$0xff] }
  0x1e   : > { %435 = vmatprep.mubr.f32.mxu0 %v1984_v0  ;;  %692 = vmatprep.mubr.f32.mxu1 %v1984_v0  ;;  %v2187_v31 = vld [vmem:[%s2035_s26 + $0x70] sm:$0xff]  ;;  %v2196_v32 = vld [vmem:[%s2035_s26 + $0x78] sm:$0xff]  ;;  %v2205_v33 = vld [vmem:[%s2035_s26 + $0x80] sm:$0xff] }
  0x1f   : > { %903 = vmatprep.subr.mxu0 %v251_v16  ;;  %1160 = vmatprep.subr.mxu1 %v253_v17  ;;  %v2214_v34 = vld [vmem:[%s2035_s26 + $0x88] sm:$0xff]  ;;  %v2223_v35 = vld [vmem:[%s2035_s26 + $0x90] sm:$0xff]  ;;  %v2232_v36 = vld [vmem:[%s2035_s26 + $0x98] sm:$0xff] }
  0x20   : > { %904 = vmatpush1.msra.mxu0 %v250_v18  ;;  %1161 = vmatpush1.msra.mxu1 %v252_v19  ;;  %v2241_v37 = vld [vmem:[%s2035_s26 + $0xa0] sm:$0xff]  ;;  %v2250_v38 = vld [vmem:[%s2035_s26 + $0xa8] sm:$0xff]  ;;  %v2259_v39 = vld [vmem:[%s2035_s26 + $0xb0] sm:$0xff] }
  0x21   : > { %1775 = vmatmul.mubr.msk.f32.gmra.mxu0 %vm262_vm0, %v2073_v15  ;;  %1807 = vmatmul.mubr.msk.f32.gmra.mxu1 %vm262_vm0, %v2073_v15  ;;  %v2268_v40 = vld [vmem:[%s2035_s26 + $0xb8] sm:$0xff]  ;;  %v2277_v41 = vld [vmem:[%s2035_s26 + $0xc0] sm:$0xff]  ;;  %v2286_v42 = vld [vmem:[%s2035_s26 + $0xc8] sm:$0xff] }
  0x22   : > { %441 = vmatprep.mubr.f32.mxu0 %v1984_v0  ;;  %698 = vmatprep.mubr.f32.mxu1 %v1984_v0  ;;  %v2295_v43 = vld [vmem:[%s2035_s26 + $0xd0] sm:$0xff]  ;;  %v2304_v44 = vld [vmem:[%s2035_s26 + $0xd8] sm:$0xff]  ;;  %v2313_v45 = vld [vmem:[%s2035_s26 + $0xe0] sm:$0xff] }
  0x23   : > { %v2322_v46 = vld [vmem:[%s2035_s26 + $0xe8] sm:$0xff]  ;;  %v2331_v47 = vld [vmem:[%s2035_s26 + $0xf0] sm:$0xff]  ;;  %v2340_v48 = vld [vmem:[%s2035_s26 + $0xf8] sm:$0xff] }
  0x25   : > { %1776 = vmatmul.mubr.msk.f32.gmra.mxu0 %vm262_vm0, %v2088_v20  ;;  %1808 = vmatmul.mubr.msk.f32.gmra.mxu1 %vm262_vm0, %v2088_v20 }
  0x26   : > { %447 = vmatprep.mubr.f32.mxu0 %v1984_v0  ;;  %704 = vmatprep.mubr.f32.mxu1 %v1984_v0 }
  0x29   : > { %1777 = vmatmul.mubr.msk.f32.gmra.mxu0 %vm262_vm0, %v2097_v21  ;;  %1809 = vmatmul.mubr.msk.f32.gmra.mxu1 %vm262_vm0, %v2097_v21 }
  0x2a   : > { %453 = vmatprep.mubr.f32.mxu0 %v1984_v0  ;;  %710 = vmatprep.mubr.f32.mxu1 %v1984_v0 }
  0x2d   : > { %1778 = vmatmul.mubr.msk.f32.gmra.mxu0 %vm262_vm0, %v2106_v22  ;;  %1810 = vmatmul.mubr.msk.f32.gmra.mxu1 %vm262_vm0, %v2106_v22 }
  0x2e   : > { %459 = vmatprep.mubr.f32.mxu0 %v1984_v0  ;;  %716 = vmatprep.mubr.f32.mxu1 %v1984_v0 }
  0x31   : > { %1779 = vmatmul.mubr.msk.f32.gmra.mxu0 %vm262_vm0, %v2115_v23  ;;  %1811 = vmatmul.mubr.msk.f32.gmra.mxu1 %vm262_vm0, %v2115_v23 }
  0x32   : > { %465 = vmatprep.mubr.f32.mxu0 %v1984_v0  ;;  %722 = vmatprep.mubr.f32.mxu1 %v1984_v0 }
  0x35   : > { %1780 = vmatmul.mubr.msk.f32.gmra.mxu0 %vm262_vm0, %v2124_v24  ;;  %1812 = vmatmul.mubr.msk.f32.gmra.mxu1 %vm262_vm0, %v2124_v24 }
  0x36   : > { %471 = vmatprep.mubr.f32.mxu0 %v1984_v0  ;;  %728 = vmatprep.mubr.f32.mxu1 %v1984_v0 }
  0x39   : > { %1781 = vmatmul.mubr.msk.f32.gmra.mxu0 %vm262_vm0, %v2133_v25  ;;  %1813 = vmatmul.mubr.msk.f32.gmra.mxu1 %vm262_vm0, %v2133_v25 }
  0x3a   : > { %477 = vmatprep.mubr.f32.mxu0 %v1984_v0  ;;  %734 = vmatprep.mubr.f32.mxu1 %v1984_v0 }
  0x3d   : > { %1782 = vmatmul.mubr.msk.f32.gmra.mxu0 %vm262_vm0, %v2142_v26  ;;  %1814 = vmatmul.mubr.msk.f32.gmra.mxu1 %vm262_vm0, %v2142_v26 }
  0x3e   : > { %483 = vmatprep.mubr.f32.mxu0 %v1984_v0  ;;  %740 = vmatprep.mubr.f32.mxu1 %v1984_v0 }
  0x41   : > { %1783 = vmatmul.mubr.msk.f32.gmra.mxu0 %vm262_vm0, %v2151_v27  ;;  %1815 = vmatmul.mubr.msk.f32.gmra.mxu1 %vm262_vm0, %v2151_v27 }
  0x42   : > { %489 = vmatprep.mubr.f32.mxu0 %v1984_v0  ;;  %746 = vmatprep.mubr.f32.mxu1 %v1984_v0 }
  0x45   : > { %1784 = vmatmul.mubr.msk.f32.gmra.mxu0 %vm262_vm0, %v2160_v28  ;;  %1816 = vmatmul.mubr.msk.f32.gmra.mxu1 %vm262_vm0, %v2160_v28 }
  0x46   : > { %495 = vmatprep.mubr.f32.mxu0 %v1984_v0  ;;  %752 = vmatprep.mubr.f32.mxu1 %v1984_v0 }
  0x49   : > { %1785 = vmatmul.mubr.msk.f32.gmra.mxu0 %vm262_vm0, %v2169_v29  ;;  %1817 = vmatmul.mubr.msk.f32.gmra.mxu1 %vm262_vm0, %v2169_v29 }
  0x4a   : > { %501 = vmatprep.mubr.f32.mxu0 %v1984_v0  ;;  %758 = vmatprep.mubr.f32.mxu1 %v1984_v0 }
  0x4d   : > { %1786 = vmatmul.mubr.msk.f32.gmra.mxu0 %vm262_vm0, %v2178_v30  ;;  %1818 = vmatmul.mubr.msk.f32.gmra.mxu1 %vm262_vm0, %v2178_v30 }
  0x4e   : > { %507 = vmatprep.mubr.f32.mxu0 %v1984_v0  ;;  %764 = vmatprep.mubr.f32.mxu1 %v1984_v0 }
  0x51   : > { %1787 = vmatmul.mubr.msk.f32.gmra.mxu0 %vm262_vm0, %v2187_v31  ;;  %1819 = vmatmul.mubr.msk.f32.gmra.mxu1 %vm262_vm0, %v2187_v31 }
  0x52   : > { %513 = vmatprep.mubr.f32.mxu0 %v1984_v0  ;;  %770 = vmatprep.mubr.f32.mxu1 %v1984_v0 }
  0x55   : > { %1788 = vmatmul.mubr.msk.f32.gmra.mxu0 %vm262_vm0, %v2196_v32  ;;  %1820 = vmatmul.mubr.msk.f32.gmra.mxu1 %vm262_vm0, %v2196_v32 }
  0x56   : > { %519 = vmatprep.mubr.f32.mxu0 %v1984_v0  ;;  %776 = vmatprep.mubr.f32.mxu1 %v1984_v0 }
  0x59   : > { %1789 = vmatmul.mubr.msk.f32.gmra.mxu0 %vm262_vm0, %v2205_v33  ;;  %1821 = vmatmul.mubr.msk.f32.gmra.mxu1 %vm262_vm0, %v2205_v33 }
  0x5a   : > { %525 = vmatprep.mubr.f32.mxu0 %v1984_v0  ;;  %782 = vmatprep.mubr.f32.mxu1 %v1984_v0 }
  0x5d   : > { %1790 = vmatmul.mubr.msk.f32.gmra.mxu0 %vm262_vm0, %v2214_v34  ;;  %1822 = vmatmul.mubr.msk.f32.gmra.mxu1 %vm262_vm0, %v2214_v34 }
  0x5e   : > { %531 = vmatprep.mubr.f32.mxu0 %v1984_v0  ;;  %788 = vmatprep.mubr.f32.mxu1 %v1984_v0 }
  0x61   : > { %1791 = vmatmul.mubr.msk.f32.gmra.mxu0 %vm262_vm0, %v2223_v35  ;;  %1823 = vmatmul.mubr.msk.f32.gmra.mxu1 %vm262_vm0, %v2223_v35 }
  0x62   : > { %537 = vmatprep.mubr.f32.mxu0 %v1984_v0  ;;  %794 = vmatprep.mubr.f32.mxu1 %v1984_v0 }
  0x65   : > { %1792 = vmatmul.mubr.msk.f32.gmra.mxu0 %vm262_vm0, %v2232_v36  ;;  %1824 = vmatmul.mubr.msk.f32.gmra.mxu1 %vm262_vm0, %v2232_v36 }
  0x66   : > { %543 = vmatprep.mubr.f32.mxu0 %v1984_v0  ;;  %800 = vmatprep.mubr.f32.mxu1 %v1984_v0 }
  0x69   : > { %1793 = vmatmul.mubr.msk.f32.gmra.mxu0 %vm262_vm0, %v2241_v37  ;;  %1825 = vmatmul.mubr.msk.f32.gmra.mxu1 %vm262_vm0, %v2241_v37 }
  0x6a   : > { %549 = vmatprep.mubr.f32.mxu0 %v1984_v0  ;;  %806 = vmatprep.mubr.f32.mxu1 %v1984_v0 }
  0x6d   : > { %1794 = vmatmul.mubr.msk.f32.gmra.mxu0 %vm262_vm0, %v2250_v38  ;;  %1826 = vmatmul.mubr.msk.f32.gmra.mxu1 %vm262_vm0, %v2250_v38 }
  0x6e   : > { %555 = vmatprep.mubr.f32.mxu0 %v1984_v0  ;;  %812 = vmatprep.mubr.f32.mxu1 %v1984_v0 }
  0x71   : > { %1795 = vmatmul.mubr.msk.f32.gmra.mxu0 %vm262_vm0, %v2259_v39  ;;  %1827 = vmatmul.mubr.msk.f32.gmra.mxu1 %vm262_vm0, %v2259_v39 }
  0x72   : > { %561 = vmatprep.mubr.f32.mxu0 %v1984_v0  ;;  %818 = vmatprep.mubr.f32.mxu1 %v1984_v0 }
  0x75   : > { %1796 = vmatmul.mubr.msk.f32.gmra.mxu0 %vm262_vm0, %v2268_v40  ;;  %1828 = vmatmul.mubr.msk.f32.gmra.mxu1 %vm262_vm0, %v2268_v40 }
  0x76   : > { %567 = vmatprep.mubr.f32.mxu0 %v1984_v0  ;;  %824 = vmatprep.mubr.f32.mxu1 %v1984_v0 }
  0x79   : > { %1797 = vmatmul.mubr.msk.f32.gmra.mxu0 %vm262_vm0, %v2277_v41  ;;  %1829 = vmatmul.mubr.msk.f32.gmra.mxu1 %vm262_vm0, %v2277_v41 }
  0x7a   : > { %573 = vmatprep.mubr.f32.mxu0 %v1984_v0  ;;  %830 = vmatprep.mubr.f32.mxu1 %v1984_v0 }
  0x7d   : > { %1798 = vmatmul.mubr.msk.f32.gmra.mxu0 %vm262_vm0, %v2286_v42  ;;  %1830 = vmatmul.mubr.msk.f32.gmra.mxu1 %vm262_vm0, %v2286_v42 }
  0x7e   : > { %579 = vmatprep.mubr.f32.mxu0 %v1984_v0  ;;  %836 = vmatprep.mubr.f32.mxu1 %v1984_v0 }
  0x81   : > { %1799 = vmatmul.mubr.msk.f32.gmra.mxu0 %vm262_vm0, %v2295_v43  ;;  %1831 = vmatmul.mubr.msk.f32.gmra.mxu1 %vm262_vm0, %v2295_v43 }
  0x82   : > { %585 = vmatprep.mubr.f32.mxu0 %v1984_v0  ;;  %842 = vmatprep.mubr.f32.mxu1 %v1984_v0 }
  0x85   : > { %1800 = vmatmul.mubr.msk.f32.gmra.mxu0 %vm262_vm0, %v2304_v44  ;;  %1832 = vmatmul.mubr.msk.f32.gmra.mxu1 %vm262_vm0, %v2304_v44 }
  0x86   : > { %591 = vmatprep.mubr.f32.mxu0 %v1984_v0  ;;  %848 = vmatprep.mubr.f32.mxu1 %v1984_v0 }
  0x89   : > { %1801 = vmatmul.mubr.msk.f32.gmra.mxu0 %vm262_vm0, %v2313_v45  ;;  %1833 = vmatmul.mubr.msk.f32.gmra.mxu1 %vm262_vm0, %v2313_v45 }
  0x8a   : > { %597 = vmatprep.mubr.f32.mxu0 %v1984_v0  ;;  %854 = vmatprep.mubr.f32.mxu1 %v1984_v0 }
  0x8d   : > { %1802 = vmatmul.mubr.msk.f32.gmra.mxu0 %vm262_vm0, %v2322_v46  ;;  %1834 = vmatmul.mubr.msk.f32.gmra.mxu1 %vm262_vm0, %v2322_v46 }
  0x8e   : > { %603 = vmatprep.mubr.f32.mxu0 %v1984_v0  ;;  %860 = vmatprep.mubr.f32.mxu1 %v1984_v0 }
  0x91   : > { %1803 = vmatmul.mubr.msk.f32.gmra.mxu0 %vm262_vm0, %v2331_v47  ;;  %1835 = vmatmul.mubr.msk.f32.gmra.mxu1 %vm262_vm0, %v2331_v47 }
  0x92   : > { %609 = vmatprep.mubr.f32.mxu0 %v1984_v0  ;;  %866 = vmatprep.mubr.f32.mxu1 %v1984_v0 }
  0x95   : > { %1804 = vmatmul.mubr.msk.f32.gmra.mxu0 %vm262_vm0, %v2340_v48  ;;  %1836 = vmatmul.mubr.msk.f32.gmra.mxu1 %vm262_vm0, %v2340_v48 }
  0x96   : > { %937 = vmatprep.mubr.f32.mxu0 %v1984_v0  ;;  %1194 = vmatprep.mubr.f32.mxu1 %v1984_v0 }
  0x99   : > { %1837 = vmatmul.mubr.msk.f32.vlgmr.msra.gmra.mxu0 %vm262_vm0, %v2053_v9  ;;  %1869 = vmatmul.mubr.msk.f32.vlgmr.msra.gmra.mxu1 %vm262_vm0, %v2053_v9 }
  0x9a   : > { %943 = vmatprep.mubr.f32.mxu0 %v1984_v0  ;;  %1200 = vmatprep.mubr.f32.mxu1 %v1984_v0 }
  0x9d   : > { %1838 = vmatmul.mubr.msk.f32.gmra.mxu0 %vm262_vm0, %v2064_v14  ;;  %1870 = vmatmul.mubr.msk.f32.gmra.mxu1 %vm262_vm0, %v2064_v14 }
  0x9e   : > { %949 = vmatprep.mubr.f32.mxu0 %v1984_v0  ;;  %1206 = vmatprep.mubr.f32.mxu1 %v1984_v0 }
  0xa1   : > { %1839 = vmatmul.mubr.msk.f32.gmra.mxu0 %vm262_vm0, %v2073_v15  ;;  %1871 = vmatmul.mubr.msk.f32.gmra.mxu1 %vm262_vm0, %v2073_v15 }
  0xa2   : > { %955 = vmatprep.mubr.f32.mxu0 %v1984_v0  ;;  %1212 = vmatprep.mubr.f32.mxu1 %v1984_v0 }
  0xa5   : > { %1840 = vmatmul.mubr.msk.f32.gmra.mxu0 %vm262_vm0, %v2088_v20  ;;  %1872 = vmatmul.mubr.msk.f32.gmra.mxu1 %vm262_vm0, %v2088_v20 }
  0xa6   : > { %961 = vmatprep.mubr.f32.mxu0 %v1984_v0  ;;  %1218 = vmatprep.mubr.f32.mxu1 %v1984_v0 }
  0xa9   : > { %1841 = vmatmul.mubr.msk.f32.gmra.mxu0 %vm262_vm0, %v2097_v21  ;;  %1873 = vmatmul.mubr.msk.f32.gmra.mxu1 %vm262_vm0, %v2097_v21 }
  0xaa   : > { %967 = vmatprep.mubr.f32.mxu0 %v1984_v0  ;;  %1224 = vmatprep.mubr.f32.mxu1 %v1984_v0 }
  0xad   : > { %1842 = vmatmul.mubr.msk.f32.gmra.mxu0 %vm262_vm0, %v2106_v22  ;;  %1874 = vmatmul.mubr.msk.f32.gmra.mxu1 %vm262_vm0, %v2106_v22 }
  0xae   : > { %973 = vmatprep.mubr.f32.mxu0 %v1984_v0  ;;  %1230 = vmatprep.mubr.f32.mxu1 %v1984_v0 }
  0xb1   : > { %1843 = vmatmul.mubr.msk.f32.gmra.mxu0 %vm262_vm0, %v2115_v23  ;;  %1875 = vmatmul.mubr.msk.f32.gmra.mxu1 %vm262_vm0, %v2115_v23 }
  0xb2   : > { %979 = vmatprep.mubr.f32.mxu0 %v1984_v0  ;;  %1236 = vmatprep.mubr.f32.mxu1 %v1984_v0 }
  0xb5   : > { %1844 = vmatmul.mubr.msk.f32.gmra.mxu0 %vm262_vm0, %v2124_v24  ;;  %1876 = vmatmul.mubr.msk.f32.gmra.mxu1 %vm262_vm0, %v2124_v24 }
  0xb6   : > { %985 = vmatprep.mubr.f32.mxu0 %v1984_v0  ;;  %1242 = vmatprep.mubr.f32.mxu1 %v1984_v0 }
  0xb9   : > { %1845 = vmatmul.mubr.msk.f32.gmra.mxu0 %vm262_vm0, %v2133_v25  ;;  %1877 = vmatmul.mubr.msk.f32.gmra.mxu1 %vm262_vm0, %v2133_v25 }
  0xba   : > { %991 = vmatprep.mubr.f32.mxu0 %v1984_v0  ;;  %1248 = vmatprep.mubr.f32.mxu1 %v1984_v0 }
  0xbd   : > { %1846 = vmatmul.mubr.msk.f32.gmra.mxu0 %vm262_vm0, %v2142_v26  ;;  %1878 = vmatmul.mubr.msk.f32.gmra.mxu1 %vm262_vm0, %v2142_v26 }
  0xbe   : > { %997 = vmatprep.mubr.f32.mxu0 %v1984_v0  ;;  %1254 = vmatprep.mubr.f32.mxu1 %v1984_v0 }
  0xc1   : > { %1847 = vmatmul.mubr.msk.f32.gmra.mxu0 %vm262_vm0, %v2151_v27  ;;  %1879 = vmatmul.mubr.msk.f32.gmra.mxu1 %vm262_vm0, %v2151_v27 }
  0xc2   : > { %1003 = vmatprep.mubr.f32.mxu0 %v1984_v0  ;;  %1260 = vmatprep.mubr.f32.mxu1 %v1984_v0 }
  0xc5   : > { %1848 = vmatmul.mubr.msk.f32.gmra.mxu0 %vm262_vm0, %v2160_v28  ;;  %1880 = vmatmul.mubr.msk.f32.gmra.mxu1 %vm262_vm0, %v2160_v28 }
  0xc6   : > { %1009 = vmatprep.mubr.f32.mxu0 %v1984_v0  ;;  %1266 = vmatprep.mubr.f32.mxu1 %v1984_v0 }
  0xc9   : > { %1849 = vmatmul.mubr.msk.f32.gmra.mxu0 %vm262_vm0, %v2169_v29  ;;  %1881 = vmatmul.mubr.msk.f32.gmra.mxu1 %vm262_vm0, %v2169_v29 }
  0xca   : > { %1015 = vmatprep.mubr.f32.mxu0 %v1984_v0  ;;  %1272 = vmatprep.mubr.f32.mxu1 %v1984_v0 }
  0xcd   : > { %1850 = vmatmul.mubr.msk.f32.gmra.mxu0 %vm262_vm0, %v2178_v30  ;;  %1882 = vmatmul.mubr.msk.f32.gmra.mxu1 %vm262_vm0, %v2178_v30 }
  0xce   : > { %1021 = vmatprep.mubr.f32.mxu0 %v1984_v0  ;;  %1278 = vmatprep.mubr.f32.mxu1 %v1984_v0 }
  0xd1   : > { %1851 = vmatmul.mubr.msk.f32.gmra.mxu0 %vm262_vm0, %v2187_v31  ;;  %1883 = vmatmul.mubr.msk.f32.gmra.mxu1 %vm262_vm0, %v2187_v31 }
  0xd2   : > { %1027 = vmatprep.mubr.f32.mxu0 %v1984_v0  ;;  %1284 = vmatprep.mubr.f32.mxu1 %v1984_v0 }
  0xd5   : > { %1852 = vmatmul.mubr.msk.f32.gmra.mxu0 %vm262_vm0, %v2196_v32  ;;  %1884 = vmatmul.mubr.msk.f32.gmra.mxu1 %vm262_vm0, %v2196_v32 }
  0xd6   : > { %1033 = vmatprep.mubr.f32.mxu0 %v1984_v0  ;;  %1290 = vmatprep.mubr.f32.mxu1 %v1984_v0 }
  0xd9   : > { %v425_v49 = vpop.f32.mrf.mxu0  ;;  %v682_v50 = vpop.f32.mrf.mxu1  ;;  %1853 = vmatmul.mubr.msk.f32.gmra.mxu0 %vm262_vm0, %v2205_v33  ;;  %1885 = vmatmul.mubr.msk.f32.gmra.mxu1 %vm262_vm0, %v2205_v33 }
  0xda   : > { %1387 = vst [vmem:[%s2448_s8] sm:$0xff] %v425_v49  ;;  %1389 = vst [vmem:[%s2448_s8 + $0x10] sm:$0xff] %v682_v50  ;;  %1039 = vmatprep.mubr.f32.mxu0 %v1984_v0  ;;  %1296 = vmatprep.mubr.f32.mxu1 %v1984_v0 }
  0xdb   : > { %v427_v51 = vpop.f32.mrf.mxu0  ;;  %v684_v52 = vpop.f32.mrf.mxu1 }
  0xdc   : > { %1388 = vst [vmem:[%s2448_s8 + $0x8] sm:$0xff] %v427_v51  ;;  %1390 = vst [vmem:[%s2448_s8 + $0x18] sm:$0xff] %v684_v52 }
  0xdd   : > { %v431_v53 = vpop.f32.mrf.mxu0  ;;  %v688_v54 = vpop.f32.mrf.mxu1  ;;  %1854 = vmatmul.mubr.msk.f32.gmra.mxu0 %vm262_vm0, %v2214_v34  ;;  %1886 = vmatmul.mubr.msk.f32.gmra.mxu1 %vm262_vm0, %v2214_v34 }
  0xde   : > { %1395 = vst [vmem:[%s2448_s8 + $0x40] sm:$0xff] %v431_v53  ;;  %1397 = vst [vmem:[%s2448_s8 + $0x50] sm:$0xff] %v688_v54  ;;  %1045 = vmatprep.mubr.f32.mxu0 %v1984_v0  ;;  %1302 = vmatprep.mubr.f32.mxu1 %v1984_v0 }
  0xdf   : > { %v433_v55 = vpop.f32.mrf.mxu0  ;;  %v690_v56 = vpop.f32.mrf.mxu1 }
  0xe0   : > { %1396 = vst [vmem:[%s2448_s8 + $0x48] sm:$0xff] %v433_v55  ;;  %1398 = vst [vmem:[%s2448_s8 + $0x58] sm:$0xff] %v690_v56 }
  0xe1   : > { %v437_v57 = vpop.f32.mrf.mxu0  ;;  %v694_v58 = vpop.f32.mrf.mxu1  ;;  %1855 = vmatmul.mubr.msk.f32.gmra.mxu0 %vm262_vm0, %v2223_v35  ;;  %1887 = vmatmul.mubr.msk.f32.gmra.mxu1 %vm262_vm0, %v2223_v35 }
  0xe2   : > { %1403 = vst [vmem:[%s2448_s8 + $0x80] sm:$0xff] %v437_v57  ;;  %1405 = vst [vmem:[%s2448_s8 + $0x90] sm:$0xff] %v694_v58  ;;  %1051 = vmatprep.mubr.f32.mxu0 %v1984_v0  ;;  %1308 = vmatprep.mubr.f32.mxu1 %v1984_v0 }
  0xe3   : > { %v439_v59 = vpop.f32.mrf.mxu0  ;;  %v696_v60 = vpop.f32.mrf.mxu1 }
  0xe4   : > { %1404 = vst [vmem:[%s2448_s8 + $0x88] sm:$0xff] %v439_v59  ;;  %1406 = vst [vmem:[%s2448_s8 + $0x98] sm:$0xff] %v696_v60 }
  0xe5   : > { %v443_v61 = vpop.f32.mrf.mxu0  ;;  %v700_v62 = vpop.f32.mrf.mxu1  ;;  %1856 = vmatmul.mubr.msk.f32.gmra.mxu0 %vm262_vm0, %v2232_v36  ;;  %1888 = vmatmul.mubr.msk.f32.gmra.mxu1 %vm262_vm0, %v2232_v36 }
  0xe6   : > { %1411 = vst [vmem:[%s2448_s8 + $0xc0] sm:$0xff] %v443_v61  ;;  %1413 = vst [vmem:[%s2448_s8 + $0xd0] sm:$0xff] %v700_v62  ;;  %1057 = vmatprep.mubr.f32.mxu0 %v1984_v0  ;;  %1314 = vmatprep.mubr.f32.mxu1 %v1984_v0 }
  0xe7   : > { %v445_v63 = vpop.f32.mrf.mxu0  ;;  %v702_v1 = vpop.f32.mrf.mxu1 }
  0xe8   : > { %1412 = vst [vmem:[%s2448_s8 + $0xc8] sm:$0xff] %v445_v63  ;;  %1414 = vst [vmem:[%s2448_s8 + $0xd8] sm:$0xff] %v702_v1 }
  0xe9   : > { %v449_v2 = vpop.f32.mrf.mxu0  ;;  %v706_v3 = vpop.f32.mrf.mxu1  ;;  %1857 = vmatmul.mubr.msk.f32.gmra.mxu0 %vm262_vm0, %v2241_v37  ;;  %1889 = vmatmul.mubr.msk.f32.gmra.mxu1 %vm262_vm0, %v2241_v37 }
  0xea   : > { %1419 = vst [vmem:[%s2448_s8 + $0x100] sm:$0xff] %v449_v2  ;;  %1421 = vst [vmem:[%s2448_s8 + $0x110] sm:$0xff] %v706_v3  ;;  %1063 = vmatprep.mubr.f32.mxu0 %v1984_v0  ;;  %1320 = vmatprep.mubr.f32.mxu1 %v1984_v0 }
  0xeb   : > { %v451_v4 = vpop.f32.mrf.mxu0  ;;  %v708_v5 = vpop.f32.mrf.mxu1 }
  0xec   : > { %1420 = vst [vmem:[%s2448_s8 + $0x108] sm:$0xff] %v451_v4  ;;  %1422 = vst [vmem:[%s2448_s8 + $0x118] sm:$0xff] %v708_v5 }
  0xed   : > { %v455_v6 = vpop.f32.mrf.mxu0  ;;  %v712_v7 = vpop.f32.mrf.mxu1  ;;  %1858 = vmatmul.mubr.msk.f32.gmra.mxu0 %vm262_vm0, %v2250_v38  ;;  %1890 = vmatmul.mubr.msk.f32.gmra.mxu1 %vm262_vm0, %v2250_v38 }
  0xee   : > { %1427 = vst [vmem:[%s2448_s8 + $0x140] sm:$0xff] %v455_v6  ;;  %1429 = vst [vmem:[%s2448_s8 + $0x150] sm:$0xff] %v712_v7  ;;  %1069 = vmatprep.mubr.f32.mxu0 %v1984_v0  ;;  %1326 = vmatprep.mubr.f32.mxu1 %v1984_v0 }
  0xef   : > { %v457_v8 = vpop.f32.mrf.mxu0  ;;  %v714_v9 = vpop.f32.mrf.mxu1 }
  0xf0   : > { %1428 = vst [vmem:[%s2448_s8 + $0x148] sm:$0xff] %v457_v8  ;;  %1430 = vst [vmem:[%s2448_s8 + $0x158] sm:$0xff] %v714_v9 }
  0xf1   : > { %v461_v10 = vpop.f32.mrf.mxu0  ;;  %v718_v11 = vpop.f32.mrf.mxu1  ;;  %1859 = vmatmul.mubr.msk.f32.gmra.mxu0 %vm262_vm0, %v2259_v39  ;;  %1891 = vmatmul.mubr.msk.f32.gmra.mxu1 %vm262_vm0, %v2259_v39 }
  0xf2   : > { %1435 = vst [vmem:[%s2448_s8 + $0x180] sm:$0xff] %v461_v10  ;;  %1437 = vst [vmem:[%s2448_s8 + $0x190] sm:$0xff] %v718_v11  ;;  %1075 = vmatprep.mubr.f32.mxu0 %v1984_v0  ;;  %1332 = vmatprep.mubr.f32.mxu1 %v1984_v0 }
  0xf3   : > { %v463_v12 = vpop.f32.mrf.mxu0  ;;  %v720_v13 = vpop.f32.mrf.mxu1 }
  0xf4   : > { %1436 = vst [vmem:[%s2448_s8 + $0x188] sm:$0xff] %v463_v12  ;;  %1438 = vst [vmem:[%s2448_s8 + $0x198] sm:$0xff] %v720_v13 }
  0xf5   : > { %v467_v14 = vpop.f32.mrf.mxu0  ;;  %v724_v15 = vpop.f32.mrf.mxu1  ;;  %1860 = vmatmul.mubr.msk.f32.gmra.mxu0 %vm262_vm0, %v2268_v40  ;;  %1892 = vmatmul.mubr.msk.f32.gmra.mxu1 %vm262_vm0, %v2268_v40 }
  0xf6   : > { %1443 = vst [vmem:[%s2448_s8 + $0x1c0] sm:$0xff] %v467_v14  ;;  %1445 = vst [vmem:[%s2448_s8 + $0x1d0] sm:$0xff] %v724_v15  ;;  %1081 = vmatprep.mubr.f32.mxu0 %v1984_v0  ;;  %1338 = vmatprep.mubr.f32.mxu1 %v1984_v0 }
  0xf7   : > { %v469_v16 = vpop.f32.mrf.mxu0  ;;  %v726_v17 = vpop.f32.mrf.mxu1 }
  0xf8   : > { %1444 = vst [vmem:[%s2448_s8 + $0x1c8] sm:$0xff] %v469_v16  ;;  %1446 = vst [vmem:[%s2448_s8 + $0x1d8] sm:$0xff] %v726_v17 }
  0xf9   : > { %v473_v18 = vpop.f32.mrf.mxu0  ;;  %v730_v19 = vpop.f32.mrf.mxu1  ;;  %1861 = vmatmul.mubr.msk.f32.gmra.mxu0 %vm262_vm0, %v2277_v41  ;;  %1893 = vmatmul.mubr.msk.f32.gmra.mxu1 %vm262_vm0, %v2277_v41 }
  0xfa   : > { %1451 = vst [vmem:[%s2448_s8 + $0x200] sm:$0xff] %v473_v18  ;;  %1453 = vst [vmem:[%s2448_s8 + $0x210] sm:$0xff] %v730_v19  ;;  %1087 = vmatprep.mubr.f32.mxu0 %v1984_v0  ;;  %1344 = vmatprep.mubr.f32.mxu1 %v1984_v0 }
  0xfb   : > { %v475_v20 = vpop.f32.mrf.mxu0  ;;  %v732_v21 = vpop.f32.mrf.mxu1 }
  0xfc   : > { %1452 = vst [vmem:[%s2448_s8 + $0x208] sm:$0xff] %v475_v20  ;;  %1454 = vst [vmem:[%s2448_s8 + $0x218] sm:$0xff] %v732_v21 }
  0xfd   : > { %v479_v22 = vpop.f32.mrf.mxu0  ;;  %v736_v23 = vpop.f32.mrf.mxu1  ;;  %1862 = vmatmul.mubr.msk.f32.gmra.mxu0 %vm262_vm0, %v2286_v42  ;;  %1894 = vmatmul.mubr.msk.f32.gmra.mxu1 %vm262_vm0, %v2286_v42 }
  0xfe   : > { %1459 = vst [vmem:[%s2448_s8 + $0x240] sm:$0xff] %v479_v22  ;;  %1461 = vst [vmem:[%s2448_s8 + $0x250] sm:$0xff] %v736_v23  ;;  %1093 = vmatprep.mubr.f32.mxu0 %v1984_v0  ;;  %1350 = vmatprep.mubr.f32.mxu1 %v1984_v0 }
  0xff   : > { %v481_v24 = vpop.f32.mrf.mxu0  ;;  %v738_v25 = vpop.f32.mrf.mxu1 }
 0x100   : > { %1460 = vst [vmem:[%s2448_s8 + $0x248] sm:$0xff] %v481_v24  ;;  %1462 = vst [vmem:[%s2448_s8 + $0x258] sm:$0xff] %v738_v25 }
 0x101   : > { %v485_v26 = vpop.f32.mrf.mxu0  ;;  %v742_v27 = vpop.f32.mrf.mxu1  ;;  %1863 = vmatmul.mubr.msk.f32.gmra.mxu0 %vm262_vm0, %v2295_v43  ;;  %1895 = vmatmul.mubr.msk.f32.gmra.mxu1 %vm262_vm0, %v2295_v43 }
 0x102   : > { %1467 = vst [vmem:[%s2448_s8 + $0x280] sm:$0xff] %v485_v26  ;;  %1469 = vst [vmem:[%s2448_s8 + $0x290] sm:$0xff] %v742_v27  ;;  %1099 = vmatprep.mubr.f32.mxu0 %v1984_v0  ;;  %1356 = vmatprep.mubr.f32.mxu1 %v1984_v0 }
 0x103   : > { %v487_v28 = vpop.f32.mrf.mxu0  ;;  %v744_v29 = vpop.f32.mrf.mxu1 }
 0x104   : > { %1468 = vst [vmem:[%s2448_s8 + $0x288] sm:$0xff] %v487_v28  ;;  %1470 = vst [vmem:[%s2448_s8 + $0x298] sm:$0xff] %v744_v29 }
 0x105   : > { %v491_v30 = vpop.f32.mrf.mxu0  ;;  %v748_v31 = vpop.f32.mrf.mxu1  ;;  %1864 = vmatmul.mubr.msk.f32.gmra.mxu0 %vm262_vm0, %v2304_v44  ;;  %1896 = vmatmul.mubr.msk.f32.gmra.mxu1 %vm262_vm0, %v2304_v44 }
 0x106   : > { %1475 = vst [vmem:[%s2448_s8 + $0x2c0] sm:$0xff] %v491_v30  ;;  %1477 = vst [vmem:[%s2448_s8 + $0x2d0] sm:$0xff] %v748_v31  ;;  %1105 = vmatprep.mubr.f32.mxu0 %v1984_v0  ;;  %1362 = vmatprep.mubr.f32.mxu1 %v1984_v0 }
 0x107   : > { %v493_v32 = vpop.f32.mrf.mxu0  ;;  %v750_v33 = vpop.f32.mrf.mxu1 }
 0x108   : > { %1476 = vst [vmem:[%s2448_s8 + $0x2c8] sm:$0xff] %v493_v32  ;;  %1478 = vst [vmem:[%s2448_s8 + $0x2d8] sm:$0xff] %v750_v33 }
 0x109   : > { %v497_v34 = vpop.f32.mrf.mxu0  ;;  %v754_v35 = vpop.f32.mrf.mxu1  ;;  %1865 = vmatmul.mubr.msk.f32.gmra.mxu0 %vm262_vm0, %v2313_v45  ;;  %1897 = vmatmul.mubr.msk.f32.gmra.mxu1 %vm262_vm0, %v2313_v45 }
 0x10a   : > { %1483 = vst [vmem:[%s2448_s8 + $0x300] sm:$0xff] %v497_v34  ;;  %1485 = vst [vmem:[%s2448_s8 + $0x310] sm:$0xff] %v754_v35  ;;  %1111 = vmatprep.mubr.f32.mxu0 %v1984_v0  ;;  %1368 = vmatprep.mubr.f32.mxu1 %v1984_v0 }
 0x10b   : > { %v499_v36 = vpop.f32.mrf.mxu0  ;;  %v756_v37 = vpop.f32.mrf.mxu1 }
 0x10c   : > { %1484 = vst [vmem:[%s2448_s8 + $0x308] sm:$0xff] %v499_v36  ;;  %1486 = vst [vmem:[%s2448_s8 + $0x318] sm:$0xff] %v756_v37 }
 0x10d   : > { %v503_v38 = vpop.f32.mrf.mxu0  ;;  %v760_v39 = vpop.f32.mrf.mxu1  ;;  %1866 = vmatmul.mubr.msk.f32.gmra.mxu0 %vm262_vm0, %v2322_v46  ;;  %1898 = vmatmul.mubr.msk.f32.gmra.mxu1 %vm262_vm0, %v2322_v46 }
 0x10e   : > { %1491 = vst [vmem:[%s2448_s8 + $0x340] sm:$0xff] %v503_v38  ;;  %1493 = vst [vmem:[%s2448_s8 + $0x350] sm:$0xff] %v760_v39  ;;  %1117 = vmatprep.mubr.f32.mxu0 %v1984_v0  ;;  %1374 = vmatprep.mubr.f32.mxu1 %v1984_v0 }
 0x10f   : > { %v505_v40 = vpop.f32.mrf.mxu0  ;;  %v762_v41 = vpop.f32.mrf.mxu1 }
 0x110   : > { %1492 = vst [vmem:[%s2448_s8 + $0x348] sm:$0xff] %v505_v40  ;;  %1494 = vst [vmem:[%s2448_s8 + $0x358] sm:$0xff] %v762_v41 }
 0x111   : > { %v509_v42 = vpop.f32.mrf.mxu0  ;;  %v766_v43 = vpop.f32.mrf.mxu1  ;;  %1867 = vmatmul.mubr.msk.f32.gmra.mxu0 %vm262_vm0, %v2331_v47  ;;  %1899 = vmatmul.mubr.msk.f32.gmra.mxu1 %vm262_vm0, %v2331_v47 }
 0x112   : > { %1499 = vst [vmem:[%s2448_s8 + $0x380] sm:$0xff] %v509_v42  ;;  %1501 = vst [vmem:[%s2448_s8 + $0x390] sm:$0xff] %v766_v43  ;;  %1123 = vmatprep.mubr.f32.mxu0 %v1984_v0  ;;  %1380 = vmatprep.mubr.f32.mxu1 %v1984_v0 }
 0x113   : > { %v511_v44 = vpop.f32.mrf.mxu0  ;;  %v768_v45 = vpop.f32.mrf.mxu1 }
 0x114   : > { %1500 = vst [vmem:[%s2448_s8 + $0x388] sm:$0xff] %v511_v44  ;;  %1502 = vst [vmem:[%s2448_s8 + $0x398] sm:$0xff] %v768_v45 }
 0x115   : > { %v515_v46 = vpop.f32.mrf.mxu0  ;;  %v772_v49 = vpop.f32.mrf.mxu1  ;;  %1868 = vmatmul.mubr.msk.f32.gmra.mxu0 %vm262_vm0, %v2340_v48  ;;  %1900 = vmatmul.mubr.msk.f32.gmra.mxu1 %vm262_vm0, %v2340_v48 }
 0x116   : > { %1507 = vst [vmem:[%s2448_s8 + $0x3c0] sm:$0xff] %v515_v46  ;;  %1509 = vst [vmem:[%s2448_s8 + $0x3d0] sm:$0xff] %v772_v49 }
 0x117   : > { %v517_v0 = vpop.f32.mrf.mxu0  ;;  %v774_v47 = vpop.f32.mrf.mxu1 }
 0x118   : > { %1508 = vst [vmem:[%s2448_s8 + $0x3c8] sm:$0xff] %v517_v0  ;;  %1510 = vst [vmem:[%s2448_s8 + $0x3d8] sm:$0xff] %v774_v47 }
 0x119   : > { %v521_v50 = vpop.f32.mrf.mxu0  ;;  %v778_v51 = vpop.f32.mrf.mxu1 }
 0x11a   : > { %1515 = vst [vmem:[%s2448_s8 + $0x400] sm:$0xff] %v521_v50  ;;  %1517 = vst [vmem:[%s2448_s8 + $0x410] sm:$0xff] %v778_v51 }
 0x11b   : > { %v523_v52 = vpop.f32.mrf.mxu0  ;;  %v780_v53 = vpop.f32.mrf.mxu1 }
 0x11c   : > { %1516 = vst [vmem:[%s2448_s8 + $0x408] sm:$0xff] %v523_v52  ;;  %1518 = vst [vmem:[%s2448_s8 + $0x418] sm:$0xff] %v780_v53 }
 0x11d   : > { %v527_v48 = vpop.f32.mrf.mxu0  ;;  %v784_v54 = vpop.f32.mrf.mxu1 }
 0x11e   : > { %1523 = vst [vmem:[%s2448_s8 + $0x440] sm:$0xff] %v527_v48  ;;  %1525 = vst [vmem:[%s2448_s8 + $0x450] sm:$0xff] %v784_v54 }
 0x11f   : > { %v529_v55 = vpop.f32.mrf.mxu0  ;;  %v786_v56 = vpop.f32.mrf.mxu1 }
 0x120   : > { %1524 = vst [vmem:[%s2448_s8 + $0x448] sm:$0xff] %v529_v55  ;;  %1526 = vst [vmem:[%s2448_s8 + $0x458] sm:$0xff] %v786_v56 }
 0x121   : > { %v533_v57 = vpop.f32.mrf.mxu0  ;;  %v790_v58 = vpop.f32.mrf.mxu1 }
 0x122   : > { %1531 = vst [vmem:[%s2448_s8 + $0x480] sm:$0xff] %v533_v57  ;;  %1533 = vst [vmem:[%s2448_s8 + $0x490] sm:$0xff] %v790_v58 }
 0x123   : > { %v535_v59 = vpop.f32.mrf.mxu0  ;;  %v792_v60 = vpop.f32.mrf.mxu1 }
 0x124   : > { %1532 = vst [vmem:[%s2448_s8 + $0x488] sm:$0xff] %v535_v59  ;;  %1534 = vst [vmem:[%s2448_s8 + $0x498] sm:$0xff] %v792_v60 }
 0x125   : > { %v539_v61 = vpop.f32.mrf.mxu0  ;;  %v796_v62 = vpop.f32.mrf.mxu1 }
 0x126   : > { %1539 = vst [vmem:[%s2448_s8 + $0x4c0] sm:$0xff] %v539_v61  ;;  %1541 = vst [vmem:[%s2448_s8 + $0x4d0] sm:$0xff] %v796_v62 }
 0x127   : > { %v541_v63 = vpop.f32.mrf.mxu0  ;;  %v798_v1 = vpop.f32.mrf.mxu1 }
 0x128   : > { %1540 = vst [vmem:[%s2448_s8 + $0x4c8] sm:$0xff] %v541_v63  ;;  %1542 = vst [vmem:[%s2448_s8 + $0x4d8] sm:$0xff] %v798_v1 }
 0x129   : > { %v545_v2 = vpop.f32.mrf.mxu0  ;;  %v802_v3 = vpop.f32.mrf.mxu1 }
 0x12a   : > { %1547 = vst [vmem:[%s2448_s8 + $0x500] sm:$0xff] %v545_v2  ;;  %1549 = vst [vmem:[%s2448_s8 + $0x510] sm:$0xff] %v802_v3 }
 0x12b   : > { %v547_v4 = vpop.f32.mrf.mxu0  ;;  %v804_v5 = vpop.f32.mrf.mxu1 }
 0x12c   : > { %1548 = vst [vmem:[%s2448_s8 + $0x508] sm:$0xff] %v547_v4  ;;  %1550 = vst [vmem:[%s2448_s8 + $0x518] sm:$0xff] %v804_v5 }
 0x12d   : > { %v551_v6 = vpop.f32.mrf.mxu0  ;;  %v808_v7 = vpop.f32.mrf.mxu1 }
 0x12e   : > { %1555 = vst [vmem:[%s2448_s8 + $0x540] sm:$0xff] %v551_v6  ;;  %1557 = vst [vmem:[%s2448_s8 + $0x550] sm:$0xff] %v808_v7 }
 0x12f   : > { %v553_v8 = vpop.f32.mrf.mxu0  ;;  %v810_v9 = vpop.f32.mrf.mxu1 }
 0x130   : > { %1556 = vst [vmem:[%s2448_s8 + $0x548] sm:$0xff] %v553_v8  ;;  %1558 = vst [vmem:[%s2448_s8 + $0x558] sm:$0xff] %v810_v9 }
 0x131   : > { %v557_v10 = vpop.f32.mrf.mxu0  ;;  %v814_v11 = vpop.f32.mrf.mxu1 }
 0x132   : > { %1563 = vst [vmem:[%s2448_s8 + $0x580] sm:$0xff] %v557_v10  ;;  %1565 = vst [vmem:[%s2448_s8 + $0x590] sm:$0xff] %v814_v11 }
 0x133   : > { %v559_v12 = vpop.f32.mrf.mxu0  ;;  %v816_v13 = vpop.f32.mrf.mxu1 }
 0x134   : > { %1564 = vst [vmem:[%s2448_s8 + $0x588] sm:$0xff] %v559_v12  ;;  %1566 = vst [vmem:[%s2448_s8 + $0x598] sm:$0xff] %v816_v13 }
 0x135   : > { %v563_v14 = vpop.f32.mrf.mxu0  ;;  %v820_v15 = vpop.f32.mrf.mxu1 }
 0x136   : > { %1571 = vst [vmem:[%s2448_s8 + $0x5c0] sm:$0xff] %v563_v14  ;;  %1573 = vst [vmem:[%s2448_s8 + $0x5d0] sm:$0xff] %v820_v15 }
 0x137   : > { %v565_v16 = vpop.f32.mrf.mxu0  ;;  %v822_v17 = vpop.f32.mrf.mxu1 }
 0x138   : > { %1572 = vst [vmem:[%s2448_s8 + $0x5c8] sm:$0xff] %v565_v16  ;;  %1574 = vst [vmem:[%s2448_s8 + $0x5d8] sm:$0xff] %v822_v17 }
 0x139   : > { %v569_v18 = vpop.f32.mrf.mxu0  ;;  %v826_v19 = vpop.f32.mrf.mxu1 }
 0x13a   : > { %1579 = vst [vmem:[%s2448_s8 + $0x600] sm:$0xff] %v569_v18  ;;  %1581 = vst [vmem:[%s2448_s8 + $0x610] sm:$0xff] %v826_v19 }
 0x13b   : > { %v571_v20 = vpop.f32.mrf.mxu0  ;;  %v828_v21 = vpop.f32.mrf.mxu1 }
 0x13c   : > { %1580 = vst [vmem:[%s2448_s8 + $0x608] sm:$0xff] %v571_v20  ;;  %1582 = vst [vmem:[%s2448_s8 + $0x618] sm:$0xff] %v828_v21 }
 0x13d   : > { %v575_v22 = vpop.f32.mrf.mxu0  ;;  %v832_v23 = vpop.f32.mrf.mxu1 }
 0x13e   : > { %1587 = vst [vmem:[%s2448_s8 + $0x640] sm:$0xff] %v575_v22  ;;  %1589 = vst [vmem:[%s2448_s8 + $0x650] sm:$0xff] %v832_v23 }
 0x13f   : > { %v577_v24 = vpop.f32.mrf.mxu0  ;;  %v834_v25 = vpop.f32.mrf.mxu1 }
 0x140   : > { %1588 = vst [vmem:[%s2448_s8 + $0x648] sm:$0xff] %v577_v24  ;;  %1590 = vst [vmem:[%s2448_s8 + $0x658] sm:$0xff] %v834_v25 }
 0x141   : > { %v581_v26 = vpop.f32.mrf.mxu0  ;;  %v838_v27 = vpop.f32.mrf.mxu1 }
 0x142   : > { %1595 = vst [vmem:[%s2448_s8 + $0x680] sm:$0xff] %v581_v26  ;;  %1597 = vst [vmem:[%s2448_s8 + $0x690] sm:$0xff] %v838_v27 }
 0x143   : > { %v583_v28 = vpop.f32.mrf.mxu0  ;;  %v840_v29 = vpop.f32.mrf.mxu1 }
 0x144   : > { %1596 = vst [vmem:[%s2448_s8 + $0x688] sm:$0xff] %v583_v28  ;;  %1598 = vst [vmem:[%s2448_s8 + $0x698] sm:$0xff] %v840_v29 }
 0x145   : > { %v587_v30 = vpop.f32.mrf.mxu0  ;;  %v844_v31 = vpop.f32.mrf.mxu1 }
 0x146   : > { %1603 = vst [vmem:[%s2448_s8 + $0x6c0] sm:$0xff] %v587_v30  ;;  %1605 = vst [vmem:[%s2448_s8 + $0x6d0] sm:$0xff] %v844_v31 }
 0x147   : > { %v589_v32 = vpop.f32.mrf.mxu0  ;;  %v846_v33 = vpop.f32.mrf.mxu1 }
 0x148   : > { %1604 = vst [vmem:[%s2448_s8 + $0x6c8] sm:$0xff] %v589_v32  ;;  %1606 = vst [vmem:[%s2448_s8 + $0x6d8] sm:$0xff] %v846_v33 }
 0x149   : > { %v593_v34 = vpop.f32.mrf.mxu0  ;;  %v850_v35 = vpop.f32.mrf.mxu1 }
 0x14a   : > { %1611 = vst [vmem:[%s2448_s8 + $0x700] sm:$0xff] %v593_v34  ;;  %1613 = vst [vmem:[%s2448_s8 + $0x710] sm:$0xff] %v850_v35 }
 0x14b   : > { %v595_v36 = vpop.f32.mrf.mxu0  ;;  %v852_v37 = vpop.f32.mrf.mxu1 }
 0x14c   : > { %1612 = vst [vmem:[%s2448_s8 + $0x708] sm:$0xff] %v595_v36  ;;  %1614 = vst [vmem:[%s2448_s8 + $0x718] sm:$0xff] %v852_v37 }
 0x14d   : > { %v599_v38 = vpop.f32.mrf.mxu0  ;;  %v856_v39 = vpop.f32.mrf.mxu1 }
 0x14e   : > { %1619 = vst [vmem:[%s2448_s8 + $0x740] sm:$0xff] %v599_v38  ;;  %1621 = vst [vmem:[%s2448_s8 + $0x750] sm:$0xff] %v856_v39 }
 0x14f   : > { %v601_v40 = vpop.f32.mrf.mxu0  ;;  %v858_v41 = vpop.f32.mrf.mxu1 }
 0x150   : > { %1620 = vst [vmem:[%s2448_s8 + $0x748] sm:$0xff] %v601_v40  ;;  %1622 = vst [vmem:[%s2448_s8 + $0x758] sm:$0xff] %v858_v41 }
 0x151   : > { %v605_v42 = vpop.f32.mrf.mxu0  ;;  %v862_v43 = vpop.f32.mrf.mxu1 }
 0x152   : > { %1627 = vst [vmem:[%s2448_s8 + $0x780] sm:$0xff] %v605_v42  ;;  %1629 = vst [vmem:[%s2448_s8 + $0x790] sm:$0xff] %v862_v43 }
 0x153   : > { %v607_v44 = vpop.f32.mrf.mxu0  ;;  %v864_v45 = vpop.f32.mrf.mxu1 }
 0x154   : > { %1628 = vst [vmem:[%s2448_s8 + $0x788] sm:$0xff] %v607_v44  ;;  %1630 = vst [vmem:[%s2448_s8 + $0x798] sm:$0xff] %v864_v45 }
 0x155   : > { %v611_v46 = vpop.f32.mrf.mxu0  ;;  %v868_v49 = vpop.f32.mrf.mxu1 }
 0x156   : > { %1635 = vst [vmem:[%s2448_s8 + $0x7c0] sm:$0xff] %v611_v46  ;;  %1637 = vst [vmem:[%s2448_s8 + $0x7d0] sm:$0xff] %v868_v49 }
 0x157   : > { %v613_v0 = vpop.f32.mrf.mxu0  ;;  %v870_v47 = vpop.f32.mrf.mxu1 }
 0x158   : > { %1636 = vst [vmem:[%s2448_s8 + $0x7c8] sm:$0xff] %v613_v0  ;;  %1638 = vst [vmem:[%s2448_s8 + $0x7d8] sm:$0xff] %v870_v47 }
 0x159   : > { %v939_v50 = vpop.f32.mrf.mxu0  ;;  %v1196_v51 = vpop.f32.mrf.mxu1 }
 0x15a   : > { %1391 = vst [vmem:[%s2448_s8 + $0x20] sm:$0xff] %v939_v50  ;;  %1393 = vst [vmem:[%s2448_s8 + $0x30] sm:$0xff] %v1196_v51 }
 0x15b   : > { %v941_v52 = vpop.f32.mrf.mxu0  ;;  %v1198_v53 = vpop.f32.mrf.mxu1 }
 0x15c   : > { %1392 = vst [vmem:[%s2448_s8 + $0x28] sm:$0xff] %v941_v52  ;;  %1394 = vst [vmem:[%s2448_s8 + $0x38] sm:$0xff] %v1198_v53 }
 0x15d   : > { %v945_v48 = vpop.f32.mrf.mxu0  ;;  %v1202_v54 = vpop.f32.mrf.mxu1 }
 0x15e   : > { %1399 = vst [vmem:[%s2448_s8 + $0x60] sm:$0xff] %v945_v48  ;;  %1401 = vst [vmem:[%s2448_s8 + $0x70] sm:$0xff] %v1202_v54 }
 0x15f   : > { %v947_v55 = vpop.f32.mrf.mxu0  ;;  %v1204_v56 = vpop.f32.mrf.mxu1 }
 0x160   : > { %1400 = vst [vmem:[%s2448_s8 + $0x68] sm:$0xff] %v947_v55  ;;  %1402 = vst [vmem:[%s2448_s8 + $0x78] sm:$0xff] %v1204_v56 }
 0x161   : > { %v951_v57 = vpop.f32.mrf.mxu0  ;;  %v1208_v58 = vpop.f32.mrf.mxu1 }
 0x162   : > { %1407 = vst [vmem:[%s2448_s8 + $0xa0] sm:$0xff] %v951_v57  ;;  %1409 = vst [vmem:[%s2448_s8 + $0xb0] sm:$0xff] %v1208_v58 }
 0x163   : > { %v953_v59 = vpop.f32.mrf.mxu0  ;;  %v1210_v60 = vpop.f32.mrf.mxu1 }
 0x164   : > { %1408 = vst [vmem:[%s2448_s8 + $0xa8] sm:$0xff] %v953_v59  ;;  %1410 = vst [vmem:[%s2448_s8 + $0xb8] sm:$0xff] %v1210_v60 }
 0x165   : > { %v957_v61 = vpop.f32.mrf.mxu0  ;;  %v1214_v62 = vpop.f32.mrf.mxu1 }
 0x166   : > { %1415 = vst [vmem:[%s2448_s8 + $0xe0] sm:$0xff] %v957_v61  ;;  %1417 = vst [vmem:[%s2448_s8 + $0xf0] sm:$0xff] %v1214_v62 }
 0x167   : > { %v959_v63 = vpop.f32.mrf.mxu0  ;;  %v1216_v1 = vpop.f32.mrf.mxu1 }
 0x168   : > { %1416 = vst [vmem:[%s2448_s8 + $0xe8] sm:$0xff] %v959_v63  ;;  %1418 = vst [vmem:[%s2448_s8 + $0xf8] sm:$0xff] %v1216_v1 }
 0x169   : > { %v963_v2 = vpop.f32.mrf.mxu0  ;;  %v1220_v3 = vpop.f32.mrf.mxu1 }
 0x16a   : > { %1423 = vst [vmem:[%s2448_s8 + $0x120] sm:$0xff] %v963_v2  ;;  %1425 = vst [vmem:[%s2448_s8 + $0x130] sm:$0xff] %v1220_v3 }
 0x16b   : > { %v965_v4 = vpop.f32.mrf.mxu0  ;;  %v1222_v5 = vpop.f32.mrf.mxu1 }
 0x16c   : > { %1424 = vst [vmem:[%s2448_s8 + $0x128] sm:$0xff] %v965_v4  ;;  %1426 = vst [vmem:[%s2448_s8 + $0x138] sm:$0xff] %v1222_v5 }
 0x16d   : > { %v969_v6 = vpop.f32.mrf.mxu0  ;;  %v1226_v7 = vpop.f32.mrf.mxu1 }
 0x16e   : > { %1431 = vst [vmem:[%s2448_s8 + $0x160] sm:$0xff] %v969_v6  ;;  %1433 = vst [vmem:[%s2448_s8 + $0x170] sm:$0xff] %v1226_v7 }
 0x16f   : > { %v971_v8 = vpop.f32.mrf.mxu0  ;;  %v1228_v9 = vpop.f32.mrf.mxu1 }
 0x170   : > { %1432 = vst [vmem:[%s2448_s8 + $0x168] sm:$0xff] %v971_v8  ;;  %1434 = vst [vmem:[%s2448_s8 + $0x178] sm:$0xff] %v1228_v9 }
 0x171   : > { %v975_v10 = vpop.f32.mrf.mxu0  ;;  %v1232_v11 = vpop.f32.mrf.mxu1 }
 0x172   : > { %1439 = vst [vmem:[%s2448_s8 + $0x1a0] sm:$0xff] %v975_v10  ;;  %1441 = vst [vmem:[%s2448_s8 + $0x1b0] sm:$0xff] %v1232_v11 }
 0x173   : > { %v977_v12 = vpop.f32.mrf.mxu0  ;;  %v1234_v13 = vpop.f32.mrf.mxu1 }
 0x174   : > { %1440 = vst [vmem:[%s2448_s8 + $0x1a8] sm:$0xff] %v977_v12  ;;  %1442 = vst [vmem:[%s2448_s8 + $0x1b8] sm:$0xff] %v1234_v13 }
 0x175   : > { %v981_v14 = vpop.f32.mrf.mxu0  ;;  %v1238_v15 = vpop.f32.mrf.mxu1 }
 0x176   : > { %1447 = vst [vmem:[%s2448_s8 + $0x1e0] sm:$0xff] %v981_v14  ;;  %1449 = vst [vmem:[%s2448_s8 + $0x1f0] sm:$0xff] %v1238_v15 }
 0x177   : > { %v983_v16 = vpop.f32.mrf.mxu0  ;;  %v1240_v17 = vpop.f32.mrf.mxu1 }
 0x178   : > { %1448 = vst [vmem:[%s2448_s8 + $0x1e8] sm:$0xff] %v983_v16  ;;  %1450 = vst [vmem:[%s2448_s8 + $0x1f8] sm:$0xff] %v1240_v17 }
 0x179   : > { %v987_v18 = vpop.f32.mrf.mxu0  ;;  %v1244_v19 = vpop.f32.mrf.mxu1 }
 0x17a   : > { %1455 = vst [vmem:[%s2448_s8 + $0x220] sm:$0xff] %v987_v18  ;;  %1457 = vst [vmem:[%s2448_s8 + $0x230] sm:$0xff] %v1244_v19 }
 0x17b   : > { %v989_v20 = vpop.f32.mrf.mxu0  ;;  %v1246_v21 = vpop.f32.mrf.mxu1 }
 0x17c   : > { %1456 = vst [vmem:[%s2448_s8 + $0x228] sm:$0xff] %v989_v20  ;;  %1458 = vst [vmem:[%s2448_s8 + $0x238] sm:$0xff] %v1246_v21 }
 0x17d   : > { %v993_v22 = vpop.f32.mrf.mxu0  ;;  %v1250_v23 = vpop.f32.mrf.mxu1 }
 0x17e   : > { %1463 = vst [vmem:[%s2448_s8 + $0x260] sm:$0xff] %v993_v22  ;;  %1465 = vst [vmem:[%s2448_s8 + $0x270] sm:$0xff] %v1250_v23 }
 0x17f   : > { %v995_v24 = vpop.f32.mrf.mxu0  ;;  %v1252_v25 = vpop.f32.mrf.mxu1 }
 0x180   : > { %1464 = vst [vmem:[%s2448_s8 + $0x268] sm:$0xff] %v995_v24  ;;  %1466 = vst [vmem:[%s2448_s8 + $0x278] sm:$0xff] %v1252_v25 }
 0x181   : > { %v999_v26 = vpop.f32.mrf.mxu0  ;;  %v1256_v27 = vpop.f32.mrf.mxu1 }
 0x182   : > { %1471 = vst [vmem:[%s2448_s8 + $0x2a0] sm:$0xff] %v999_v26  ;;  %1473 = vst [vmem:[%s2448_s8 + $0x2b0] sm:$0xff] %v1256_v27 }
 0x183   : > { %v1001_v28 = vpop.f32.mrf.mxu0  ;;  %v1258_v29 = vpop.f32.mrf.mxu1 }
 0x184   : > { %1472 = vst [vmem:[%s2448_s8 + $0x2a8] sm:$0xff] %v1001_v28  ;;  %1474 = vst [vmem:[%s2448_s8 + $0x2b8] sm:$0xff] %v1258_v29 }
 0x185   : > { %v1005_v30 = vpop.f32.mrf.mxu0  ;;  %v1262_v31 = vpop.f32.mrf.mxu1 }
 0x186   : > { %1479 = vst [vmem:[%s2448_s8 + $0x2e0] sm:$0xff] %v1005_v30  ;;  %1481 = vst [vmem:[%s2448_s8 + $0x2f0] sm:$0xff] %v1262_v31 }
 0x187   : > { %v1007_v32 = vpop.f32.mrf.mxu0  ;;  %v1264_v33 = vpop.f32.mrf.mxu1 }
 0x188   : > { %1480 = vst [vmem:[%s2448_s8 + $0x2e8] sm:$0xff] %v1007_v32  ;;  %1482 = vst [vmem:[%s2448_s8 + $0x2f8] sm:$0xff] %v1264_v33 }
 0x189   : > { %v1011_v34 = vpop.f32.mrf.mxu0  ;;  %v1268_v35 = vpop.f32.mrf.mxu1 }
 0x18a   : > { %1487 = vst [vmem:[%s2448_s8 + $0x320] sm:$0xff] %v1011_v34  ;;  %1489 = vst [vmem:[%s2448_s8 + $0x330] sm:$0xff] %v1268_v35 }
 0x18b   : > { %v1013_v36 = vpop.f32.mrf.mxu0  ;;  %v1270_v37 = vpop.f32.mrf.mxu1 }
 0x18c   : > { %1488 = vst [vmem:[%s2448_s8 + $0x328] sm:$0xff] %v1013_v36  ;;  %1490 = vst [vmem:[%s2448_s8 + $0x338] sm:$0xff] %v1270_v37 }
 0x18d   : > { %v1017_v38 = vpop.f32.mrf.mxu0  ;;  %v1274_v39 = vpop.f32.mrf.mxu1 }
 0x18e   : > { %1495 = vst [vmem:[%s2448_s8 + $0x360] sm:$0xff] %v1017_v38  ;;  %1497 = vst [vmem:[%s2448_s8 + $0x370] sm:$0xff] %v1274_v39 }
 0x18f   : > { %v1019_v40 = vpop.f32.mrf.mxu0  ;;  %v1276_v41 = vpop.f32.mrf.mxu1 }
 0x190   : > { %1496 = vst [vmem:[%s2448_s8 + $0x368] sm:$0xff] %v1019_v40  ;;  %1498 = vst [vmem:[%s2448_s8 + $0x378] sm:$0xff] %v1276_v41 }
 0x191   : > { %v1023_v42 = vpop.f32.mrf.mxu0  ;;  %v1280_v43 = vpop.f32.mrf.mxu1 }
 0x192   : > { %1503 = vst [vmem:[%s2448_s8 + $0x3a0] sm:$0xff] %v1023_v42  ;;  %1505 = vst [vmem:[%s2448_s8 + $0x3b0] sm:$0xff] %v1280_v43 }
 0x193   : > { %v1025_v44 = vpop.f32.mrf.mxu0  ;;  %v1282_v45 = vpop.f32.mrf.mxu1 }
 0x194   : > { %1504 = vst [vmem:[%s2448_s8 + $0x3a8] sm:$0xff] %v1025_v44  ;;  %1506 = vst [vmem:[%s2448_s8 + $0x3b8] sm:$0xff] %v1282_v45 }
 0x195   : > { %v1029_v46 = vpop.f32.mrf.mxu0  ;;  %v1286_v49 = vpop.f32.mrf.mxu1 }
 0x196   : > { %1511 = vst [vmem:[%s2448_s8 + $0x3e0] sm:$0xff] %v1029_v46  ;;  %1513 = vst [vmem:[%s2448_s8 + $0x3f0] sm:$0xff] %v1286_v49 }
 0x197   : > { %v1031_v0 = vpop.f32.mrf.mxu0  ;;  %v1288_v47 = vpop.f32.mrf.mxu1 }
 0x198   : > { %1512 = vst [vmem:[%s2448_s8 + $0x3e8] sm:$0xff] %v1031_v0  ;;  %1514 = vst [vmem:[%s2448_s8 + $0x3f8] sm:$0xff] %v1288_v47 }
 0x199   : > { %v1035_v50 = vpop.f32.mrf.mxu0  ;;  %v1292_v51 = vpop.f32.mrf.mxu1 }
 0x19a   : > { %1519 = vst [vmem:[%s2448_s8 + $0x420] sm:$0xff] %v1035_v50  ;;  %1521 = vst [vmem:[%s2448_s8 + $0x430] sm:$0xff] %v1292_v51 }
 0x19b   : > { %v1037_v52 = vpop.f32.mrf.mxu0  ;;  %v1294_v53 = vpop.f32.mrf.mxu1 }
 0x19c   : > { %1520 = vst [vmem:[%s2448_s8 + $0x428] sm:$0xff] %v1037_v52  ;;  %1522 = vst [vmem:[%s2448_s8 + $0x438] sm:$0xff] %v1294_v53 }
 0x19d   : > { %v1041_v48 = vpop.f32.mrf.mxu0  ;;  %v1298_v54 = vpop.f32.mrf.mxu1 }
 0x19e   : > { %1527 = vst [vmem:[%s2448_s8 + $0x460] sm:$0xff] %v1041_v48  ;;  %1529 = vst [vmem:[%s2448_s8 + $0x470] sm:$0xff] %v1298_v54 }
 0x19f   : > { %v1043_v55 = vpop.f32.mrf.mxu0  ;;  %v1300_v56 = vpop.f32.mrf.mxu1 }
 0x1a0   : > { %1528 = vst [vmem:[%s2448_s8 + $0x468] sm:$0xff] %v1043_v55  ;;  %1530 = vst [vmem:[%s2448_s8 + $0x478] sm:$0xff] %v1300_v56 }
 0x1a1   : > { %v1047_v57 = vpop.f32.mrf.mxu0  ;;  %v1304_v58 = vpop.f32.mrf.mxu1 }
 0x1a2   : > { %1535 = vst [vmem:[%s2448_s8 + $0x4a0] sm:$0xff] %v1047_v57  ;;  %1537 = vst [vmem:[%s2448_s8 + $0x4b0] sm:$0xff] %v1304_v58 }
 0x1a3   : > { %v1049_v59 = vpop.f32.mrf.mxu0  ;;  %v1306_v60 = vpop.f32.mrf.mxu1 }
 0x1a4   : > { %1536 = vst [vmem:[%s2448_s8 + $0x4a8] sm:$0xff] %v1049_v59  ;;  %1538 = vst [vmem:[%s2448_s8 + $0x4b8] sm:$0xff] %v1306_v60 }
 0x1a5   : > { %v1053_v61 = vpop.f32.mrf.mxu0  ;;  %v1310_v62 = vpop.f32.mrf.mxu1 }
 0x1a6   : > { %1543 = vst [vmem:[%s2448_s8 + $0x4e0] sm:$0xff] %v1053_v61  ;;  %1545 = vst [vmem:[%s2448_s8 + $0x4f0] sm:$0xff] %v1310_v62 }
 0x1a7   : > { %v1055_v63 = vpop.f32.mrf.mxu0  ;;  %v1312_v1 = vpop.f32.mrf.mxu1 }
 0x1a8   : > { %1544 = vst [vmem:[%s2448_s8 + $0x4e8] sm:$0xff] %v1055_v63  ;;  %1546 = vst [vmem:[%s2448_s8 + $0x4f8] sm:$0xff] %v1312_v1 }
 0x1a9   : > { %v1059_v2 = vpop.f32.mrf.mxu0  ;;  %v1316_v3 = vpop.f32.mrf.mxu1 }
 0x1aa   : > { %1551 = vst [vmem:[%s2448_s8 + $0x520] sm:$0xff] %v1059_v2  ;;  %1553 = vst [vmem:[%s2448_s8 + $0x530] sm:$0xff] %v1316_v3 }
 0x1ab   : > { %v1061_v4 = vpop.f32.mrf.mxu0  ;;  %v1318_v5 = vpop.f32.mrf.mxu1 }
 0x1ac   : > { %1552 = vst [vmem:[%s2448_s8 + $0x528] sm:$0xff] %v1061_v4  ;;  %1554 = vst [vmem:[%s2448_s8 + $0x538] sm:$0xff] %v1318_v5 }
 0x1ad   : > { %v1065_v6 = vpop.f32.mrf.mxu0  ;;  %v1322_v7 = vpop.f32.mrf.mxu1 }
 0x1ae   : > { %1559 = vst [vmem:[%s2448_s8 + $0x560] sm:$0xff] %v1065_v6  ;;  %1561 = vst [vmem:[%s2448_s8 + $0x570] sm:$0xff] %v1322_v7 }
 0x1af   : > { %v1067_v8 = vpop.f32.mrf.mxu0  ;;  %v1324_v9 = vpop.f32.mrf.mxu1 }
 0x1b0   : > { %1560 = vst [vmem:[%s2448_s8 + $0x568] sm:$0xff] %v1067_v8  ;;  %1562 = vst [vmem:[%s2448_s8 + $0x578] sm:$0xff] %v1324_v9 }
 0x1b1   : > { %v1071_v10 = vpop.f32.mrf.mxu0  ;;  %v1328_v11 = vpop.f32.mrf.mxu1 }
 0x1b2   : > { %1567 = vst [vmem:[%s2448_s8 + $0x5a0] sm:$0xff] %v1071_v10  ;;  %1569 = vst [vmem:[%s2448_s8 + $0x5b0] sm:$0xff] %v1328_v11 }
 0x1b3   : > { %v1073_v12 = vpop.f32.mrf.mxu0  ;;  %v1330_v13 = vpop.f32.mrf.mxu1 }
 0x1b4   : > { %1568 = vst [vmem:[%s2448_s8 + $0x5a8] sm:$0xff] %v1073_v12  ;;  %1570 = vst [vmem:[%s2448_s8 + $0x5b8] sm:$0xff] %v1330_v13 }
 0x1b5   : > { %v1077_v14 = vpop.f32.mrf.mxu0  ;;  %v1334_v15 = vpop.f32.mrf.mxu1 }
 0x1b6   : > { %1575 = vst [vmem:[%s2448_s8 + $0x5e0] sm:$0xff] %v1077_v14  ;;  %1577 = vst [vmem:[%s2448_s8 + $0x5f0] sm:$0xff] %v1334_v15 }
 0x1b7   : > { %v1079_v16 = vpop.f32.mrf.mxu0  ;;  %v1336_v17 = vpop.f32.mrf.mxu1 }
 0x1b8   : > { %1576 = vst [vmem:[%s2448_s8 + $0x5e8] sm:$0xff] %v1079_v16  ;;  %1578 = vst [vmem:[%s2448_s8 + $0x5f8] sm:$0xff] %v1336_v17 }
 0x1b9   : > { %v1083_v18 = vpop.f32.mrf.mxu0  ;;  %v1340_v19 = vpop.f32.mrf.mxu1 }
 0x1ba   : > { %1583 = vst [vmem:[%s2448_s8 + $0x620] sm:$0xff] %v1083_v18  ;;  %1585 = vst [vmem:[%s2448_s8 + $0x630] sm:$0xff] %v1340_v19 }
 0x1bb   : > { %v1085_v20 = vpop.f32.mrf.mxu0  ;;  %v1342_v21 = vpop.f32.mrf.mxu1 }
 0x1bc   : > { %1584 = vst [vmem:[%s2448_s8 + $0x628] sm:$0xff] %v1085_v20  ;;  %1586 = vst [vmem:[%s2448_s8 + $0x638] sm:$0xff] %v1342_v21 }
 0x1bd   : > { %v1089_v22 = vpop.f32.mrf.mxu0  ;;  %v1346_v23 = vpop.f32.mrf.mxu1 }
 0x1be   : > { %1591 = vst [vmem:[%s2448_s8 + $0x660] sm:$0xff] %v1089_v22  ;;  %1593 = vst [vmem:[%s2448_s8 + $0x670] sm:$0xff] %v1346_v23 }
 0x1bf   : > { %v1091_v24 = vpop.f32.mrf.mxu0  ;;  %v1348_v25 = vpop.f32.mrf.mxu1 }
 0x1c0   : > { %1592 = vst [vmem:[%s2448_s8 + $0x668] sm:$0xff] %v1091_v24  ;;  %1594 = vst [vmem:[%s2448_s8 + $0x678] sm:$0xff] %v1348_v25 }
 0x1c1   : > { %v1095_v26 = vpop.f32.mrf.mxu0  ;;  %v1352_v27 = vpop.f32.mrf.mxu1 }
 0x1c2   : > { %1599 = vst [vmem:[%s2448_s8 + $0x6a0] sm:$0xff] %v1095_v26  ;;  %1601 = vst [vmem:[%s2448_s8 + $0x6b0] sm:$0xff] %v1352_v27 }
 0x1c3   : > { %v1097_v28 = vpop.f32.mrf.mxu0  ;;  %v1354_v29 = vpop.f32.mrf.mxu1 }
 0x1c4   : > { %1600 = vst [vmem:[%s2448_s8 + $0x6a8] sm:$0xff] %v1097_v28  ;;  %1602 = vst [vmem:[%s2448_s8 + $0x6b8] sm:$0xff] %v1354_v29 }
 0x1c5   : > { %v1101_v30 = vpop.f32.mrf.mxu0  ;;  %v1358_v31 = vpop.f32.mrf.mxu1 }
 0x1c6   : > { %1607 = vst [vmem:[%s2448_s8 + $0x6e0] sm:$0xff] %v1101_v30  ;;  %1609 = vst [vmem:[%s2448_s8 + $0x6f0] sm:$0xff] %v1358_v31 }
 0x1c7   : > { %v1103_v32 = vpop.f32.mrf.mxu0  ;;  %v1360_v33 = vpop.f32.mrf.mxu1 }
 0x1c8   : > { %1608 = vst [vmem:[%s2448_s8 + $0x6e8] sm:$0xff] %v1103_v32  ;;  %1610 = vst [vmem:[%s2448_s8 + $0x6f8] sm:$0xff] %v1360_v33 }
 0x1c9   : > { %v1107_v34 = vpop.f32.mrf.mxu0  ;;  %v1364_v35 = vpop.f32.mrf.mxu1 }
 0x1ca   : > { %1615 = vst [vmem:[%s2448_s8 + $0x720] sm:$0xff] %v1107_v34  ;;  %1617 = vst [vmem:[%s2448_s8 + $0x730] sm:$0xff] %v1364_v35 }
 0x1cb   : > { %v1109_v36 = vpop.f32.mrf.mxu0  ;;  %v1366_v37 = vpop.f32.mrf.mxu1 }
 0x1cc   : > { %1616 = vst [vmem:[%s2448_s8 + $0x728] sm:$0xff] %v1109_v36  ;;  %1618 = vst [vmem:[%s2448_s8 + $0x738] sm:$0xff] %v1366_v37 }
 0x1cd   : > { %v1113_v38 = vpop.f32.mrf.mxu0  ;;  %v1370_v39 = vpop.f32.mrf.mxu1 }
 0x1ce   : > { %1623 = vst [vmem:[%s2448_s8 + $0x760] sm:$0xff] %v1113_v38  ;;  %1625 = vst [vmem:[%s2448_s8 + $0x770] sm:$0xff] %v1370_v39 }
 0x1cf   : > { %v1115_v40 = vpop.f32.mrf.mxu0  ;;  %v1372_v41 = vpop.f32.mrf.mxu1 }
 0x1d0   : > { %1624 = vst [vmem:[%s2448_s8 + $0x768] sm:$0xff] %v1115_v40  ;;  %1626 = vst [vmem:[%s2448_s8 + $0x778] sm:$0xff] %v1372_v41 }
 0x1d1   : > { %v1119_v42 = vpop.f32.mrf.mxu0  ;;  %v1376_v43 = vpop.f32.mrf.mxu1 }
 0x1d2   : > { %1631 = vst [vmem:[%s2448_s8 + $0x7a0] sm:$0xff] %v1119_v42  ;;  %1633 = vst [vmem:[%s2448_s8 + $0x7b0] sm:$0xff] %v1376_v43 }
 0x1d3   : > { %v1121_v44 = vpop.f32.mrf.mxu0  ;;  %v1378_v45 = vpop.f32.mrf.mxu1 }
 0x1d4   : > { %1632 = vst [vmem:[%s2448_s8 + $0x7a8] sm:$0xff] %v1121_v44  ;;  %1634 = vst [vmem:[%s2448_s8 + $0x7b8] sm:$0xff] %v1378_v45 }
 0x1d5   : > { %v1125_v46 = vpop.f32.mrf.mxu0  ;;  %v1382_v49 = vpop.f32.mrf.mxu1 }
 0x1d6   : > { %1639 = vst [vmem:[%s2448_s8 + $0x7e0] sm:$0xff] %v1125_v46  ;;  %1641 = vst [vmem:[%s2448_s8 + $0x7f0] sm:$0xff] %v1382_v49 }
 0x1d7   : > { %v1127_v0 = vpop.f32.mrf.mxu0  ;;  %v1384_v47 = vpop.f32.mrf.mxu1 }
 0x1d8   : > { %1640 = vst [vmem:[%s2448_s8 + $0x7e8] sm:$0xff] %v1127_v0  ;;  %1642 = vst [vmem:[%s2448_s8 + $0x7f8] sm:$0xff] %v1384_v47 }
 0x1d9 PF: > { %s12_s13 = sadd.s32 1, %s1982_s13   ;;  %s2818_s9 = smov %s1974_s11 }
 0x1da   : > { %p9_p7 = scmp.ge.s32.totalorder %s12_s13, 10   ;;  %s2819_s10 = smov %s1978_s12 }
 0x1db   : > { %s2820_s11 = smov %s2823_s14  ;;  %s2821_s12 = smov %s2827_s15 }
 0x1dc   :  { %11 = sbr.rel (!%p9_p7) target bundleno = 3 (0x3), region = 61 }

// kernel: dpaa_user2d_forward.2
= control target key start
LH: loop header
LB: loop body
LE: loop exit
PB: predicated region body
PF: predicated region fallthrough
CT: control target
= control target key end

     0   :  { %7 = vsyncpa [#allocation4], 0  ;;  %s10015_s0 = inlined_call_operand.hbm [shape: f32[2,4,512,512], index: 0, kind: input, shape index: {}]   ;;  %s10016_s1 = inlined_call_operand.vmem [shape: f32[512,64], index: 1, kind: input, shape index: {}]   ;;  %s10017_s2 = inlined_call_operand.vmem [shape: f32[2,4,64,64], index: 2, kind: output, shape index: {}]  }
   0x1   :  { %9 = vsyncpa [#allocation4 + $0x1], 0  ;;  %s7378_s9 = smov 0   ;;  %s7380_s10 = smov 0  }
   0x2   :  { %s7382_s11 = smov 0   ;;  %s7384_s12 = smov 0  }
   0x3   :  { %s7386_s13 = smov 0   ;;  %s7388_s14 = smov 0  }
   0x4   :  { %s7390_s15 = smov 0   ;;  %s7392_s16 = smov 0  }
   0x5 LB: > { %s24_s17 = sadd.s32 1, %s7344_s14  ;;  %s27_s18 = sadd.s32 1, %s7348_s15  ;;  %s7352_s16 = sphi %s7392_s16, %s15_s16   ;;  %s7348_s15 = sphi %s7390_s15, %s10279_s15   ;;  %s7344_s14 = sphi %s7388_s14, %s10278_s14   ;;  %s7340_s13 = sphi %s7386_s13, %s10277_s13   ;;  %s7336_s12 = sphi %s7384_s12, %s10276_s12   ;;  %s7332_s11 = sphi %s7382_s11, %s10275_s11   ;;  %s7328_s10 = sphi %s7380_s10, %s10274_s10   ;;  %s7324_s9 = sphi %s7378_s9, %s10273_s9  }
   0x6   : > { %p25_p0 = scmp.ge.s32.totalorder %s24_s17, 4  ;;  %s6235_s19 = sadd.s32 4294967295, %s7352_s16  }
   0x7   : > { %p43_p1 = scmp.ne.s32.totalorder %s7332_s11, %s7328_s10  ;;  %p44_p2 = scmp.eq.s32.totalorder %s7352_s16, 0 }
   0x8   : > { %s10281_s17 = smov (%p25_p0, %s24_s17), 0  ;;  %s10283_s18 = smov (!%p25_p0, %s27_s18), %s7348_s15 }
   0x9   : > { %s32_s20 = ssub.s32 %s7344_s14, %s10281_s17  ;;  %p29_p3 = scmp.ge.s32.totalorder %s10283_s18, 2 }
   0xa   : > { %p49_p4 = scmp.ne.s32.totalorder %s7328_s10, %s7324_s9  ;;  %p7431_p5 = por %p44_p2, %p43_p1 }
   0xb   : > { %p50_p6 = scmp.eq.s32.totalorder %s6235_s19, 0  ;;  %s10285_s18 = smov (%p29_p3, %s10283_s18), 0 }
   0xc   : > { %p96_p8 = scmp.eq.s32.totalorder %s6235_s19, 7  ;;  %s31_s23 = ssub.s32 %s7348_s15, %s10285_s18 }
   0xd   : > { %p7437_p7 = por %p50_p6, %p49_p4  ;;  %s36_s24 = sadd.s32 1, %s7332_s11 }
   0xe   : > { %s33_s25 = sor.u32 %s32_s20, %s31_s23  ;;  %p7447_p9 = por %p96_p8, %p43_p1 }
   0xf   : > { %p34_p10 = scmp.eq.s32.totalorder %s33_s25, 0  ;;  %p6238_p11 = scmp.ge.s32.totalorder %s7352_s16, 8 }
  0x11   : > { %s7452_s27 = scalar_select %p34_p10, %s7332_s11, %s36_s24  }
  0x12   : > { %121 = sbr.rel (%p6238_p11) target bundleno = 39 (0x27), region = 20 }
  0x17   : > { %s125_s28 = sand.u32 1, %s7332_s11   ;;  %s6709_s29 = sshll.u32 %s7344_s14, 6 }
  0x18   : > { %s6239_s30 = sshll.u32 %s125_s28, 11  ;;  %s6242_s3 = sshll.u32 %s7348_s15, 10 }
  0x19   : > { %s136_s4 = sadd.s32 %s6709_s29, %s6242_s3  ;;  %s129_s5 = scalar_lea.vmem [#allocation3], %s6239_s30 }
  0x1a   : > { %s151_s6 = sshll.u32 %s129_s5, 4  ;;  %s6243_s7 = sshll.u32 %s136_s4, 7  ;;  %s152_s6 = int_to_ptr.vmem [resolvable:$true] %s151_s6 }
  0x1b   : > { %s7014_s8 = scalar_select %p7431_p5, [#allocation0], [#allocation8] }
  0x1c   : > { %s7354_s9 = smov 32768   ;;  %s7355_s20 = smov 8192  }
  0x1d   : > { %7015 = sst [smem:[#allocation7]] (%p7431_p5), %s7354_s9  ;;  %s7356_s23 = smov 16  }
  0x1e   : > { %s143_s19 = sld [smem:[%s7014_s8]]   ;;  %s7357_s24 = smov 512  }
  0x1f   : > { %7016 = sst [smem:[#allocation7 + $0x1]] (%p7431_p5), %s7355_s20  ;;  %s138_s30 = scalar_lea.hbm %s10015_s0, %s6243_s7 }
  0x20   : > { %7017 = sst [smem:[#allocation7 + $0x2]] (%p7431_p5), %s7356_s23  ;;  %s7358_s3 = smov 32  }
  0x21   : > { %7018 = sst [smem:[#allocation7 + $0x3]] (%p7431_p5), %s7357_s24  ;;  %s126_s8 = scalar_lea.sflag [#allocation4], %s125_s28 }
  0x22   : > { %7019 = sst [smem:[#allocation7 + $0x4]] (%p7431_p5), %s7357_s24  ;;  %s7359_s9 = smov 131072  }
  0x23   : > { %7020 = sst [smem:[#allocation7 + $0x5]] (%p7431_p5), %s7358_s3 }
  0x24   : > { %s6244_s4 = sshll.u32 %s143_s19, 26 }
  0x25   : > { %s6245_s5 = sadd.s32 134217728, %s6244_s4 }
  0x26   : > { %7021 = dma.general (%p7431_p5), %s138_s30, 32768, %s152_s6, %s126_s8, %s7359_s9, [#allocation7], %s6245_s5, 0  }
  0x27 PF: > { %p6246_p12 = scmp.ge.s32.totalorder %s7352_s16, 1  ;;  %p172_p13 = scmp.lt.s32.totalorder %s7352_s16, 9 }
  0x29   : > { %p173_p0 = pnand %p6246_p12, %p172_p13 }
  0x2b   : > { %176 = sbr.rel (%p173_p0) target bundleno = 1040 (0x410), region = 28 }
  0x30   : > { %s7480_s7 = sand.u32 1, %s7328_s10  }
  0x31   : > { %s6247_s20 = sshll.u32 %s7480_s7, 11  ;;  %s179_s19 = scalar_lea.sflag [#allocation4], %s7480_s7 }
  0x32   : > { %s7484_s23 = scalar_lea.vmem [#allocation3], %s6247_s20 }
  0x33   : > { %7319 = dma.done.wait (%p7437_p7), %s179_s19, 32768  }
  0x34   : > { %7321 = vsyncadd (%p7437_p7), %s179_s19, 4294934528  ;;  %v7493_v0 = vld [vmem:[%s10016_s1 + $0xf8] sm:$0xff]  ;;  %v5360_v4 = vld [vmem:[%s10016_s1 + $0xf0] sm:$0xff]  ;;  %v7360_v36 = vmov 1966171168   ;;  %v300_v38 = vlaneseq  ;;  %s6248_s9 = sshll.u32 %s7480_s7, 6 }
  0x35   : > { %v7498_v1 = vld [vmem:[%s10016_s1 + $0x1f8] sm:$0xff]  ;;  %6710 = vmatprep.subr.mxu0 %v7493_v0  ;;  %v5392_v5 = vld [vmem:[%s10016_s1 + $0x1f0] sm:$0xff]  ;;  %v5359_v8 = vld [vmem:[%s10016_s1 + $0xe8] sm:$0xff]  ;;  %v298_v37 = vunpack.c.l.s4 %v7360_v36  ;;  %s9944_s7 = scalar_lea.vmem [#allocation5], %s6248_s9  ;;  %s6704_s20 = sshll.u32 (%p7447_p9), %s7336_s12, 1 }
  0x36   : > { %v5345_v2 = vld [vmem:[%s10016_s1 + $0x78] sm:$0xff]  ;;  %6748 = vmatprep.subr.mxu1 %v7498_v1  ;;  %v5344_v6 = vld [vmem:[%s10016_s1 + $0x70] sm:$0xff]  ;;  %v5391_v9 = vld [vmem:[%s10016_s1 + $0x1e8] sm:$0xff]  ;;  %v301_v51 = vshrl.u32 %v300_v38, 7  ;;  %s6705_s19 = sshll.u32 (%p7447_p9), %s7340_s13, 5 }
  0x37   : > { %v5377_v3 = vld [vmem:[%s10016_s1 + $0x178] sm:$0xff]  ;;  %6711 = vmatpush3.msra.mxu0 %v5345_v2  ;;  %v5376_v7 = vld [vmem:[%s10016_s1 + $0x170] sm:$0xff]  ;;  %v5343_v10 = vld [vmem:[%s10016_s1 + $0x68] sm:$0xff]  ;;  %v299_v50 = vunpack.c.0.s8 %v298_v37  ;;  %s6047_s21 = sadd.s32 (%p7447_p9), %s6705_s19, %s6704_s20 }
  0x38   : > { %6749 = vmatpush3.msra.mxu1 %v5377_v3  ;;  %6712 = vmatprep.subr.mxu0 %v5360_v4  ;;  %v5375_v11 = vld [vmem:[%s10016_s1 + $0x168] sm:$0xff]  ;;  %v5358_v12 = vld [vmem:[%s10016_s1 + $0xe0] sm:$0xff]  ;;  %v5357_v16 = vld [vmem:[%s10016_s1 + $0xd8] sm:$0xff]  ;;  %s6706_s26 = sshll.u32 (%p7447_p9), %s6047_s21, 3 }
  0x39   : > { %6750 = vmatprep.subr.mxu1 %v5392_v5  ;;  %6713 = vmatpush3.msra.mxu0 %v5344_v6  ;;  %v5390_v13 = vld [vmem:[%s10016_s1 + $0x1e0] sm:$0xff]  ;;  %v5389_v17 = vld [vmem:[%s10016_s1 + $0x1d8] sm:$0xff]  ;;  %v5356_v20 = vld [vmem:[%s10016_s1 + $0xd0] sm:$0xff]  ;;  %s6049_s6 = scalar_lea.vmem (%p7447_p9), %s10017_s2, %s6706_s26 }
  0x3a   : > { %6751 = vmatpush3.msra.mxu1 %v5376_v7  ;;  %6714 = vmatprep.subr.mxu0 %v5359_v8  ;;  %v5342_v14 = vld [vmem:[%s10016_s1 + $0x60] sm:$0xff]  ;;  %v5341_v18 = vld [vmem:[%s10016_s1 + $0x58] sm:$0xff]  ;;  %v5388_v21 = vld [vmem:[%s10016_s1 + $0x1d0] sm:$0xff]  ;;  %v7673_v7 = vsub.s32 %v299_v50, %v301_v51  ;;  %v10018_v8 = vmov 0  }
  0x3b   : > { %6752 = vmatprep.subr.mxu1 %v5391_v9  ;;  %v5374_v15 = vld [vmem:[%s10016_s1 + $0x160] sm:$0xff]  ;;  %6715 = vmatpush3.msra.mxu0 %v5343_v10  ;;  %v5373_v19 = vld [vmem:[%s10016_s1 + $0x158] sm:$0xff]  ;;  %v5340_v22 = vld [vmem:[%s10016_s1 + $0x50] sm:$0xff] }
  0x3c   : > { %6753 = vmatpush3.msra.mxu1 %v5375_v11  ;;  %6716 = vmatprep.subr.mxu0 %v5358_v12  ;;  %v5372_v23 = vld [vmem:[%s10016_s1 + $0x150] sm:$0xff]  ;;  %v5355_v24 = vld [vmem:[%s10016_s1 + $0xc8] sm:$0xff]  ;;  %v5354_v28 = vld [vmem:[%s10016_s1 + $0xc0] sm:$0xff] }
  0x3d   : > { %6754 = vmatprep.subr.mxu1 %v5390_v13  ;;  %6717 = vmatpush3.msra.mxu0 %v5342_v14  ;;  %v5387_v25 = vld [vmem:[%s10016_s1 + $0x1c8] sm:$0xff]  ;;  %v5386_v29 = vld [vmem:[%s10016_s1 + $0x1c0] sm:$0xff]  ;;  %v5353_v32 = vld [vmem:[%s10016_s1 + $0xb8] sm:$0xff] }
  0x3e   : > { %6755 = vmatpush3.msra.mxu1 %v5374_v15  ;;  %6718 = vmatprep.subr.mxu0 %v5357_v16  ;;  %v5339_v26 = vld [vmem:[%s10016_s1 + $0x48] sm:$0xff]  ;;  %v5338_v30 = vld [vmem:[%s10016_s1 + $0x40] sm:$0xff]  ;;  %v5385_v33 = vld [vmem:[%s10016_s1 + $0x1b8] sm:$0xff] }
  0x3f   : > { %6756 = vmatprep.subr.mxu1 %v5389_v17  ;;  %6719 = vmatpush3.msra.mxu0 %v5341_v18  ;;  %v5371_v27 = vld [vmem:[%s10016_s1 + $0x148] sm:$0xff]  ;;  %v5370_v31 = vld [vmem:[%s10016_s1 + $0x140] sm:$0xff]  ;;  %v5337_v34 = vld [vmem:[%s10016_s1 + $0x38] sm:$0xff] }
  0x40   : > { %6757 = vmatpush3.msra.mxu1 %v5373_v19  ;;  %6720 = vmatprep.subr.mxu0 %v5356_v20  ;;  %v5369_v35 = vld [vmem:[%s10016_s1 + $0x138] sm:$0xff]  ;;  %v5352_v39 = vld [vmem:[%s10016_s1 + $0xb0] sm:$0xff]  ;;  %v5351_v43 = vld [vmem:[%s10016_s1 + $0xa8] sm:$0xff] }
  0x41   : > { %6758 = vmatprep.subr.mxu1 %v5388_v21  ;;  %6721 = vmatpush3.msra.mxu0 %v5340_v22  ;;  %v5384_v40 = vld [vmem:[%s10016_s1 + $0x1b0] sm:$0xff]  ;;  %v5383_v44 = vld [vmem:[%s10016_s1 + $0x1a8] sm:$0xff]  ;;  %v5350_v47 = vld [vmem:[%s10016_s1 + $0xa0] sm:$0xff] }
  0x42   : > { %6759 = vmatpush3.msra.mxu1 %v5372_v23  ;;  %6722 = vmatprep.subr.mxu0 %v5355_v24  ;;  %v5336_v41 = vld [vmem:[%s10016_s1 + $0x30] sm:$0xff]  ;;  %v5335_v45 = vld [vmem:[%s10016_s1 + $0x28] sm:$0xff]  ;;  %v5382_v48 = vld [vmem:[%s10016_s1 + $0x1a0] sm:$0xff] }
  0x43   : > { %6760 = vmatprep.subr.mxu1 %v5387_v25  ;;  %6723 = vmatpush3.msra.mxu0 %v5339_v26  ;;  %v5368_v42 = vld [vmem:[%s10016_s1 + $0x130] sm:$0xff]  ;;  %v5367_v46 = vld [vmem:[%s10016_s1 + $0x128] sm:$0xff]  ;;  %v5334_v49 = vld [vmem:[%s10016_s1 + $0x20] sm:$0xff] }
  0x44   : > { %6761 = vmatpush3.msra.mxu1 %v5371_v27  ;;  %6724 = vmatprep.subr.mxu0 %v5354_v28  ;;  %v5366_v52 = vld [vmem:[%s10016_s1 + $0x120] sm:$0xff]  ;;  %v5349_v53 = vld [vmem:[%s10016_s1 + $0x98] sm:$0xff]  ;;  %v205_v58 = vld [vmem:[%s7484_s23 + $0x8] sm:$0xff] }
  0x45   : > { %6762 = vmatprep.subr.mxu1 %v5386_v29  ;;  %6725 = vmatpush3.msra.mxu0 %v5338_v30  ;;  %v5381_v54 = vld [vmem:[%s10016_s1 + $0x198] sm:$0xff]  ;;  %v204_v57 = vld [vmem:[%s7484_s23] sm:$0xff]  ;;  %v5348_v59 = vld [vmem:[%s10016_s1 + $0x90] sm:$0xff] }
  0x46   : > { %6763 = vmatpush3.msra.mxu1 %v5370_v31  ;;  %6726 = vmatprep.subr.mxu0 %v5353_v32  ;;  %v5333_v55 = vld [vmem:[%s10016_s1 + $0x18] sm:$0xff]  ;;  %v5380_v60 = vld [vmem:[%s10016_s1 + $0x190] sm:$0xff]  ;;  %v6249_v63 = vld [vmem:[%s7484_s23 + $0x200] sm:$0xff] }
  0x47   : > { %6764 = vmatprep.subr.mxu1 %v5385_v33  ;;  %6727 = vmatpush3.msra.mxu0 %v5337_v34  ;;  %v5365_v56 = vld [vmem:[%s10016_s1 + $0x118] sm:$0xff]  ;;  %v206_v61 = vld [vmem:[%s7484_s23 + $0x10] sm:$0xff]  ;;  %v6250_v4 = vld [vmem:[%s7484_s23 + $0x208] sm:$0xff]  ;;  %vm213_vm0 = vcmp.gt.f32.partialorder %v6249_v63, %v204_v57 }
  0x48   : > { %6765 = vmatpush3.msra.mxu1 %v5369_v35  ;;  %6728 = vmatprep.subr.mxu0 %v5352_v39  ;;  %v207_v62 = vld [vmem:[%s7484_s23 + $0x18] sm:$0xff]  ;;  %v5332_v2 = vld [vmem:[%s10016_s1 + $0x10] sm:$0xff]  ;;  %vm214_vm1 = vcmp.gt.f32.partialorder %v6250_v4, %v205_v58  ;;  %v221_v9 = vsel %vm213_vm0, 1, %v10018_v8  ;;  %v6253_v10 = vld [vmem:[%s7484_s23 + $0x400] sm:$0xff]  ;;  %v217_v15 = vsel %vm213_vm0, %v6249_v63, %v204_v57 }
  0x49   : > { %6766 = vmatprep.subr.mxu1 %v5384_v40  ;;  %6729 = vmatpush3.msra.mxu0 %v5336_v41  ;;  %v5364_v3 = vld [vmem:[%s10016_s1 + $0x110] sm:$0xff]  ;;  %v6252_v6 = vld [vmem:[%s7484_s23 + $0x218] sm:$0xff]  ;;  %v6254_v11 = vld [vmem:[%s7484_s23 + $0x408] sm:$0xff]  ;;  %v218_v16 = vsel %vm214_vm1, %v6250_v4, %v205_v58  ;;  %v222_v18 = vsel %vm214_vm1, 1, %v10018_v8  ;;  %vm230_vm4 = vcmp.gt.f32.partialorder %v6253_v10, %v217_v15 }
  0x4a   : > { %6767 = vmatpush3.msra.mxu1 %v5368_v42  ;;  %6730 = vmatprep.subr.mxu0 %v5351_v43  ;;  %v6251_v5 = vld [vmem:[%s7484_s23 + $0x210] sm:$0xff]  ;;  %vm216_vm3 = vcmp.gt.f32.partialorder %v6252_v6, %v207_v62  ;;  %v5347_v13 = vld [vmem:[%s10016_s1 + $0x88] sm:$0xff]  ;;  %v6256_v19 = vld [vmem:[%s7484_s23 + $0x418] sm:$0xff]  ;;  %vm231_vm5 = vcmp.gt.f32.partialorder %v6254_v11, %v218_v16  ;;  %v238_v26 = vsel %vm230_vm4, 2, %v221_v9  ;;  %v234_v32 = vsel %vm230_vm4, %v6253_v10, %v217_v15 }
  0x4b   : > { %6768 = vmatprep.subr.mxu1 %v5383_v44  ;;  %6731 = vmatpush3.msra.mxu0 %v5335_v45  ;;  %vm215_vm2 = vcmp.gt.f32.partialorder %v6251_v5, %v206_v61  ;;  %v6255_v12 = vld [vmem:[%s7484_s23 + $0x410] sm:$0xff]  ;;  %v5379_v14 = vld [vmem:[%s10016_s1 + $0x188] sm:$0xff]  ;;  %v220_v22 = vsel %vm216_vm3, %v6252_v6, %v207_v62  ;;  %v224_v24 = vsel %vm216_vm3, 1, %v10018_v8  ;;  %v6257_v25 = vld [vmem:[%s7484_s23 + $0x600] sm:$0xff]  ;;  %v235_v33 = vsel %vm231_vm5, %v6254_v11, %v218_v16 }
  0x4c   : > { %6769 = vmatpush3.msra.mxu1 %v5367_v46  ;;  %6732 = vmatprep.subr.mxu0 %v5350_v47  ;;  %v219_v17 = vsel %vm215_vm2, %v6251_v5, %v206_v61  ;;  %v5331_v20 = vld [vmem:[%s10016_s1 + $0x8] sm:$0xff]  ;;  %v223_v23 = vsel %vm215_vm2, 1, %v10018_v8  ;;  %vm233_vm7 = vcmp.gt.f32.partialorder %v6256_v19, %v220_v22  ;;  %v6259_v28 = vld [vmem:[%s7484_s23 + $0x610] sm:$0xff]  ;;  %v6260_v29 = vld [vmem:[%s7484_s23 + $0x618] sm:$0xff]  ;;  %v239_v35 = vsel %vm231_vm5, 2, %v222_v18 }
  0x4d   : > { %6770 = vmatprep.subr.mxu1 %v5382_v48  ;;  %6733 = vmatpush3.msra.mxu0 %v5334_v49  ;;  %v5363_v21 = vld [vmem:[%s10016_s1 + $0x108] sm:$0xff]  ;;  %vm232_vm6 = vcmp.gt.f32.partialorder %v6255_v12, %v219_v17  ;;  %v5346_v30 = vld [vmem:[%s10016_s1 + $0x80] sm:$0xff]  ;;  %v237_v39 = vsel %vm233_vm7, %v6256_v19, %v220_v22  ;;  %v241_v41 = vsel %vm233_vm7, 2, %v224_v24  ;;  %vm247_vm8 = vcmp.gt.f32.partialorder %v6257_v25, %v234_v32  ;;  %v532_v45 = vld [vmem:[%s7484_s23 + $0x30] sm:$0xff] }
  0x4e   : > { %6771 = vmatpush3.msra.mxu1 %v5366_v52  ;;  %6734 = vmatprep.subr.mxu0 %v5349_v53  ;;  %v6258_v27 = vld [vmem:[%s7484_s23 + $0x608] sm:$0xff]  ;;  %v5378_v31 = vld [vmem:[%s10016_s1 + $0x180] sm:$0xff]  ;;  %v236_v34 = vsel %vm232_vm6, %v6255_v12, %v219_v17  ;;  %v240_v40 = vsel %vm232_vm6, 2, %v223_v23  ;;  %vm250_vm11 = vcmp.gt.f32.partialorder %v6260_v29, %v237_v39  ;;  %v7722_v43 = vsel %vm247_vm8, 3, %v238_v26  ;;  %v533_v46 = vld [vmem:[%s7484_s23 + $0x38] sm:$0xff] }
  0x4f   : > { %6772 = vmatprep.subr.mxu1 %v5381_v54  ;;  %6735 = vmatpush3.msra.mxu0 %v5333_v55  ;;  %v5330_v36 = vld [vmem:[%s10016_s1] sm:$0xff]  ;;  %vm248_vm9 = vcmp.gt.f32.partialorder %v6258_v27, %v235_v33  ;;  %vm249_vm10 = vcmp.gt.f32.partialorder %v6259_v28, %v236_v34  ;;  %v531_v44 = vld [vmem:[%s7484_s23 + $0x28] sm:$0xff]  ;;  %v7731_v49 = vsel %vm250_vm11, 3, %v241_v41  ;;  %vm255_vm12 = vcmp.eq.s32.totalorder %v7722_v43, 0  ;;  %v6279_v54 = vld [vmem:[%s7484_s23 + $0x230] sm:$0xff] }
  0x50   : > { %6773 = vmatpush3.msra.mxu1 %v5365_v56  ;;  %6736 = vmatprep.subr.mxu0 %v5348_v59  ;;  %v5362_v37 = vld [vmem:[%s10016_s1 + $0x100] sm:$0xff]  ;;  %v7727_v47 = vsel %vm248_vm9, 3, %v239_v35  ;;  %v7729_v48 = vsel %vm249_vm10, 3, %v240_v40  ;;  %10132 = vst [vmem:[#allocation12_spill] sm:$0xff] %v7731_v49  ;;  %v6278_v51 = vld [vmem:[%s7484_s23 + $0x228] sm:$0xff]  ;;  %vm258_vm15 = vcmp.eq.s32.totalorder %v7731_v49, 0  ;;  %vm540_vm2 = vcmp.gt.f32.partialorder %v6279_v54, %v532_v45 }
  0x51   : > { %6774 = vmatprep.subr.mxu1 %v5380_v60  ;;  %6737 = vmatpush3.msra.mxu0 %v5332_v2  ;;  %v530_v42 = vld [vmem:[%s7484_s23 + $0x20] sm:$0xff]  ;;  %10130 = vst [vmem:[#allocation10_spill] sm:$0xff] %v7727_v47  ;;  %10131 = vst [vmem:[#allocation11_spill] sm:$0xff] %v7729_v48  ;;  %vm256_vm13 = vcmp.eq.s32.totalorder %v7727_v47, 0  ;;  %vm257_vm14 = vcmp.eq.s32.totalorder %v7729_v48, 0  ;;  %v10020_v52 = vmov 0.0   ;;  %vm539_vm1 = vcmp.gt.f32.partialorder %v6278_v51, %v531_v44 }
  0x52   : > { %6775 = vmatpush3.msra.mxu1 %v5364_v3  ;;  %6738 = vmatprep.subr.mxu0 %v5347_v13  ;;  %v6277_v50 = vld [vmem:[%s7484_s23 + $0x220] sm:$0xff]  ;;  %v6261_v53 = vsel %vm255_vm12, 1.0, %v10020_v52  ;;  %v6280_v55 = vld [vmem:[%s7484_s23 + $0x238] sm:$0xff]  ;;  %v6262_v56 = vsel %vm256_vm13, 1.0, %v10020_v52  ;;  %v6263_v57 = vsel %vm257_vm14, 1.0, %v10020_v52  ;;  %v6264_v58 = vsel %vm258_vm15, 1.0, %v10020_v52 }
  0x53   : > { %6776 = vmatprep.subr.mxu1 %v5379_v14  ;;  %6739 = vmatpush3.msra.mxu0 %v5331_v20  ;;  %v267_v59 = vrot.slane %v6261_v53, 4  ;;  %v273_v60 = vrot.slane %v6262_v56, 4  ;;  %v279_v61 = vrot.slane %v6263_v57, 4  ;;  %v285_v62 = vrot.slane %v6264_v58, 4  ;;  %v6281_v10 = vld [vmem:[%s7484_s23 + $0x420] sm:$0xff]  ;;  %v6282_v11 = vld [vmem:[%s7484_s23 + $0x428] sm:$0xff] }
  0x54   : > { %6777 = vmatpush3.msra.mxu1 %v5363_v21  ;;  %6740 = vmatprep.subr.mxu0 %v5346_v30  ;;  %vm538_vm0 = vcmp.gt.f32.partialorder %v6277_v50, %v530_v42  ;;  %vm541_vm3 = vcmp.gt.f32.partialorder %v6280_v55, %v533_v46  ;;  %v544_v6 = vsel %vm540_vm2, %v6279_v54, %v532_v45  ;;  %v6283_v16 = vld [vmem:[%s7484_s23 + $0x430] sm:$0xff]  ;;  %v6284_v17 = vld [vmem:[%s7484_s23 + $0x438] sm:$0xff]  ;;  %v547_v19 = vsel %vm539_vm1, 1, %v10018_v8  ;;  %v6285_v30 = vld [vmem:[%s7484_s23 + $0x620] sm:$0xff] }
  0x55   : > { %6778 = vmatprep.subr.mxu1 %v5378_v31  ;;  %6741 = vmatpush3.msra.mxu0 %v5330_v36  ;;  %v268_v63 = vadd.f32 %v6261_v53, %v267_v59  ;;  %v274_v2 = vadd.f32 %v6262_v56, %v273_v60  ;;  %v280_v3 = vadd.f32 %v6263_v57, %v279_v61  ;;  %v546_v15 = vsel %vm538_vm0, 1, %v10018_v8  ;;  %v6286_v36 = vld [vmem:[%s7484_s23 + $0x628] sm:$0xff]  ;;  %v850_v56 = vld [vmem:[%s7484_s23 + $0x40] sm:$0xff]  ;;  %v852_v61 = vld [vmem:[%s7484_s23 + $0x50] sm:$0xff] }
  0x56   : > { %6779 = vmatpush3.msra.mxu1 %v5362_v37  ;;  %6786 = vmatprep.subr.mxu0 %v7493_v0  ;;  %v286_v4 = vadd.f32 %v6264_v58, %v285_v62  ;;  %v542_v5 = vsel %vm538_vm0, %v6277_v50, %v530_v42  ;;  %v545_v9 = vsel %vm541_vm3, %v6280_v55, %v533_v46  ;;  %v548_v20 = vsel %vm540_vm2, 1, %v10018_v8  ;;  %v6287_v37 = vld [vmem:[%s7484_s23 + $0x630] sm:$0xff]  ;;  %v851_v60 = vld [vmem:[%s7484_s23 + $0x48] sm:$0xff]  ;;  %v6305_v62 = vld [vmem:[%s7484_s23 + $0x240] sm:$0xff] }
  0x57   : > { %6824 = vmatprep.subr.mxu1 %v7498_v1  ;;  %v269_v0 = vrot.slane %v268_v63, 2  ;;  %v543_v1 = vsel %vm539_vm1, %v6278_v51, %v531_v44  ;;  %v275_v12 = vrot.slane %v274_v2, 2  ;;  %v281_v13 = vrot.slane %v280_v3, 2  ;;  %v6288_v44 = vld [vmem:[%s7484_s23 + $0x638] sm:$0xff] }
  0x58   : > { %v287_v14 = vrot.slane %v286_v4, 2  ;;  %v549_v21 = vsel %vm541_vm3, 1, %v10018_v8  ;;  %vm554_vm4 = vcmp.gt.f32.partialorder %v6281_v10, %v542_v5  ;;  %vm555_vm5 = vcmp.gt.f32.partialorder %v6282_v11, %v543_v1 }
  0x59   : > { %v270_v18 = vadd.f32 %v269_v0, %v268_v63  ;;  %v276_v22 = vadd.f32 %v275_v12, %v274_v2  ;;  %v282_v23 = vadd.f32 %v281_v13, %v280_v3  ;;  %vm556_vm6 = vcmp.gt.f32.partialorder %v6283_v16, %v544_v6  ;;  %v6306_v2 = vld [vmem:[%s7484_s23 + $0x248] sm:$0xff]  ;;  %v6307_v3 = vld [vmem:[%s7484_s23 + $0x250] sm:$0xff]  ;;  %v853_v12 = vld [vmem:[%s7484_s23 + $0x58] sm:$0xff] }
  0x5a   : > { %v288_v24 = vadd.f32 %v287_v14, %v286_v4  ;;  %vm557_vm7 = vcmp.gt.f32.partialorder %v6284_v17, %v545_v9  ;;  %v558_v29 = vsel %vm554_vm4, %v6281_v10, %v542_v5  ;;  %vm7766_vm8 = vcmp.lt.s32.totalorder %v300_v38, 512  ;;  %v6308_v13 = vld [vmem:[%s7484_s23 + $0x258] sm:$0xff] }
  0x5b   : > { %v271_v25 = vrot.slane %v270_v18, 1  ;;  %v277_v26 = vrot.slane %v276_v22, 1  ;;  %v283_v27 = vrot.slane %v282_v23, 1  ;;  %v559_v33 = vsel %vm555_vm5, %v6282_v11, %v543_v1 }
  0x5c   : > { %v289_v28 = vrot.slane %v288_v24, 1  ;;  %v560_v34 = vsel %vm556_vm6, %v6283_v16, %v544_v6  ;;  %v561_v35 = vsel %vm557_vm7, %v6284_v17, %v545_v9  ;;  %v562_v42 = vsel %vm554_vm4, 2, %v546_v15 }
  0x5d   : > { %v272_v31 = vadd.f32 %v271_v25, %v270_v18  ;;  %v278_v39 = vadd.f32 %v277_v26, %v276_v22  ;;  %v284_v40 = vadd.f32 %v283_v27, %v282_v23  ;;  %v563_v38 = vsel %vm555_vm5, 2, %v547_v19  ;;  %v6309_v22 = vld [vmem:[%s7484_s23 + $0x440] sm:$0xff]  ;;  %v6310_v27 = vld [vmem:[%s7484_s23 + $0x448] sm:$0xff] }
  0x5e   : > { %v290_v41 = vadd.f32 %v289_v28, %v288_v24  ;;  %v564_v45 = vsel %vm556_vm6, 2, %v548_v20  ;;  %v565_v46 = vsel %vm557_vm7, 2, %v549_v21  ;;  %vm570_vm9 = vcmp.gt.f32.partialorder %v6285_v30, %v558_v29  ;;  %v6311_v28 = vld [vmem:[%s7484_s23 + $0x450] sm:$0xff] }
  0x5f   : > { %v295_v50 = vcombine.low %v272_v31, %v278_v39  ;;  %vm571_vm10 = vcmp.gt.f32.partialorder %v6286_v36, %v559_v33  ;;  %vm572_vm11 = vcmp.gt.f32.partialorder %v6287_v37, %v560_v34  ;;  %vm573_vm12 = vcmp.gt.f32.partialorder %v6288_v44, %v561_v35  ;;  %v6312_v39 = vld [vmem:[%s7484_s23 + $0x458] sm:$0xff] }
  0x60   : > { %v296_v51 = vcombine.low %v284_v40, %v290_v41  ;;  %v7780_v53 = vsel %vm570_vm9, 3, %v562_v42  ;;  %v7782_v54 = vsel %vm571_vm10, 3, %v563_v38  ;;  %v7784_v55 = vsel %vm572_vm11, 3, %v564_v45 }
  0x61   : > { %v303_v57 = vrot.slane %v295_v50, %v7673_v7  ;;  %v7789_v59 = vsel %vm573_vm12, 3, %v565_v46  ;;  %vm578_vm13 = vcmp.eq.s32.totalorder %v7780_v53, 0  ;;  %vm579_vm14 = vcmp.eq.s32.totalorder %v7782_v54, 0 }
  0x62   : > { %v310_v58 = vrot.slane %v296_v51, %v7673_v7  ;;  %vm580_vm15 = vcmp.eq.s32.totalorder %v7784_v55, 0  ;;  %vm581_vm0 = vcmp.eq.s32.totalorder %v7789_v59, 0  ;;  %v6289_v63 = vsel %vm578_vm13, 1.0, %v10020_v52  ;;  %v6313_v51 = vld [vmem:[%s7484_s23 + $0x640] sm:$0xff] }
  0x63   : > { %v6290_v5 = vsel %vm579_vm14, 1.0, %v10020_v52  ;;  %v6291_v0 = vsel %vm580_vm15, 1.0, %v10020_v52  ;;  %v6292_v1 = vsel %vm581_vm0, 1.0, %v10020_v52  ;;  %v590_v6 = vrot.slane %v6289_v63, 4 }
  0x64   : > { %v311_v4 = vcombine.low %v303_v57, %v310_v58  ;;  %v596_v9 = vrot.slane %v6290_v5, 4  ;;  %v602_v10 = vrot.slane %v6291_v0, 4  ;;  %v608_v11 = vrot.slane %v6292_v1, 4 }
  0x65   : > { %vm858_vm1 = vcmp.gt.f32.partialorder %v6305_v62, %v850_v56  ;;  %vm859_vm2 = vcmp.gt.f32.partialorder %v6306_v2, %v851_v60  ;;  %vm860_vm3 = vcmp.gt.f32.partialorder %v6307_v3, %v852_v61  ;;  %v591_v15 = vadd.f32 %v6289_v63, %v590_v6  ;;  %v6316_v63 = vld [vmem:[%s7484_s23 + $0x658] sm:$0xff] }
  0x66   : > { %v318_v14 = vrot.slane %v311_v4, %v7673_v7  ;;  %v597_v16 = vadd.f32 %v6290_v5, %v596_v9  ;;  %v603_v17 = vadd.f32 %v6291_v0, %v602_v10  ;;  %v609_v18 = vadd.f32 %v6292_v1, %v608_v11 }
  0x67   : > { %vm861_vm4 = vcmp.gt.f32.partialorder %v6308_v13, %v853_v12  ;;  %v862_v19 = vsel %vm858_vm1, %v6305_v62, %v850_v56  ;;  %v863_v20 = vsel %vm859_vm2, %v6306_v2, %v851_v60  ;;  %v864_v21 = vsel %vm860_vm3, %v6307_v3, %v852_v61  ;;  %v6314_v61 = vld [vmem:[%s7484_s23 + $0x648] sm:$0xff]  ;;  %v6315_v62 = vld [vmem:[%s7484_s23 + $0x650] sm:$0xff] }
  0x68   : > { %324 = vst.msk [vmem:[#allocation2] ss:$8 sm:$0xf] %vm7766_vm8, %v318_v14  ;;  %v592_v23 = vrot.slane %v591_v15, 2  ;;  %v598_v24 = vrot.slane %v597_v16, 2  ;;  %v604_v25 = vrot.slane %v603_v17, 2  ;;  %v865_v29 = vsel %vm861_vm4, %v6308_v13, %v853_v12 }
  0x69   : > { %v610_v26 = vrot.slane %v609_v18, 2  ;;  %v866_v30 = vsel %vm858_vm1, 1, %v10018_v8  ;;  %v867_v31 = vsel %vm859_vm2, 1, %v10018_v8  ;;  %v868_v33 = vsel %vm860_vm3, 1, %v10018_v8  ;;  %v1170_v14 = vld [vmem:[%s7484_s23 + $0x60] sm:$0xff] }
  0x6a   : > { %v593_v34 = vadd.f32 %v592_v23, %v591_v15  ;;  %v599_v35 = vadd.f32 %v598_v24, %v597_v16  ;;  %v605_v36 = vadd.f32 %v604_v25, %v603_v17  ;;  %v869_v40 = vsel %vm861_vm4, 1, %v10018_v8  ;;  %v1171_v16 = vld [vmem:[%s7484_s23 + $0x68] sm:$0xff]  ;;  %v6333_v17 = vld [vmem:[%s7484_s23 + $0x260] sm:$0xff]  ;;  %v6335_v23 = vld [vmem:[%s7484_s23 + $0x270] sm:$0xff] }
  0x6b   : > { %v611_v37 = vadd.f32 %v610_v26, %v609_v18  ;;  %vm874_vm5 = vcmp.gt.f32.partialorder %v6309_v22, %v862_v19  ;;  %vm875_vm6 = vcmp.gt.f32.partialorder %v6310_v27, %v863_v20  ;;  %vm876_vm7 = vcmp.gt.f32.partialorder %v6311_v28, %v864_v21 }
  0x6c   : > { %v594_v41 = vrot.slane %v593_v34, 1  ;;  %v600_v42 = vrot.slane %v599_v35, 1  ;;  %v606_v44 = vrot.slane %v605_v36, 1  ;;  %vm877_vm9 = vcmp.gt.f32.partialorder %v6312_v39, %v865_v29 }
  0x6d   : > { %v612_v38 = vrot.slane %v611_v37, 1  ;;  %v878_v45 = vsel %vm874_vm5, %v6309_v22, %v862_v19  ;;  %v879_v46 = vsel %vm875_vm6, %v6310_v27, %v863_v20  ;;  %v880_v50 = vsel %vm876_vm7, %v6311_v28, %v864_v21  ;;  %v1172_v21 = vld [vmem:[%s7484_s23 + $0x70] sm:$0xff]  ;;  %v6334_v22 = vld [vmem:[%s7484_s23 + $0x268] sm:$0xff]  ;;  %v1173_v28 = vld [vmem:[%s7484_s23 + $0x78] sm:$0xff] }
  0x6e   : > { %v595_v56 = vadd.f32 %v594_v41, %v593_v34  ;;  %v601_v57 = vadd.f32 %v600_v42, %v599_v35  ;;  %v607_v58 = vadd.f32 %v606_v44, %v605_v36  ;;  %v881_v2 = vsel %vm877_vm9, %v6312_v39, %v865_v29  ;;  %v6336_v29 = vld [vmem:[%s7484_s23 + $0x278] sm:$0xff] }
  0x6f   : > { %v613_v60 = vadd.f32 %v612_v38, %v611_v37  ;;  %v882_v3 = vsel %vm874_vm5, 2, %v866_v30  ;;  %v883_v4 = vsel %vm875_vm6, 2, %v867_v31  ;;  %v884_v5 = vsel %vm876_vm7, 2, %v868_v33  ;;  %v6337_v38 = vld [vmem:[%s7484_s23 + $0x460] sm:$0xff] }
  0x70   : > { %v618_v0 = vcombine.low %v595_v56, %v601_v57  ;;  %v885_v6 = vsel %vm877_vm9, 2, %v869_v40  ;;  %vm890_vm10 = vcmp.gt.f32.partialorder %v6313_v51, %v878_v45  ;;  %vm891_vm11 = vcmp.gt.f32.partialorder %v6314_v61, %v879_v46  ;;  %v6338_v56 = vld [vmem:[%s7484_s23 + $0x468] sm:$0xff]  ;;  %v6339_v57 = vld [vmem:[%s7484_s23 + $0x470] sm:$0xff] }
  0x71   : > { %v619_v1 = vcombine.low %v607_v58, %v613_v60  ;;  %vm892_vm12 = vcmp.gt.f32.partialorder %v6315_v62, %v880_v50  ;;  %vm893_vm13 = vcmp.gt.f32.partialorder %v6316_v63, %v881_v2  ;;  %v7837_v9 = vsel %vm890_vm10, 3, %v882_v3  ;;  %v6340_v63 = vld [vmem:[%s7484_s23 + $0x478] sm:$0xff] }
  0x72   : > { %v626_v10 = vrot.slane %v618_v0, %v7673_v7  ;;  %v7841_v12 = vsel %vm891_vm11, 3, %v883_v4  ;;  %v7843_v13 = vsel %vm892_vm12, 3, %v884_v5  ;;  %v7846_v15 = vsel %vm893_vm13, 3, %v885_v6 }
  0x73   : > { %v633_v11 = vrot.slane %v619_v1, %v7673_v7  ;;  %10135 = vst [vmem:[#allocation13_spill] sm:$0xff] %v7846_v15  ;;  %vm898_vm14 = vcmp.eq.s32.totalorder %v7837_v9, 0  ;;  %vm899_vm15 = vcmp.eq.s32.totalorder %v7841_v12, 0  ;;  %vm900_vm0 = vcmp.eq.s32.totalorder %v7843_v13, 0 }
  0x74   : > { %vm901_vm1 = vcmp.eq.s32.totalorder %v7846_v15, 0  ;;  %v6317_v19 = vsel %vm898_vm14, 1.0, %v10020_v52  ;;  %v6318_v20 = vsel %vm899_vm15, 1.0, %v10020_v52  ;;  %v6319_v24 = vsel %vm900_vm0, 1.0, %v10020_v52 }
  0x75   : > { %v634_v18 = vcombine.low %v626_v10, %v633_v11  ;;  %v6320_v25 = vsel %vm901_vm1, 1.0, %v10020_v52  ;;  %v910_v26 = vrot.slane %v6317_v19, 4  ;;  %v916_v27 = vrot.slane %v6318_v20, 4 }
  0x76   : > { %v922_v31 = vrot.slane %v6319_v24, 4  ;;  %v928_v33 = vrot.slane %v6320_v25, 4  ;;  %vm1178_vm2 = vcmp.gt.f32.partialorder %v6333_v17, %v1170_v14  ;;  %vm1179_vm3 = vcmp.gt.f32.partialorder %v6334_v22, %v1171_v16 }
  0x77   : > { %v641_v30 = vrot.slane %v634_v18, %v7673_v7  ;;  %v911_v34 = vadd.f32 %v6317_v19, %v910_v26  ;;  %v917_v35 = vadd.f32 %v6318_v20, %v916_v27  ;;  %vm1180_vm4 = vcmp.gt.f32.partialorder %v6335_v23, %v1172_v21  ;;  %v6341_v18 = vld [vmem:[%s7484_s23 + $0x660] sm:$0xff]  ;;  %v6342_v19 = vld [vmem:[%s7484_s23 + $0x668] sm:$0xff]  ;;  %v6343_v20 = vld [vmem:[%s7484_s23 + $0x670] sm:$0xff] }
  0x78   : > { %v923_v36 = vadd.f32 %v6319_v24, %v922_v31  ;;  %v929_v37 = vadd.f32 %v6320_v25, %v928_v33  ;;  %vm1181_vm5 = vcmp.gt.f32.partialorder %v6336_v29, %v1173_v28  ;;  %v1182_v39 = vsel %vm1178_vm2, %v6333_v17, %v1170_v14  ;;  %v6344_v25 = vld [vmem:[%s7484_s23 + $0x678] sm:$0xff] }
  0x79   : > { %644 = vst.msk [vmem:[#allocation2 + $0x1] ss:$8 sm:$0xf] %vm7766_vm8, %v641_v30  ;;  %v912_v40 = vrot.slane %v911_v34, 2  ;;  %v918_v41 = vrot.slane %v917_v35, 2  ;;  %v1183_v42 = vsel %vm1179_vm3, %v6334_v22, %v1171_v16  ;;  %v1184_v44 = vsel %vm1180_vm4, %v6335_v23, %v1172_v21 }
  0x7a   : > { %v924_v45 = vrot.slane %v923_v36, 2  ;;  %v930_v46 = vrot.slane %v929_v37, 2  ;;  %v1185_v50 = vsel %vm1181_vm5, %v6336_v29, %v1173_v28  ;;  %v1186_v51 = vsel %vm1178_vm2, 1, %v10018_v8 }
  0x7b   : > { %v913_v58 = vadd.f32 %v912_v40, %v911_v34  ;;  %v919_v60 = vadd.f32 %v918_v41, %v917_v35  ;;  %v1187_v61 = vsel %vm1179_vm3, 1, %v10018_v8  ;;  %v1188_v62 = vsel %vm1180_vm4, 1, %v10018_v8  ;;  %v1490_v35 = vld [vmem:[%s7484_s23 + $0x80] sm:$0xff]  ;;  %v1491_v40 = vld [vmem:[%s7484_s23 + $0x88] sm:$0xff]  ;;  %v1492_v41 = vld [vmem:[%s7484_s23 + $0x90] sm:$0xff] }
  0x7c   : > { %v925_v2 = vadd.f32 %v924_v45, %v923_v36  ;;  %v931_v3 = vadd.f32 %v930_v46, %v929_v37  ;;  %v1189_v4 = vsel %vm1181_vm5, 1, %v10018_v8  ;;  %vm1194_vm6 = vcmp.gt.f32.partialorder %v6337_v38, %v1182_v39  ;;  %v6363_v45 = vld [vmem:[%s7484_s23 + $0x290] sm:$0xff] }
  0x7d   : > { %v914_v5 = vrot.slane %v913_v58, 1  ;;  %v920_v0 = vrot.slane %v919_v60, 1  ;;  %vm1195_vm7 = vcmp.gt.f32.partialorder %v6338_v56, %v1183_v42  ;;  %vm1196_vm9 = vcmp.gt.f32.partialorder %v6339_v57, %v1184_v44 }
  0x7e   : > { %v926_v1 = vrot.slane %v925_v2, 1  ;;  %v932_v6 = vrot.slane %v931_v3, 1  ;;  %vm1197_vm10 = vcmp.gt.f32.partialorder %v6340_v63, %v1185_v50  ;;  %v1198_v10 = vsel %vm1194_vm6, %v6337_v38, %v1182_v39  ;;  %v6362_v38 = vld [vmem:[%s7484_s23 + $0x288] sm:$0xff] }
  0x7f   : > { %v915_v11 = vadd.f32 %v914_v5, %v913_v58  ;;  %v921_v14 = vadd.f32 %v920_v0, %v919_v60  ;;  %v1199_v16 = vsel %vm1195_vm7, %v6338_v56, %v1183_v42  ;;  %v1200_v17 = vsel %vm1196_vm9, %v6339_v57, %v1184_v44  ;;  %v6361_v42 = vld [vmem:[%s7484_s23 + $0x280] sm:$0xff] }
  0x80   : > { %v927_v21 = vadd.f32 %v926_v1, %v925_v2  ;;  %v933_v22 = vadd.f32 %v932_v6, %v931_v3  ;;  %v1201_v23 = vsel %vm1197_vm10, %v6340_v63, %v1185_v50  ;;  %v1202_v24 = vsel %vm1194_vm6, 2, %v1186_v51  ;;  %v6364_v63 = vld [vmem:[%s7484_s23 + $0x298] sm:$0xff] }
  0x81   : > { %v938_v26 = vcombine.low %v915_v11, %v921_v14  ;;  %v1203_v27 = vsel %vm1195_vm7, 2, %v1187_v61  ;;  %v1204_v28 = vsel %vm1196_vm9, 2, %v1188_v62  ;;  %v1205_v29 = vsel %vm1197_vm10, 2, %v1189_v4  ;;  %v1493_v62 = vld [vmem:[%s7484_s23 + $0x98] sm:$0xff]  ;;  %v6365_v11 = vld [vmem:[%s7484_s23 + $0x480] sm:$0xff] }
  0x82   : > { %v939_v30 = vcombine.low %v927_v21, %v933_v22  ;;  %vm1210_vm11 = vcmp.gt.f32.partialorder %v6341_v18, %v1198_v10  ;;  %vm1211_vm12 = vcmp.gt.f32.partialorder %v6342_v19, %v1199_v16  ;;  %vm1212_vm13 = vcmp.gt.f32.partialorder %v6343_v20, %v1200_v17  ;;  %v6366_v19 = vld [vmem:[%s7484_s23 + $0x488] sm:$0xff]  ;;  %v6367_v20 = vld [vmem:[%s7484_s23 + $0x490] sm:$0xff] }
  0x83   : > { %v946_v31 = vrot.slane %v938_v26, %v7673_v7  ;;  %vm1213_vm14 = vcmp.gt.f32.partialorder %v6344_v25, %v1201_v23  ;;  %v7895_v33 = vsel %vm1210_vm11, 3, %v1202_v24  ;;  %v7897_v34 = vsel %vm1211_vm12, 3, %v1203_v27 }
  0x84   : > { %v953_v36 = vrot.slane %v939_v30, %v7673_v7  ;;  %v7901_v37 = vsel %vm1212_vm13, 3, %v1204_v28  ;;  %v7903_v39 = vsel %vm1213_vm14, 3, %v1205_v29  ;;  %vm1218_vm15 = vcmp.eq.s32.totalorder %v7895_v33, 0  ;;  %v6368_v29 = vld [vmem:[%s7484_s23 + $0x498] sm:$0xff] }
  0x85   : > { %vm1219_vm0 = vcmp.eq.s32.totalorder %v7897_v34, 0  ;;  %vm1220_vm1 = vcmp.eq.s32.totalorder %v7901_v37, 0  ;;  %vm1221_vm2 = vcmp.eq.s32.totalorder %v7903_v39, 0  ;;  %v6345_v44 = vsel %vm1218_vm15, 1.0, %v10020_v52 }
  0x86   : > { %v954_v46 = vcombine.low %v946_v31, %v953_v36  ;;  %v6346_v50 = vsel %vm1219_vm0, 1.0, %v10020_v52  ;;  %v6347_v51 = vsel %vm1220_vm1, 1.0, %v10020_v52  ;;  %v6348_v56 = vsel %vm1221_vm2, 1.0, %v10020_v52 }
  0x87   : > { %v1230_v57 = vrot.slane %v6345_v44, 4  ;;  %v1236_v58 = vrot.slane %v6346_v50, 4  ;;  %v1242_v60 = vrot.slane %v6347_v51, 4  ;;  %v1248_v61 = vrot.slane %v6348_v56, 4 }
  0x88   : > { %v961_v2 = vrot.slane %v954_v46, %v7673_v7  ;;  %vm1498_vm3 = vcmp.gt.f32.partialorder %v6361_v42, %v1490_v35  ;;  %vm1499_vm4 = vcmp.gt.f32.partialorder %v6362_v38, %v1491_v40  ;;  %vm1500_vm5 = vcmp.gt.f32.partialorder %v6363_v45, %v1492_v41 }
  0x89   : > { %v1231_v3 = vadd.f32 %v6345_v44, %v1230_v57  ;;  %v1237_v4 = vadd.f32 %v6346_v50, %v1236_v58  ;;  %v1243_v5 = vadd.f32 %v6347_v51, %v1242_v60  ;;  %v1249_v0 = vadd.f32 %v6348_v56, %v1248_v61  ;;  %v6370_v56 = vld [vmem:[%s7484_s23 + $0x688] sm:$0xff]  ;;  %v6371_v57 = vld [vmem:[%s7484_s23 + $0x690] sm:$0xff]  ;;  %v6372_v58 = vld [vmem:[%s7484_s23 + $0x698] sm:$0xff] }
  0x8a   : > { %964 = vst.msk [vmem:[#allocation2 + $0x2] ss:$8 sm:$0xf] %vm7766_vm8, %v961_v2  ;;  %vm1501_vm6 = vcmp.gt.f32.partialorder %v6364_v63, %v1493_v62  ;;  %v1502_v1 = vsel %vm1498_vm3, %v6361_v42, %v1490_v35  ;;  %v1503_v6 = vsel %vm1499_vm4, %v6362_v38, %v1491_v40  ;;  %v1504_v10 = vsel %vm1500_vm5, %v6363_v45, %v1492_v41  ;;  %v6369_v38 = vld [vmem:[%s7484_s23 + $0x680] sm:$0xff] }
  0x8b   : > { %v1232_v14 = vrot.slane %v1231_v3, 2  ;;  %v1238_v16 = vrot.slane %v1237_v4, 2  ;;  %v1244_v17 = vrot.slane %v1243_v5, 2  ;;  %v1250_v18 = vrot.slane %v1249_v0, 2 }
  0x8c   : > { %v1505_v21 = vsel %vm1501_vm6, %v6364_v63, %v1493_v62  ;;  %v1506_v22 = vsel %vm1498_vm3, 1, %v10018_v8  ;;  %v1507_v23 = vsel %vm1499_vm4, 1, %v10018_v8  ;;  %v1508_v24 = vsel %vm1500_vm5, 1, %v10018_v8 }
  0x8d   : > { %v1233_v25 = vadd.f32 %v1232_v14, %v1231_v3  ;;  %v1239_v26 = vadd.f32 %v1238_v16, %v1237_v4  ;;  %v1245_v27 = vadd.f32 %v1244_v17, %v1243_v5  ;;  %v1251_v28 = vadd.f32 %v1250_v18, %v1249_v0  ;;  %v1811_v16 = vld [vmem:[%s7484_s23 + $0xa8] sm:$0xff]  ;;  %v6389_v17 = vld [vmem:[%s7484_s23 + $0x2a0] sm:$0xff] }
  0x8e   : > { %v1509_v30 = vsel %vm1501_vm6, 1, %v10018_v8  ;;  %vm1514_vm7 = vcmp.gt.f32.partialorder %v6365_v11, %v1502_v1  ;;  %vm1515_vm9 = vcmp.gt.f32.partialorder %v6366_v19, %v1503_v6  ;;  %vm1516_vm10 = vcmp.gt.f32.partialorder %v6367_v20, %v1504_v10 }
  0x8f   : > { %v1234_v31 = vrot.slane %v1233_v25, 1  ;;  %v1240_v35 = vrot.slane %v1239_v26, 1  ;;  %v1246_v36 = vrot.slane %v1245_v27, 1  ;;  %v1252_v40 = vrot.slane %v1251_v28, 1 }
  0x90   : > { %vm1517_vm11 = vcmp.gt.f32.partialorder %v6368_v29, %v1505_v21  ;;  %v1518_v41 = vsel %vm1514_vm7, %v6365_v11, %v1502_v1  ;;  %v1519_v42 = vsel %vm1515_vm9, %v6366_v19, %v1503_v6  ;;  %v1520_v44 = vsel %vm1516_vm10, %v6367_v20, %v1504_v10  ;;  %v1810_v11 = vld [vmem:[%s7484_s23 + $0xa0] sm:$0xff] }
  0x91   : > { %v1235_v45 = vadd.f32 %v1234_v31, %v1233_v25  ;;  %v1241_v46 = vadd.f32 %v1240_v35, %v1239_v26  ;;  %v1247_v50 = vadd.f32 %v1246_v36, %v1245_v27  ;;  %v1253_v51 = vadd.f32 %v1252_v40, %v1251_v28  ;;  %v1813_v28 = vld [vmem:[%s7484_s23 + $0xb8] sm:$0xff] }
  0x92   : > { %v1521_v60 = vsel %vm1517_vm11, %v6368_v29, %v1505_v21  ;;  %v1522_v61 = vsel %vm1514_vm7, 2, %v1506_v22  ;;  %v1523_v62 = vsel %vm1515_vm9, 2, %v1507_v23  ;;  %v1524_v63 = vsel %vm1516_vm10, 2, %v1508_v24  ;;  %v1812_v21 = vld [vmem:[%s7484_s23 + $0xb0] sm:$0xff]  ;;  %v6390_v22 = vld [vmem:[%s7484_s23 + $0x2a8] sm:$0xff]  ;;  %v6392_v29 = vld [vmem:[%s7484_s23 + $0x2b8] sm:$0xff] }
  0x93   : > { %v1258_v2 = vcombine.low %v1235_v45, %v1241_v46  ;;  %v1259_v3 = vcombine.low %v1247_v50, %v1253_v51  ;;  %v1525_v4 = vsel %vm1517_vm11, 2, %v1509_v30  ;;  %vm1530_vm12 = vcmp.gt.f32.partialorder %v6369_v38, %v1518_v41  ;;  %v6391_v23 = vld [vmem:[%s7484_s23 + $0x2b0] sm:$0xff]  ;;  %v6393_v51 = vld [vmem:[%s7484_s23 + $0x4a0] sm:$0xff] }
  0x94   : > { %vm1531_vm13 = vcmp.gt.f32.partialorder %v6370_v56, %v1519_v42  ;;  %vm1532_vm14 = vcmp.gt.f32.partialorder %v6371_v57, %v1520_v44  ;;  %vm1533_vm15 = vcmp.gt.f32.partialorder %v6372_v58, %v1521_v60  ;;  %v7951_v5 = vsel %vm1530_vm12, 3, %v1522_v61  ;;  %v6394_v61 = vld [vmem:[%s7484_s23 + $0x4a8] sm:$0xff] }
  0x95   : > { %v1266_v0 = vrot.slane %v1258_v2, %v7673_v7  ;;  %v1273_v1 = vrot.slane %v1259_v3, %v7673_v7  ;;  %v7955_v6 = vsel %vm1531_vm13, 3, %v1523_v62  ;;  %v7957_v10 = vsel %vm1532_vm14, 3, %v1524_v63  ;;  %v6395_v62 = vld [vmem:[%s7484_s23 + $0x4b0] sm:$0xff] }
  0x96   : > { %v7960_v14 = vsel %vm1533_vm15, 3, %v1525_v4  ;;  %vm1538_vm0 = vcmp.eq.s32.totalorder %v7951_v5, 0  ;;  %vm1539_vm1 = vcmp.eq.s32.totalorder %v7955_v6, 0  ;;  %vm1540_vm2 = vcmp.eq.s32.totalorder %v7957_v10, 0 }
  0x97   : > { %v1274_v18 = vcombine.low %v1266_v0, %v1273_v1  ;;  %vm1541_vm3 = vcmp.eq.s32.totalorder %v7960_v14, 0  ;;  %v6373_v19 = vsel %vm1538_vm0, 1.0, %v10020_v52  ;;  %v6374_v20 = vsel %vm1539_vm1, 1.0, %v10020_v52  ;;  %v6396_v0 = vld [vmem:[%s7484_s23 + $0x4b8] sm:$0xff] }
  0x98   : > { %v6375_v24 = vsel %vm1540_vm2, 1.0, %v10020_v52  ;;  %v6376_v25 = vsel %vm1541_vm3, 1.0, %v10020_v52  ;;  %v1550_v26 = vrot.slane %v6373_v19, 4  ;;  %v1556_v27 = vrot.slane %v6374_v20, 4 }
  0x99   : > { %v1281_v30 = vrot.slane %v1274_v18, %v7673_v7  ;;  %v1562_v31 = vrot.slane %v6375_v24, 4  ;;  %v1568_v35 = vrot.slane %v6376_v25, 4  ;;  %vm1818_vm4 = vcmp.gt.f32.partialorder %v6389_v17, %v1810_v11 }
  0x9a   : > { %v1551_v36 = vadd.f32 %v6373_v19, %v1550_v26  ;;  %v1557_v40 = vadd.f32 %v6374_v20, %v1556_v27  ;;  %vm1819_vm5 = vcmp.gt.f32.partialorder %v6390_v22, %v1811_v16  ;;  %vm1820_vm6 = vcmp.gt.f32.partialorder %v6391_v23, %v1812_v21  ;;  %v6397_v26 = vld [vmem:[%s7484_s23 + $0x6a0] sm:$0xff]  ;;  %v6398_v27 = vld [vmem:[%s7484_s23 + $0x6a8] sm:$0xff] }
  0x9b   : > { %1284 = vst.msk [vmem:[#allocation2 + $0x3] ss:$8 sm:$0xf] %vm7766_vm8, %v1281_v30  ;;  %v1563_v41 = vadd.f32 %v6375_v24, %v1562_v31  ;;  %v1569_v42 = vadd.f32 %v6376_v25, %v1568_v35  ;;  %vm1821_vm7 = vcmp.gt.f32.partialorder %v6392_v29, %v1813_v28  ;;  %v1822_v44 = vsel %vm1818_vm4, %v6389_v17, %v1810_v11 }
  0x9c   : > { %v1552_v38 = vrot.slane %v1551_v36, 2  ;;  %v1558_v45 = vrot.slane %v1557_v40, 2  ;;  %v1823_v46 = vsel %vm1819_vm5, %v6390_v22, %v1811_v16  ;;  %v1824_v50 = vsel %vm1820_vm6, %v6391_v23, %v1812_v21 }
  0x9d   : > { %v1564_v56 = vrot.slane %v1563_v41, 2  ;;  %v1570_v57 = vrot.slane %v1569_v42, 2  ;;  %v1825_v58 = vsel %vm1821_vm7, %v6392_v29, %v1813_v28  ;;  %v1826_v60 = vsel %vm1818_vm4, 1, %v10018_v8  ;;  %v6399_v28 = vld [vmem:[%s7484_s23 + $0x6b0] sm:$0xff] }
  0x9e   : > { %v1553_v63 = vadd.f32 %v1552_v38, %v1551_v36  ;;  %v1559_v2 = vadd.f32 %v1558_v45, %v1557_v40  ;;  %v1827_v3 = vsel %vm1819_vm5, 1, %v10018_v8  ;;  %v1828_v4 = vsel %vm1820_vm6, 1, %v10018_v8  ;;  %v6400_v36 = vld [vmem:[%s7484_s23 + $0x6b8] sm:$0xff] }
  0x9f   : > { %v1565_v1 = vadd.f32 %v1564_v56, %v1563_v41  ;;  %v1571_v18 = vadd.f32 %v1570_v57, %v1569_v42  ;;  %v1829_v19 = vsel %vm1821_vm7, 1, %v10018_v8  ;;  %vm1834_vm9 = vcmp.gt.f32.partialorder %v6393_v51, %v1822_v44 }
  0xa0   : > { %v1554_v11 = vrot.slane %v1553_v63, 1  ;;  %v1560_v17 = vrot.slane %v1559_v2, 1  ;;  %vm1835_vm10 = vcmp.gt.f32.partialorder %v6394_v61, %v1823_v46  ;;  %vm1836_vm11 = vcmp.gt.f32.partialorder %v6395_v62, %v1824_v50 }
  0xa1   : > { %v1566_v16 = vrot.slane %v1565_v1, 1  ;;  %v1572_v20 = vrot.slane %v1571_v18, 1  ;;  %vm1837_vm12 = vcmp.gt.f32.partialorder %v6396_v0, %v1825_v58  ;;  %v1838_v21 = vsel %vm1834_vm9, %v6393_v51, %v1822_v44 }
  0xa2   : > { %v1555_v22 = vadd.f32 %v1554_v11, %v1553_v63  ;;  %v1561_v23 = vadd.f32 %v1560_v17, %v1559_v2  ;;  %v1839_v24 = vsel %vm1835_vm10, %v6394_v61, %v1823_v46  ;;  %v1840_v25 = vsel %vm1836_vm11, %v6395_v62, %v1824_v50  ;;  %v2130_v50 = vld [vmem:[%s7484_s23 + $0xc0] sm:$0xff]  ;;  %v2132_v61 = vld [vmem:[%s7484_s23 + $0xd0] sm:$0xff]  ;;  %v6418_v2 = vld [vmem:[%s7484_s23 + $0x2c8] sm:$0xff] }
  0xa3   : > { %v1567_v29 = vadd.f32 %v1566_v16, %v1565_v1  ;;  %v1573_v30 = vadd.f32 %v1572_v20, %v1571_v18  ;;  %v1841_v31 = vsel %vm1837_vm12, %v6396_v0, %v1825_v58  ;;  %v1842_v35 = vsel %vm1834_vm9, 2, %v1826_v60  ;;  %v2131_v60 = vld [vmem:[%s7484_s23 + $0xc8] sm:$0xff]  ;;  %v6417_v62 = vld [vmem:[%s7484_s23 + $0x2c0] sm:$0xff]  ;;  %v2133_v20 = vld [vmem:[%s7484_s23 + $0xd8] sm:$0xff] }
  0xa4   : > { %v1578_v40 = vcombine.low %v1555_v22, %v1561_v23  ;;  %v1843_v41 = vsel %vm1835_vm10, 2, %v1827_v3  ;;  %v1844_v42 = vsel %vm1836_vm11, 2, %v1828_v4  ;;  %v1845_v38 = vsel %vm1837_vm12, 2, %v1829_v19  ;;  %v6419_v3 = vld [vmem:[%s7484_s23 + $0x2d0] sm:$0xff] }
  0xa5   : > { %v1579_v45 = vcombine.low %v1567_v29, %v1573_v30  ;;  %vm1850_vm13 = vcmp.gt.f32.partialorder %v6397_v26, %v1838_v21  ;;  %vm1851_vm14 = vcmp.gt.f32.partialorder %v6398_v27, %v1839_v24  ;;  %vm1852_vm15 = vcmp.gt.f32.partialorder %v6399_v28, %v1840_v25  ;;  %v6420_v21 = vld [vmem:[%s7484_s23 + $0x2d8] sm:$0xff]  ;;  %v6421_v30 = vld [vmem:[%s7484_s23 + $0x4c0] sm:$0xff] }
  0xa6   : > { %v1586_v56 = vrot.slane %v1578_v40, %v7673_v7  ;;  %vm1853_vm0 = vcmp.gt.f32.partialorder %v6400_v36, %v1841_v31  ;;  %v8009_v44 = vsel %vm1850_vm13, 3, %v1842_v35  ;;  %v8011_v46 = vsel %vm1851_vm14, 3, %v1843_v41  ;;  %v6422_v41 = vld [vmem:[%s7484_s23 + $0x4c8] sm:$0xff] }
  0xa7   : > { %v1593_v51 = vrot.slane %v1579_v45, %v7673_v7  ;;  %v8015_v57 = vsel %vm1852_vm15, 3, %v1844_v42  ;;  %v8017_v58 = vsel %vm1853_vm0, 3, %v1845_v38  ;;  %vm1858_vm1 = vcmp.eq.s32.totalorder %v8009_v44, 0  ;;  %v6423_v42 = vld [vmem:[%s7484_s23 + $0x4d0] sm:$0xff] }
  0xa8   : > { %10136 = vst [vmem:[#allocation14_spill] sm:$0xff] %v8015_v57  ;;  %10137 = vst [vmem:[#allocation15_spill] sm:$0xff] %v8017_v58  ;;  %vm1859_vm2 = vcmp.eq.s32.totalorder %v8011_v46, 0  ;;  %vm1860_vm3 = vcmp.eq.s32.totalorder %v8015_v57, 0  ;;  %vm1861_vm4 = vcmp.eq.s32.totalorder %v8017_v58, 0  ;;  %v6401_v63 = vsel %vm1858_vm1, 1.0, %v10020_v52 }
  0xa9   : > { %v1594_v4 = vcombine.low %v1586_v56, %v1593_v51  ;;  %v6402_v0 = vsel %vm1859_vm2, 1.0, %v10020_v52  ;;  %v6403_v1 = vsel %vm1860_vm3, 1.0, %v10020_v52  ;;  %v6404_v18 = vsel %vm1861_vm4, 1.0, %v10020_v52 }
  0xaa   : > { %v1870_v19 = vrot.slane %v6401_v63, 4  ;;  %v1876_v11 = vrot.slane %v6402_v0, 4  ;;  %v1882_v17 = vrot.slane %v6403_v1, 4  ;;  %v1888_v16 = vrot.slane %v6404_v18, 4 }
  0xab   : > { %v1601_v22 = vrot.slane %v1594_v4, %v7673_v7  ;;  %vm2138_vm5 = vcmp.gt.f32.partialorder %v6417_v62, %v2130_v50  ;;  %vm2139_vm6 = vcmp.gt.f32.partialorder %v6418_v2, %v2131_v60  ;;  %vm2140_vm7 = vcmp.gt.f32.partialorder %v6419_v3, %v2132_v61 }
  0xac   : > { %v1871_v23 = vadd.f32 %v6401_v63, %v1870_v19  ;;  %v1877_v24 = vadd.f32 %v6402_v0, %v1876_v11  ;;  %v1883_v25 = vadd.f32 %v6403_v1, %v1882_v17  ;;  %v1889_v26 = vadd.f32 %v6404_v18, %v1888_v16  ;;  %v6424_v18 = vld [vmem:[%s7484_s23 + $0x4d8] sm:$0xff]  ;;  %v6425_v17 = vld [vmem:[%s7484_s23 + $0x6c0] sm:$0xff] }
  0xad   : > { %1604 = vst.msk [vmem:[#allocation2 + $0x4] ss:$8 sm:$0xf] %vm7766_vm8, %v1601_v22  ;;  %vm2141_vm9 = vcmp.gt.f32.partialorder %v6420_v21, %v2133_v20  ;;  %v2142_v27 = vsel %vm2138_vm5, %v6417_v62, %v2130_v50  ;;  %v2143_v28 = vsel %vm2139_vm6, %v6418_v2, %v2131_v60  ;;  %v2144_v29 = vsel %vm2140_vm7, %v6419_v3, %v2132_v61 }
  0xae   : > { %v1872_v31 = vrot.slane %v1871_v23, 2  ;;  %v1878_v35 = vrot.slane %v1877_v24, 2  ;;  %v1884_v36 = vrot.slane %v1883_v25, 2  ;;  %v1890_v40 = vrot.slane %v1889_v26, 2 }
  0xaf   : > { %v2145_v38 = vsel %vm2141_vm9, %v6420_v21, %v2133_v20  ;;  %v2146_v45 = vsel %vm2138_vm5, 1, %v10018_v8  ;;  %v2147_v56 = vsel %vm2139_vm6, 1, %v10018_v8  ;;  %v2148_v51 = vsel %vm2140_vm7, 1, %v10018_v8 }
  0xb0   : > { %v1873_v63 = vadd.f32 %v1872_v31, %v1871_v23  ;;  %v1879_v4 = vadd.f32 %v1878_v35, %v1877_v24  ;;  %v1885_v0 = vadd.f32 %v1884_v36, %v1883_v25  ;;  %v1891_v1 = vadd.f32 %v1890_v40, %v1889_v26  ;;  %v6426_v23 = vld [vmem:[%s7484_s23 + $0x6c8] sm:$0xff]  ;;  %v6427_v24 = vld [vmem:[%s7484_s23 + $0x6d0] sm:$0xff]  ;;  %v6428_v25 = vld [vmem:[%s7484_s23 + $0x6d8] sm:$0xff] }
  0xb1   : > { %v2149_v19 = vsel %vm2141_vm9, 1, %v10018_v8  ;;  %vm2154_vm10 = vcmp.gt.f32.partialorder %v6421_v30, %v2142_v27  ;;  %vm2155_vm11 = vcmp.gt.f32.partialorder %v6422_v41, %v2143_v28  ;;  %vm2156_vm12 = vcmp.gt.f32.partialorder %v6423_v42, %v2144_v29 }
  0xb2   : > { %v1874_v50 = vrot.slane %v1873_v63, 1  ;;  %v1880_v60 = vrot.slane %v1879_v4, 1  ;;  %v1886_v62 = vrot.slane %v1885_v0, 1  ;;  %v1892_v61 = vrot.slane %v1891_v1, 1 }
  0xb3   : > { %vm2157_vm13 = vcmp.gt.f32.partialorder %v6424_v18, %v2145_v38  ;;  %v2158_v2 = vsel %vm2154_vm10, %v6421_v30, %v2142_v27  ;;  %v2159_v3 = vsel %vm2155_vm11, %v6422_v41, %v2143_v28  ;;  %v2160_v11 = vsel %vm2156_vm12, %v6423_v42, %v2144_v29  ;;  %v2450_v41 = vld [vmem:[%s7484_s23 + $0xe0] sm:$0xff] }
  0xb4   : > { %v1875_v16 = vadd.f32 %v1874_v50, %v1873_v63  ;;  %v1881_v20 = vadd.f32 %v1880_v60, %v1879_v4  ;;  %v1887_v21 = vadd.f32 %v1886_v62, %v1885_v0  ;;  %v1893_v22 = vadd.f32 %v1892_v61, %v1891_v1  ;;  %v2452_v0 = vld [vmem:[%s7484_s23 + $0xf0] sm:$0xff]  ;;  %v6446_v1 = vld [vmem:[%s7484_s23 + $0x2e8] sm:$0xff]  ;;  %v2453_v61 = vld [vmem:[%s7484_s23 + $0xf8] sm:$0xff] }
  0xb5   : > { %v2161_v26 = vsel %vm2157_vm13, %v6424_v18, %v2145_v38  ;;  %v2162_v31 = vsel %vm2154_vm10, 2, %v2146_v45  ;;  %v2163_v35 = vsel %vm2155_vm11, 2, %v2147_v56  ;;  %v2164_v36 = vsel %vm2156_vm12, 2, %v2148_v51  ;;  %v2451_v38 = vld [vmem:[%s7484_s23 + $0xe8] sm:$0xff]  ;;  %v6445_v45 = vld [vmem:[%s7484_s23 + $0x2e0] sm:$0xff]  ;;  %v6447_v18 = vld [vmem:[%s7484_s23 + $0x2f0] sm:$0xff] }
  0xb6   : > { %v1898_v40 = vcombine.low %v1875_v16, %v1881_v20  ;;  %v1899_v8 = vcombine.low %v1887_v21, %v1893_v22  ;;  %v2165_v63 = vsel %vm2157_vm13, 2, %v2149_v19  ;;  %vm2170_vm14 = vcmp.gt.f32.partialorder %v6425_v17, %v2158_v2  ;;  %v6448_v2 = vld [vmem:[%s7484_s23 + $0x2f8] sm:$0xff] }
  0xb7   : > { %vm2171_vm15 = vcmp.gt.f32.partialorder %v6426_v23, %v2159_v3  ;;  %vm2172_vm0 = vcmp.gt.f32.partialorder %v6427_v24, %v2160_v11  ;;  %vm2173_vm1 = vcmp.gt.f32.partialorder %v6428_v25, %v2161_v26  ;;  %v8065_v4 = vsel %vm2170_vm14, 3, %v2162_v31 }
  0xb8   : > { %10138 = vst [vmem:[#allocation16_spill] sm:$0xff] %v8065_v4  ;;  %v1906_v27 = vrot.slane %v1898_v40, %v7673_v7  ;;  %v1913_v28 = vrot.slane %v1899_v8, %v7673_v7  ;;  %v8069_v29 = vsel %vm2171_vm15, 3, %v2163_v35  ;;  %v8071_v30 = vsel %vm2172_vm0, 3, %v2164_v36  ;;  %v6449_v35 = vld [vmem:[%s7484_s23 + $0x4e0] sm:$0xff] }
  0xb9   : > { %10139 = vst [vmem:[#allocation17_spill] sm:$0xff] %v8069_v29  ;;  %10140 = vst [vmem:[#allocation18_spill] sm:$0xff] %v8071_v30  ;;  %v8074_v42 = vsel %vm2173_vm1, 3, %v2165_v63  ;;  %vm2178_vm2 = vcmp.eq.s32.totalorder %v8065_v4, 0  ;;  %vm2179_vm3 = vcmp.eq.s32.totalorder %v8069_v29, 0  ;;  %vm2180_vm4 = vcmp.eq.s32.totalorder %v8071_v30, 0 }
  0xba   : > { %10141 = vst [vmem:[#allocation19_spill] sm:$0xff] %v8074_v42  ;;  %v1914_v56 = vcombine.low %v1906_v27, %v1913_v28  ;;  %vm2181_vm5 = vcmp.eq.s32.totalorder %v8074_v42, 0  ;;  %v6429_v8 = vsel %vm2178_vm2, 1.0, %v10020_v52  ;;  %v6430_v51 = vsel %vm2179_vm3, 1.0, %v10020_v52 }
  0xbb   : > { %v6431_v19 = vsel %vm2180_vm4, 1.0, %v10020_v52  ;;  %v6432_v50 = vsel %vm2181_vm5, 1.0, %v10020_v52  ;;  %v2190_v60 = vrot.slane %v6429_v8, 4  ;;  %v2196_v62 = vrot.slane %v6430_v51, 4  ;;  %v6456_v52 = vld [vmem:[%s7484_s23 + $0x6f8] sm:$0xff] }
  0xbc   : > { %v1921_v3 = vrot.slane %v1914_v56, %v7673_v7  ;;  %v2202_v11 = vrot.slane %v6431_v19, 4  ;;  %v2208_v17 = vrot.slane %v6432_v50, 4  ;;  %vm2458_vm6 = vcmp.gt.f32.partialorder %v6445_v45, %v2450_v41  ;;  %v6450_v56 = vld [vmem:[%s7484_s23 + $0x4e8] sm:$0xff] }
  0xbd   : > { %v2191_v16 = vadd.f32 %v6429_v8, %v2190_v60  ;;  %v2197_v20 = vadd.f32 %v6430_v51, %v2196_v62  ;;  %vm2459_vm7 = vcmp.gt.f32.partialorder %v6446_v1, %v2451_v38  ;;  %vm2460_vm9 = vcmp.gt.f32.partialorder %v6447_v18, %v2452_v0  ;;  %v6451_v8 = vld [vmem:[%s7484_s23 + $0x4f0] sm:$0xff]  ;;  %v6452_v62 = vld [vmem:[%s7484_s23 + $0x4f8] sm:$0xff] }
  0xbe   : > { %1924 = vst.msk [vmem:[#allocation2 + $0x5] ss:$8 sm:$0xf] %vm7766_vm8, %v1921_v3  ;;  %v2203_v21 = vadd.f32 %v6431_v19, %v2202_v11  ;;  %v2209_v22 = vadd.f32 %v6432_v50, %v2208_v17  ;;  %vm2461_vm10 = vcmp.gt.f32.partialorder %v6448_v2, %v2453_v61  ;;  %v2462_v23 = vsel %vm2458_vm6, %v6445_v45, %v2450_v41 }
  0xbf   : > { %v2192_v24 = vrot.slane %v2191_v16, 2  ;;  %v2198_v25 = vrot.slane %v2197_v20, 2  ;;  %v2463_v26 = vsel %vm2459_vm7, %v6446_v1, %v2451_v38  ;;  %v2464_v31 = vsel %vm2460_vm9, %v6447_v18, %v2452_v0 }
  0xc0   : > { %v2204_v36 = vrot.slane %v2203_v21, 2  ;;  %v2210_v40 = vrot.slane %v2209_v22, 2  ;;  %v2465_v63 = vsel %vm2461_vm10, %v6448_v2, %v2453_v61  ;;  %v10142_v27 = vmov 0   ;;  %v6453_v2 = vld [vmem:[%s7484_s23 + $0x6e0] sm:$0xff] }
  0xc1   : > { %v2466_v28 = vsel %vm2458_vm6, 1, %v10142_v27  ;;  %v2193_v51 = vadd.f32 %v2192_v24, %v2191_v16  ;;  %v2199_v19 = vadd.f32 %v2198_v25, %v2197_v20  ;;  %v2467_v50 = vsel %vm2459_vm7, 1, %v10142_v27 }
  0xc2   : > { %v2468_v60 = vsel %vm2460_vm9, 1, %v10142_v27  ;;  %v2205_v3 = vadd.f32 %v2204_v36, %v2203_v21  ;;  %v2211_v11 = vadd.f32 %v2210_v40, %v2209_v22  ;;  %v2469_v17 = vsel %vm2461_vm10, 1, %v10142_v27  ;;  %v6454_v21 = vld [vmem:[%s7484_s23 + $0x6e8] sm:$0xff]  ;;  %v6455_v22 = vld [vmem:[%s7484_s23 + $0x6f0] sm:$0xff] }
  0xc3   : > { %vm2474_vm11 = vcmp.gt.f32.partialorder %v6449_v35, %v2462_v23  ;;  %v2194_v41 = vrot.slane %v2193_v51, 1  ;;  %v2200_v45 = vrot.slane %v2199_v19, 1  ;;  %vm2475_vm12 = vcmp.gt.f32.partialorder %v6450_v56, %v2463_v26 }
  0xc4   : > { %vm2476_vm13 = vcmp.gt.f32.partialorder %v6451_v8, %v2464_v31  ;;  %v2206_v38 = vrot.slane %v2205_v3, 1  ;;  %v2212_v1 = vrot.slane %v2211_v11, 1  ;;  %vm2477_vm14 = vcmp.gt.f32.partialorder %v6452_v62, %v2465_v63 }
  0xc5   : > { %v2478_v0 = vsel %vm2474_vm11, %v6449_v35, %v2462_v23  ;;  %v2195_v18 = vadd.f32 %v2194_v41, %v2193_v51  ;;  %v2201_v16 = vadd.f32 %v2200_v45, %v2199_v19  ;;  %v2479_v20 = vsel %vm2475_vm12, %v6450_v56, %v2463_v26  ;;  %v2771_v56 = vld [vmem:[%s7484_s23 + $0x108] sm:$0xff] }
  0xc6   : > { %v2480_v61 = vsel %vm2476_vm13, %v6451_v8, %v2464_v31  ;;  %v2207_v24 = vadd.f32 %v2206_v38, %v2205_v3  ;;  %v2213_v25 = vadd.f32 %v2212_v1, %v2211_v11  ;;  %v2481_v36 = vsel %vm2477_vm14, %v6452_v62, %v2465_v63  ;;  %v2770_v31 = vld [vmem:[%s7484_s23 + $0x100] sm:$0xff]  ;;  %v2772_v8 = vld [vmem:[%s7484_s23 + $0x110] sm:$0xff] }
  0xc7   : > { %v2482_v40 = vsel %vm2474_vm11, 2, %v2466_v28  ;;  %v2218_v42 = vcombine.low %v2195_v18, %v2201_v16  ;;  %v2483_v30 = vsel %vm2475_vm12, 2, %v2467_v50  ;;  %v2484_v51 = vsel %vm2476_vm13, 2, %v2468_v60  ;;  %v6474_v50 = vld [vmem:[%s7484_s23 + $0x308] sm:$0xff]  ;;  %v6475_v60 = vld [vmem:[%s7484_s23 + $0x310] sm:$0xff]  ;;  %v2773_v16 = vld [vmem:[%s7484_s23 + $0x118] sm:$0xff] }
  0xc8   : > { %v2485_v19 = vsel %vm2477_vm14, 2, %v2469_v17  ;;  %v2219_v41 = vcombine.low %v2207_v24, %v2213_v25  ;;  %vm2490_vm15 = vcmp.gt.f32.partialorder %v6453_v2, %v2478_v0  ;;  %vm2491_vm0 = vcmp.gt.f32.partialorder %v6454_v21, %v2479_v20  ;;  %v6476_v20 = vld [vmem:[%s7484_s23 + $0x318] sm:$0xff] }
  0xc9   : > { %vm2492_vm1 = vcmp.gt.f32.partialorder %v6455_v22, %v2480_v61  ;;  %v2226_v3 = vrot.slane %v2218_v42, %v7673_v7  ;;  %vm2493_vm2 = vcmp.gt.f32.partialorder %v6456_v52, %v2481_v36  ;;  %v8123_v23 = vsel %vm2490_vm15, 3, %v2482_v40  ;;  %v6473_v42 = vld [vmem:[%s7484_s23 + $0x300] sm:$0xff] }
  0xca   : > { %10143 = vst [vmem:[#allocation20_spill] sm:$0xff] %v8123_v23  ;;  %v8125_v26 = vsel %vm2491_vm0, 3, %v2483_v30  ;;  %v2233_v35 = vrot.slane %v2219_v41, %v7673_v7  ;;  %v8129_v63 = vsel %vm2492_vm1, 3, %v2484_v51  ;;  %v8131_v28 = vsel %vm2493_vm2, 3, %v2485_v19  ;;  %v6477_v51 = vld [vmem:[%s7484_s23 + $0x500] sm:$0xff] }
  0xcb   : > { %10144 = vst [vmem:[#allocation21_spill] sm:$0xff] %v8125_v26  ;;  %10145 = vst [vmem:[#allocation22_spill] sm:$0xff] %v8129_v63  ;;  %vm2498_vm3 = vcmp.eq.s32.totalorder %v8123_v23, 0  ;;  %vm2499_vm4 = vcmp.eq.s32.totalorder %v8125_v26, 0  ;;  %vm2500_vm5 = vcmp.eq.s32.totalorder %v8129_v63, 0  ;;  %vm2501_vm6 = vcmp.eq.s32.totalorder %v8131_v28, 0 }
  0xcc   : > { %10146 = vst [vmem:[#allocation23_spill] sm:$0xff] %v8131_v28  ;;  %v10147_v52 = vmov 0.0   ;;  %v2234_v62 = vcombine.low %v2226_v3, %v2233_v35  ;;  %vm2778_vm7 = vcmp.gt.f32.partialorder %v6473_v42, %v2770_v31  ;;  %vm2779_vm9 = vcmp.gt.f32.partialorder %v6474_v50, %v2771_v56  ;;  %v6480_v28 = vld [vmem:[%s7484_s23 + $0x518] sm:$0xff] }
  0xcd   : > { %v6457_v30 = vsel %vm2498_vm3, 1.0, %v10147_v52  ;;  %v6458_v11 = vsel %vm2499_vm4, 1.0, %v10147_v52  ;;  %v6459_v17 = vsel %vm2500_vm5, 1.0, %v10147_v52  ;;  %v6460_v45 = vsel %vm2501_vm6, 1.0, %v10147_v52 }
  0xce   : > { %v2510_v38 = vrot.slane %v6457_v30, 4  ;;  %v2516_v1 = vrot.slane %v6458_v11, 4  ;;  %v2522_v0 = vrot.slane %v6459_v17, 4  ;;  %v2528_v18 = vrot.slane %v6460_v45, 4 }
  0xcf   : > { %v2241_v61 = vrot.slane %v2234_v62, %v7673_v7  ;;  %vm2780_vm10 = vcmp.gt.f32.partialorder %v6475_v60, %v2772_v8  ;;  %vm2781_vm11 = vcmp.gt.f32.partialorder %v6476_v20, %v2773_v16  ;;  %v2782_v25 = vsel %vm2778_vm7, %v6473_v42, %v2770_v31  ;;  %v6479_v62 = vld [vmem:[%s7484_s23 + $0x510] sm:$0xff] }
  0xd0   : > { %v2511_v2 = vadd.f32 %v6457_v30, %v2510_v38  ;;  %v2517_v21 = vadd.f32 %v6458_v11, %v2516_v1  ;;  %v2523_v22 = vadd.f32 %v6459_v17, %v2522_v0  ;;  %v2529_v24 = vadd.f32 %v6460_v45, %v2528_v18  ;;  %v6478_v30 = vld [vmem:[%s7484_s23 + $0x508] sm:$0xff] }
  0xd1   : > { %2244 = vst.msk [vmem:[#allocation2 + $0x6] ss:$8 sm:$0xf] %vm7766_vm8, %v2241_v61  ;;  %v2783_v36 = vsel %vm2779_vm9, %v6474_v50, %v2771_v56  ;;  %v2784_v40 = vsel %vm2780_vm10, %v6475_v60, %v2772_v8  ;;  %v2785_v11 = vsel %vm2781_vm11, %v6476_v20, %v2773_v16  ;;  %v2786_v17 = vsel %vm2778_vm7, 1, %v10142_v27 }
  0xd2   : > { %v2512_v19 = vrot.slane %v2511_v2, 2  ;;  %v2518_v41 = vrot.slane %v2517_v21, 2  ;;  %v2524_v3 = vrot.slane %v2523_v22, 2  ;;  %v2530_v35 = vrot.slane %v2529_v24, 2 }
  0xd3   : > { %v2787_v45 = vsel %vm2779_vm9, 1, %v10142_v27  ;;  %v2788_v38 = vsel %vm2780_vm10, 1, %v10142_v27  ;;  %v2789_v63 = vsel %vm2781_vm11, 1, %v10142_v27  ;;  %vm2794_vm12 = vcmp.gt.f32.partialorder %v6477_v51, %v2782_v25 }
  0xd4   : > { %v2513_v1 = vadd.f32 %v2512_v19, %v2511_v2  ;;  %v2519_v0 = vadd.f32 %v2518_v41, %v2517_v21  ;;  %v2525_v18 = vadd.f32 %v2524_v3, %v2523_v22  ;;  %v2531_v61 = vadd.f32 %v2530_v35, %v2529_v24  ;;  %v6481_v21 = vld [vmem:[%s7484_s23 + $0x700] sm:$0xff]  ;;  %v6482_v19 = vld [vmem:[%s7484_s23 + $0x708] sm:$0xff]  ;;  %v6483_v41 = vld [vmem:[%s7484_s23 + $0x710] sm:$0xff] }
  0xd5   : > { %vm2795_vm13 = vcmp.gt.f32.partialorder %v6478_v30, %v2783_v36  ;;  %vm2796_vm14 = vcmp.gt.f32.partialorder %v6479_v62, %v2784_v40  ;;  %vm2797_vm15 = vcmp.gt.f32.partialorder %v6480_v28, %v2785_v11  ;;  %v2798_v50 = vsel %vm2794_vm12, %v6477_v51, %v2782_v25  ;;  %v6484_v3 = vld [vmem:[%s7484_s23 + $0x718] sm:$0xff] }
  0xd6   : > { %v2514_v31 = vrot.slane %v2513_v1, 1  ;;  %v2520_v56 = vrot.slane %v2519_v0, 1  ;;  %v2526_v42 = vrot.slane %v2525_v18, 1  ;;  %v2532_v8 = vrot.slane %v2531_v61, 1 }
  0xd7   : > { %v2799_v60 = vsel %vm2795_vm13, %v6478_v30, %v2783_v36  ;;  %v2800_v2 = vsel %vm2796_vm14, %v6479_v62, %v2784_v40  ;;  %v2801_v35 = vsel %vm2797_vm15, %v6480_v28, %v2785_v11  ;;  %v2802_v26 = vsel %vm2794_vm12, 2, %v2786_v17  ;;  %v3090_v28 = vld [vmem:[%s7484_s23 + $0x120] sm:$0xff]  ;;  %v6502_v62 = vld [vmem:[%s7484_s23 + $0x328] sm:$0xff]  ;;  %v6503_v11 = vld [vmem:[%s7484_s23 + $0x330] sm:$0xff] }
  0xd8   : > { %v2515_v16 = vadd.f32 %v2514_v31, %v2513_v1  ;;  %v2521_v20 = vadd.f32 %v2520_v56, %v2519_v0  ;;  %v2527_v22 = vadd.f32 %v2526_v42, %v2525_v18  ;;  %v2533_v24 = vadd.f32 %v2532_v8, %v2531_v61  ;;  %v3093_v61 = vld [vmem:[%s7484_s23 + $0x138] sm:$0xff] }
  0xd9   : > { %v2803_v23 = vsel %vm2795_vm13, 2, %v2787_v45  ;;  %v2804_v29 = vsel %vm2796_vm14, 2, %v2788_v38  ;;  %v2805_v1 = vsel %vm2797_vm15, 2, %v2789_v63  ;;  %vm2810_vm0 = vcmp.gt.f32.partialorder %v6481_v21, %v2798_v50  ;;  %v6504_v31 = vld [vmem:[%s7484_s23 + $0x338] sm:$0xff] }
  0xda   : > { %v2538_v4 = vcombine.low %v2515_v16, %v2521_v20  ;;  %v2539_v58 = vcombine.low %v2527_v22, %v2533_v24  ;;  %vm2811_vm1 = vcmp.gt.f32.partialorder %v6482_v19, %v2799_v60  ;;  %vm2812_vm2 = vcmp.gt.f32.partialorder %v6483_v41, %v2800_v2  ;;  %v6505_v41 = vld [vmem:[%s7484_s23 + $0x520] sm:$0xff] }
  0xdb   : > { %vm2813_vm3 = vcmp.gt.f32.partialorder %v6484_v3, %v2801_v35  ;;  %v8179_v0 = vsel %vm2810_vm0, 3, %v2802_v26  ;;  %v8183_v40 = vsel %vm2811_vm1, 3, %v2803_v23  ;;  %v8185_v51 = vsel %vm2812_vm2, 3, %v2804_v29  ;;  %v6501_v26 = vld [vmem:[%s7484_s23 + $0x320] sm:$0xff]  ;;  %v3092_v23 = vld [vmem:[%s7484_s23 + $0x130] sm:$0xff] }
  0xdc   : > { %10148 = vst [vmem:[#allocation24_spill] sm:$0xff] %v8179_v0  ;;  %v2546_v25 = vrot.slane %v2538_v4, %v7673_v7  ;;  %v2553_v36 = vrot.slane %v2539_v58, %v7673_v7  ;;  %10149 = vst [vmem:[#allocation25_spill] sm:$0xff] %v8183_v40  ;;  %v8188_v63 = vsel %vm2813_vm3, 3, %v2805_v1  ;;  %vm2818_vm4 = vcmp.eq.s32.totalorder %v8179_v0, 0  ;;  %v3091_v4 = vld [vmem:[%s7484_s23 + $0x128] sm:$0xff]  ;;  %v6512_v0 = vld [vmem:[%s7484_s23 + $0x738] sm:$0xff] }
  0xdd   : > { %10150 = vst [vmem:[#allocation26_spill] sm:$0xff] %v8185_v51  ;;  %10151 = vst [vmem:[#allocation27_spill] sm:$0xff] %v8188_v63  ;;  %vm2819_vm5 = vcmp.eq.s32.totalorder %v8183_v40, 0  ;;  %vm2820_vm6 = vcmp.eq.s32.totalorder %v8185_v51, 0  ;;  %vm2821_vm7 = vcmp.eq.s32.totalorder %v8188_v63, 0  ;;  %v6485_v58 = vsel %vm2818_vm4, 1.0, %v10147_v52 }
  0xde   : > { %v2554_v30 = vcombine.low %v2546_v25, %v2553_v36  ;;  %v6486_v29 = vsel %vm2819_vm5, 1.0, %v10147_v52  ;;  %v6487_v17 = vsel %vm2820_vm6, 1.0, %v10147_v52  ;;  %v6488_v45 = vsel %vm2821_vm7, 1.0, %v10147_v52  ;;  %v6506_v36 = vld [vmem:[%s7484_s23 + $0x528] sm:$0xff]  ;;  %v6511_v40 = vld [vmem:[%s7484_s23 + $0x730] sm:$0xff] }
  0xdf   : > { %v2830_v38 = vrot.slane %v6485_v58, 4  ;;  %v2836_v18 = vrot.slane %v6486_v29, 4  ;;  %v2842_v42 = vrot.slane %v6487_v17, 4  ;;  %v2848_v8 = vrot.slane %v6488_v45, 4 }
  0xe0   : > { %v2561_v56 = vrot.slane %v2554_v30, %v7673_v7  ;;  %vm3098_vm9 = vcmp.gt.f32.partialorder %v6501_v26, %v3090_v28  ;;  %vm3099_vm10 = vcmp.gt.f32.partialorder %v6502_v62, %v3091_v4  ;;  %vm3100_vm11 = vcmp.gt.f32.partialorder %v6503_v11, %v3092_v23  ;;  %v6507_v30 = vld [vmem:[%s7484_s23 + $0x530] sm:$0xff] }
  0xe1   : > { %v2831_v50 = vadd.f32 %v6485_v58, %v2830_v38  ;;  %v2837_v60 = vadd.f32 %v6486_v29, %v2836_v18  ;;  %v2843_v2 = vadd.f32 %v6487_v17, %v2842_v42  ;;  %v2849_v21 = vadd.f32 %v6488_v45, %v2848_v8  ;;  %v6508_v38 = vld [vmem:[%s7484_s23 + $0x538] sm:$0xff] }
  0xe2   : > { %2564 = vst.msk [vmem:[#allocation2 + $0x7] ss:$8 sm:$0xf] %vm7766_vm8, %v2561_v56  ;;  %vm3101_vm12 = vcmp.gt.f32.partialorder %v6504_v31, %v3093_v61  ;;  %v3102_v16 = vsel %vm3098_vm9, %v6501_v26, %v3090_v28  ;;  %v3103_v24 = vsel %vm3099_vm10, %v6502_v62, %v3091_v4  ;;  %v3104_v19 = vsel %vm3100_vm11, %v6503_v11, %v3092_v23  ;;  %v6509_v62 = vld [vmem:[%s7484_s23 + $0x720] sm:$0xff]  ;;  %v6510_v23 = vld [vmem:[%s7484_s23 + $0x728] sm:$0xff] }
  0xe3   : > { %v2832_v20 = vrot.slane %v2831_v50, 2  ;;  %v2838_v22 = vrot.slane %v2837_v60, 2  ;;  %v2844_v3 = vrot.slane %v2843_v2, 2  ;;  %v2850_v35 = vrot.slane %v2849_v21, 2 }
  0xe4   : > { %v3105_v1 = vsel %vm3101_vm12, %v6504_v31, %v3093_v61  ;;  %v3106_v25 = vsel %vm3098_vm9, 1, %v10142_v27  ;;  %v3107_v17 = vsel %vm3099_vm10, 1, %v10142_v27  ;;  %v3108_v45 = vsel %vm3100_vm11, 1, %v10142_v27 }
  0xe5   : > { %v2833_v58 = vadd.f32 %v2832_v20, %v2831_v50  ;;  %v2839_v29 = vadd.f32 %v2838_v22, %v2837_v60  ;;  %v2845_v18 = vadd.f32 %v2844_v3, %v2843_v2  ;;  %v2851_v56 = vadd.f32 %v2850_v35, %v2849_v21 }
  0xe6   : > { %v3109_v42 = vsel %vm3101_vm12, 1, %v10142_v27  ;;  %vm3114_vm13 = vcmp.gt.f32.partialorder %v6505_v41, %v3102_v16  ;;  %vm3115_vm14 = vcmp.gt.f32.partialorder %v6506_v36, %v3103_v24  ;;  %vm3116_vm15 = vcmp.gt.f32.partialorder %v6507_v30, %v3104_v19 }
  0xe7   : > { %v2834_v28 = vrot.slane %v2833_v58, 1  ;;  %v2840_v26 = vrot.slane %v2839_v29, 1  ;;  %v2846_v8 = vrot.slane %v2845_v18, 1  ;;  %v2852_v50 = vrot.slane %v2851_v56, 1 }
  0xe8   : > { %vm3117_vm0 = vcmp.gt.f32.partialorder %v6508_v38, %v3105_v1  ;;  %v3118_v4 = vsel %vm3114_vm13, %v6505_v41, %v3102_v16  ;;  %v3119_v31 = vsel %vm3115_vm14, %v6506_v36, %v3103_v24  ;;  %v3120_v20 = vsel %vm3116_vm15, %v6507_v30, %v3104_v19  ;;  %v7097_v16 = vld [vmem:[%s10016_s1 + $0x178] sm:$0xff]  ;;  %v7098_v24 = vld [vmem:[%s10016_s1 + $0xf0] sm:$0xff] }
  0xe9   : > { %v5395_v11 = vld [vmem:[#allocation2 + $0x8] sm:$0xff]  ;;  %v5397_v60 = vld [vmem:[#allocation2 + $0x18] sm:$0xff]  ;;  %v5394_v2 = vld [vmem:[#allocation2] sm:$0xff]  ;;  %v2835_v21 = vadd.f32 %v2834_v28, %v2833_v58  ;;  %v2841_v61 = vadd.f32 %v2840_v26, %v2839_v29  ;;  %v2847_v3 = vadd.f32 %v2846_v8, %v2845_v18  ;;  %v2853_v35 = vadd.f32 %v2852_v50, %v2851_v56 }
  0xea   : > { %5466 = vmatprep.mubr.f32.mxu0 %v5395_v11  ;;  %5541 = vmatprep.mubr.f32.mxu1 %v5397_v60  ;;  %v5396_v22 = vld [vmem:[#allocation2 + $0x10] sm:$0xff]  ;;  %v3121_v63 = vsel %vm3117_vm0, %v6508_v38, %v3105_v1  ;;  %v3122_v51 = vsel %vm3114_vm13, 2, %v3106_v25  ;;  %v3123_v58 = vsel %vm3115_vm14, 2, %v3107_v17  ;;  %v3124_v29 = vsel %vm3116_vm15, 2, %v3108_v45  ;;  %v7096_v18 = vld [vmem:[%s10016_s1 + $0x78] sm:$0xff]  ;;  %v7103_v38 = vld [vmem:[%s10016_s1 + $0x1e8] sm:$0xff] }
  0xeb   : > { %5467 = vmatmul.mubr.f32.vlgmr.msra.gmra.mxu0 %v5394_v2  ;;  %5542 = vmatmul.mubr.f32.vlgmr.msra.gmra.mxu1 %v5396_v22  ;;  %v2858_v57 = vcombine.low %v2835_v21, %v2841_v61  ;;  %v3125_v28 = vsel %vm3117_vm0, 2, %v3109_v42  ;;  %v2859_v41 = vcombine.low %v2847_v3, %v2853_v35  ;;  %vm3130_vm1 = vcmp.gt.f32.partialorder %v6509_v62, %v3118_v4  ;;  %v7099_v19 = vld [vmem:[%s10016_s1 + $0x1f0] sm:$0xff]  ;;  %v6529_v56 = vld [vmem:[%s7484_s23 + $0x340] sm:$0xff]  ;;  %v6530_v42 = vld [vmem:[%s7484_s23 + $0x348] sm:$0xff] }
  0xec   : > { %6787 = vmatpush3.msra.mxu0 %v7096_v18  ;;  %6825 = vmatpush3.msra.mxu1 %v7097_v16  ;;  %vm3131_vm2 = vcmp.gt.f32.partialorder %v6510_v23, %v3119_v31  ;;  %vm3132_vm3 = vcmp.gt.f32.partialorder %v6511_v40, %v3120_v20  ;;  %vm3133_vm4 = vcmp.gt.f32.partialorder %v6512_v0, %v3121_v63  ;;  %v8249_v25 = vsel %vm3130_vm1, 3, %v3122_v51  ;;  %v7100_v36 = vld [vmem:[%s10016_s1 + $0x70] sm:$0xff]  ;;  %v8265_v40 = vld [vmem:[%s7484_s23 + $0x140] sm:$0xff]  ;;  %v8268_v51 = vld [vmem:[%s7484_s23 + $0x148] sm:$0xff] }
  0xed   : > { %6788 = vmatprep.subr.mxu0 %v7098_v24  ;;  %6826 = vmatprep.subr.mxu1 %v7099_v19  ;;  %v2866_v1 = vrot.slane %v2858_v57, %v7673_v7  ;;  %v7101_v30 = vld [vmem:[%s10016_s1 + $0x170] sm:$0xff]  ;;  %v2873_v17 = vrot.slane %v2859_v41, %v7673_v7  ;;  %v8258_v45 = vsel %vm3131_vm2, 3, %v3123_v58  ;;  %v8260_v57 = vsel %vm3132_vm3, 3, %v3124_v29  ;;  %v7102_v63 = vld [vmem:[%s10016_s1 + $0xe8] sm:$0xff]  ;;  %v8295_v60 = vld [vmem:[%s7484_s23 + $0x158] sm:$0xff] }
  0xee   : > { %6789 = vmatpush3.msra.mxu0 %v7100_v36  ;;  %6827 = vmatpush3.msra.mxu1 %v7101_v30  ;;  %10152 = vst [vmem:[#allocation28_spill] sm:$0xff] %v8260_v57  ;;  %v8262_v0 = vsel %vm3133_vm4, 3, %v3125_v28  ;;  %vm3138_vm5 = vcmp.eq.s32.totalorder %v8249_v25, 0  ;;  %vm3139_vm6 = vcmp.eq.s32.totalorder %v8258_v45, 0  ;;  %vm3140_vm7 = vcmp.eq.s32.totalorder %v8260_v57, 0  ;;  %v7104_v26 = vld [vmem:[%s10016_s1 + $0x68] sm:$0xff] }
  0xef   : > { %10153 = vst [vmem:[#allocation29_spill] sm:$0xff] %v8262_v0  ;;  %6790 = vmatprep.subr.mxu0 %v7102_v63  ;;  %6828 = vmatprep.subr.mxu1 %v7103_v38  ;;  %vm3141_vm9 = vcmp.eq.s32.totalorder %v8262_v0, 0  ;;  %v7105_v8 = vld [vmem:[%s10016_s1 + $0x168] sm:$0xff]  ;;  %v2874_v50 = vcombine.low %v2866_v1, %v2873_v17  ;;  %v6513_v4 = vsel %vm3138_vm5, 1.0, %v10147_v52  ;;  %v6514_v62 = vsel %vm3139_vm6, 1.0, %v10147_v52  ;;  %v8292_v11 = vld [vmem:[%s7484_s23 + $0x150] sm:$0xff] }
  0xf0   : > { %6791 = vmatpush3.msra.mxu0 %v7104_v26  ;;  %6829 = vmatpush3.msra.mxu1 %v7105_v8  ;;  %v6515_v23 = vsel %vm3140_vm7, 1.0, %v10147_v52  ;;  %v7106_v2 = vld [vmem:[%s10016_s1 + $0xe0] sm:$0xff]  ;;  %v6516_v61 = vsel %vm3141_vm9, 1.0, %v10147_v52  ;;  %v3150_v31 = vrot.slane %v6513_v4, 4  ;;  %v3156_v20 = vrot.slane %v6514_v62, 4  ;;  %v6531_v3 = vld [vmem:[%s7484_s23 + $0x350] sm:$0xff] }
  0xf1   : > { %6792 = vmatprep.subr.mxu0 %v7106_v2  ;;  %v7107_v21 = vld [vmem:[%s10016_s1 + $0x1e0] sm:$0xff]  ;;  %v3162_v22 = vrot.slane %v6515_v23, 4  ;;  %v6532_v35 = vld [vmem:[%s7484_s23 + $0x358] sm:$0xff]  ;;  %v2881_v28 = vrot.slane %v2874_v50, %v7673_v7  ;;  %v3168_v18 = vrot.slane %v6516_v61, 4  ;;  %vm3418_vm10 = vcmp.gt.f32.partialorder %v6529_v56, %v8265_v40  ;;  %v7114_v26 = vld [vmem:[%s10016_s1 + $0xd0] sm:$0xff] }
  0xf2   : > { %6830 = vmatprep.subr.mxu1 %v7107_v21  ;;  %v7108_v58 = vld [vmem:[%s10016_s1 + $0x60] sm:$0xff]  ;;  %vm3419_vm11 = vcmp.gt.f32.partialorder %v6530_v42, %v8268_v51  ;;  %v7110_v16 = vld [vmem:[%s10016_s1 + $0xd8] sm:$0xff]  ;;  %v3151_v24 = vadd.f32 %v6513_v4, %v3150_v31  ;;  %v3157_v19 = vadd.f32 %v6514_v62, %v3156_v20  ;;  %v8326_v36 = vsel %vm3418_vm10, 1, %v10142_v27  ;;  %v7115_v8 = vld [vmem:[%s10016_s1 + $0x1d0] sm:$0xff] }
  0xf3   : > { %6793 = vmatpush3.msra.mxu0 %v7108_v58  ;;  %v7109_v29 = vld [vmem:[%s10016_s1 + $0x160] sm:$0xff]  ;;  %v7111_v41 = vld [vmem:[%s10016_s1 + $0x1d8] sm:$0xff]  ;;  %v3163_v1 = vadd.f32 %v6515_v23, %v3162_v22  ;;  %2884 = vst.msk [vmem:[#allocation2 + $0x20] ss:$8 sm:$0xf] %vm7766_vm8, %v2881_v28  ;;  %v3169_v63 = vadd.f32 %v6516_v61, %v3168_v18  ;;  %vm3420_vm12 = vcmp.gt.f32.partialorder %v6531_v3, %v8292_v11  ;;  %v8341_v38 = vsel %vm3419_vm11, 1, %v10142_v27 }
  0xf4   : > { %6831 = vmatpush3.msra.mxu1 %v7109_v29  ;;  %6794 = vmatprep.subr.mxu0 %v7110_v16  ;;  %v7112_v30 = vld [vmem:[%s10016_s1 + $0x58] sm:$0xff]  ;;  %vm3421_vm13 = vcmp.gt.f32.partialorder %v6532_v35, %v8295_v60  ;;  %v3152_v50 = vrot.slane %v3151_v24, 2  ;;  %v3158_v4 = vrot.slane %v3157_v19, 2  ;;  %v3422_v23 = vsel %vm3418_vm10, %v6529_v56, %v8265_v40  ;;  %v6533_v2 = vld [vmem:[%s7484_s23 + $0x540] sm:$0xff]  ;;  %v6534_v21 = vld [vmem:[%s7484_s23 + $0x548] sm:$0xff] }
  0xf5   : > { %6832 = vmatprep.subr.mxu1 %v7111_v41  ;;  %6795 = vmatpush3.msra.mxu0 %v7112_v30  ;;  %v7113_v17 = vld [vmem:[%s10016_s1 + $0x158] sm:$0xff]  ;;  %v3164_v62 = vrot.slane %v3163_v1, 2  ;;  %v7116_v61 = vld [vmem:[%s10016_s1 + $0x50] sm:$0xff]  ;;  %v3170_v20 = vrot.slane %v3169_v63, 2  ;;  %v3423_v22 = vsel %vm3419_vm11, %v6530_v42, %v8268_v51  ;;  %v3424_v40 = vsel %vm3420_vm12, %v6531_v3, %v8292_v11  ;;  %v7118_v29 = vld [vmem:[%s10016_s1 + $0xc8] sm:$0xff] }
  0xf6   : > { %6833 = vmatpush3.msra.mxu1 %v7113_v17  ;;  %6796 = vmatprep.subr.mxu0 %v7114_v26  ;;  %v7117_v31 = vld [vmem:[%s10016_s1 + $0x150] sm:$0xff]  ;;  %v3425_v56 = vsel %vm3421_vm13, %v6532_v35, %v8295_v60  ;;  %v7119_v28 = vld [vmem:[%s10016_s1 + $0x1c8] sm:$0xff]  ;;  %v3153_v51 = vadd.f32 %v3152_v50, %v3151_v24  ;;  %v3159_v42 = vadd.f32 %v3158_v4, %v3157_v19  ;;  %v3428_v16 = vsel %vm3420_vm12, 1, %v10142_v27  ;;  %v6536_v41 = vld [vmem:[%s7484_s23 + $0x558] sm:$0xff] }
  0xf7   : > { %6834 = vmatprep.subr.mxu1 %v7115_v8  ;;  %6797 = vmatpush3.msra.mxu0 %v7116_v61  ;;  %v6535_v58 = vld [vmem:[%s7484_s23 + $0x550] sm:$0xff]  ;;  %v3165_v18 = vadd.f32 %v3164_v62, %v3163_v1  ;;  %v7120_v30 = vld [vmem:[%s10016_s1 + $0x48] sm:$0xff]  ;;  %v3171_v26 = vadd.f32 %v3170_v20, %v3169_v63  ;;  %v3429_v24 = vsel %vm3421_vm13, 1, %v10142_v27  ;;  %vm3434_vm14 = vcmp.gt.f32.partialorder %v6533_v2, %v3422_v23  ;;  %v7122_v11 = vld [vmem:[%s10016_s1 + $0xc0] sm:$0xff] }
  0xf8   : > { %6835 = vmatpush3.msra.mxu1 %v7117_v31  ;;  %6798 = vmatprep.subr.mxu0 %v7118_v29  ;;  %v7121_v17 = vld [vmem:[%s10016_s1 + $0x148] sm:$0xff]  ;;  %vm3435_vm15 = vcmp.gt.f32.partialorder %v6534_v21, %v3423_v22  ;;  %v7123_v3 = vld [vmem:[%s10016_s1 + $0x1c0] sm:$0xff]  ;;  %v3154_v19 = vrot.slane %v3153_v51, 1  ;;  %v3160_v1 = vrot.slane %v3159_v42, 1  ;;  %vm3436_vm0 = vcmp.gt.f32.partialorder %v6535_v58, %v3424_v40  ;;  %v7126_v61 = vld [vmem:[%s10016_s1 + $0xb8] sm:$0xff] }
  0xf9   : > { %6836 = vmatprep.subr.mxu1 %v7119_v28  ;;  %6799 = vmatpush3.msra.mxu0 %v7120_v30  ;;  %v3166_v63 = vrot.slane %v3165_v18, 1  ;;  %v7124_v60 = vld [vmem:[%s10016_s1 + $0x40] sm:$0xff]  ;;  %v3172_v8 = vrot.slane %v3171_v26, 1  ;;  %vm3437_vm1 = vcmp.gt.f32.partialorder %v6536_v41, %v3425_v56  ;;  %v3438_v50 = vsel %vm3434_vm14, %v6533_v2, %v3422_v23  ;;  %v7127_v31 = vld [vmem:[%s10016_s1 + $0x1b8] sm:$0xff]  ;;  %v7130_v2 = vld [vmem:[%s10016_s1 + $0xb0] sm:$0xff] }
  0xfa   : > { %6837 = vmatpush3.msra.mxu1 %v7121_v17  ;;  %6800 = vmatprep.subr.mxu0 %v7122_v11  ;;  %v7125_v35 = vld [vmem:[%s10016_s1 + $0x140] sm:$0xff]  ;;  %v3439_v4 = vsel %vm3435_vm15, %v6534_v21, %v3423_v22  ;;  %v3155_v20 = vadd.f32 %v3154_v19, %v3153_v51  ;;  %v3161_v29 = vadd.f32 %v3160_v1, %v3159_v42  ;;  %v3442_v30 = vsel %vm3434_vm14, 2, %v8326_v36  ;;  %v6538_v17 = vld [vmem:[%s7484_s23 + $0x748] sm:$0xff]  ;;  %v6539_v11 = vld [vmem:[%s7484_s23 + $0x750] sm:$0xff] }
  0xfb   : > { %6838 = vmatprep.subr.mxu1 %v7123_v3  ;;  %6801 = vmatpush3.msra.mxu0 %v7124_v60  ;;  %v6537_v62 = vld [vmem:[%s7484_s23 + $0x740] sm:$0xff]  ;;  %v3167_v28 = vadd.f32 %v3166_v63, %v3165_v18  ;;  %v7128_v3 = vld [vmem:[%s10016_s1 + $0x38] sm:$0xff]  ;;  %v3440_v51 = vsel %vm3436_vm0, %v6535_v58, %v3424_v40  ;;  %v3441_v42 = vsel %vm3437_vm1, %v6536_v41, %v3425_v56  ;;  %v3443_v36 = vsel %vm3435_vm15, 2, %v8341_v38  ;;  %v7131_v18 = vld [vmem:[%s10016_s1 + $0x1b0] sm:$0xff] }
  0xfc   : > { %6839 = vmatpush3.msra.mxu1 %v7125_v35  ;;  %6802 = vmatprep.subr.mxu0 %v7126_v61  ;;  %v7129_v60 = vld [vmem:[%s10016_s1 + $0x138] sm:$0xff]  ;;  %v3173_v35 = vadd.f32 %v3172_v8, %v3171_v26  ;;  %v3178_v19 = vcombine.low %v3155_v20, %v3161_v29  ;;  %v3444_v26 = vsel %vm3436_vm0, 2, %v3428_v16  ;;  %v3445_v1 = vsel %vm3437_vm1, 2, %v3429_v24  ;;  %v7132_v38 = vld [vmem:[%s10016_s1 + $0x30] sm:$0xff]  ;;  %v7134_v40 = vld [vmem:[%s10016_s1 + $0xa8] sm:$0xff] }
  0xfd   : > { %6840 = vmatprep.subr.mxu1 %v7127_v31  ;;  %6803 = vmatpush3.msra.mxu0 %v7128_v3  ;;  %v6540_v23 = vld [vmem:[%s7484_s23 + $0x758] sm:$0xff]  ;;  %vm3450_vm2 = vcmp.gt.f32.partialorder %v6537_v62, %v3438_v50  ;;  %v7133_v21 = vld [vmem:[%s10016_s1 + $0x130] sm:$0xff]  ;;  %vm3451_vm3 = vcmp.gt.f32.partialorder %v6538_v17, %v3439_v4  ;;  %vm3452_vm4 = vcmp.gt.f32.partialorder %v6539_v11, %v3440_v51  ;;  %v7135_v56 = vld [vmem:[%s10016_s1 + $0x1a8] sm:$0xff] }
  0xfe   : > { %6841 = vmatpush3.msra.mxu1 %v7129_v60  ;;  %6804 = vmatprep.subr.mxu0 %v7130_v2  ;;  %v3179_v22 = vcombine.low %v3167_v28, %v3173_v35  ;;  %v8439_v63 = vsel %vm3450_vm2, 3, %v3442_v30  ;;  %v3186_v58 = vrot.slane %v3178_v19, %v7673_v7  ;;  %vm3453_vm5 = vcmp.gt.f32.partialorder %v6540_v23, %v3441_v42  ;;  %v7136_v24 = vld [vmem:[%s10016_s1 + $0x28] sm:$0xff]  ;;  %v3730_v62 = vld [vmem:[%s7484_s23 + $0x160] sm:$0xff]  ;;  %v6559_v23 = vld [vmem:[%s7484_s23 + $0x370] sm:$0xff] }
  0xff   : > { %6842 = vmatprep.subr.mxu1 %v7131_v18  ;;  %6805 = vmatpush3.msra.mxu0 %v7132_v38  ;;  %10154 = vst [vmem:[#allocation30_spill] sm:$0xff] %v8439_v63  ;;  %v8448_v16 = vsel %vm3451_vm3, 3, %v3443_v36  ;;  %v8450_v41 = vsel %vm3452_vm4, 3, %v3444_v26  ;;  %v7137_v8 = vld [vmem:[%s10016_s1 + $0x128] sm:$0xff]  ;;  %v8459_v4 = vsel %vm3453_vm5, 3, %v3445_v1  ;;  %vm3458_vm6 = vcmp.eq.s32.totalorder %v8439_v63, 0 }
 0x100   : > { %6843 = vmatpush3.msra.mxu1 %v7133_v21  ;;  %6806 = vmatprep.subr.mxu0 %v7134_v40  ;;  %10155 = vst [vmem:[#allocation31_spill] sm:$0xff] %v8448_v16  ;;  %10156 = vst [vmem:[#allocation32_spill] sm:$0xff] %v8450_v41  ;;  %v3193_v50 = vrot.slane %v3179_v22, %v7673_v7  ;;  %vm3459_vm7 = vcmp.eq.s32.totalorder %v8448_v16, 0  ;;  %v6557_v61 = vld [vmem:[%s7484_s23 + $0x360] sm:$0xff]  ;;  %vm3460_vm9 = vcmp.eq.s32.totalorder %v8450_v41, 0  ;;  %vm3461_vm10 = vcmp.eq.s32.totalorder %v8459_v4, 0 }
 0x101   : > { %6844 = vmatprep.subr.mxu1 %v7135_v56  ;;  %6807 = vmatpush3.msra.mxu0 %v7136_v24  ;;  %10157 = vst [vmem:[#allocation33_spill] sm:$0xff] %v8459_v4  ;;  %v7138_v31 = vld [vmem:[%s10016_s1 + $0xa0] sm:$0xff]  ;;  %v6541_v29 = vsel %vm3458_vm6, 1.0, %v10147_v52  ;;  %v6542_v28 = vsel %vm3459_vm7, 1.0, %v10147_v52  ;;  %v3731_v30 = vld [vmem:[%s7484_s23 + $0x168] sm:$0xff]  ;;  %v6543_v35 = vsel %vm3460_vm9, 1.0, %v10147_v52  ;;  %vm3738_vm11 = vcmp.gt.f32.partialorder %v6557_v61, %v3730_v62 }
 0x102   : > { %6845 = vmatpush3.msra.mxu1 %v7137_v8  ;;  %6808 = vmatprep.subr.mxu0 %v7138_v31  ;;  %v7139_v20 = vld [vmem:[%s10016_s1 + $0x1a0] sm:$0xff]  ;;  %v6558_v17 = vld [vmem:[%s7484_s23 + $0x368] sm:$0xff]  ;;  %v3194_v60 = vcombine.low %v3186_v58, %v3193_v50  ;;  %v6544_v51 = vsel %vm3461_vm10, 1.0, %v10147_v52  ;;  %v3470_v42 = vrot.slane %v6541_v29, 4  ;;  %v3732_v36 = vld [vmem:[%s7484_s23 + $0x170] sm:$0xff]  ;;  %v3476_v19 = vrot.slane %v6542_v28, 4 }
 0x103   : > { %6846 = vmatprep.subr.mxu1 %v7139_v20  ;;  %v7140_v11 = vld [vmem:[%s10016_s1 + $0x20] sm:$0xff]  ;;  %v7142_v2 = vld [vmem:[%s10016_s1 + $0x98] sm:$0xff]  ;;  %v3482_v26 = vrot.slane %v6543_v35, 4  ;;  %v3488_v1 = vrot.slane %v6544_v51, 4  ;;  %vm3739_vm12 = vcmp.gt.f32.partialorder %v6558_v17, %v3731_v30  ;;  %v8504_v24 = vsel %vm3738_vm11, 1, %v10142_v27  ;;  %v7146_v20 = vld [vmem:[%s10016_s1 + $0x90] sm:$0xff] }
 0x104   : > { %6809 = vmatpush3.msra.mxu0 %v7140_v11  ;;  %v7141_v3 = vld [vmem:[%s10016_s1 + $0x120] sm:$0xff]  ;;  %v7143_v18 = vld [vmem:[%s10016_s1 + $0x198] sm:$0xff]  ;;  %v3201_v56 = vrot.slane %v3194_v60, %v7673_v7  ;;  %v3471_v58 = vadd.f32 %v6541_v29, %v3470_v42  ;;  %v3477_v8 = vadd.f32 %v6542_v28, %v3476_v19  ;;  %vm3740_vm13 = vcmp.gt.f32.partialorder %v6559_v23, %v3732_v36  ;;  %v7148_v60 = vld [vmem:[%s10016_s1 + $0x10] sm:$0xff] }
 0x105   : > { %6847 = vmatpush3.msra.mxu1 %v7141_v3  ;;  %6810 = vmatprep.subr.mxu0 %v7142_v2  ;;  %v3733_v38 = vld [vmem:[%s7484_s23 + $0x178] sm:$0xff]  ;;  %v3483_v50 = vadd.f32 %v6543_v35, %v3482_v26  ;;  %v3489_v31 = vadd.f32 %v6544_v51, %v3488_v1  ;;  %v8512_v11 = vsel %vm3738_vm11, %v6557_v61, %v3730_v62  ;;  %v7147_v3 = vld [vmem:[%s10016_s1 + $0x190] sm:$0xff]  ;;  %v6561_v61 = vld [vmem:[%s7484_s23 + $0x560] sm:$0xff] }
 0x106   : > { %6848 = vmatprep.subr.mxu1 %v7143_v18  ;;  %v6560_v21 = vld [vmem:[%s7484_s23 + $0x378] sm:$0xff]  ;;  %3204 = vst.msk [vmem:[#allocation2 + $0x21] ss:$8 sm:$0xf] %vm7766_vm8, %v3201_v56  ;;  %v3472_v29 = vrot.slane %v3471_v58, 2  ;;  %v8515_v28 = vsel %vm3739_vm12, %v6558_v17, %v3731_v30  ;;  %v3478_v35 = vrot.slane %v3477_v8, 2  ;;  %v3744_v62 = vsel %vm3740_vm13, %v6559_v23, %v3732_v36 }
 0x107   : > { %v7144_v22 = vld [vmem:[%s10016_s1 + $0x18] sm:$0xff]  ;;  %vm3741_vm14 = vcmp.gt.f32.partialorder %v6560_v21, %v3733_v38  ;;  %v3484_v51 = vrot.slane %v3483_v50, 2  ;;  %v3490_v42 = vrot.slane %v3489_v31, 2  ;;  %v6562_v2 = vld [vmem:[%s7484_s23 + $0x568] sm:$0xff]  ;;  %v6563_v18 = vld [vmem:[%s7484_s23 + $0x570] sm:$0xff]  ;;  %v3748_v56 = vsel %vm3740_vm13, 1, %v10142_v27 }
 0x108   : > { %6811 = vmatpush3.msra.mxu0 %v7144_v22  ;;  %v7145_v40 = vld [vmem:[%s10016_s1 + $0x118] sm:$0xff]  ;;  %v7149_v19 = vld [vmem:[%s10016_s1 + $0x110] sm:$0xff]  ;;  %v7150_v26 = vld [vmem:[%s10016_s1 + $0x88] sm:$0xff]  ;;  %v3473_v1 = vadd.f32 %v3472_v29, %v3471_v58  ;;  %v3745_v22 = vsel %vm3741_vm14, %v6560_v21, %v3733_v38  ;;  %v3479_v58 = vadd.f32 %v3478_v35, %v3477_v8  ;;  %v3749_v30 = vsel %vm3741_vm14, 1, %v10142_v27 }
 0x109   : > { %6849 = vmatpush3.msra.mxu1 %v7145_v40  ;;  %6812 = vmatprep.subr.mxu0 %v7146_v20  ;;  %v3747_v40 = vsel %vm3739_vm12, 1, %v10142_v27  ;;  %v6564_v20 = vld [vmem:[%s7484_s23 + $0x578] sm:$0xff]  ;;  %v3485_v29 = vadd.f32 %v3484_v51, %v3483_v50  ;;  %v7153_v17 = vld [vmem:[%s10016_s1 + $0x108] sm:$0xff]  ;;  %v7154_v36 = vld [vmem:[%s10016_s1 + $0x80] sm:$0xff]  ;;  %vm3754_vm15 = vcmp.gt.f32.partialorder %v6561_v61, %v8512_v11  ;;  %vm3755_vm0 = vcmp.gt.f32.partialorder %v6562_v2, %v8515_v28 }
 0x10a   : > { %6850 = vmatprep.subr.mxu1 %v7147_v3  ;;  %6813 = vmatpush3.msra.mxu0 %v7148_v60  ;;  %v7151_v3 = vld [vmem:[%s10016_s1 + $0x188] sm:$0xff]  ;;  %v3474_v23 = vrot.slane %v3473_v1, 1  ;;  %vm3756_vm1 = vcmp.gt.f32.partialorder %v6563_v18, %v3744_v62  ;;  %v7155_v38 = vld [vmem:[%s10016_s1 + $0x180] sm:$0xff]  ;;  %v3480_v8 = vrot.slane %v3479_v58, 1  ;;  %vm3757_vm2 = vcmp.gt.f32.partialorder %v6564_v20, %v3745_v22  ;;  %v7158_v51 = vld [vmem:[%s10016_s1 + $0xf8] sm:$0xff] }
 0x10b   : > { %6851 = vmatpush3.msra.mxu1 %v7149_v19  ;;  %6814 = vmatprep.subr.mxu0 %v7150_v26  ;;  %v7152_v60 = vld [vmem:[%s10016_s1 + $0x8] sm:$0xff]  ;;  %v3491_v19 = vadd.f32 %v3490_v42, %v3489_v31  ;;  %v7156_v21 = vld [vmem:[%s10016_s1] sm:$0xff]  ;;  %v3486_v50 = vrot.slane %v3485_v29, 1  ;;  %v3758_v26 = vsel %vm3754_vm15, %v6561_v61, %v8512_v11  ;;  %v6568_v4 = vld [vmem:[%s7484_s23 + $0x778] sm:$0xff]  ;;  %v3762_v41 = vsel %vm3754_vm15, 2, %v8504_v24 }
 0x10c   : > { %6852 = vmatprep.subr.mxu1 %v7151_v3  ;;  %6815 = vmatpush3.msra.mxu0 %v7152_v60  ;;  %v7157_v35 = vld [vmem:[%s10016_s1 + $0x100] sm:$0xff]  ;;  %v3475_v42 = vadd.f32 %v3474_v23, %v3473_v1  ;;  %v3759_v3 = vsel %vm3755_vm0, %v6562_v2, %v8515_v28  ;;  %v3760_v60 = vsel %vm3756_vm1, %v6563_v18, %v3744_v62  ;;  %v3763_v16 = vsel %vm3755_vm0, 2, %v3747_v40  ;;  %v4051_v18 = vld [vmem:[%s7484_s23 + $0x188] sm:$0xff] }
 0x10d   : > { %6853 = vmatpush3.msra.mxu1 %v7153_v17  ;;  %6816 = vmatprep.subr.mxu0 %v7154_v36  ;;  %v3492_v31 = vrot.slane %v3491_v19, 1  ;;  %v6565_v17 = vld [vmem:[%s7484_s23 + $0x760] sm:$0xff]  ;;  %v6566_v36 = vld [vmem:[%s7484_s23 + $0x768] sm:$0xff]  ;;  %v3761_v23 = vsel %vm3757_vm2, %v6564_v20, %v3745_v22  ;;  %v3764_v63 = vsel %vm3756_vm1, 2, %v3748_v56  ;;  %v4052_v56 = vld [vmem:[%s7484_s23 + $0x190] sm:$0xff] }
 0x10e   : > { %6854 = vmatprep.subr.mxu1 %v7155_v38  ;;  %6817 = vmatpush3.msra.mxu0 %v7156_v21  ;;  %v7159_v38 = vld [vmem:[%s10016_s1 + $0x1f8] sm:$0xff]  ;;  %v3481_v21 = vadd.f32 %v3480_v8, %v3479_v58  ;;  %vm3770_vm3 = vcmp.gt.f32.partialorder %v6565_v17, %v3758_v26  ;;  %vm3771_vm4 = vcmp.gt.f32.partialorder %v6566_v36, %v3759_v3  ;;  %v4050_v2 = vld [vmem:[%s7484_s23 + $0x180] sm:$0xff]  ;;  %v6587_v20 = vld [vmem:[%s7484_s23 + $0x390] sm:$0xff] }
 0x10f   : > { %6855 = vmatpush3.msra.mxu1 %v7157_v35  ;;  %6862 = vmatprep.subr.mxu0 %v7158_v51  ;;  %v3487_v35 = vadd.f32 %v3486_v50, %v3485_v29  ;;  %v3493_v1 = vadd.f32 %v3492_v31, %v3491_v19  ;;  %v6567_v51 = vld [vmem:[%s7484_s23 + $0x770] sm:$0xff]  ;;  %vm3773_vm6 = vcmp.gt.f32.partialorder %v6568_v4, %v3761_v23  ;;  %v8589_v19 = vsel %vm3770_vm3, 3, %v3762_v41  ;;  %v6586_v41 = vld [vmem:[%s7484_s23 + $0x388] sm:$0xff]  ;;  %v6588_v26 = vld [vmem:[%s7484_s23 + $0x398] sm:$0xff] }
 0x110   : > { %6900 = vmatprep.subr.mxu1 %v7159_v38  ;;  %v3765_v38 = vsel %vm3757_vm2, 2, %v3749_v30  ;;  %v3498_v58 = vcombine.low %v3475_v42, %v3481_v21  ;;  %vm3772_vm5 = vcmp.gt.f32.partialorder %v6567_v51, %v3760_v60  ;;  %10158 = vst [vmem:[#allocation34_spill] sm:$0xff] %v8589_v19  ;;  %v8591_v24 = vsel %vm3771_vm4, 3, %v3763_v16  ;;  %v6585_v16 = vld [vmem:[%s7484_s23 + $0x380] sm:$0xff]  ;;  %v4053_v42 = vld [vmem:[%s7484_s23 + $0x198] sm:$0xff] }
 0x111   : > { %v3499_v29 = vcombine.low %v3487_v35, %v3493_v1  ;;  %10159 = vst [vmem:[#allocation35_spill] sm:$0xff] %v8591_v24  ;;  %v8595_v62 = vsel %vm3772_vm5, 3, %v3764_v63  ;;  %v8597_v61 = vsel %vm3773_vm6, 3, %v3765_v38  ;;  %vm3778_vm7 = vcmp.eq.s32.totalorder %v8589_v19, 0 }
 0x112   : > { %v3506_v11 = vrot.slane %v3498_v58, %v7673_v7  ;;  %10160 = vst [vmem:[#allocation36_spill] sm:$0xff] %v8595_v62  ;;  %10161 = vst [vmem:[#allocation37_spill] sm:$0xff] %v8597_v61  ;;  %vm3779_vm9 = vcmp.eq.s32.totalorder %v8591_v24, 0  ;;  %vm3780_vm10 = vcmp.eq.s32.totalorder %v8595_v62, 0  ;;  %vm3781_vm11 = vcmp.eq.s32.totalorder %v8597_v61, 0 }
 0x113   : > { %v3513_v28 = vrot.slane %v3499_v29, %v7673_v7  ;;  %v6569_v63 = vsel %vm3778_vm7, 1.0, %v10147_v52  ;;  %v6570_v22 = vsel %vm3779_vm9, 1.0, %v10147_v52  ;;  %v6571_v40 = vsel %vm3780_vm10, 1.0, %v10147_v52 }
 0x114   : > { %v6572_v30 = vsel %vm3781_vm11, 1.0, %v10147_v52  ;;  %v3790_v8 = vrot.slane %v6569_v63, 4  ;;  %v3796_v50 = vrot.slane %v6570_v22, 4  ;;  %v3802_v31 = vrot.slane %v6571_v40, 4 }
 0x115   : > { %v3514_v4 = vcombine.low %v3506_v11, %v3513_v28  ;;  %v3808_v60 = vrot.slane %v6572_v30, 4  ;;  %vm4058_vm12 = vcmp.gt.f32.partialorder %v6585_v16, %v4050_v2  ;;  %vm4059_vm13 = vcmp.gt.f32.partialorder %v6586_v41, %v4051_v18  ;;  %v6589_v11 = vld [vmem:[%s7484_s23 + $0x580] sm:$0xff]  ;;  %v6590_v28 = vld [vmem:[%s7484_s23 + $0x588] sm:$0xff] }
 0x116   : > { %v3791_v17 = vadd.f32 %v6569_v63, %v3790_v8  ;;  %v3797_v36 = vadd.f32 %v6570_v22, %v3796_v50  ;;  %v3803_v21 = vadd.f32 %v6571_v40, %v3802_v31  ;;  %vm4060_vm14 = vcmp.gt.f32.partialorder %v6587_v20, %v4052_v56 }
 0x117   : > { %v3521_v3 = vrot.slane %v3514_v4, %v7673_v7  ;;  %v3809_v35 = vadd.f32 %v6572_v30, %v3808_v60  ;;  %vm4061_vm15 = vcmp.gt.f32.partialorder %v6588_v26, %v4053_v42  ;;  %v4062_v1 = vsel %vm4058_vm12, %v6585_v16, %v4050_v2  ;;  %v6591_v30 = vld [vmem:[%s7484_s23 + $0x590] sm:$0xff]  ;;  %v6592_v60 = vld [vmem:[%s7484_s23 + $0x598] sm:$0xff] }
 0x118   : > { %v4063_v23 = vsel %vm4059_vm13, %v6586_v41, %v4051_v18  ;;  %v3792_v51 = vrot.slane %v3791_v17, 2  ;;  %v3798_v38 = vrot.slane %v3797_v36, 2  ;;  %v3804_v58 = vrot.slane %v3803_v21, 2 }
 0x119   : > { %3524 = vst.msk [vmem:[#allocation2 + $0x22] ss:$8 sm:$0xf] %vm7766_vm8, %v3521_v3  ;;  %v4064_v29 = vsel %vm4060_vm14, %v6587_v20, %v4052_v56  ;;  %v3810_v4 = vrot.slane %v3809_v35, 2  ;;  %v4065_v63 = vsel %vm4061_vm15, %v6588_v26, %v4053_v42  ;;  %v4066_v22 = vsel %vm4058_vm12, 1, %v10142_v27  ;;  %v6593_v20 = vld [vmem:[%s7484_s23 + $0x780] sm:$0xff] }
 0x11a   : > { %v4067_v40 = vsel %vm4059_vm13, 1, %v10142_v27  ;;  %v3793_v8 = vadd.f32 %v3792_v51, %v3791_v17  ;;  %v3799_v50 = vadd.f32 %v3798_v38, %v3797_v36  ;;  %v3805_v31 = vadd.f32 %v3804_v58, %v3803_v21  ;;  %v6595_v51 = vld [vmem:[%s7484_s23 + $0x790] sm:$0xff]  ;;  %v6596_v38 = vld [vmem:[%s7484_s23 + $0x798] sm:$0xff] }
 0x11b   : > { %v4068_v3 = vsel %vm4060_vm14, 1, %v10142_v27  ;;  %v3811_v61 = vadd.f32 %v3810_v4, %v3809_v35  ;;  %v4069_v62 = vsel %vm4061_vm15, 1, %v10142_v27  ;;  %vm4074_vm0 = vcmp.gt.f32.partialorder %v6589_v11, %v4062_v1  ;;  %v6594_v35 = vld [vmem:[%s7484_s23 + $0x788] sm:$0xff] }
 0x11c   : > { %vm4075_vm1 = vcmp.gt.f32.partialorder %v6590_v28, %v4063_v23  ;;  %v3794_v2 = vrot.slane %v3793_v8, 1  ;;  %v3800_v18 = vrot.slane %v3799_v50, 1  ;;  %v3806_v16 = vrot.slane %v3805_v31, 1 }
 0x11d   : > { %vm4076_vm2 = vcmp.gt.f32.partialorder %v6591_v30, %v4064_v29  ;;  %v3812_v41 = vrot.slane %v3811_v61, 1  ;;  %vm4077_vm3 = vcmp.gt.f32.partialorder %v6592_v60, %v4065_v63  ;;  %v4078_v17 = vsel %vm4074_vm0, %v6589_v11, %v4062_v1  ;;  %v4370_v11 = vld [vmem:[%s7484_s23 + $0x1a0] sm:$0xff] }
 0x11e   : > { %v4079_v56 = vsel %vm4075_vm1, %v6590_v28, %v4063_v23  ;;  %v3795_v36 = vadd.f32 %v3794_v2, %v3793_v8  ;;  %v3801_v21 = vadd.f32 %v3800_v18, %v3799_v50  ;;  %v3807_v42 = vadd.f32 %v3806_v16, %v3805_v31  ;;  %v4373_v2 = vld [vmem:[%s7484_s23 + $0x1b8] sm:$0xff] }
 0x11f   : > { %v4080_v26 = vsel %vm4076_vm2, %v6591_v30, %v4064_v29  ;;  %v3813_v58 = vadd.f32 %v3812_v41, %v3811_v61  ;;  %v4081_v4 = vsel %vm4077_vm3, %v6592_v60, %v4065_v63  ;;  %v4082_v24 = vsel %vm4074_vm0, 2, %v4066_v22  ;;  %v4372_v63 = vld [vmem:[%s7484_s23 + $0x1b0] sm:$0xff]  ;;  %v6614_v22 = vld [vmem:[%s7484_s23 + $0x3a8] sm:$0xff]  ;;  %v6616_v18 = vld [vmem:[%s7484_s23 + $0x3b8] sm:$0xff] }
 0x120   : > { %v4083_v19 = vsel %vm4075_vm1, 2, %v4067_v40  ;;  %v3818_v0 = vcombine.low %v3795_v36, %v3801_v21  ;;  %v4084_v57 = vsel %vm4076_vm2, 2, %v4068_v3  ;;  %v4085_v8 = vsel %vm4077_vm3, 2, %v4069_v62  ;;  %v6615_v40 = vld [vmem:[%s7484_s23 + $0x3b0] sm:$0xff] }
 0x121   : > { %vm4090_vm4 = vcmp.gt.f32.partialorder %v6593_v20, %v4078_v17  ;;  %v3819_v50 = vcombine.low %v3807_v42, %v3813_v58  ;;  %vm4091_vm5 = vcmp.gt.f32.partialorder %v6594_v35, %v4079_v56  ;;  %vm4092_vm6 = vcmp.gt.f32.partialorder %v6595_v51, %v4080_v26 }
 0x122   : > { %vm4093_vm7 = vcmp.gt.f32.partialorder %v6596_v38, %v4081_v4  ;;  %v3826_v61 = vrot.slane %v3818_v0, %v7673_v7  ;;  %v8647_v1 = vsel %vm4090_vm4, 3, %v4082_v24  ;;  %v8649_v23 = vsel %vm4091_vm5, 3, %v4083_v19  ;;  %v4371_v0 = vld [vmem:[%s7484_s23 + $0x1a8] sm:$0xff]  ;;  %v6613_v24 = vld [vmem:[%s7484_s23 + $0x3a0] sm:$0xff] }
 0x123   : > { %10162 = vst [vmem:[#allocation38_spill] sm:$0xff] %v8647_v1  ;;  %10163 = vst [vmem:[#allocation39_spill] sm:$0xff] %v8649_v23  ;;  %v8651_v29 = vsel %vm4092_vm6, 3, %v4084_v57  ;;  %v3833_v62 = vrot.slane %v3819_v50, %v7673_v7  ;;  %v8655_v28 = vsel %vm4093_vm7, 3, %v4085_v8  ;;  %vm4098_vm9 = vcmp.eq.s32.totalorder %v8647_v1, 0 }
 0x124   : > { %10164 = vst [vmem:[#allocation40_spill] sm:$0xff] %v8651_v29  ;;  %10165 = vst [vmem:[#allocation41_spill] sm:$0xff] %v8655_v28  ;;  %vm4099_vm10 = vcmp.eq.s32.totalorder %v8649_v23, 0  ;;  %vm4100_vm11 = vcmp.eq.s32.totalorder %v8651_v29, 0  ;;  %vm4101_vm12 = vcmp.eq.s32.totalorder %v8655_v28, 0  ;;  %v6597_v57 = vsel %vm4098_vm9, 1.0, %v10147_v52 }
 0x125   : > { %v6598_v19 = vsel %vm4099_vm10, 1.0, %v10147_v52  ;;  %v3834_v30 = vcombine.low %v3826_v61, %v3833_v62  ;;  %v6599_v31 = vsel %vm4100_vm11, 1.0, %v10147_v52  ;;  %v6600_v3 = vsel %vm4101_vm12, 1.0, %v10147_v52  ;;  %v6617_v61 = vld [vmem:[%s7484_s23 + $0x5a0] sm:$0xff]  ;;  %v6618_v62 = vld [vmem:[%s7484_s23 + $0x5a8] sm:$0xff] }
 0x126   : > { %v4110_v60 = vrot.slane %v6597_v57, 4  ;;  %v4116_v16 = vrot.slane %v6598_v19, 4  ;;  %v4122_v41 = vrot.slane %v6599_v31, 4  ;;  %v4128_v17 = vrot.slane %v6600_v3, 4 }
 0x127   : > { %vm4378_vm13 = vcmp.gt.f32.partialorder %v6613_v24, %v4370_v11  ;;  %v3841_v56 = vrot.slane %v3834_v30, %v7673_v7  ;;  %vm4379_vm14 = vcmp.gt.f32.partialorder %v6614_v22, %v4371_v0  ;;  %vm4380_vm15 = vcmp.gt.f32.partialorder %v6615_v40, %v4372_v63 }
 0x128   : > { %v4111_v20 = vadd.f32 %v6597_v57, %v4110_v60  ;;  %v4117_v36 = vadd.f32 %v6598_v19, %v4116_v16  ;;  %v4123_v21 = vadd.f32 %v6599_v31, %v4122_v41  ;;  %v4129_v42 = vadd.f32 %v6600_v3, %v4128_v17  ;;  %v6619_v57 = vld [vmem:[%s7484_s23 + $0x5b0] sm:$0xff]  ;;  %v6620_v60 = vld [vmem:[%s7484_s23 + $0x5b8] sm:$0xff] }
 0x129   : > { %vm4381_vm0 = vcmp.gt.f32.partialorder %v6616_v18, %v4373_v2  ;;  %3844 = vst.msk [vmem:[#allocation2 + $0x23] ss:$8 sm:$0xf] %vm7766_vm8, %v3841_v56  ;;  %v4382_v35 = vsel %vm4378_vm13, %v6613_v24, %v4370_v11  ;;  %v4383_v51 = vsel %vm4379_vm14, %v6614_v22, %v4371_v0  ;;  %v4384_v38 = vsel %vm4380_vm15, %v6615_v40, %v4372_v63 }
 0x12a   : > { %v4112_v26 = vrot.slane %v4111_v20, 2  ;;  %v4118_v58 = vrot.slane %v4117_v36, 2  ;;  %v4124_v4 = vrot.slane %v4123_v21, 2  ;;  %v4130_v8 = vrot.slane %v4129_v42, 2 }
 0x12b   : > { %v4385_v50 = vsel %vm4381_vm0, %v6616_v18, %v4373_v2  ;;  %v4386_v30 = vsel %vm4378_vm13, 1, %v10142_v27  ;;  %v4387_v31 = vsel %vm4379_vm14, 1, %v10142_v27  ;;  %v4388_v3 = vsel %vm4380_vm15, 1, %v10142_v27  ;;  %v6622_v2 = vld [vmem:[%s7484_s23 + $0x7a8] sm:$0xff] }
 0x12c   : > { %v4113_v19 = vadd.f32 %v4112_v26, %v4111_v20  ;;  %v4119_v16 = vadd.f32 %v4118_v58, %v4117_v36  ;;  %v4125_v41 = vadd.f32 %v4124_v4, %v4123_v21  ;;  %v4131_v17 = vadd.f32 %v4130_v8, %v4129_v42  ;;  %v6621_v36 = vld [vmem:[%s7484_s23 + $0x7a0] sm:$0xff]  ;;  %v6623_v58 = vld [vmem:[%s7484_s23 + $0x7b0] sm:$0xff]  ;;  %v6624_v4 = vld [vmem:[%s7484_s23 + $0x7b8] sm:$0xff] }
 0x12d   : > { %v4389_v56 = vsel %vm4381_vm0, 1, %v10142_v27  ;;  %vm4394_vm1 = vcmp.gt.f32.partialorder %v6617_v61, %v4382_v35  ;;  %vm4395_vm2 = vcmp.gt.f32.partialorder %v6618_v62, %v4383_v51  ;;  %vm4396_vm3 = vcmp.gt.f32.partialorder %v6619_v57, %v4384_v38 }
 0x12e   : > { %v4114_v28 = vrot.slane %v4113_v19, 1  ;;  %v4120_v11 = vrot.slane %v4119_v16, 1  ;;  %v4126_v0 = vrot.slane %v4125_v41, 1  ;;  %v4132_v24 = vrot.slane %v4131_v17, 1 }
 0x12f   : > { %vm4397_vm4 = vcmp.gt.f32.partialorder %v6620_v60, %v4385_v50  ;;  %v4398_v22 = vsel %vm4394_vm1, %v6617_v61, %v4382_v35  ;;  %v4399_v40 = vsel %vm4395_vm2, %v6618_v62, %v4383_v51  ;;  %v4400_v20 = vsel %vm4396_vm3, %v6619_v57, %v4384_v38  ;;  %v4690_v62 = vld [vmem:[%s7484_s23 + $0x1c0] sm:$0xff]  ;;  %v4691_v57 = vld [vmem:[%s7484_s23 + $0x1c8] sm:$0xff] }
 0x130   : > { %v4115_v63 = vadd.f32 %v4114_v28, %v4113_v19  ;;  %v4121_v18 = vadd.f32 %v4120_v11, %v4119_v16  ;;  %v4127_v21 = vadd.f32 %v4126_v0, %v4125_v41  ;;  %v4133_v42 = vadd.f32 %v4132_v24, %v4131_v17  ;;  %v6643_v41 = vld [vmem:[%s7484_s23 + $0x3d0] sm:$0xff]  ;;  %v4693_v24 = vld [vmem:[%s7484_s23 + $0x1d8] sm:$0xff] }
 0x131   : > { %v4401_v26 = vsel %vm4397_vm4, %v6620_v60, %v4385_v50  ;;  %v4402_v8 = vsel %vm4394_vm1, 2, %v4386_v30  ;;  %v4403_v28 = vsel %vm4395_vm2, 2, %v4387_v31  ;;  %v4404_v19 = vsel %vm4396_vm3, 2, %v4388_v3  ;;  %v6642_v30 = vld [vmem:[%s7484_s23 + $0x3c8] sm:$0xff]  ;;  %v4692_v60 = vld [vmem:[%s7484_s23 + $0x1d0] sm:$0xff] }
 0x132   : > { %v4405_v29 = vsel %vm4397_vm4, 2, %v4389_v56  ;;  %v4138_v23 = vcombine.low %v4115_v63, %v4121_v18  ;;  %v4139_v1 = vcombine.low %v4127_v21, %v4133_v42  ;;  %vm4410_vm5 = vcmp.gt.f32.partialorder %v6621_v36, %v4398_v22  ;;  %v6644_v63 = vld [vmem:[%s7484_s23 + $0x3d8] sm:$0xff] }
 0x133   : > { %vm4411_vm6 = vcmp.gt.f32.partialorder %v6622_v2, %v4399_v40  ;;  %vm4412_vm7 = vcmp.gt.f32.partialorder %v6623_v58, %v4400_v20  ;;  %vm4413_vm9 = vcmp.gt.f32.partialorder %v6624_v4, %v4401_v26  ;;  %v8703_v16 = vsel %vm4410_vm5, 3, %v4402_v8 }
 0x134   : > { %10166 = vst [vmem:[#allocation42_spill] sm:$0xff] %v8703_v16  ;;  %v8705_v35 = vsel %vm4411_vm6, 3, %v4403_v28  ;;  %v4146_v51 = vrot.slane %v4138_v23, %v7673_v7  ;;  %v4153_v38 = vrot.slane %v4139_v1, %v7673_v7  ;;  %v8709_v50 = vsel %vm4412_vm7, 3, %v4404_v19  ;;  %v6641_v23 = vld [vmem:[%s7484_s23 + $0x3c0] sm:$0xff]  ;;  %v6646_v19 = vld [vmem:[%s7484_s23 + $0x5c8] sm:$0xff] }
 0x135   : > { %10167 = vst [vmem:[#allocation43_spill] sm:$0xff] %v8705_v35  ;;  %10168 = vst [vmem:[#allocation44_spill] sm:$0xff] %v8709_v50  ;;  %v8711_v61 = vsel %vm4413_vm9, 3, %v4405_v29  ;;  %vm4418_vm10 = vcmp.eq.s32.totalorder %v8703_v16, 0  ;;  %vm4419_vm11 = vcmp.eq.s32.totalorder %v8705_v35, 0  ;;  %vm4420_vm12 = vcmp.eq.s32.totalorder %v8709_v50, 0 }
 0x136   : > { %10169 = vst [vmem:[#allocation45_spill] sm:$0xff] %v8711_v61  ;;  %vm4421_vm13 = vcmp.eq.s32.totalorder %v8711_v61, 0  ;;  %v4154_v1 = vcombine.low %v4146_v51, %v4153_v38  ;;  %v6625_v31 = vsel %vm4418_vm10, 1.0, %v10147_v52  ;;  %v6626_v29 = vsel %vm4419_vm11, 1.0, %v10147_v52  ;;  %v6645_v28 = vld [vmem:[%s7484_s23 + $0x5c0] sm:$0xff] }
 0x137   : > { %v6627_v3 = vsel %vm4420_vm12, 1.0, %v10147_v52  ;;  %v6628_v17 = vsel %vm4421_vm13, 1.0, %v10147_v52  ;;  %v4430_v56 = vrot.slane %v6625_v31, 4  ;;  %v4436_v11 = vrot.slane %v6626_v29, 4 }
 0x138   : > { %v4442_v0 = vrot.slane %v6627_v3, 4  ;;  %v4161_v22 = vrot.slane %v4154_v1, %v7673_v7  ;;  %v4448_v40 = vrot.slane %v6628_v17, 4  ;;  %vm4698_vm14 = vcmp.gt.f32.partialorder %v6641_v23, %v4690_v62 }
 0x139   : > { %vm4699_vm15 = vcmp.gt.f32.partialorder %v6642_v30, %v4691_v57  ;;  %v4431_v20 = vadd.f32 %v6625_v31, %v4430_v56  ;;  %v4437_v36 = vadd.f32 %v6626_v29, %v4436_v11  ;;  %vm4700_vm0 = vcmp.gt.f32.partialorder %v6643_v41, %v4692_v60  ;;  %v6647_v29 = vld [vmem:[%s7484_s23 + $0x5d0] sm:$0xff] }
 0x13a   : > { %v4443_v2 = vadd.f32 %v6627_v3, %v4442_v0  ;;  %4164 = vst.msk [vmem:[#allocation2 + $0x24] ss:$8 sm:$0xf] %vm7766_vm8, %v4161_v22  ;;  %v4449_v18 = vadd.f32 %v6628_v17, %v4448_v40  ;;  %vm4701_vm1 = vcmp.gt.f32.partialorder %v6644_v63, %v4693_v24  ;;  %v4702_v21 = vsel %vm4698_vm14, %v6641_v23, %v4690_v62  ;;  %v6648_v0 = vld [vmem:[%s7484_s23 + $0x5d8] sm:$0xff] }
 0x13b   : > { %v4703_v42 = vsel %vm4699_vm15, %v6642_v30, %v4691_v57  ;;  %v4432_v26 = vrot.slane %v4431_v20, 2  ;;  %v4438_v58 = vrot.slane %v4437_v36, 2  ;;  %v4704_v8 = vsel %vm4700_vm0, %v6643_v41, %v4692_v60  ;;  %v6649_v41 = vld [vmem:[%s7484_s23 + $0x7c0] sm:$0xff] }
 0x13c   : > { %v4444_v4 = vrot.slane %v4443_v2, 2  ;;  %v4450_v51 = vrot.slane %v4449_v18, 2  ;;  %v4705_v38 = vsel %vm4701_vm1, %v6644_v63, %v4693_v24  ;;  %v4706_v1 = vsel %vm4698_vm14, 1, %v10142_v27 }
 0x13d   : > { %v4707_v31 = vsel %vm4699_vm15, 1, %v10142_v27  ;;  %v4433_v3 = vadd.f32 %v4432_v26, %v4431_v20  ;;  %v4439_v17 = vadd.f32 %v4438_v58, %v4437_v36  ;;  %v4708_v11 = vsel %vm4700_vm0, 1, %v10142_v27  ;;  %v6651_v26 = vld [vmem:[%s7484_s23 + $0x7d0] sm:$0xff]  ;;  %v6652_v58 = vld [vmem:[%s7484_s23 + $0x7d8] sm:$0xff] }
 0x13e   : > { %v4445_v56 = vadd.f32 %v4444_v4, %v4443_v2  ;;  %v4451_v22 = vadd.f32 %v4450_v51, %v4449_v18  ;;  %v4709_v40 = vsel %vm4701_vm1, 1, %v10142_v27  ;;  %vm4714_vm2 = vcmp.gt.f32.partialorder %v6645_v28, %v4702_v21  ;;  %v6650_v18 = vld [vmem:[%s7484_s23 + $0x7c8] sm:$0xff] }
 0x13f   : > { %vm4715_vm3 = vcmp.gt.f32.partialorder %v6646_v19, %v4703_v42  ;;  %v4434_v62 = vrot.slane %v4433_v3, 1  ;;  %v4440_v57 = vrot.slane %v4439_v17, 1  ;;  %vm4716_vm4 = vcmp.gt.f32.partialorder %v6647_v29, %v4704_v8 }
 0x140   : > { %v4446_v23 = vrot.slane %v4445_v56, 1  ;;  %v4452_v30 = vrot.slane %v4451_v22, 1  ;;  %vm4717_vm5 = vcmp.gt.f32.partialorder %v6648_v0, %v4705_v38  ;;  %v4718_v20 = vsel %vm4714_vm2, %v6645_v28, %v4702_v21  ;;  %v5010_v28 = vld [vmem:[%s7484_s23 + $0x1e0] sm:$0xff] }
 0x141   : > { %v4719_v60 = vsel %vm4715_vm3, %v6646_v19, %v4703_v42  ;;  %v4435_v36 = vadd.f32 %v4434_v62, %v4433_v3  ;;  %v4441_v2 = vadd.f32 %v4440_v57, %v4439_v17  ;;  %v4720_v63 = vsel %vm4716_vm4, %v6647_v29, %v4704_v8  ;;  %v6671_v29 = vld [vmem:[%s7484_s23 + $0x3f0] sm:$0xff]  ;;  %v5013_v62 = vld [vmem:[%s7484_s23 + $0x1f8] sm:$0xff] }
 0x142   : > { %v4447_v24 = vadd.f32 %v4446_v23, %v4445_v56  ;;  %v4453_v4 = vadd.f32 %v4452_v30, %v4451_v22  ;;  %v4721_v51 = vsel %vm4717_vm5, %v6648_v0, %v4705_v38  ;;  %v4722_v61 = vsel %vm4714_vm2, 2, %v4706_v1  ;;  %v5012_v1 = vld [vmem:[%s7484_s23 + $0x1f0] sm:$0xff]  ;;  %v6672_v57 = vld [vmem:[%s7484_s23 + $0x3f8] sm:$0xff] }
 0x143   : > { %v4723_v50 = vsel %vm4715_vm3, 2, %v4707_v31  ;;  %v4458_v35 = vcombine.low %v4435_v36, %v4441_v2  ;;  %v4724_v16 = vsel %vm4716_vm4, 2, %v4708_v11  ;;  %v4725_v3 = vsel %vm4717_vm5, 2, %v4709_v40  ;;  %v6670_v31 = vld [vmem:[%s7484_s23 + $0x3e8] sm:$0xff] }
 0x144   : > { %vm4730_vm6 = vcmp.gt.f32.partialorder %v6649_v41, %v4718_v20  ;;  %v4459_v17 = vcombine.low %v4447_v24, %v4453_v4  ;;  %vm4731_vm7 = vcmp.gt.f32.partialorder %v6650_v18, %v4719_v60  ;;  %vm4732_vm9 = vcmp.gt.f32.partialorder %v6651_v26, %v4720_v63 }
 0x145   : > { %vm4733_vm10 = vcmp.gt.f32.partialorder %v6652_v58, %v4721_v51  ;;  %v4466_v56 = vrot.slane %v4458_v35, %v7673_v7  ;;  %v8761_v21 = vsel %vm4730_vm6, 3, %v4722_v61  ;;  %v8763_v42 = vsel %vm4731_vm7, 3, %v4723_v50  ;;  %v5011_v35 = vld [vmem:[%s7484_s23 + $0x1e8] sm:$0xff]  ;;  %v6669_v61 = vld [vmem:[%s7484_s23 + $0x3e0] sm:$0xff] }
 0x146   : > { %10170 = vst [vmem:[#allocation46_spill] sm:$0xff] %v8761_v21  ;;  %10171 = vst [vmem:[#allocation47_spill] sm:$0xff] %v8763_v42  ;;  %v8765_v8 = vsel %vm4732_vm9, 3, %v4724_v16  ;;  %v4473_v19 = vrot.slane %v4459_v17, %v7673_v7  ;;  %v8769_v38 = vsel %vm4733_vm10, 3, %v4725_v3  ;;  %vm4738_vm11 = vcmp.eq.s32.totalorder %v8761_v21, 0 }
 0x147   : > { %10172 = vst [vmem:[#allocation48_spill] sm:$0xff] %v8765_v8  ;;  %10173 = vst [vmem:[#allocation49_spill] sm:$0xff] %v8769_v38  ;;  %vm4739_vm12 = vcmp.eq.s32.totalorder %v8763_v42, 0  ;;  %vm4740_vm13 = vcmp.eq.s32.totalorder %v8765_v8, 0  ;;  %vm4741_vm14 = vcmp.eq.s32.totalorder %v8769_v38, 0  ;;  %v6653_v16 = vsel %vm4738_vm11, 1.0, %v10147_v52 }
 0x148   : > { %v6654_v50 = vsel %vm4739_vm12, 1.0, %v10147_v52  ;;  %v4474_v11 = vcombine.low %v4466_v56, %v4473_v19  ;;  %v6655_v0 = vsel %vm4740_vm13, 1.0, %v10147_v52  ;;  %v6656_v22 = vsel %vm4741_vm14, 1.0, %v10147_v52  ;;  %v6673_v56 = vld [vmem:[%s7484_s23 + $0x5e0] sm:$0xff]  ;;  %v6674_v19 = vld [vmem:[%s7484_s23 + $0x5e8] sm:$0xff] }
 0x149   : > { %v4750_v40 = vrot.slane %v6653_v16, 4  ;;  %v4756_v23 = vrot.slane %v6654_v50, 4  ;;  %v4762_v30 = vrot.slane %v6655_v0, 4  ;;  %v4768_v20 = vrot.slane %v6656_v22, 4 }
 0x14a   : > { %vm5018_vm15 = vcmp.gt.f32.partialorder %v6669_v61, %v5010_v28  ;;  %v4481_v60 = vrot.slane %v4474_v11, %v7673_v7  ;;  %vm5019_vm0 = vcmp.gt.f32.partialorder %v6670_v31, %v5011_v35  ;;  %vm5020_vm1 = vcmp.gt.f32.partialorder %v6671_v29, %v5012_v1 }
 0x14b   : > { %v4751_v41 = vadd.f32 %v6653_v16, %v4750_v40  ;;  %v4757_v36 = vadd.f32 %v6654_v50, %v4756_v23  ;;  %v4763_v2 = vadd.f32 %v6655_v0, %v4762_v30  ;;  %v4769_v24 = vadd.f32 %v6656_v22, %v4768_v20  ;;  %v6675_v16 = vld [vmem:[%s7484_s23 + $0x5f0] sm:$0xff]  ;;  %v6676_v40 = vld [vmem:[%s7484_s23 + $0x5f8] sm:$0xff] }
 0x14c   : > { %vm5021_vm2 = vcmp.gt.f32.partialorder %v6672_v57, %v5013_v62  ;;  %4484 = vst.msk [vmem:[#allocation2 + $0x25] ss:$8 sm:$0xf] %vm7766_vm8, %v4481_v60  ;;  %v5022_v18 = vsel %vm5018_vm15, %v6669_v61, %v5010_v28  ;;  %v5023_v26 = vsel %vm5019_vm0, %v6670_v31, %v5011_v35  ;;  %v5024_v58 = vsel %vm5020_vm1, %v6671_v29, %v5012_v1 }
 0x14d   : > { %v4752_v63 = vrot.slane %v4751_v41, 2  ;;  %v4758_v4 = vrot.slane %v4757_v36, 2  ;;  %v4764_v51 = vrot.slane %v4763_v2, 2  ;;  %v4770_v3 = vrot.slane %v4769_v24, 2 }
 0x14e   : > { %v5025_v17 = vsel %vm5021_vm2, %v6672_v57, %v5013_v62  ;;  %v5026_v11 = vsel %vm5018_vm15, 1, %v10142_v27  ;;  %v5027_v0 = vsel %vm5019_vm0, 1, %v10142_v27  ;;  %v5028_v22 = vsel %vm5020_vm1, 1, %v10142_v27  ;;  %v6678_v62 = vld [vmem:[%s7484_s23 + $0x7e8] sm:$0xff] }
 0x14f   : > { %v4753_v50 = vadd.f32 %v4752_v63, %v4751_v41  ;;  %v4759_v23 = vadd.f32 %v4758_v4, %v4757_v36  ;;  %v4765_v30 = vadd.f32 %v4764_v51, %v4763_v2  ;;  %v4771_v20 = vadd.f32 %v4770_v3, %v4769_v24  ;;  %v6677_v36 = vld [vmem:[%s7484_s23 + $0x7e0] sm:$0xff]  ;;  %v6679_v63 = vld [vmem:[%s7484_s23 + $0x7f0] sm:$0xff]  ;;  %v6680_v4 = vld [vmem:[%s7484_s23 + $0x7f8] sm:$0xff] }
 0x150   : > { %v5029_v60 = vsel %vm5021_vm2, 1, %v10142_v27  ;;  %vm5034_vm3 = vcmp.gt.f32.partialorder %v6673_v56, %v5022_v18  ;;  %vm5035_vm4 = vcmp.gt.f32.partialorder %v6674_v19, %v5023_v26  ;;  %vm5036_vm5 = vcmp.gt.f32.partialorder %v6675_v16, %v5024_v58 }
 0x151   : > { %v4754_v38 = vrot.slane %v4753_v50, 1  ;;  %v4760_v28 = vrot.slane %v4759_v23, 1  ;;  %v4766_v35 = vrot.slane %v4765_v30, 1  ;;  %v4772_v61 = vrot.slane %v4771_v20, 1 }
 0x152   : > { %vm5037_vm6 = vcmp.gt.f32.partialorder %v6676_v40, %v5025_v17  ;;  %v5038_v31 = vsel %vm5034_vm3, %v6673_v56, %v5022_v18  ;;  %v5039_v29 = vsel %vm5035_vm4, %v6674_v19, %v5023_v26  ;;  %v5040_v41 = vsel %vm5036_vm5, %v6675_v16, %v5024_v58 }
 0x153   : > { %v4755_v1 = vadd.f32 %v4754_v38, %v4753_v50  ;;  %vm326_vm7 = vcmp.eq.s32.totalorder %v7722_v43, 1  ;;  %v4761_v27 = vadd.f32 %v4760_v28, %v4759_v23  ;;  %v4767_v57 = vadd.f32 %v4766_v35, %v4765_v30 }
 0x154   : > { %v4773_v2 = vadd.f32 %v4772_v61, %v4771_v20  ;;  %v5041_v24 = vsel %vm5037_vm6, %v6676_v40, %v5025_v17  ;;  %v5042_v51 = vsel %vm5034_vm3, 2, %v5026_v11  ;;  %v5043_v38 = vsel %vm5035_vm4, 2, %v5027_v0 }
 0x155   : > { %v5044_v3 = vsel %vm5036_vm5, 2, %v5028_v22  ;;  %v5045_v50 = vsel %vm5037_vm6, 2, %v5029_v60  ;;  %v4778_v8 = vcombine.low %v4755_v1, %v4761_v27  ;;  %vm5050_vm9 = vcmp.gt.f32.partialorder %v6677_v36, %v5038_v31 }
 0x156   : > { %v4779_v42 = vcombine.low %v4767_v57, %v4773_v2  ;;  %vm5051_vm10 = vcmp.gt.f32.partialorder %v6678_v62, %v5039_v29  ;;  %vm5052_vm11 = vcmp.gt.f32.partialorder %v6679_v63, %v5040_v41  ;;  %vm5053_vm12 = vcmp.gt.f32.partialorder %v6680_v4, %v5041_v24 }
 0x157   : > { %v8818_v23 = vsel %vm5050_vm9, 3, %v5042_v51  ;;  %v8820_v30 = vsel %vm5051_vm10, 3, %v5043_v38  ;;  %v4786_v20 = vrot.slane %v4778_v8, %v7673_v7  ;;  %v8824_v26 = vsel %vm5052_vm11, 3, %v5044_v3 }
 0x158   : > { %v4793_v18 = vrot.slane %v4779_v42, %v7673_v7  ;;  %10174 = vst [vmem:[#allocation50_spill] sm:$0xff] %v8824_v26  ;;  %v8826_v58 = vsel %vm5053_vm12, 3, %v5045_v50  ;;  %vm5058_vm13 = vcmp.eq.s32.totalorder %v8818_v23, 0  ;;  %vm5059_vm14 = vcmp.eq.s32.totalorder %v8820_v30, 0 }
 0x159   : > { %10175 = vst [vmem:[#allocation51_spill] sm:$0xff] %v8826_v58  ;;  %vm5060_vm15 = vcmp.eq.s32.totalorder %v8824_v26, 0  ;;  %vm5061_vm0 = vcmp.eq.s32.totalorder %v8826_v58, 0  ;;  %v6681_v56 = vsel %vm5058_vm13, 1.0, %v10147_v52  ;;  %v6682_v19 = vsel %vm5059_vm14, 1.0, %v10147_v52 }
 0x15a   : > { %v4794_v17 = vcombine.low %v4786_v20, %v4793_v18  ;;  %v6683_v8 = vsel %vm5060_vm15, 1.0, %v10147_v52  ;;  %v6684_v42 = vsel %vm5061_vm0, 1.0, %v10147_v52  ;;  %v5070_v16 = vrot.slane %v6681_v56, 4 }
 0x15b   : > { %v5076_v11 = vrot.slane %v6682_v19, 4  ;;  %v5082_v0 = vrot.slane %v6683_v8, 4  ;;  %v5088_v40 = vrot.slane %v6684_v42, 4  ;;  %vm327_vm1 = vcmp.eq.s32.totalorder %v7727_v47, 1 }
 0x15c   : > { %v4801_v22 = vrot.slane %v4794_v17, %v7673_v7  ;;  %vm328_vm2 = vcmp.eq.s32.totalorder %v7729_v48, 1  ;;  %v5071_v60 = vadd.f32 %v6681_v56, %v5070_v16  ;;  %vm329_vm3 = vcmp.eq.s32.totalorder %v7731_v49, 1 }
 0x15d   : > { %v5077_v28 = vadd.f32 %v6682_v19, %v5076_v11  ;;  %v5083_v35 = vadd.f32 %v6683_v8, %v5082_v0  ;;  %v5089_v61 = vadd.f32 %v6684_v42, %v5088_v40  ;;  %v6265_v1 = vsel %vm326_vm7, 1.0, %v10147_v52 }
 0x15e   : > { %4804 = vst.msk [vmem:[#allocation2 + $0x26] ss:$8 sm:$0xf] %vm7766_vm8, %v4801_v22  ;;  %v6266_v31 = vsel %vm327_vm1, 1.0, %v10147_v52  ;;  %v6267_v29 = vsel %vm328_vm2, 1.0, %v10147_v52  ;;  %v5072_v41 = vrot.slane %v5071_v60, 2 }
 0x15f   : > { %v5078_v36 = vrot.slane %v5077_v28, 2  ;;  %v5084_v62 = vrot.slane %v5083_v35, 2  ;;  %v6268_v27 = vsel %vm329_vm3, 1.0, %v10147_v52  ;;  %v5090_v57 = vrot.slane %v5089_v61, 2 }
 0x160   : > { %v338_v2 = vrot.slane %v6265_v1, 4  ;;  %v344_v24 = vrot.slane %v6266_v31, 4  ;;  %v350_v63 = vrot.slane %v6267_v29, 4  ;;  %v5073_v4 = vadd.f32 %v5072_v41, %v5071_v60 }
 0x161   : > { %v5079_v51 = vadd.f32 %v5078_v36, %v5077_v28  ;;  %v5085_v38 = vadd.f32 %v5084_v62, %v5083_v35  ;;  %v356_v3 = vrot.slane %v6268_v27, 4  ;;  %v5091_v50 = vadd.f32 %v5090_v57, %v5089_v61 }
 0x162   : > { %v339_v20 = vadd.f32 %v6265_v1, %v338_v2  ;;  %v345_v18 = vadd.f32 %v6266_v31, %v344_v24  ;;  %v351_v17 = vadd.f32 %v6267_v29, %v350_v63  ;;  %v5074_v56 = vrot.slane %v5073_v4, 1 }
 0x163   : > { %v5080_v19 = vrot.slane %v5079_v51, 1  ;;  %v5086_v8 = vrot.slane %v5085_v38, 1  ;;  %v357_v42 = vadd.f32 %v6268_v27, %v356_v3  ;;  %v5092_v16 = vrot.slane %v5091_v50, 1 }
 0x164   : > { %v340_v11 = vrot.slane %v339_v20, 2  ;;  %v346_v0 = vrot.slane %v345_v18, 2  ;;  %v352_v22 = vrot.slane %v351_v17, 2  ;;  %v5075_v40 = vadd.f32 %v5074_v56, %v5073_v4 }
 0x165   : > { %v5081_v49 = vadd.f32 %v5080_v19, %v5079_v51  ;;  %v5087_v48 = vadd.f32 %v5086_v8, %v5085_v38  ;;  %v358_v47 = vrot.slane %v357_v42, 2  ;;  %v5093_v60 = vadd.f32 %v5092_v16, %v5091_v50 }
 0x166   : > { %v341_v28 = vadd.f32 %v340_v11, %v339_v20  ;;  %v347_v35 = vadd.f32 %v346_v0, %v345_v18  ;;  %v353_v41 = vadd.f32 %v352_v22, %v351_v17  ;;  %vm646_vm4 = vcmp.eq.s32.totalorder %v7780_v53, 1 }
 0x167   : > { %v5098_v61 = vcombine.low %v5075_v40, %v5081_v49  ;;  %v359_v1 = vadd.f32 %v358_v47, %v357_v42  ;;  %vm647_vm5 = vcmp.eq.s32.totalorder %v7782_v54, 1  ;;  %v5099_v31 = vcombine.low %v5087_v48, %v5093_v60 }
 0x168   : > { %v342_v29 = vrot.slane %v341_v28, 1  ;;  %v348_v36 = vrot.slane %v347_v35, 1  ;;  %v354_v62 = vrot.slane %v353_v41, 1  ;;  %vm648_vm6 = vcmp.eq.s32.totalorder %v7784_v55, 1 }
 0x169   : > { %v5106_v27 = vrot.slane %v5098_v61, %v7673_v7  ;;  %v360_v57 = vrot.slane %v359_v1, 1  ;;  %vm649_vm7 = vcmp.eq.s32.totalorder %v7789_v59, 1  ;;  %v5113_v2 = vrot.slane %v5099_v31, %v7673_v7 }
 0x16a   : > { %v343_v24 = vadd.f32 %v342_v29, %v341_v28  ;;  %v349_v49 = vadd.f32 %v348_v36, %v347_v35  ;;  %v355_v47 = vadd.f32 %v354_v62, %v353_v41  ;;  %v6293_v4 = vsel %vm646_vm4, 1.0, %v10147_v52 }
 0x16b   : > { %v361_v63 = vadd.f32 %v360_v57, %v359_v1  ;;  %v6294_v48 = vsel %vm647_vm5, 1.0, %v10147_v52  ;;  %v6295_v51 = vsel %vm648_vm6, 1.0, %v10147_v52  ;;  %v5114_v38 = vcombine.low %v5106_v27, %v5113_v2 }
 0x16c   : > { %v366_v3 = vcombine.low %v343_v24, %v349_v49  ;;  %v6296_v50 = vsel %vm649_vm7, 1.0, %v10147_v52  ;;  %v658_v20 = vrot.slane %v6293_v4, 4  ;;  %v664_v17 = vrot.slane %v6294_v48, 4 }
 0x16d   : > { %v367_v18 = vcombine.low %v355_v47, %v361_v63  ;;  %v670_v56 = vrot.slane %v6295_v51, 4  ;;  %v676_v19 = vrot.slane %v6296_v50, 4  ;;  %v5121_v8 = vrot.slane %v5114_v38, %v7673_v7 }
 0x16e   : > { %v374_v42 = vrot.slane %v366_v3, %v7673_v7  ;;  %v659_v16 = vadd.f32 %v6293_v4, %v658_v20  ;;  %vm966_vm9 = vcmp.eq.s32.totalorder %v7837_v9, 1  ;;  %v665_v0 = vadd.f32 %v6294_v48, %v664_v17 }
 0x16f   : > { %v381_v11 = vrot.slane %v367_v18, %v7673_v7  ;;  %v671_v22 = vadd.f32 %v6295_v51, %v670_v56  ;;  %v677_v40 = vadd.f32 %v6296_v50, %v676_v19  ;;  %5124 = vst.msk [vmem:[#allocation2 + $0x27] ss:$8 sm:$0xf] %vm7766_vm8, %v5121_v8  ;;  %vm967_vm10 = vcmp.eq.s32.totalorder %v7841_v12, 1 }
 0x170   : > { %v660_v60 = vrot.slane %v659_v16, 2  ;;  %vm968_vm11 = vcmp.eq.s32.totalorder %v7843_v13, 1  ;;  %vm969_vm12 = vcmp.eq.s32.totalorder %v7846_v15, 1  ;;  %v666_v35 = vrot.slane %v665_v0, 2 }
 0x171   : > { %v382_v28 = vcombine.low %v374_v42, %v381_v11  ;;  %v672_v41 = vrot.slane %v671_v22, 2  ;;  %v678_v61 = vrot.slane %v677_v40, 2  ;;  %v6321_v31 = vsel %vm966_vm9, 1.0, %v10147_v52 }
 0x172   : > { %v661_v1 = vadd.f32 %v660_v60, %v659_v16  ;;  %v6322_v29 = vsel %vm967_vm10, 1.0, %v10147_v52  ;;  %v6323_v36 = vsel %vm968_vm11, 1.0, %v10147_v52  ;;  %v667_v27 = vadd.f32 %v666_v35, %v665_v0 }
 0x173   : > { %v389_v62 = vrot.slane %v382_v28, %v7673_v7  ;;  %v673_v57 = vadd.f32 %v672_v41, %v671_v22  ;;  %v679_v2 = vadd.f32 %v678_v61, %v677_v40  ;;  %v6324_v49 = vsel %vm969_vm12, 1.0, %v10147_v52 }
 0x174   : > { %v662_v24 = vrot.slane %v661_v1, 1  ;;  %v978_v47 = vrot.slane %v6321_v31, 4  ;;  %v984_v63 = vrot.slane %v6322_v29, 4  ;;  %v668_v4 = vrot.slane %v667_v27, 1 }
 0x175   : > { %392 = vst.msk [vmem:[#allocation2 + $0x40] ss:$8 sm:$0xf] %vm7766_vm8, %v389_v62  ;;  %v674_v48 = vrot.slane %v673_v57, 1  ;;  %v680_v51 = vrot.slane %v679_v2, 1  ;;  %v990_v38 = vrot.slane %v6323_v36, 4 }
 0x176   : > { %v663_v3 = vadd.f32 %v662_v24, %v661_v1  ;;  %v979_v50 = vadd.f32 %v6321_v31, %v978_v47  ;;  %v985_v20 = vadd.f32 %v6322_v29, %v984_v63  ;;  %v996_v18 = vrot.slane %v6324_v49, 4  ;;  %v5399_v17 = vld [vmem:[#allocation2 + $0x28] sm:$0xff]  ;;  %v5401_v56 = vld [vmem:[#allocation2 + $0x38] sm:$0xff]  ;;  %v5398_v19 = vld [vmem:[#allocation2 + $0x20] sm:$0xff] }
 0x177   : > { %v669_v8 = vadd.f32 %v668_v4, %v667_v27  ;;  %v675_v42 = vadd.f32 %v674_v48, %v673_v57  ;;  %v681_v16 = vadd.f32 %v680_v51, %v679_v2  ;;  %v991_v11 = vadd.f32 %v6323_v36, %v990_v38  ;;  %5471 = vmatprep.mubr.f32.mxu0 %v5399_v17  ;;  %v5400_v0 = vld [vmem:[#allocation2 + $0x30] sm:$0xff] }
 0x178   : > { %5546 = vmatprep.mubr.f32.mxu1 %v5401_v56  ;;  %v980_v22 = vrot.slane %v979_v50, 2  ;;  %v986_v40 = vrot.slane %v985_v20, 2  ;;  %v997_v60 = vadd.f32 %v6324_v49, %v996_v18  ;;  %vm1286_vm13 = vcmp.eq.s32.totalorder %v7895_v33, 1  ;;  %5472 = vmatmul.mubr.f32.gmra.mxu0 %v5398_v19 }
 0x179   : > { %5547 = vmatmul.mubr.f32.gmra.mxu1 %v5400_v0  ;;  %v686_v28 = vcombine.low %v663_v3, %v669_v8  ;;  %v687_v35 = vcombine.low %v675_v42, %v681_v16  ;;  %v992_v41 = vrot.slane %v991_v11, 2  ;;  %vm1287_vm14 = vcmp.eq.s32.totalorder %v7897_v34, 1 }
 0x17a   : > { %v981_v61 = vadd.f32 %v980_v22, %v979_v50  ;;  %v987_v1 = vadd.f32 %v986_v40, %v985_v20  ;;  %v998_v31 = vrot.slane %v997_v60, 2  ;;  %vm1288_vm15 = vcmp.eq.s32.totalorder %v7901_v37, 1 }
 0x17b   : > { %v694_v29 = vrot.slane %v686_v28, %v7673_v7  ;;  %v701_v36 = vrot.slane %v687_v35, %v7673_v7  ;;  %v993_v62 = vadd.f32 %v992_v41, %v991_v11  ;;  %vm1289_vm0 = vcmp.eq.s32.totalorder %v7903_v39, 1 }
 0x17c   : > { %v982_v27 = vrot.slane %v981_v61, 1  ;;  %v988_v57 = vrot.slane %v987_v1, 1  ;;  %v999_v2 = vadd.f32 %v998_v31, %v997_v60  ;;  %v6349_v24 = vsel %vm1286_vm13, 1.0, %v10147_v52 }
 0x17d   : > { %v702_v49 = vcombine.low %v694_v29, %v701_v36  ;;  %v994_v47 = vrot.slane %v993_v62, 1  ;;  %v6350_v63 = vsel %vm1287_vm14, 1.0, %v10147_v52  ;;  %v6351_v4 = vsel %vm1288_vm15, 1.0, %v10147_v52 }
 0x17e   : > { %v983_v48 = vadd.f32 %v982_v27, %v981_v61  ;;  %v989_v51 = vadd.f32 %v988_v57, %v987_v1  ;;  %v1000_v38 = vrot.slane %v999_v2, 1  ;;  %v6352_v3 = vsel %vm1289_vm0, 1.0, %v10147_v52 }
 0x17f   : > { %v709_v50 = vrot.slane %v702_v49, %v7673_v7  ;;  %v995_v20 = vadd.f32 %v994_v47, %v993_v62  ;;  %v1298_v18 = vrot.slane %v6349_v24, 4  ;;  %v1304_v17 = vrot.slane %v6350_v63, 4 }
 0x180   : > { %v1001_v56 = vadd.f32 %v1000_v38, %v999_v2  ;;  %v1006_v19 = vcombine.low %v983_v48, %v989_v51  ;;  %v1310_v8 = vrot.slane %v6351_v4, 4  ;;  %v1316_v42 = vrot.slane %v6352_v3, 4 }
 0x181   : > { %712 = vst.msk [vmem:[#allocation2 + $0x41] ss:$8 sm:$0xf] %vm7766_vm8, %v709_v50  ;;  %v1299_v16 = vadd.f32 %v6349_v24, %v1298_v18  ;;  %v1305_v11 = vadd.f32 %v6350_v63, %v1304_v17  ;;  %vm1606_vm1 = vcmp.eq.s32.totalorder %v7951_v5, 1  ;;  %vm1607_vm2 = vcmp.eq.s32.totalorder %v7955_v6, 1 }
 0x182   : > { %v1007_v0 = vcombine.low %v995_v20, %v1001_v56  ;;  %v1014_v22 = vrot.slane %v1006_v19, %v7673_v7  ;;  %v1311_v40 = vadd.f32 %v6351_v4, %v1310_v8  ;;  %v1317_v60 = vadd.f32 %v6352_v3, %v1316_v42 }
 0x183   : > { %v1300_v28 = vrot.slane %v1299_v16, 2  ;;  %v1306_v35 = vrot.slane %v1305_v11, 2  ;;  %vm1608_vm3 = vcmp.eq.s32.totalorder %v7957_v10, 1  ;;  %vm1609_vm4 = vcmp.eq.s32.totalorder %v7960_v14, 1 }
 0x184   : > { %v1021_v41 = vrot.slane %v1007_v0, %v7673_v7  ;;  %v1312_v61 = vrot.slane %v1311_v40, 2  ;;  %v1318_v1 = vrot.slane %v1317_v60, 2  ;;  %v6377_v31 = vsel %vm1606_vm1, 1.0, %v10147_v52 }
 0x185   : > { %v1301_v29 = vadd.f32 %v1300_v28, %v1299_v16  ;;  %v1307_v36 = vadd.f32 %v1306_v35, %v1305_v11  ;;  %v6378_v62 = vsel %vm1607_vm2, 1.0, %v10147_v52  ;;  %v6379_v27 = vsel %vm1608_vm3, 1.0, %v10147_v52 }
 0x186   : > { %v1022_v57 = vcombine.low %v1014_v22, %v1021_v41  ;;  %v1313_v2 = vadd.f32 %v1312_v61, %v1311_v40  ;;  %v1319_v24 = vadd.f32 %v1318_v1, %v1317_v60  ;;  %v6380_v49 = vsel %vm1609_vm4, 1.0, %v10147_v52  ;;  %v10176_v1 = vld [vmem:[#allocation14_spill] sm:$0xff] }
 0x187   : > { %v1302_v47 = vrot.slane %v1301_v29, 1  ;;  %v1308_v63 = vrot.slane %v1307_v36, 1  ;;  %v1618_v4 = vrot.slane %v6377_v31, 4  ;;  %v1624_v48 = vrot.slane %v6378_v62, 4 }
 0x188   : > { %v1029_v51 = vrot.slane %v1022_v57, %v7673_v7  ;;  %v1314_v38 = vrot.slane %v1313_v2, 1  ;;  %v1320_v3 = vrot.slane %v1319_v24, 1  ;;  %v1630_v50 = vrot.slane %v6379_v27, 4 }
 0x189   : > { %v1303_v20 = vadd.f32 %v1302_v47, %v1301_v29  ;;  %v1309_v18 = vadd.f32 %v1308_v63, %v1307_v36  ;;  %v1619_v17 = vadd.f32 %v6377_v31, %v1618_v4  ;;  %v1625_v56 = vadd.f32 %v6378_v62, %v1624_v48  ;;  %v10177_v62 = vld [vmem:[#allocation15_spill] sm:$0xff] }
 0x18a   : > { %1032 = vst.msk [vmem:[#allocation2 + $0x42] ss:$8 sm:$0xf] %vm7766_vm8, %v1029_v51  ;;  %v1315_v19 = vadd.f32 %v1314_v38, %v1313_v2  ;;  %v1321_v8 = vadd.f32 %v1320_v3, %v1319_v24  ;;  %v1631_v42 = vadd.f32 %v6379_v27, %v1630_v50  ;;  %v1636_v16 = vrot.slane %v6380_v49, 4 }
 0x18b   : > { %v1326_v11 = vcombine.low %v1303_v20, %v1309_v18  ;;  %v1620_v0 = vrot.slane %v1619_v17, 2  ;;  %v1626_v22 = vrot.slane %v1625_v56, 2  ;;  %vm1926_vm5 = vcmp.eq.s32.totalorder %v8009_v44, 1 }
 0x18c   : > { %v1327_v40 = vcombine.low %v1315_v19, %v1321_v8  ;;  %v1632_v60 = vrot.slane %v1631_v42, 2  ;;  %v1637_v28 = vadd.f32 %v6380_v49, %v1636_v16  ;;  %vm1927_vm6 = vcmp.eq.s32.totalorder %v8011_v46, 1 }
 0x18d   : > { %v1334_v35 = vrot.slane %v1326_v11, %v7673_v7  ;;  %v1621_v41 = vadd.f32 %v1620_v0, %v1619_v17  ;;  %v1627_v61 = vadd.f32 %v1626_v22, %v1625_v56  ;;  %vm1928_vm7 = vcmp.eq.s32.totalorder %v10176_v1, 1  ;;  %v10178_v0 = vld [vmem:[#allocation16_spill] sm:$0xff]  ;;  %v10179_v22 = vld [vmem:[#allocation17_spill] sm:$0xff] }
 0x18e   : > { %v1341_v31 = vrot.slane %v1327_v40, %v7673_v7  ;;  %v1633_v29 = vadd.f32 %v1632_v60, %v1631_v42  ;;  %v1638_v36 = vrot.slane %v1637_v28, 2  ;;  %vm1929_vm9 = vcmp.eq.s32.totalorder %v10177_v62, 1 }
 0x18f   : > { %v1622_v27 = vrot.slane %v1621_v41, 1  ;;  %v1628_v57 = vrot.slane %v1627_v61, 1  ;;  %v6405_v2 = vsel %vm1926_vm5, 1.0, %v10147_v52  ;;  %v6406_v24 = vsel %vm1927_vm6, 1.0, %v10147_v52 }
 0x190   : > { %v1342_v49 = vcombine.low %v1334_v35, %v1341_v31  ;;  %v1634_v47 = vrot.slane %v1633_v29, 1  ;;  %v1639_v63 = vadd.f32 %v1638_v36, %v1637_v28  ;;  %v6407_v4 = vsel %vm1928_vm7, 1.0, %v10147_v52  ;;  %v10180_v31 = vld [vmem:[#allocation18_spill] sm:$0xff] }
 0x191   : > { %v1623_v48 = vadd.f32 %v1622_v27, %v1621_v41  ;;  %v1629_v51 = vadd.f32 %v1628_v57, %v1627_v61  ;;  %v6408_v38 = vsel %vm1929_vm9, 1.0, %v10147_v52  ;;  %v1938_v3 = vrot.slane %v6405_v2, 4 }
 0x192   : > { %v1349_v50 = vrot.slane %v1342_v49, %v7673_v7  ;;  %v1635_v20 = vadd.f32 %v1634_v47, %v1633_v29  ;;  %v1640_v18 = vrot.slane %v1639_v63, 1  ;;  %v1944_v17 = vrot.slane %v6406_v24, 4  ;;  %v10181_v29 = vld [vmem:[#allocation19_spill] sm:$0xff] }
 0x193   : > { %v1646_v56 = vcombine.low %v1623_v48, %v1629_v51  ;;  %v1939_v19 = vadd.f32 %v6405_v2, %v1938_v3  ;;  %v1950_v8 = vrot.slane %v6407_v4, 4  ;;  %v1956_v42 = vrot.slane %v6408_v38, 4 }
 0x194   : > { %1352 = vst.msk [vmem:[#allocation2 + $0x43] ss:$8 sm:$0xf] %vm7766_vm8, %v1349_v50  ;;  %v1641_v16 = vadd.f32 %v1640_v18, %v1639_v63  ;;  %v1945_v11 = vadd.f32 %v6406_v24, %v1944_v17  ;;  %vm2246_vm10 = vcmp.eq.s32.totalorder %v10178_v0, 1  ;;  %vm2247_vm11 = vcmp.eq.s32.totalorder %v10179_v22, 1 }
 0x195   : > { %v1654_v40 = vrot.slane %v1646_v56, %v7673_v7  ;;  %v1940_v60 = vrot.slane %v1939_v19, 2  ;;  %v1951_v28 = vadd.f32 %v6407_v4, %v1950_v8  ;;  %v1957_v35 = vadd.f32 %v6408_v38, %v1956_v42 }
 0x196   : > { %v1647_v41 = vcombine.low %v1635_v20, %v1641_v16  ;;  %v1946_v61 = vrot.slane %v1945_v11, 2  ;;  %vm2248_vm12 = vcmp.eq.s32.totalorder %v10180_v31, 1  ;;  %vm2249_vm13 = vcmp.eq.s32.totalorder %v10181_v29, 1  ;;  %v10183_v31 = vld [vmem:[#allocation21_spill] sm:$0xff] }
 0x197   : > { %v1941_v36 = vadd.f32 %v1940_v60, %v1939_v19  ;;  %v1952_v27 = vrot.slane %v1951_v28, 2  ;;  %v1958_v57 = vrot.slane %v1957_v35, 2  ;;  %v6433_v2 = vsel %vm2246_vm10, 1.0, %v10147_v52 }
 0x198   : > { %v1661_v24 = vrot.slane %v1647_v41, %v7673_v7  ;;  %v1947_v49 = vadd.f32 %v1946_v61, %v1945_v11  ;;  %v6434_v47 = vsel %vm2247_vm11, 1.0, %v10147_v52  ;;  %v6435_v63 = vsel %vm2248_vm12, 1.0, %v10147_v52 }
 0x199   : > { %v1942_v4 = vrot.slane %v1941_v36, 1  ;;  %v1953_v48 = vadd.f32 %v1952_v27, %v1951_v28  ;;  %v1959_v51 = vadd.f32 %v1958_v57, %v1957_v35  ;;  %v6436_v38 = vsel %vm2249_vm13, 1.0, %v10147_v52  ;;  %v10182_v57 = vld [vmem:[#allocation20_spill] sm:$0xff] }
 0x19a   : > { %v1662_v3 = vcombine.low %v1654_v40, %v1661_v24  ;;  %v1948_v50 = vrot.slane %v1947_v49, 1  ;;  %v2258_v20 = vrot.slane %v6433_v2, 4  ;;  %v2264_v18 = vrot.slane %v6434_v47, 4 }
 0x19b   : > { %v1943_v17 = vadd.f32 %v1942_v4, %v1941_v36  ;;  %v1954_v56 = vrot.slane %v1953_v48, 1  ;;  %v1960_v19 = vrot.slane %v1959_v51, 1  ;;  %v2270_v8 = vrot.slane %v6435_v63, 4 }
 0x19c   : > { %v1669_v42 = vrot.slane %v1662_v3, %v7673_v7  ;;  %v1949_v16 = vadd.f32 %v1948_v50, %v1947_v49  ;;  %v2259_v11 = vadd.f32 %v6433_v2, %v2258_v20  ;;  %v2265_v60 = vadd.f32 %v6434_v47, %v2264_v18  ;;  %v10185_v50 = vld [vmem:[#allocation23_spill] sm:$0xff] }
 0x19d   : > { %v1955_v41 = vadd.f32 %v1954_v56, %v1953_v48  ;;  %v1961_v61 = vadd.f32 %v1960_v19, %v1959_v51  ;;  %v2271_v29 = vadd.f32 %v6435_v63, %v2270_v8  ;;  %v2276_v28 = vrot.slane %v6436_v38, 4  ;;  %v10184_v48 = vld [vmem:[#allocation22_spill] sm:$0xff] }
 0x19e   : > { %1672 = vst.msk [vmem:[#allocation2 + $0x44] ss:$8 sm:$0xf] %vm7766_vm8, %v1669_v42  ;;  %v1966_v40 = vcombine.low %v1943_v17, %v1949_v16  ;;  %v2260_v35 = vrot.slane %v2259_v11, 2  ;;  %v2266_v27 = vrot.slane %v2265_v60, 2  ;;  %vm2566_vm14 = vcmp.eq.s32.totalorder %v10182_v57, 1 }
 0x19f   : > { %v1967_v36 = vcombine.low %v1955_v41, %v1961_v61  ;;  %v2272_v24 = vrot.slane %v2271_v29, 2  ;;  %v2277_v4 = vadd.f32 %v6436_v38, %v2276_v28  ;;  %vm2567_vm15 = vcmp.eq.s32.totalorder %v10183_v31, 1 }
 0x1a0   : > { %v1974_v2 = vrot.slane %v1966_v40, %v7673_v7  ;;  %v2261_v49 = vadd.f32 %v2260_v35, %v2259_v11  ;;  %v2267_v47 = vadd.f32 %v2266_v27, %v2265_v60  ;;  %vm2568_vm0 = vcmp.eq.s32.totalorder %v10184_v48, 1 }
 0x1a1   : > { %v1981_v63 = vrot.slane %v1967_v36, %v7673_v7  ;;  %v2273_v51 = vadd.f32 %v2272_v24, %v2271_v29  ;;  %v2278_v3 = vrot.slane %v2277_v4, 2  ;;  %vm2569_vm1 = vcmp.eq.s32.totalorder %v10185_v50, 1 }
 0x1a2   : > { %v2262_v20 = vrot.slane %v2261_v49, 1  ;;  %v2268_v18 = vrot.slane %v2267_v47, 1  ;;  %v6461_v17 = vsel %vm2566_vm14, 1.0, %v10147_v52  ;;  %v6462_v38 = vsel %vm2567_vm15, 1.0, %v10147_v52 }
 0x1a3   : > { %v1982_v56 = vcombine.low %v1974_v2, %v1981_v63  ;;  %v2274_v19 = vrot.slane %v2273_v51, 1  ;;  %v2279_v8 = vadd.f32 %v2278_v3, %v2277_v4  ;;  %v6463_v42 = vsel %vm2568_vm0, 1.0, %v10147_v52  ;;  %v10186_v63 = vld [vmem:[#allocation24_spill] sm:$0xff] }
 0x1a4   : > { %v2263_v16 = vadd.f32 %v2262_v20, %v2261_v49  ;;  %v2269_v11 = vadd.f32 %v2268_v18, %v2267_v47  ;;  %v6464_v60 = vsel %vm2569_vm1, 1.0, %v10147_v52  ;;  %v2578_v41 = vrot.slane %v6461_v17, 4  ;;  %v10187_v49 = vld [vmem:[#allocation25_spill] sm:$0xff] }
 0x1a5   : > { %v1989_v29 = vrot.slane %v1982_v56, %v7673_v7  ;;  %v2275_v61 = vadd.f32 %v2274_v19, %v2273_v51  ;;  %v2280_v28 = vrot.slane %v2279_v8, 1  ;;  %v2584_v40 = vrot.slane %v6462_v38, 4  ;;  %v10188_v19 = vld [vmem:[#allocation26_spill] sm:$0xff] }
 0x1a6   : > { %v2286_v35 = vcombine.low %v2263_v16, %v2269_v11  ;;  %v2579_v27 = vadd.f32 %v6461_v17, %v2578_v41  ;;  %v2590_v36 = vrot.slane %v6463_v42, 4  ;;  %v2596_v24 = vrot.slane %v6464_v60, 4  ;;  %v10189_v17 = vld [vmem:[#allocation27_spill] sm:$0xff] }
 0x1a7   : > { %1992 = vst.msk [vmem:[#allocation2 + $0x45] ss:$8 sm:$0xf] %vm7766_vm8, %v1989_v29  ;;  %v2281_v4 = vadd.f32 %v2280_v28, %v2279_v8  ;;  %v2585_v2 = vadd.f32 %v6462_v38, %v2584_v40  ;;  %vm2886_vm2 = vcmp.eq.s32.totalorder %v10186_v63, 1  ;;  %vm2887_vm3 = vcmp.eq.s32.totalorder %v10187_v49, 1 }
 0x1a8   : > { %v2294_v47 = vrot.slane %v2286_v35, %v7673_v7  ;;  %v2580_v3 = vrot.slane %v2579_v27, 2  ;;  %v2591_v20 = vadd.f32 %v6463_v42, %v2590_v36  ;;  %v2597_v51 = vadd.f32 %v6464_v60, %v2596_v24 }
 0x1a9   : > { %v2287_v18 = vcombine.low %v2275_v61, %v2281_v4  ;;  %v2586_v56 = vrot.slane %v2585_v2, 2  ;;  %vm2888_vm4 = vcmp.eq.s32.totalorder %v10188_v19, 1  ;;  %vm2889_vm5 = vcmp.eq.s32.totalorder %v10189_v17, 1 }
 0x1aa   : > { %v2581_v16 = vadd.f32 %v2580_v3, %v2579_v27  ;;  %v2592_v11 = vrot.slane %v2591_v20, 2  ;;  %v2598_v41 = vrot.slane %v2597_v51, 2  ;;  %v6489_v38 = vsel %vm2886_vm2, 1.0, %v10147_v52 }
 0x1ab   : > { %v2301_v8 = vrot.slane %v2287_v18, %v7673_v7  ;;  %v2587_v29 = vadd.f32 %v2586_v56, %v2585_v2  ;;  %v6490_v28 = vsel %vm2887_vm3, 1.0, %v10147_v52  ;;  %v6491_v40 = vsel %vm2888_vm4, 1.0, %v10147_v52 }
 0x1ac   : > { %v2582_v42 = vrot.slane %v2581_v16, 1  ;;  %v2593_v60 = vadd.f32 %v2592_v11, %v2591_v20  ;;  %v2599_v61 = vadd.f32 %v2598_v41, %v2597_v51  ;;  %v6492_v35 = vsel %vm2889_vm5, 1.0, %v10147_v52 }
 0x1ad   : > { %v2302_v36 = vcombine.low %v2294_v47, %v2301_v8  ;;  %v2588_v24 = vrot.slane %v2587_v29, 1  ;;  %v2898_v4 = vrot.slane %v6489_v38, 4  ;;  %v2904_v27 = vrot.slane %v6490_v28, 4 }
 0x1ae   : > { %v2583_v3 = vadd.f32 %v2582_v42, %v2581_v16  ;;  %v2594_v17 = vrot.slane %v2593_v60, 1  ;;  %v2600_v19 = vrot.slane %v2599_v61, 1  ;;  %v2910_v49 = vrot.slane %v6491_v40, 4  ;;  %v10191_v42 = vld [vmem:[#allocation29_spill] sm:$0xff] }
 0x1af   : > { %v2309_v18 = vrot.slane %v2302_v36, %v7673_v7  ;;  %v2589_v2 = vadd.f32 %v2588_v24, %v2587_v29  ;;  %v2899_v56 = vadd.f32 %v6489_v38, %v2898_v4  ;;  %v2905_v63 = vadd.f32 %v6490_v28, %v2904_v27 }
 0x1b0   : > { %v2595_v50 = vadd.f32 %v2594_v17, %v2593_v60  ;;  %v2601_v48 = vadd.f32 %v2600_v19, %v2599_v61  ;;  %v2911_v31 = vadd.f32 %v6491_v40, %v2910_v49  ;;  %v2916_v20 = vrot.slane %v6492_v35, 4  ;;  %v10190_v19 = vld [vmem:[#allocation28_spill] sm:$0xff] }
 0x1b1   : > { %2312 = vst.msk [vmem:[#allocation2 + $0x46] ss:$8 sm:$0xf] %vm7766_vm8, %v2309_v18  ;;  %v2606_v47 = vcombine.low %v2583_v3, %v2589_v2  ;;  %v2900_v51 = vrot.slane %v2899_v56, 2  ;;  %v2906_v11 = vrot.slane %v2905_v63, 2  ;;  %vm3206_vm6 = vcmp.eq.s32.totalorder %v8249_v25, 1 }
 0x1b2   : > { %v2607_v16 = vcombine.low %v2595_v50, %v2601_v48  ;;  %v2912_v41 = vrot.slane %v2911_v31, 2  ;;  %v2917_v8 = vadd.f32 %v6492_v35, %v2916_v20  ;;  %vm3207_vm7 = vcmp.eq.s32.totalorder %v8258_v45, 1 }
 0x1b3   : > { %v2614_v38 = vrot.slane %v2606_v47, %v7673_v7  ;;  %v2901_v29 = vadd.f32 %v2900_v51, %v2899_v56  ;;  %v2907_v17 = vadd.f32 %v2906_v11, %v2905_v63  ;;  %vm3208_vm9 = vcmp.eq.s32.totalorder %v10190_v19, 1 }
 0x1b4   : > { %v2621_v49 = vrot.slane %v2607_v16, %v7673_v7  ;;  %v2913_v28 = vadd.f32 %v2912_v41, %v2911_v31  ;;  %v2918_v40 = vrot.slane %v2917_v8, 2  ;;  %vm3209_vm10 = vcmp.eq.s32.totalorder %v10191_v42, 1  ;;  %v10196_v42 = vld [vmem:[#allocation34_spill] sm:$0xff] }
 0x1b5   : > { %v2902_v60 = vrot.slane %v2901_v29, 1  ;;  %v2908_v61 = vrot.slane %v2907_v17, 1  ;;  %v6517_v48 = vsel %vm3206_vm6, 1.0, %v10147_v52  ;;  %v6518_v50 = vsel %vm3207_vm7, 1.0, %v10147_v52 }
 0x1b6   : > { %v2622_v35 = vcombine.low %v2614_v38, %v2621_v49  ;;  %v2914_v36 = vrot.slane %v2913_v28, 1  ;;  %v2919_v24 = vadd.f32 %v2918_v40, %v2917_v8  ;;  %v6519_v4 = vsel %vm3208_vm9, 1.0, %v10147_v52  ;;  %v10192_v38 = vld [vmem:[#allocation30_spill] sm:$0xff] }
 0x1b7   : > { %v2903_v63 = vadd.f32 %v2902_v60, %v2901_v29  ;;  %v2909_v27 = vadd.f32 %v2908_v61, %v2907_v17  ;;  %v6520_v3 = vsel %vm3209_vm10, 1.0, %v10147_v52  ;;  %v3218_v18 = vrot.slane %v6517_v48, 4  ;;  %v10193_v29 = vld [vmem:[#allocation31_spill] sm:$0xff] }
 0x1b8   : > { %v2629_v31 = vrot.slane %v2622_v35, %v7673_v7  ;;  %v2915_v2 = vadd.f32 %v2914_v36, %v2913_v28  ;;  %v2920_v56 = vrot.slane %v2919_v24, 1  ;;  %v3224_v20 = vrot.slane %v6518_v50, 4  ;;  %v10194_v35 = vld [vmem:[#allocation32_spill] sm:$0xff] }
 0x1b9   : > { %v2926_v47 = vcombine.low %v2903_v63, %v2909_v27  ;;  %v3219_v51 = vadd.f32 %v6517_v48, %v3218_v18  ;;  %v3230_v11 = vrot.slane %v6519_v4, 4  ;;  %v3236_v16 = vrot.slane %v6520_v3, 4  ;;  %v10195_v48 = vld [vmem:[#allocation33_spill] sm:$0xff] }
 0x1ba   : > { %2632 = vst.msk [vmem:[#allocation2 + $0x47] ss:$8 sm:$0xf] %vm7766_vm8, %v2629_v31  ;;  %v2921_v41 = vadd.f32 %v2920_v56, %v2919_v24  ;;  %v3225_v8 = vadd.f32 %v6518_v50, %v3224_v20  ;;  %vm3526_vm11 = vcmp.eq.s32.totalorder %v10192_v38, 1  ;;  %vm3527_vm12 = vcmp.eq.s32.totalorder %v10193_v29, 1 }
 0x1bb   : > { %v2934_v17 = vrot.slane %v2926_v47, %v7673_v7  ;;  %v3220_v49 = vrot.slane %v3219_v51, 2  ;;  %v3231_v40 = vadd.f32 %v6519_v4, %v3230_v11  ;;  %v3237_v28 = vadd.f32 %v6520_v3, %v3236_v16 }
 0x1bc   : > { %v2927_v60 = vcombine.low %v2915_v2, %v2921_v41  ;;  %v3226_v61 = vrot.slane %v3225_v8, 2  ;;  %vm3528_vm13 = vcmp.eq.s32.totalorder %v10194_v35, 1  ;;  %vm3529_vm14 = vcmp.eq.s32.totalorder %v10195_v48, 1 }
 0x1bd   : > { %v3221_v36 = vadd.f32 %v3220_v49, %v3219_v51  ;;  %v3232_v63 = vrot.slane %v3231_v40, 2  ;;  %v3238_v27 = vrot.slane %v3237_v28, 2  ;;  %v6545_v50 = vsel %vm3526_vm11, 1.0, %v10147_v52 }
 0x1be   : > { %v2941_v24 = vrot.slane %v2927_v60, %v7673_v7  ;;  %v3227_v18 = vadd.f32 %v3226_v61, %v3225_v8  ;;  %v6546_v31 = vsel %vm3527_vm12, 1.0, %v10147_v52  ;;  %v6547_v56 = vsel %vm3528_vm13, 1.0, %v10147_v52 }
 0x1bf   : > { %v3222_v4 = vrot.slane %v3221_v36, 1  ;;  %v3233_v3 = vadd.f32 %v3232_v63, %v3231_v40  ;;  %v3239_v2 = vadd.f32 %v3238_v27, %v3237_v28  ;;  %v6548_v20 = vsel %vm3529_vm14, 1.0, %v10147_v52 }
 0x1c0   : > { %v2942_v47 = vcombine.low %v2934_v17, %v2941_v24  ;;  %v3228_v11 = vrot.slane %v3227_v18, 1  ;;  %v3538_v16 = vrot.slane %v6545_v50, 4  ;;  %v3544_v51 = vrot.slane %v6546_v31, 4 }
 0x1c1   : > { %v5556_v41 = vld [vmem:[#allocation2 + $0x48] sm:$0xff]  ;;  %v5558_v49 = vld [vmem:[#allocation2 + $0x58] sm:$0xff]  ;;  %v5555_v48 = vld [vmem:[#allocation2 + $0x40] sm:$0xff]  ;;  %v3223_v35 = vadd.f32 %v3222_v4, %v3221_v36  ;;  %v3234_v29 = vrot.slane %v3233_v3, 1  ;;  %v3240_v60 = vrot.slane %v3239_v2, 1  ;;  %v3550_v8 = vrot.slane %v6547_v56, 4 }
 0x1c2   : > { %5627 = vmatprep.mubr.f32.mxu0 %v5556_v41  ;;  %5702 = vmatprep.mubr.f32.mxu1 %v5558_v49  ;;  %v5557_v61 = vld [vmem:[#allocation2 + $0x50] sm:$0xff]  ;;  %v2949_v38 = vrot.slane %v2942_v47, %v7673_v7  ;;  %v3229_v40 = vadd.f32 %v3228_v11, %v3227_v18  ;;  %v3539_v28 = vadd.f32 %v6545_v50, %v3538_v16  ;;  %v3556_v63 = vrot.slane %v6548_v20, 4  ;;  %v7160_v36 = vld [vmem:[%s10016_s1 + $0x78] sm:$0xff]  ;;  %v10197_v11 = vld [vmem:[#allocation35_spill] sm:$0xff] }
 0x1c3   : > { %5628 = vmatmul.mubr.f32.vlgmr.msra.gmra.mxu0 %v5555_v48  ;;  %5703 = vmatmul.mubr.f32.vlgmr.msra.gmra.mxu1 %v5557_v61  ;;  %v3235_v17 = vadd.f32 %v3234_v29, %v3233_v3  ;;  %v3241_v27 = vadd.f32 %v3240_v60, %v3239_v2  ;;  %v3545_v24 = vadd.f32 %v6546_v31, %v3544_v51  ;;  %vm3846_vm15 = vcmp.eq.s32.totalorder %v10196_v42, 1  ;;  %v7161_v4 = vld [vmem:[%s10016_s1 + $0x178] sm:$0xff]  ;;  %v7162_v31 = vld [vmem:[%s10016_s1 + $0xf0] sm:$0xff]  ;;  %v7166_v49 = vld [vmem:[%s10016_s1 + $0xe8] sm:$0xff] }
 0x1c4   : > { %6863 = vmatpush3.msra.mxu0 %v7160_v36  ;;  %6901 = vmatpush3.msra.mxu1 %v7161_v4  ;;  %2952 = vst.msk [vmem:[#allocation2 + $0x60] ss:$8 sm:$0xf] %vm7766_vm8, %v2949_v38  ;;  %v3246_v48 = vcombine.low %v3223_v35, %v3229_v40  ;;  %v3540_v50 = vrot.slane %v3539_v28, 2  ;;  %v3551_v29 = vadd.f32 %v6547_v56, %v3550_v8  ;;  %v7163_v3 = vld [vmem:[%s10016_s1 + $0x1f0] sm:$0xff]  ;;  %vm3847_vm0 = vcmp.eq.s32.totalorder %v10197_v11, 1 }
 0x1c5   : > { %v3557_v18 = vadd.f32 %v6548_v20, %v3556_v63  ;;  %6864 = vmatprep.subr.mxu0 %v7162_v31  ;;  %6902 = vmatprep.subr.mxu1 %v7163_v3  ;;  %v3247_v2 = vcombine.low %v3235_v17, %v3241_v27  ;;  %v3546_v47 = vrot.slane %v3545_v24, 2  ;;  %v10198_v16 = vld [vmem:[#allocation36_spill] sm:$0xff]  ;;  %v7167_v60 = vld [vmem:[%s10016_s1 + $0x1e8] sm:$0xff]  ;;  %v10199_v40 = vld [vmem:[#allocation37_spill] sm:$0xff]  ;;  %vm4806_vm12 = vcmp.eq.s32.totalorder %v8761_v21, 1 }
 0x1c6   : > { %vm3848_vm1 = vcmp.eq.s32.totalorder %v10198_v16, 1  ;;  %v7164_v38 = vld [vmem:[%s10016_s1 + $0x70] sm:$0xff]  ;;  %v3254_v56 = vrot.slane %v3246_v48, %v7673_v7  ;;  %v3541_v20 = vadd.f32 %v3540_v50, %v3539_v28  ;;  %v3552_v51 = vrot.slane %v3551_v29, 2  ;;  %v7168_v63 = vld [vmem:[%s10016_s1 + $0x68] sm:$0xff]  ;;  %v7170_v48 = vld [vmem:[%s10016_s1 + $0xe0] sm:$0xff] }
 0x1c7   : > { %6865 = vmatpush3.msra.mxu0 %v7164_v38  ;;  %v7165_v35 = vld [vmem:[%s10016_s1 + $0x170] sm:$0xff]  ;;  %v3558_v41 = vrot.slane %v3557_v18, 2  ;;  %v3261_v8 = vrot.slane %v3247_v2, %v7673_v7  ;;  %v3547_v61 = vadd.f32 %v3546_v47, %v3545_v24  ;;  %vm3849_vm2 = vcmp.eq.s32.totalorder %v10199_v40, 1  ;;  %v7169_v17 = vld [vmem:[%s10016_s1 + $0x168] sm:$0xff]  ;;  %v7171_v50 = vld [vmem:[%s10016_s1 + $0x1e0] sm:$0xff] }
 0x1c8   : > { %6903 = vmatpush3.msra.mxu1 %v7165_v35  ;;  %6866 = vmatprep.subr.mxu0 %v7166_v49  ;;  %v6573_v28 = vsel %vm3846_vm15, 1.0, %v10147_v52  ;;  %v3542_v27 = vrot.slane %v3541_v20, 1  ;;  %v3553_v36 = vadd.f32 %v3552_v51, %v3551_v29  ;;  %v6574_v24 = vsel %vm3847_vm0, 1.0, %v10147_v52  ;;  %v7172_v2 = vld [vmem:[%s10016_s1 + $0x60] sm:$0xff]  ;;  %v7175_v49 = vld [vmem:[%s10016_s1 + $0x1d8] sm:$0xff] }
 0x1c9   : > { %6904 = vmatprep.subr.mxu1 %v7167_v60  ;;  %6867 = vmatpush3.msra.mxu0 %v7168_v63  ;;  %v3559_v4 = vadd.f32 %v3558_v41, %v3557_v18  ;;  %v3262_v31 = vcombine.low %v3254_v56, %v3261_v8  ;;  %v3548_v3 = vrot.slane %v3547_v61, 1  ;;  %v6575_v29 = vsel %vm3848_vm1, 1.0, %v10147_v52  ;;  %v7173_v47 = vld [vmem:[%s10016_s1 + $0x160] sm:$0xff]  ;;  %v7174_v41 = vld [vmem:[%s10016_s1 + $0xd8] sm:$0xff] }
 0x1ca   : > { %6905 = vmatpush3.msra.mxu1 %v7169_v17  ;;  %6868 = vmatprep.subr.mxu0 %v7170_v48  ;;  %v6576_v18 = vsel %vm3849_vm2, 1.0, %v10147_v52  ;;  %v3543_v38 = vadd.f32 %v3542_v27, %v3541_v20  ;;  %v3554_v35 = vrot.slane %v3553_v36, 1  ;;  %v3858_v51 = vrot.slane %v6573_v28, 4  ;;  %v7176_v20 = vld [vmem:[%s10016_s1 + $0x58] sm:$0xff] }
 0x1cb   : > { %6906 = vmatprep.subr.mxu1 %v7171_v50  ;;  %6869 = vmatpush3.msra.mxu0 %v7172_v2  ;;  %v3560_v56 = vrot.slane %v3559_v4, 1  ;;  %v3269_v60 = vrot.slane %v3262_v31, %v7673_v7  ;;  %v3549_v8 = vadd.f32 %v3548_v3, %v3547_v61  ;;  %v3864_v63 = vrot.slane %v6574_v24, 4  ;;  %v7177_v27 = vld [vmem:[%s10016_s1 + $0x158] sm:$0xff]  ;;  %v7178_v61 = vld [vmem:[%s10016_s1 + $0xd0] sm:$0xff] }
 0x1cc   : > { %6907 = vmatpush3.msra.mxu1 %v7173_v47  ;;  %6870 = vmatprep.subr.mxu0 %v7174_v41  ;;  %v3870_v17 = vrot.slane %v6575_v29, 4  ;;  %v3555_v48 = vadd.f32 %v3554_v35, %v3553_v36  ;;  %v3859_v2 = vadd.f32 %v6573_v28, %v3858_v51  ;;  %v3876_v47 = vrot.slane %v6576_v18, 4  ;;  %v7179_v31 = vld [vmem:[%s10016_s1 + $0x1d0] sm:$0xff]  ;;  %v10200_v36 = vld [vmem:[#allocation38_spill] sm:$0xff] }
 0x1cd   : > { %6908 = vmatprep.subr.mxu1 %v7175_v49  ;;  %6871 = vmatpush3.msra.mxu0 %v7176_v20  ;;  %v3561_v50 = vadd.f32 %v3560_v56, %v3559_v4  ;;  %3272 = vst.msk [vmem:[#allocation2 + $0x61] ss:$8 sm:$0xf] %vm7766_vm8, %v3269_v60  ;;  %v3566_v3 = vcombine.low %v3543_v38, %v3549_v8  ;;  %vm4166_vm3 = vcmp.eq.s32.totalorder %v10200_v36, 1  ;;  %v7180_v28 = vld [vmem:[%s10016_s1 + $0x50] sm:$0xff]  ;;  %v10201_v20 = vld [vmem:[#allocation39_spill] sm:$0xff] }
 0x1ce   : > { %6909 = vmatpush3.msra.mxu1 %v7177_v27  ;;  %6872 = vmatprep.subr.mxu0 %v7178_v61  ;;  %v3865_v41 = vadd.f32 %v6574_v24, %v3864_v63  ;;  %v3871_v49 = vadd.f32 %v6575_v29, %v3870_v17  ;;  %v7181_v4 = vld [vmem:[%s10016_s1 + $0x150] sm:$0xff]  ;;  %v3860_v56 = vrot.slane %v3859_v2, 2  ;;  %v3877_v51 = vadd.f32 %v6576_v18, %v3876_v47  ;;  %v7182_v24 = vld [vmem:[%s10016_s1 + $0xc8] sm:$0xff]  ;;  %v10203_v47 = vld [vmem:[#allocation41_spill] sm:$0xff] }
 0x1cf   : > { %6910 = vmatprep.subr.mxu1 %v7179_v31  ;;  %6873 = vmatpush3.msra.mxu0 %v7180_v28  ;;  %v3567_v35 = vcombine.low %v3555_v48, %v3561_v50  ;;  %vm4167_vm4 = vcmp.eq.s32.totalorder %v10201_v20, 1  ;;  %v7183_v29 = vld [vmem:[%s10016_s1 + $0x1c8] sm:$0xff]  ;;  %v3574_v38 = vrot.slane %v3566_v3, %v7673_v7  ;;  %v10202_v63 = vld [vmem:[#allocation40_spill] sm:$0xff]  ;;  %vm4169_vm6 = vcmp.eq.s32.totalorder %v10203_v47, 1  ;;  %v7186_v61 = vld [vmem:[%s10016_s1 + $0xc0] sm:$0xff] }
 0x1d0   : > { %6911 = vmatpush3.msra.mxu1 %v7181_v4  ;;  %6874 = vmatprep.subr.mxu0 %v7182_v24  ;;  %v3866_v60 = vrot.slane %v3865_v41, 2  ;;  %v3872_v8 = vrot.slane %v3871_v49, 2  ;;  %vm4168_vm5 = vcmp.eq.s32.totalorder %v10202_v63, 1  ;;  %v7184_v18 = vld [vmem:[%s10016_s1 + $0x48] sm:$0xff]  ;;  %v3861_v48 = vadd.f32 %v3860_v56, %v3859_v2  ;;  %v7187_v31 = vld [vmem:[%s10016_s1 + $0x1c0] sm:$0xff] }
 0x1d1   : > { %6912 = vmatprep.subr.mxu1 %v7183_v29  ;;  %6875 = vmatpush3.msra.mxu0 %v7184_v18  ;;  %v7185_v17 = vld [vmem:[%s10016_s1 + $0x148] sm:$0xff]  ;;  %v3581_v27 = vrot.slane %v3567_v35, %v7673_v7  ;;  %v3878_v50 = vrot.slane %v3877_v51, 2  ;;  %v6601_v4 = vsel %vm4166_vm3, 1.0, %v10147_v52  ;;  %v6602_v2 = vsel %vm4167_vm4, 1.0, %v10147_v52  ;;  %v7188_v35 = vld [vmem:[%s10016_s1 + $0x40] sm:$0xff] }
 0x1d2   : > { %6913 = vmatpush3.msra.mxu1 %v7185_v17  ;;  %6876 = vmatprep.subr.mxu0 %v7186_v61  ;;  %v3867_v3 = vadd.f32 %v3866_v60, %v3865_v41  ;;  %v3873_v28 = vadd.f32 %v3872_v8, %v3871_v49  ;;  %v7189_v56 = vld [vmem:[%s10016_s1 + $0x140] sm:$0xff]  ;;  %v3862_v49 = vrot.slane %v3861_v48, 1  ;;  %v6603_v29 = vsel %vm4168_vm5, 1.0, %v10147_v52  ;;  %v7190_v60 = vld [vmem:[%s10016_s1 + $0xb8] sm:$0xff] }
 0x1d3   : > { %6914 = vmatprep.subr.mxu1 %v7187_v31  ;;  %6877 = vmatpush3.msra.mxu0 %v7188_v35  ;;  %v3582_v41 = vcombine.low %v3574_v38, %v3581_v27  ;;  %v3879_v24 = vadd.f32 %v3878_v50, %v3877_v51  ;;  %v7191_v8 = vld [vmem:[%s10016_s1 + $0x1b8] sm:$0xff]  ;;  %v6604_v51 = vsel %vm4169_vm6, 1.0, %v10147_v52  ;;  %v4178_v38 = vrot.slane %v6601_v4, 4 }
 0x1d4   : > { %6915 = vmatpush3.msra.mxu1 %v7189_v56  ;;  %6878 = vmatprep.subr.mxu0 %v7190_v60  ;;  %v3868_v18 = vrot.slane %v3867_v3, 1  ;;  %v3874_v17 = vrot.slane %v3873_v28, 1  ;;  %v7192_v27 = vld [vmem:[%s10016_s1 + $0x38] sm:$0xff]  ;;  %v3863_v31 = vadd.f32 %v3862_v49, %v3861_v48  ;;  %v4184_v56 = vrot.slane %v6602_v2, 4  ;;  %v7194_v60 = vld [vmem:[%s10016_s1 + $0xb0] sm:$0xff] }
 0x1d5   : > { %6916 = vmatprep.subr.mxu1 %v7191_v8  ;;  %6879 = vmatpush3.msra.mxu0 %v7192_v27  ;;  %v7193_v50 = vld [vmem:[%s10016_s1 + $0x138] sm:$0xff]  ;;  %v3589_v61 = vrot.slane %v3582_v41, %v7673_v7  ;;  %v3880_v35 = vrot.slane %v3879_v24, 1  ;;  %v7195_v8 = vld [vmem:[%s10016_s1 + $0x1b0] sm:$0xff]  ;;  %v4179_v63 = vadd.f32 %v6601_v4, %v4178_v38  ;;  %v4190_v20 = vrot.slane %v6603_v29, 4  ;;  %v7199_v4 = vld [vmem:[%s10016_s1 + $0x1a8] sm:$0xff] }
 0x1d6   : > { %6917 = vmatpush3.msra.mxu1 %v7193_v50  ;;  %6880 = vmatprep.subr.mxu0 %v7194_v60  ;;  %v3869_v27 = vadd.f32 %v3868_v18, %v3867_v3  ;;  %v3875_v47 = vadd.f32 %v3874_v17, %v3873_v28  ;;  %v7196_v48 = vld [vmem:[%s10016_s1 + $0x30] sm:$0xff]  ;;  %v4185_v50 = vadd.f32 %v6602_v2, %v4184_v56  ;;  %v4196_v60 = vrot.slane %v6604_v51, 4  ;;  %v10204_v3 = vld [vmem:[#allocation42_spill] sm:$0xff]  ;;  %v7198_v28 = vld [vmem:[%s10016_s1 + $0xa8] sm:$0xff] }
 0x1d7   : > { %6918 = vmatprep.subr.mxu1 %v7195_v8  ;;  %6881 = vmatpush3.msra.mxu0 %v7196_v48  ;;  %v7197_v41 = vld [vmem:[%s10016_s1 + $0x130] sm:$0xff]  ;;  %3592 = vst.msk [vmem:[#allocation2 + $0x62] ss:$8 sm:$0xf] %vm7766_vm8, %v3589_v61  ;;  %v3881_v49 = vadd.f32 %v3880_v35, %v3879_v24  ;;  %vm4486_vm7 = vcmp.eq.s32.totalorder %v10204_v3, 1  ;;  %v4180_v17 = vrot.slane %v4179_v63, 2  ;;  %v4191_v38 = vadd.f32 %v6603_v29, %v4190_v20 }
 0x1d8   : > { %6919 = vmatpush3.msra.mxu1 %v7197_v41  ;;  %6882 = vmatprep.subr.mxu0 %v7198_v28  ;;  %v3886_v18 = vcombine.low %v3863_v31, %v3869_v27  ;;  %v10205_v8 = vld [vmem:[#allocation43_spill] sm:$0xff]  ;;  %v4186_v35 = vrot.slane %v4185_v50, 2  ;;  %v4197_v56 = vadd.f32 %v6604_v51, %v4196_v60  ;;  %v10206_v48 = vld [vmem:[#allocation44_spill] sm:$0xff]  ;;  %v7202_v20 = vld [vmem:[%s10016_s1 + $0xa0] sm:$0xff]  ;;  %vm5126_vm0 = vcmp.eq.s32.totalorder %v8818_v23, 1 }
 0x1d9   : > { %6920 = vmatprep.subr.mxu1 %v7199_v4  ;;  %vm4487_vm9 = vcmp.eq.s32.totalorder %v10205_v8, 1  ;;  %v7200_v2 = vld [vmem:[%s10016_s1 + $0x28] sm:$0xff]  ;;  %v3887_v61 = vcombine.low %v3875_v47, %v3881_v49  ;;  %vm4488_vm10 = vcmp.eq.s32.totalorder %v10206_v48, 1  ;;  %v7203_v29 = vld [vmem:[%s10016_s1 + $0x1a0] sm:$0xff]  ;;  %v4181_v27 = vadd.f32 %v4180_v17, %v4179_v63  ;;  %v10207_v28 = vld [vmem:[#allocation45_spill] sm:$0xff] }
 0x1da   : > { %6883 = vmatpush3.msra.mxu0 %v7200_v2  ;;  %v7201_v24 = vld [vmem:[%s10016_s1 + $0x128] sm:$0xff]  ;;  %v3894_v31 = vrot.slane %v3886_v18, %v7673_v7  ;;  %v4192_v41 = vrot.slane %v4191_v38, 2  ;;  %vm4489_vm11 = vcmp.eq.s32.totalorder %v10207_v28, 1  ;;  %v7204_v47 = vld [vmem:[%s10016_s1 + $0x20] sm:$0xff]  ;;  %v4187_v60 = vadd.f32 %v4186_v35, %v4185_v50  ;;  %v7206_v18 = vld [vmem:[%s10016_s1 + $0x98] sm:$0xff] }
 0x1db   : > { %6921 = vmatpush3.msra.mxu1 %v7201_v24  ;;  %6884 = vmatprep.subr.mxu0 %v7202_v20  ;;  %v7205_v51 = vld [vmem:[%s10016_s1 + $0x120] sm:$0xff]  ;;  %v3901_v49 = vrot.slane %v3887_v61, %v7673_v7  ;;  %v4198_v4 = vrot.slane %v4197_v56, 2  ;;  %v6629_v63 = vsel %vm4486_vm7, 1.0, %v10147_v52  ;;  %v7207_v17 = vld [vmem:[%s10016_s1 + $0x198] sm:$0xff]  ;;  %v4182_v2 = vrot.slane %v4181_v27, 1 }
 0x1dc   : > { %6922 = vmatprep.subr.mxu1 %v7203_v29  ;;  %6885 = vmatpush3.msra.mxu0 %v7204_v47  ;;  %v4193_v24 = vadd.f32 %v4192_v41, %v4191_v38  ;;  %v6630_v50 = vsel %vm4487_vm9, 1.0, %v10147_v52  ;;  %v6631_v61 = vsel %vm4488_vm10, 1.0, %v10147_v52  ;;  %v7208_v35 = vld [vmem:[%s10016_s1 + $0x18] sm:$0xff]  ;;  %v4188_v38 = vrot.slane %v4187_v60, 1 }
 0x1dd   : > { %6923 = vmatpush3.msra.mxu1 %v7205_v51  ;;  %6886 = vmatprep.subr.mxu0 %v7206_v18  ;;  %v7209_v20 = vld [vmem:[%s10016_s1 + $0x118] sm:$0xff]  ;;  %v3902_v29 = vcombine.low %v3894_v31, %v3901_v49  ;;  %v4199_v41 = vadd.f32 %v4198_v4, %v4197_v56  ;;  %v6632_v47 = vsel %vm4489_vm11, 1.0, %v10147_v52  ;;  %v4183_v51 = vadd.f32 %v4182_v2, %v4181_v27  ;;  %v7212_v27 = vld [vmem:[%s10016_s1 + $0x10] sm:$0xff] }
 0x1de   : > { %6924 = vmatprep.subr.mxu1 %v7207_v17  ;;  %6887 = vmatpush3.msra.mxu0 %v7208_v35  ;;  %v4194_v18 = vrot.slane %v4193_v24, 1  ;;  %v4498_v17 = vrot.slane %v6629_v63, 4  ;;  %v4504_v48 = vrot.slane %v6630_v50, 4  ;;  %v7210_v35 = vld [vmem:[%s10016_s1 + $0x90] sm:$0xff]  ;;  %v4189_v31 = vadd.f32 %v4188_v38, %v4187_v60  ;;  %v7214_v60 = vld [vmem:[%s10016_s1 + $0x88] sm:$0xff] }
 0x1df   : > { %6925 = vmatpush3.msra.mxu1 %v7209_v20  ;;  %6888 = vmatprep.subr.mxu0 %v7210_v35  ;;  %v7211_v20 = vld [vmem:[%s10016_s1 + $0x190] sm:$0xff]  ;;  %v3909_v56 = vrot.slane %v3902_v29, %v7673_v7  ;;  %v4200_v49 = vrot.slane %v4199_v41, 1  ;;  %v4510_v4 = vrot.slane %v6631_v61, 4  ;;  %v4516_v3 = vrot.slane %v6632_v47, 4  ;;  %v7215_v29 = vld [vmem:[%s10016_s1 + $0x188] sm:$0xff] }
 0x1e0   : > { %6926 = vmatprep.subr.mxu1 %v7211_v20  ;;  %6889 = vmatpush3.msra.mxu0 %v7212_v27  ;;  %v7213_v2 = vld [vmem:[%s10016_s1 + $0x110] sm:$0xff]  ;;  %v4195_v35 = vadd.f32 %v4194_v18, %v4193_v24  ;;  %v4499_v28 = vadd.f32 %v6629_v63, %v4498_v17  ;;  %v4505_v8 = vadd.f32 %v6630_v50, %v4504_v48  ;;  %v7216_v48 = vld [vmem:[%s10016_s1 + $0x8] sm:$0xff]  ;;  %vm5127_vm1 = vcmp.eq.s32.totalorder %v8820_v30, 1 }
 0x1e1   : > { %6927 = vmatpush3.msra.mxu1 %v7213_v2  ;;  %6890 = vmatprep.subr.mxu0 %v7214_v60  ;;  %3912 = vst.msk [vmem:[#allocation2 + $0x63] ss:$8 sm:$0xf] %vm7766_vm8, %v3909_v56  ;;  %v4201_v38 = vadd.f32 %v4200_v49, %v4199_v41  ;;  %v4206_v20 = vcombine.low %v4183_v51, %v4189_v31  ;;  %v7217_v63 = vld [vmem:[%s10016_s1 + $0x108] sm:$0xff]  ;;  %v7219_v41 = vld [vmem:[%s10016_s1 + $0x180] sm:$0xff]  ;;  %v10209_v49 = vld [vmem:[#allocation48_spill] sm:$0xff] }
 0x1e2   : > { %6928 = vmatprep.subr.mxu1 %v7215_v29  ;;  %v4511_v27 = vadd.f32 %v6631_v61, %v4510_v4  ;;  %6891 = vmatpush3.msra.mxu0 %v7216_v48  ;;  %v4500_v24 = vrot.slane %v4499_v28, 2  ;;  %v4506_v50 = vrot.slane %v4505_v8, 2  ;;  %v4517_v18 = vadd.f32 %v6632_v47, %v4516_v3  ;;  %v10208_v17 = vld [vmem:[#allocation47_spill] sm:$0xff]  ;;  %v7218_v61 = vld [vmem:[%s10016_s1 + $0x80] sm:$0xff]  ;;  %v10210_v29 = vld [vmem:[#allocation49_spill] sm:$0xff] }
 0x1e3   : > { %6929 = vmatpush3.msra.mxu1 %v7217_v63  ;;  %vm4807_vm13 = vcmp.eq.s32.totalorder %v10208_v17, 1  ;;  %6892 = vmatprep.subr.mxu0 %v7218_v61  ;;  %v4207_v51 = vcombine.low %v4195_v35, %v4201_v38  ;;  %v4214_v56 = vrot.slane %v4206_v20, %v7673_v7  ;;  %vm4808_vm14 = vcmp.eq.s32.totalorder %v10209_v49, 1  ;;  %v7220_v3 = vld [vmem:[%s10016_s1] sm:$0xff]  ;;  %v7222_v35 = vld [vmem:[%s10016_s1 + $0xf8] sm:$0xff] }
 0x1e4   : > { %6930 = vmatprep.subr.mxu1 %v7219_v41  ;;  %v4512_v31 = vrot.slane %v4511_v27, 2  ;;  %6893 = vmatpush3.msra.mxu0 %v7220_v3  ;;  %v7221_v47 = vld [vmem:[%s10016_s1 + $0x100] sm:$0xff]  ;;  %v4501_v4 = vadd.f32 %v4500_v24, %v4499_v28  ;;  %v4507_v2 = vadd.f32 %v4506_v50, %v4505_v8  ;;  %v4518_v60 = vrot.slane %v4517_v18, 2  ;;  %v7223_v38 = vld [vmem:[%s10016_s1 + $0x1f8] sm:$0xff] }
 0x1e5   : > { %6931 = vmatpush3.msra.mxu1 %v7221_v47  ;;  %vm4809_vm15 = vcmp.eq.s32.totalorder %v10210_v29, 1  ;;  %6938 = vmatprep.subr.mxu0 %v7222_v35  ;;  %v4221_v20 = vrot.slane %v4207_v51, %v7673_v7  ;;  %v6657_v8 = vsel %vm4806_vm12, 1.0, %v10147_v52  ;;  %v6658_v28 = vsel %vm4807_vm13, 1.0, %v10147_v52 }
 0x1e6   : > { %6976 = vmatprep.subr.mxu1 %v7223_v38  ;;  %v4513_v48 = vadd.f32 %v4512_v31, %v4511_v27  ;;  %v4502_v63 = vrot.slane %v4501_v4, 1  ;;  %v4508_v24 = vrot.slane %v4507_v2, 1  ;;  %v4519_v50 = vadd.f32 %v4518_v60, %v4517_v18 }
 0x1e7   : > { %v6659_v61 = vsel %vm4808_vm14, 1.0, %v10147_v52  ;;  %v4222_v41 = vcombine.low %v4214_v56, %v4221_v20  ;;  %v6660_v51 = vsel %vm4809_vm15, 1.0, %v10147_v52  ;;  %v4818_v27 = vrot.slane %v6657_v8, 4 }
 0x1e8   : > { %v4514_v3 = vrot.slane %v4513_v48, 1  ;;  %v4503_v31 = vadd.f32 %v4502_v63, %v4501_v4  ;;  %v4509_v47 = vadd.f32 %v4508_v24, %v4507_v2  ;;  %v4520_v35 = vrot.slane %v4519_v50, 1 }
 0x1e9   : > { %v4824_v38 = vrot.slane %v6658_v28, 4  ;;  %v4229_v29 = vrot.slane %v4222_v41, %v7673_v7  ;;  %v4819_v21 = vadd.f32 %v6657_v8, %v4818_v27  ;;  %v4830_v36 = vrot.slane %v6659_v61, 4 }
 0x1ea   : > { %v4515_v17 = vadd.f32 %v4514_v3, %v4513_v48  ;;  %v4521_v40 = vadd.f32 %v4520_v35, %v4519_v50  ;;  %v4526_v18 = vcombine.low %v4503_v31, %v4509_v47  ;;  %v4836_v16 = vrot.slane %v6660_v51, 4 }
 0x1eb   : > { %v4825_v60 = vadd.f32 %v6658_v28, %v4824_v38  ;;  %4232 = vst.msk [vmem:[#allocation2 + $0x64] ss:$8 sm:$0xf] %vm7766_vm8, %v4229_v29  ;;  %v4820_v56 = vrot.slane %v4819_v21, 2  ;;  %v4831_v20 = vadd.f32 %v6659_v61, %v4830_v36  ;;  %vm5128_vm2 = vcmp.eq.s32.totalorder %v8824_v26, 1 }
 0x1ec   : > { %v4527_v4 = vcombine.low %v4515_v17, %v4521_v40  ;;  %v4534_v2 = vrot.slane %v4526_v18, %v7673_v7  ;;  %v4837_v48 = vadd.f32 %v6660_v51, %v4836_v16  ;;  %vm5129_vm3 = vcmp.eq.s32.totalorder %v8826_v58, 1  ;;  %v10211_v58 = vld [vmem:[#allocation10_spill] sm:$0xff] }
 0x1ed   : > { %v4826_v63 = vrot.slane %v4825_v60, 2  ;;  %v4821_v8 = vadd.f32 %v4820_v56, %v4819_v21  ;;  %v4832_v24 = vrot.slane %v4831_v20, 2  ;;  %v6685_v36 = vsel %vm5126_vm0, 1.0, %v10147_v52 }
 0x1ee   : > { %v4541_v28 = vrot.slane %v4527_v4, %v7673_v7  ;;  %v4838_v50 = vrot.slane %v4837_v48, 2  ;;  %v6686_v40 = vsel %vm5127_vm1, 1.0, %v10147_v52  ;;  %v6687_v17 = vsel %vm5128_vm2, 1.0, %v10147_v52 }
 0x1ef   : > { %v4827_v29 = vadd.f32 %v4826_v63, %v4825_v60  ;;  %v4822_v61 = vrot.slane %v4821_v8, 1  ;;  %v4833_v41 = vadd.f32 %v4832_v24, %v4831_v20  ;;  %v6688_v51 = vsel %vm5129_vm3, 1.0, %v10147_v52 }
 0x1f0   : > { %v4542_v3 = vcombine.low %v4534_v2, %v4541_v28  ;;  %v4839_v21 = vadd.f32 %v4838_v50, %v4837_v48  ;;  %v5138_v47 = vrot.slane %v6685_v36, 4  ;;  %v5144_v35 = vrot.slane %v6686_v40, 4 }
 0x1f1   : > { %v4828_v16 = vrot.slane %v4827_v29, 1  ;;  %v4823_v27 = vadd.f32 %v4822_v61, %v4821_v8  ;;  %v4834_v31 = vrot.slane %v4833_v41, 1  ;;  %v5150_v56 = vrot.slane %v6687_v17, 4 }
 0x1f2   : > { %v4549_v38 = vrot.slane %v4542_v3, %v7673_v7  ;;  %v4840_v60 = vrot.slane %v4839_v21, 1  ;;  %v5139_v20 = vadd.f32 %v6685_v36, %v5138_v47  ;;  %v5145_v63 = vadd.f32 %v6686_v40, %v5144_v35  ;;  %v10212_v36 = vld [vmem:[#allocation11_spill] sm:$0xff]  ;;  %v10213_v47 = vld [vmem:[#allocation12_spill] sm:$0xff] }
 0x1f3   : > { %v4829_v18 = vadd.f32 %v4828_v16, %v4827_v29  ;;  %v4835_v4 = vadd.f32 %v4834_v31, %v4833_v41  ;;  %v5156_v24 = vrot.slane %v6688_v51, 4  ;;  %v5151_v28 = vadd.f32 %v6687_v17, %v5150_v56 }
 0x1f4   : > { %4552 = vst.msk [vmem:[#allocation2 + $0x65] ss:$8 sm:$0xf] %vm7766_vm8, %v4549_v38  ;;  %v4841_v2 = vadd.f32 %v4840_v60, %v4839_v21  ;;  %vm394_vm4 = vcmp.eq.s32.totalorder %v7722_v43, 2  ;;  %v5140_v8 = vrot.slane %v5139_v20, 2  ;;  %v5146_v50 = vrot.slane %v5145_v63, 2 }
 0x1f5   : > { %v4846_v48 = vcombine.low %v4823_v27, %v4829_v18  ;;  %v5157_v61 = vadd.f32 %v6688_v51, %v5156_v24  ;;  %vm395_vm5 = vcmp.eq.s32.totalorder %v10211_v58, 2  ;;  %v5152_v41 = vrot.slane %v5151_v28, 2 }
 0x1f6   : > { %v4847_v29 = vcombine.low %v4835_v4, %v4841_v2  ;;  %vm396_vm6 = vcmp.eq.s32.totalorder %v10212_v36, 2  ;;  %v5141_v40 = vadd.f32 %v5140_v8, %v5139_v20  ;;  %v5147_v16 = vadd.f32 %v5146_v50, %v5145_v63 }
 0x1f7   : > { %v4854_v3 = vrot.slane %v4846_v48, %v7673_v7  ;;  %v5158_v31 = vrot.slane %v5157_v61, 2  ;;  %vm397_vm7 = vcmp.eq.s32.totalorder %v10213_v47, 2  ;;  %v5153_v21 = vadd.f32 %v5152_v41, %v5151_v28 }
 0x1f8   : > { %v4861_v17 = vrot.slane %v4847_v29, %v7673_v7  ;;  %v6269_v27 = vsel %vm394_vm4, 1.0, %v10147_v52  ;;  %v6270_v51 = vsel %vm395_vm5, 1.0, %v10147_v52  ;;  %v5142_v35 = vrot.slane %v5141_v40, 1 }
 0x1f9   : > { %v5148_v38 = vrot.slane %v5147_v16, 1  ;;  %v5159_v18 = vadd.f32 %v5158_v31, %v5157_v61  ;;  %v6271_v60 = vsel %vm396_vm6, 1.0, %v10147_v52  ;;  %v5154_v4 = vrot.slane %v5153_v21, 1 }
 0x1fa   : > { %v4862_v56 = vcombine.low %v4854_v3, %v4861_v17  ;;  %v6272_v20 = vsel %vm397_vm7, 1.0, %v10147_v52  ;;  %v406_v63 = vrot.slane %v6269_v27, 4  ;;  %v5143_v24 = vadd.f32 %v5142_v35, %v5141_v40 }
 0x1fb   : > { %v5149_v2 = vadd.f32 %v5148_v38, %v5147_v16  ;;  %v5160_v48 = vrot.slane %v5159_v18, 1  ;;  %v412_v8 = vrot.slane %v6270_v51, 4  ;;  %v5155_v50 = vadd.f32 %v5154_v4, %v5153_v21 }
 0x1fc   : > { %v4869_v28 = vrot.slane %v4862_v56, %v7673_v7  ;;  %v407_v29 = vadd.f32 %v6269_v27, %v406_v63  ;;  %v418_v41 = vrot.slane %v6271_v60, 4  ;;  %v424_v61 = vrot.slane %v6272_v20, 4 }
 0x1fd   : > { %v5161_v47 = vadd.f32 %v5160_v48, %v5159_v18  ;;  %v5166_v36 = vcombine.low %v5143_v24, %v5149_v2  ;;  %v413_v58 = vadd.f32 %v6270_v51, %v412_v8  ;;  %vm714_vm9 = vcmp.eq.s32.totalorder %v7780_v53, 2 }
 0x1fe   : > { %4872 = vst.msk [vmem:[#allocation2 + $0x66] ss:$8 sm:$0xf] %vm7766_vm8, %v4869_v28  ;;  %v408_v3 = vrot.slane %v407_v29, 2  ;;  %v419_v31 = vadd.f32 %v6271_v60, %v418_v41  ;;  %vm715_vm10 = vcmp.eq.s32.totalorder %v7782_v54, 2  ;;  %v425_v21 = vadd.f32 %v6272_v20, %v424_v61 }
 0x1ff   : > { %v5167_v40 = vcombine.low %v5155_v50, %v5161_v47  ;;  %v5174_v16 = vrot.slane %v5166_v36, %v7673_v7  ;;  %v414_v17 = vrot.slane %v413_v58, 2  ;;  %vm716_vm11 = vcmp.eq.s32.totalorder %v7784_v55, 2 }
 0x200   : > { %v409_v27 = vadd.f32 %v408_v3, %v407_v29  ;;  %v420_v35 = vrot.slane %v419_v31, 2  ;;  %vm717_vm12 = vcmp.eq.s32.totalorder %v7789_v59, 2  ;;  %v426_v18 = vrot.slane %v425_v21, 2 }
 0x201   : > { %v5181_v51 = vrot.slane %v5167_v40, %v7673_v7  ;;  %v415_v38 = vadd.f32 %v414_v17, %v413_v58  ;;  %v6297_v60 = vsel %vm714_vm9, 1.0, %v10147_v52  ;;  %v6298_v47 = vsel %vm715_vm10, 1.0, %v10147_v52 }
 0x202   : > { %v410_v56 = vrot.slane %v409_v27, 1  ;;  %v421_v4 = vadd.f32 %v420_v35, %v419_v31  ;;  %v6299_v36 = vsel %vm716_vm11, 1.0, %v10147_v52  ;;  %v427_v24 = vadd.f32 %v426_v18, %v425_v21 }
 0x203   : > { %v5182_v63 = vcombine.low %v5174_v16, %v5181_v51  ;;  %v416_v20 = vrot.slane %v415_v38, 1  ;;  %v6300_v2 = vsel %vm717_vm12, 1.0, %v10147_v52  ;;  %v726_v28 = vrot.slane %v6297_v60, 4 }
 0x204   : > { %v411_v48 = vadd.f32 %v410_v56, %v409_v27  ;;  %v422_v8 = vrot.slane %v421_v4, 1  ;;  %v732_v50 = vrot.slane %v6298_v47, 4  ;;  %v428_v41 = vrot.slane %v427_v24, 1 }
 0x205   : > { %v5189_v58 = vrot.slane %v5182_v63, %v7673_v7  ;;  %v417_v29 = vadd.f32 %v416_v20, %v415_v38  ;;  %v738_v61 = vrot.slane %v6299_v36, 4  ;;  %v727_v31 = vadd.f32 %v6297_v60, %v726_v28 }
 0x206   : > { %v423_v3 = vadd.f32 %v422_v8, %v421_v4  ;;  %v733_v40 = vadd.f32 %v6298_v47, %v732_v50  ;;  %v744_v17 = vrot.slane %v6300_v2, 4  ;;  %v429_v16 = vadd.f32 %v428_v41, %v427_v24 }
 0x207   : > { %5192 = vst.msk [vmem:[#allocation2 + $0x67] ss:$8 sm:$0xf] %vm7766_vm8, %v5189_v58  ;;  %v434_v21 = vcombine.low %v411_v48, %v417_v29  ;;  %v739_v35 = vadd.f32 %v6299_v36, %v738_v61  ;;  %vm1034_vm13 = vcmp.eq.s32.totalorder %v7837_v9, 2  ;;  %v728_v27 = vrot.slane %v727_v31, 2 }
 0x208   : > { %v734_v51 = vrot.slane %v733_v40, 2  ;;  %v745_v18 = vadd.f32 %v6300_v2, %v744_v17  ;;  %vm1035_vm14 = vcmp.eq.s32.totalorder %v7841_v12, 2  ;;  %v435_v38 = vcombine.low %v423_v3, %v429_v16 }
 0x209   : > { %v442_v56 = vrot.slane %v434_v21, %v7673_v7  ;;  %v740_v4 = vrot.slane %v739_v35, 2  ;;  %vm1036_vm15 = vcmp.eq.s32.totalorder %v7843_v13, 2  ;;  %v729_v60 = vadd.f32 %v728_v27, %v727_v31 }
 0x20a   : > { %v735_v47 = vadd.f32 %v734_v51, %v733_v40  ;;  %v746_v63 = vrot.slane %v745_v18, 2  ;;  %vm1037_vm0 = vcmp.eq.s32.totalorder %v7846_v15, 2  ;;  %v449_v36 = vrot.slane %v435_v38, %v7673_v7 }
 0x20b   : > { %v741_v20 = vadd.f32 %v740_v4, %v739_v35  ;;  %v6325_v24 = vsel %vm1034_vm13, 1.0, %v10147_v52  ;;  %v6326_v2 = vsel %vm1035_vm14, 1.0, %v10147_v52  ;;  %v730_v48 = vrot.slane %v729_v60, 1 }
 0x20c   : > { %v736_v8 = vrot.slane %v735_v47, 1  ;;  %v747_v28 = vadd.f32 %v746_v63, %v745_v18  ;;  %v6327_v50 = vsel %vm1036_vm15, 1.0, %v10147_v52  ;;  %v450_v58 = vcombine.low %v442_v56, %v449_v36 }
 0x20d   : > { %v742_v29 = vrot.slane %v741_v20, 1  ;;  %v6328_v41 = vsel %vm1037_vm0, 1.0, %v10147_v52  ;;  %v1046_v61 = vrot.slane %v6325_v24, 4  ;;  %v731_v17 = vadd.f32 %v730_v48, %v729_v60 }
 0x20e   : > { %v5560_v3 = vld [vmem:[#allocation2 + $0x68] sm:$0xff]  ;;  %v5562_v31 = vld [vmem:[#allocation2 + $0x78] sm:$0xff]  ;;  %v5559_v40 = vld [vmem:[#allocation2 + $0x60] sm:$0xff]  ;;  %v737_v16 = vadd.f32 %v736_v8, %v735_v47  ;;  %v748_v21 = vrot.slane %v747_v28, 1  ;;  %v1052_v35 = vrot.slane %v6326_v2, 4  ;;  %v457_v51 = vrot.slane %v450_v58, %v7673_v7 }
 0x20f   : > { %5632 = vmatprep.mubr.f32.mxu0 %v5560_v3  ;;  %5707 = vmatprep.mubr.f32.mxu1 %v5562_v31  ;;  %v5561_v27 = vld [vmem:[#allocation2 + $0x70] sm:$0xff]  ;;  %v743_v18 = vadd.f32 %v742_v29, %v741_v20  ;;  %v1047_v38 = vadd.f32 %v6325_v24, %v1046_v61  ;;  %v1058_v4 = vrot.slane %v6327_v50, 4  ;;  %v1064_v15 = vrot.slane %v6328_v41, 4 }
 0x210   : > { %5633 = vmatmul.mubr.f32.gmra.mxu0 %v5559_v40  ;;  %5708 = vmatmul.mubr.f32.gmra.mxu1 %v5561_v27  ;;  %v749_v56 = vadd.f32 %v748_v21, %v747_v28  ;;  %v754_v63 = vcombine.low %v731_v17, %v737_v16  ;;  %v1053_v36 = vadd.f32 %v6326_v2, %v1052_v35  ;;  %vm1354_vm1 = vcmp.eq.s32.totalorder %v7895_v33, 2 }
 0x211   : > { %460 = vst.msk [vmem:[#allocation2 + $0x80] ss:$8 sm:$0xf] %vm7766_vm8, %v457_v51  ;;  %v1048_v60 = vrot.slane %v1047_v38, 2  ;;  %v1059_v47 = vadd.f32 %v6327_v50, %v1058_v4  ;;  %vm1355_vm2 = vcmp.eq.s32.totalorder %v7897_v34, 2  ;;  %v1065_v8 = vadd.f32 %v6328_v41, %v1064_v15 }
 0x212   : > { %v755_v48 = vcombine.low %v743_v18, %v749_v56  ;;  %v762_v20 = vrot.slane %v754_v63, %v7673_v7  ;;  %v1054_v24 = vrot.slane %v1053_v36, 2  ;;  %vm1356_vm3 = vcmp.eq.s32.totalorder %v7901_v37, 2 }
 0x213   : > { %v1049_v58 = vadd.f32 %v1048_v60, %v1047_v38  ;;  %v1060_v29 = vrot.slane %v1059_v47, 2  ;;  %vm1357_vm4 = vcmp.eq.s32.totalorder %v7903_v39, 2  ;;  %v1066_v61 = vrot.slane %v1065_v8, 2 }
 0x214   : > { %v769_v2 = vrot.slane %v755_v48, %v7673_v7  ;;  %v1055_v28 = vadd.f32 %v1054_v24, %v1053_v36  ;;  %v6353_v50 = vsel %vm1354_vm1, 1.0, %v10147_v52  ;;  %v6354_v40 = vsel %vm1355_vm2, 1.0, %v10147_v52 }
 0x215   : > { %v1050_v3 = vrot.slane %v1049_v58, 1  ;;  %v1061_v31 = vadd.f32 %v1060_v29, %v1059_v47  ;;  %v6355_v17 = vsel %vm1356_vm3, 1.0, %v10147_v52  ;;  %v1067_v41 = vadd.f32 %v1066_v61, %v1065_v8 }
 0x216   : > { %v770_v16 = vcombine.low %v762_v20, %v769_v2  ;;  %v1056_v15 = vrot.slane %v1055_v28, 1  ;;  %v6356_v21 = vsel %vm1357_vm4, 1.0, %v10147_v52  ;;  %v1366_v51 = vrot.slane %v6353_v50, 4 }
 0x217   : > { %v1051_v35 = vadd.f32 %v1050_v3, %v1049_v58  ;;  %v1062_v27 = vrot.slane %v1061_v31, 1  ;;  %v1372_v18 = vrot.slane %v6354_v40, 4  ;;  %v1068_v56 = vrot.slane %v1067_v41, 1 }
 0x218   : > { %v777_v38 = vrot.slane %v770_v16, %v7673_v7  ;;  %v1057_v4 = vadd.f32 %v1056_v15, %v1055_v28  ;;  %v1378_v63 = vrot.slane %v6355_v17, 4  ;;  %v1367_v60 = vadd.f32 %v6353_v50, %v1366_v51 }
 0x219   : > { %v1063_v36 = vadd.f32 %v1062_v27, %v1061_v31  ;;  %v1373_v47 = vadd.f32 %v6354_v40, %v1372_v18  ;;  %v1384_v48 = vrot.slane %v6356_v21, 4  ;;  %v1069_v20 = vadd.f32 %v1068_v56, %v1067_v41 }
 0x21a   : > { %780 = vst.msk [vmem:[#allocation2 + $0x81] ss:$8 sm:$0xf] %vm7766_vm8, %v777_v38  ;;  %v1074_v24 = vcombine.low %v1051_v35, %v1057_v4  ;;  %v1379_v8 = vadd.f32 %v6355_v17, %v1378_v63  ;;  %vm1674_vm5 = vcmp.eq.s32.totalorder %v7951_v5, 2  ;;  %v1368_v58 = vrot.slane %v1367_v60, 2 }
 0x21b   : > { %v1374_v29 = vrot.slane %v1373_v47, 2  ;;  %v1385_v2 = vadd.f32 %v6356_v21, %v1384_v48  ;;  %vm1675_vm6 = vcmp.eq.s32.totalorder %v7955_v6, 2  ;;  %v1075_v28 = vcombine.low %v1063_v36, %v1069_v20 }
 0x21c   : > { %v1082_v61 = vrot.slane %v1074_v24, %v7673_v7  ;;  %v1380_v3 = vrot.slane %v1379_v8, 2  ;;  %vm1676_vm7 = vcmp.eq.s32.totalorder %v7957_v10, 2  ;;  %v1369_v50 = vadd.f32 %v1368_v58, %v1367_v60 }
 0x21d   : > { %v1375_v31 = vadd.f32 %v1374_v29, %v1373_v47  ;;  %v1386_v40 = vrot.slane %v1385_v2, 2  ;;  %vm1677_vm9 = vcmp.eq.s32.totalorder %v7960_v14, 2  ;;  %v1089_v17 = vrot.slane %v1075_v28, %v7673_v7 }
 0x21e   : > { %v1381_v16 = vadd.f32 %v1380_v3, %v1379_v8  ;;  %v6381_v15 = vsel %vm1674_vm5, 1.0, %v10147_v52  ;;  %v6382_v41 = vsel %vm1675_vm6, 1.0, %v10147_v52  ;;  %v1370_v21 = vrot.slane %v1369_v50, 1 }
 0x21f   : > { %v1376_v35 = vrot.slane %v1375_v31, 1  ;;  %v1387_v27 = vadd.f32 %v1386_v40, %v1385_v2  ;;  %v6383_v51 = vsel %vm1676_vm7, 1.0, %v10147_v52  ;;  %v1090_v18 = vcombine.low %v1082_v61, %v1089_v17 }
 0x220   : > { %v1382_v38 = vrot.slane %v1381_v16, 1  ;;  %v6384_v4 = vsel %vm1677_vm9, 1.0, %v10147_v52  ;;  %v1686_v56 = vrot.slane %v6381_v15, 4  ;;  %v1371_v63 = vadd.f32 %v1370_v21, %v1369_v50 }
 0x221   : > { %v1377_v36 = vadd.f32 %v1376_v35, %v1375_v31  ;;  %v1388_v60 = vrot.slane %v1387_v27, 1  ;;  %v1692_v47 = vrot.slane %v6382_v41, 4  ;;  %v1097_v48 = vrot.slane %v1090_v18, %v7673_v7 }
 0x222   : > { %v1383_v20 = vadd.f32 %v1382_v38, %v1381_v16  ;;  %v1687_v24 = vadd.f32 %v6381_v15, %v1686_v56  ;;  %v1698_v8 = vrot.slane %v6383_v51, 4  ;;  %v1704_v2 = vrot.slane %v6384_v4, 4 }
 0x223   : > { %v1389_v58 = vadd.f32 %v1388_v60, %v1387_v27  ;;  %v1394_v29 = vcombine.low %v1371_v63, %v1377_v36  ;;  %v1693_v28 = vadd.f32 %v6382_v41, %v1692_v47  ;;  %1100 = vst.msk [vmem:[#allocation2 + $0x82] ss:$8 sm:$0xf] %vm7766_vm8, %v1097_v48  ;;  %vm1994_vm10 = vcmp.eq.s32.totalorder %v8009_v44, 2 }
 0x224   : > { %v1688_v61 = vrot.slane %v1687_v24, 2  ;;  %v1699_v3 = vadd.f32 %v6383_v51, %v1698_v8  ;;  %vm1995_vm11 = vcmp.eq.s32.totalorder %v8011_v46, 2  ;;  %v1705_v17 = vadd.f32 %v6384_v4, %v1704_v2 }
 0x225   : > { %v1395_v50 = vcombine.low %v1383_v20, %v1389_v58  ;;  %v1402_v31 = vrot.slane %v1394_v29, %v7673_v7  ;;  %v1694_v40 = vrot.slane %v1693_v28, 2  ;;  %vm1996_vm12 = vcmp.eq.s32.totalorder %v10176_v1, 2 }
 0x226   : > { %v1689_v16 = vadd.f32 %v1688_v61, %v1687_v24  ;;  %v1700_v15 = vrot.slane %v1699_v3, 2  ;;  %vm1997_vm13 = vcmp.eq.s32.totalorder %v10177_v62, 2  ;;  %v1706_v35 = vrot.slane %v1705_v17, 2 }
 0x227   : > { %v1409_v41 = vrot.slane %v1395_v50, %v7673_v7  ;;  %v1695_v21 = vadd.f32 %v1694_v40, %v1693_v28  ;;  %v6409_v27 = vsel %vm1994_vm10, 1.0, %v10147_v52  ;;  %v6410_v38 = vsel %vm1995_vm11, 1.0, %v10147_v52 }
 0x228   : > { %v1690_v51 = vrot.slane %v1689_v16, 1  ;;  %v1701_v18 = vadd.f32 %v1700_v15, %v1699_v3  ;;  %v6411_v56 = vsel %vm1996_vm12, 1.0, %v10147_v52  ;;  %v1707_v36 = vadd.f32 %v1706_v35, %v1705_v17 }
 0x229   : > { %v1410_v63 = vcombine.low %v1402_v31, %v1409_v41  ;;  %v1696_v4 = vrot.slane %v1695_v21, 1  ;;  %v6412_v60 = vsel %vm1997_vm13, 1.0, %v10147_v52  ;;  %v2006_v20 = vrot.slane %v6409_v27, 4 }
 0x22a   : > { %v1691_v47 = vadd.f32 %v1690_v51, %v1689_v16  ;;  %v1702_v48 = vrot.slane %v1701_v18, 1  ;;  %v2012_v24 = vrot.slane %v6410_v38, 4  ;;  %v1708_v29 = vrot.slane %v1707_v36, 1 }
 0x22b   : > { %v1417_v8 = vrot.slane %v1410_v63, %v7673_v7  ;;  %v1697_v58 = vadd.f32 %v1696_v4, %v1695_v21  ;;  %v2018_v28 = vrot.slane %v6411_v56, 4  ;;  %v2007_v61 = vadd.f32 %v6409_v27, %v2006_v20  ;;  %v10214_v27 = vld [vmem:[#allocation18_spill] sm:$0xff]  ;;  %v10215_v4 = vld [vmem:[#allocation19_spill] sm:$0xff] }
 0x22c   : > { %v1703_v2 = vadd.f32 %v1702_v48, %v1701_v18  ;;  %v2013_v3 = vadd.f32 %v6410_v38, %v2012_v24  ;;  %v2024_v50 = vrot.slane %v6412_v60, 4  ;;  %v1709_v31 = vadd.f32 %v1708_v29, %v1707_v36 }
 0x22d   : > { %1420 = vst.msk [vmem:[#allocation2 + $0x83] ss:$8 sm:$0xf] %vm7766_vm8, %v1417_v8  ;;  %v1714_v40 = vcombine.low %v1691_v47, %v1697_v58  ;;  %v2019_v17 = vadd.f32 %v6411_v56, %v2018_v28  ;;  %vm2314_vm14 = vcmp.eq.s32.totalorder %v10178_v0, 2  ;;  %v2008_v16 = vrot.slane %v2007_v61, 2 }
 0x22e   : > { %v2014_v15 = vrot.slane %v2013_v3, 2  ;;  %v2025_v41 = vadd.f32 %v6412_v60, %v2024_v50  ;;  %vm2315_vm15 = vcmp.eq.s32.totalorder %v10179_v22, 2  ;;  %v1715_v21 = vcombine.low %v1703_v2, %v1709_v31 }
 0x22f   : > { %v1722_v35 = vrot.slane %v1714_v40, %v7673_v7  ;;  %v2020_v51 = vrot.slane %v2019_v17, 2  ;;  %vm2316_vm0 = vcmp.eq.s32.totalorder %v10214_v27, 2  ;;  %v2009_v18 = vadd.f32 %v2008_v16, %v2007_v61 }
 0x230   : > { %v2015_v38 = vadd.f32 %v2014_v15, %v2013_v3  ;;  %v2026_v63 = vrot.slane %v2025_v41, 2  ;;  %vm2317_vm1 = vcmp.eq.s32.totalorder %v10215_v4, 2  ;;  %v1729_v56 = vrot.slane %v1715_v21, %v7673_v7 }
 0x231   : > { %v2021_v36 = vadd.f32 %v2020_v51, %v2019_v17  ;;  %v6437_v47 = vsel %vm2314_vm14, 1.0, %v10147_v52  ;;  %v6438_v60 = vsel %vm2315_vm15, 1.0, %v10147_v52  ;;  %v2010_v48 = vrot.slane %v2009_v18, 1 }
 0x232   : > { %v2016_v20 = vrot.slane %v2015_v38, 1  ;;  %v2027_v24 = vadd.f32 %v2026_v63, %v2025_v41  ;;  %v6439_v8 = vsel %vm2316_vm0, 1.0, %v10147_v52  ;;  %v1730_v58 = vcombine.low %v1722_v35, %v1729_v56 }
 0x233   : > { %v2022_v29 = vrot.slane %v2021_v36, 1  ;;  %v6440_v28 = vsel %vm2317_vm1, 1.0, %v10147_v52  ;;  %v2326_v2 = vrot.slane %v6437_v47, 4  ;;  %v2011_v61 = vadd.f32 %v2010_v48, %v2009_v18  ;;  %v10216_v18 = vld [vmem:[#allocation21_spill] sm:$0xff] }
 0x234   : > { %v2017_v3 = vadd.f32 %v2016_v20, %v2015_v38  ;;  %v2028_v50 = vrot.slane %v2027_v24, 1  ;;  %v2332_v31 = vrot.slane %v6438_v60, 4  ;;  %v1737_v40 = vrot.slane %v1730_v58, %v7673_v7 }
 0x235   : > { %v2023_v17 = vadd.f32 %v2022_v29, %v2021_v36  ;;  %v2327_v16 = vadd.f32 %v6437_v47, %v2326_v2  ;;  %v2338_v15 = vrot.slane %v6439_v8, 4  ;;  %v2344_v41 = vrot.slane %v6440_v28, 4 }
 0x236   : > { %v2029_v21 = vadd.f32 %v2028_v50, %v2027_v24  ;;  %v2034_v51 = vcombine.low %v2011_v61, %v2017_v3  ;;  %v2333_v4 = vadd.f32 %v6438_v60, %v2332_v31  ;;  %1740 = vst.msk [vmem:[#allocation2 + $0x84] ss:$8 sm:$0xf] %vm7766_vm8, %v1737_v40  ;;  %vm2634_vm2 = vcmp.eq.s32.totalorder %v10182_v57, 2  ;;  %v10217_v24 = vld [vmem:[#allocation22_spill] sm:$0xff]  ;;  %v10218_v60 = vld [vmem:[#allocation23_spill] sm:$0xff] }
 0x237   : > { %v2328_v35 = vrot.slane %v2327_v16, 2  ;;  %v2339_v63 = vadd.f32 %v6439_v8, %v2338_v15  ;;  %vm2635_vm3 = vcmp.eq.s32.totalorder %v10216_v18, 2  ;;  %v2345_v36 = vadd.f32 %v6440_v28, %v2344_v41  ;;  %v10220_v57 = vld [vmem:[#allocation25_spill] sm:$0xff] }
 0x238   : > { %v2035_v38 = vcombine.low %v2023_v17, %v2029_v21  ;;  %v2042_v56 = vrot.slane %v2034_v51, %v7673_v7  ;;  %v2334_v48 = vrot.slane %v2333_v4, 2  ;;  %vm2636_vm4 = vcmp.eq.s32.totalorder %v10217_v24, 2 }
 0x239   : > { %v2329_v47 = vadd.f32 %v2328_v35, %v2327_v16  ;;  %v2340_v20 = vrot.slane %v2339_v63, 2  ;;  %vm2637_vm5 = vcmp.eq.s32.totalorder %v10218_v60, 2  ;;  %v2346_v2 = vrot.slane %v2345_v36, 2 }
 0x23a   : > { %v2049_v58 = vrot.slane %v2035_v38, %v7673_v7  ;;  %v2335_v29 = vadd.f32 %v2334_v48, %v2333_v4  ;;  %v6465_v8 = vsel %vm2634_vm2, 1.0, %v10147_v52  ;;  %v6466_v50 = vsel %vm2635_vm3, 1.0, %v10147_v52 }
 0x23b   : > { %v2330_v61 = vrot.slane %v2329_v47, 1  ;;  %v2341_v3 = vadd.f32 %v2340_v20, %v2339_v63  ;;  %v6467_v31 = vsel %vm2636_vm4, 1.0, %v10147_v52  ;;  %v2347_v17 = vadd.f32 %v2346_v2, %v2345_v36  ;;  %v10219_v2 = vld [vmem:[#allocation24_spill] sm:$0xff] }
 0x23c   : > { %v2050_v40 = vcombine.low %v2042_v56, %v2049_v58  ;;  %v2336_v28 = vrot.slane %v2335_v29, 1  ;;  %v6468_v16 = vsel %vm2637_vm5, 1.0, %v10147_v52  ;;  %v2646_v51 = vrot.slane %v6465_v8, 4 }
 0x23d   : > { %v2331_v15 = vadd.f32 %v2330_v61, %v2329_v47  ;;  %v2342_v21 = vrot.slane %v2341_v3, 1  ;;  %v2652_v41 = vrot.slane %v6466_v50, 4  ;;  %v2348_v38 = vrot.slane %v2347_v17, 1 }
 0x23e   : > { %v2057_v4 = vrot.slane %v2050_v40, %v7673_v7  ;;  %v2337_v35 = vadd.f32 %v2336_v28, %v2335_v29  ;;  %v2658_v48 = vrot.slane %v6467_v31, 4  ;;  %v2647_v63 = vadd.f32 %v6465_v8, %v2646_v51  ;;  %v10221_v8 = vld [vmem:[#allocation26_spill] sm:$0xff]  ;;  %v10222_v51 = vld [vmem:[#allocation27_spill] sm:$0xff] }
 0x23f   : > { %v2343_v60 = vadd.f32 %v2342_v21, %v2341_v3  ;;  %v2653_v20 = vadd.f32 %v6466_v50, %v2652_v41  ;;  %v2664_v24 = vrot.slane %v6468_v16, 4  ;;  %v2349_v56 = vadd.f32 %v2348_v38, %v2347_v17 }
 0x240   : > { %2060 = vst.msk [vmem:[#allocation2 + $0x85] ss:$8 sm:$0xf] %vm7766_vm8, %v2057_v4  ;;  %v2354_v36 = vcombine.low %v2331_v15, %v2337_v35  ;;  %v2659_v58 = vadd.f32 %v6467_v31, %v2658_v48  ;;  %vm2954_vm6 = vcmp.eq.s32.totalorder %v10219_v2, 2  ;;  %v2648_v47 = vrot.slane %v2647_v63, 2 }
 0x241   : > { %v2654_v61 = vrot.slane %v2653_v20, 2  ;;  %v2665_v18 = vadd.f32 %v6468_v16, %v2664_v24  ;;  %vm2955_vm7 = vcmp.eq.s32.totalorder %v10220_v57, 2  ;;  %v2355_v29 = vcombine.low %v2343_v60, %v2349_v56 }
 0x242   : > { %v2362_v40 = vrot.slane %v2354_v36, %v7673_v7  ;;  %v2660_v3 = vrot.slane %v2659_v58, 2  ;;  %vm2956_vm9 = vcmp.eq.s32.totalorder %v10221_v8, 2  ;;  %v2649_v50 = vadd.f32 %v2648_v47, %v2647_v63 }
 0x243   : > { %v2655_v28 = vadd.f32 %v2654_v61, %v2653_v20  ;;  %v2666_v21 = vrot.slane %v2665_v18, 2  ;;  %vm2957_vm10 = vcmp.eq.s32.totalorder %v10222_v51, 2  ;;  %v2369_v31 = vrot.slane %v2355_v29, %v7673_v7 }
 0x244   : > { %v2661_v17 = vadd.f32 %v2660_v3, %v2659_v58  ;;  %v6493_v15 = vsel %vm2954_vm6, 1.0, %v10147_v52  ;;  %v6494_v24 = vsel %vm2955_vm7, 1.0, %v10147_v52  ;;  %v2650_v16 = vrot.slane %v2649_v50, 1 }
 0x245   : > { %v2656_v41 = vrot.slane %v2655_v28, 1  ;;  %v2667_v60 = vadd.f32 %v2666_v21, %v2665_v18  ;;  %v6495_v4 = vsel %vm2956_vm9, 1.0, %v10147_v52  ;;  %v2370_v35 = vcombine.low %v2362_v40, %v2369_v31 }
 0x246   : > { %v2662_v38 = vrot.slane %v2661_v17, 1  ;;  %v6496_v48 = vsel %vm2957_vm10, 1.0, %v10147_v52  ;;  %v2966_v63 = vrot.slane %v6493_v15, 4  ;;  %v2651_v20 = vadd.f32 %v2650_v16, %v2649_v50 }
 0x247   : > { %v2657_v56 = vadd.f32 %v2656_v41, %v2655_v28  ;;  %v2668_v36 = vrot.slane %v2667_v60, 1  ;;  %v2972_v47 = vrot.slane %v6494_v24, 4  ;;  %v2377_v58 = vrot.slane %v2370_v35, %v7673_v7 }
 0x248   : > { %v2663_v61 = vadd.f32 %v2662_v38, %v2661_v17  ;;  %v2967_v29 = vadd.f32 %v6493_v15, %v2966_v63  ;;  %v2978_v3 = vrot.slane %v6495_v4, 4  ;;  %v2984_v18 = vrot.slane %v6496_v48, 4 }
 0x249   : > { %v2669_v51 = vadd.f32 %v2668_v36, %v2667_v60  ;;  %v2674_v8 = vcombine.low %v2651_v20, %v2657_v56  ;;  %v2973_v57 = vadd.f32 %v6494_v24, %v2972_v47  ;;  %2380 = vst.msk [vmem:[#allocation2 + $0x86] ss:$8 sm:$0xf] %vm7766_vm8, %v2377_v58  ;;  %vm3274_vm11 = vcmp.eq.s32.totalorder %v8249_v25, 2  ;;  %v10223_v24 = vld [vmem:[#allocation29_spill] sm:$0xff] }
 0x24a   : > { %v2968_v40 = vrot.slane %v2967_v29, 2  ;;  %v2979_v21 = vadd.f32 %v6495_v4, %v2978_v3  ;;  %vm3275_vm12 = vcmp.eq.s32.totalorder %v8258_v45, 2  ;;  %v2985_v17 = vadd.f32 %v6496_v48, %v2984_v18 }
 0x24b   : > { %v2675_v50 = vcombine.low %v2663_v61, %v2669_v51  ;;  %v2682_v28 = vrot.slane %v2674_v8, %v7673_v7  ;;  %v2974_v31 = vrot.slane %v2973_v57, 2  ;;  %vm3276_vm13 = vcmp.eq.s32.totalorder %v10190_v19, 2  ;;  %v10225_v19 = vld [vmem:[#allocation31_spill] sm:$0xff] }
 0x24c   : > { %v2969_v15 = vadd.f32 %v2968_v40, %v2967_v29  ;;  %v2980_v16 = vrot.slane %v2979_v21, 2  ;;  %vm3277_vm14 = vcmp.eq.s32.totalorder %v10223_v24, 2  ;;  %v2986_v35 = vrot.slane %v2985_v17, 2 }
 0x24d   : > { %v2689_v41 = vrot.slane %v2675_v50, %v7673_v7  ;;  %v2975_v60 = vadd.f32 %v2974_v31, %v2973_v57  ;;  %v6521_v4 = vsel %vm3274_vm11, 1.0, %v10147_v52  ;;  %v6522_v51 = vsel %vm3275_vm12, 1.0, %v10147_v52 }
 0x24e   : > { %v2970_v38 = vrot.slane %v2969_v15, 1  ;;  %v2981_v63 = vadd.f32 %v2980_v16, %v2979_v21  ;;  %v6523_v8 = vsel %vm3276_vm13, 1.0, %v10147_v52  ;;  %v2987_v56 = vadd.f32 %v2986_v35, %v2985_v17  ;;  %v10224_v35 = vld [vmem:[#allocation30_spill] sm:$0xff] }
 0x24f   : > { %v2690_v20 = vcombine.low %v2682_v28, %v2689_v41  ;;  %v2976_v48 = vrot.slane %v2975_v60, 1  ;;  %v6524_v36 = vsel %vm3277_vm14, 1.0, %v10147_v52  ;;  %v3286_v61 = vrot.slane %v6521_v4, 4 }
 0x250   : > { %v2971_v47 = vadd.f32 %v2970_v38, %v2969_v15  ;;  %v2982_v58 = vrot.slane %v2981_v63, 1  ;;  %v3292_v29 = vrot.slane %v6522_v51, 4  ;;  %v2988_v18 = vrot.slane %v2987_v56, 1 }
 0x251   : > { %v2697_v57 = vrot.slane %v2690_v20, %v7673_v7  ;;  %v2977_v3 = vadd.f32 %v2976_v48, %v2975_v60  ;;  %v3298_v40 = vrot.slane %v6523_v8, 4  ;;  %v3287_v21 = vadd.f32 %v6521_v4, %v3286_v61  ;;  %v10226_v4 = vld [vmem:[#allocation32_spill] sm:$0xff]  ;;  %v10227_v61 = vld [vmem:[#allocation33_spill] sm:$0xff] }
 0x252   : > { %v2983_v50 = vadd.f32 %v2982_v58, %v2981_v63  ;;  %v3293_v31 = vadd.f32 %v6522_v51, %v3292_v29  ;;  %v3304_v16 = vrot.slane %v6524_v36, 4  ;;  %v2989_v28 = vadd.f32 %v2988_v18, %v2987_v56 }
 0x253   : > { %2700 = vst.msk [vmem:[#allocation2 + $0x87] ss:$8 sm:$0xf] %vm7766_vm8, %v2697_v57  ;;  %v2994_v17 = vcombine.low %v2971_v47, %v2977_v3  ;;  %v3299_v41 = vadd.f32 %v6523_v8, %v3298_v40  ;;  %vm3594_vm15 = vcmp.eq.s32.totalorder %v10224_v35, 2  ;;  %v3288_v15 = vrot.slane %v3287_v21, 2 }
 0x254   : > { %v3294_v38 = vrot.slane %v3293_v31, 2  ;;  %v3305_v24 = vadd.f32 %v6524_v36, %v3304_v16  ;;  %vm3595_vm0 = vcmp.eq.s32.totalorder %v10225_v19, 2  ;;  %v2995_v60 = vcombine.low %v2983_v50, %v2989_v28 }
 0x255   : > { %v3002_v20 = vrot.slane %v2994_v17, %v7673_v7  ;;  %v3300_v63 = vrot.slane %v3299_v41, 2  ;;  %vm3596_vm1 = vcmp.eq.s32.totalorder %v10226_v4, 2  ;;  %v3289_v51 = vadd.f32 %v3288_v15, %v3287_v21 }
 0x256   : > { %v3295_v48 = vadd.f32 %v3294_v38, %v3293_v31  ;;  %v3306_v58 = vrot.slane %v3305_v24, 2  ;;  %vm3597_vm2 = vcmp.eq.s32.totalorder %v10227_v61, 2  ;;  %v3009_v8 = vrot.slane %v2995_v60, %v7673_v7 }
 0x257   : > { %v3301_v56 = vadd.f32 %v3300_v63, %v3299_v41  ;;  %v6549_v47 = vsel %vm3594_vm15, 1.0, %v10147_v52  ;;  %v6550_v36 = vsel %vm3595_vm0, 1.0, %v10147_v52  ;;  %v3290_v29 = vrot.slane %v3289_v51, 1 }
 0x258   : > { %v3296_v57 = vrot.slane %v3295_v48, 1  ;;  %v3307_v3 = vadd.f32 %v3306_v58, %v3305_v24  ;;  %v6551_v18 = vsel %vm3596_vm1, 1.0, %v10147_v52  ;;  %v3010_v40 = vcombine.low %v3002_v20, %v3009_v8 }
 0x259   : > { %v3302_v50 = vrot.slane %v3301_v56, 1  ;;  %v6552_v21 = vsel %vm3597_vm2, 1.0, %v10147_v52  ;;  %v3606_v31 = vrot.slane %v6549_v47, 4  ;;  %v3291_v15 = vadd.f32 %v3290_v29, %v3289_v51  ;;  %v7224_v51 = vld [vmem:[%s10016_s1 + $0x78] sm:$0xff]  ;;  %v7227_v29 = vld [vmem:[%s10016_s1 + $0x1f0] sm:$0xff] }
 0x25a   : > { %v5717_v16 = vld [vmem:[#allocation2 + $0x88] sm:$0xff]  ;;  %v5719_v28 = vld [vmem:[#allocation2 + $0x98] sm:$0xff]  ;;  %v5716_v17 = vld [vmem:[#allocation2 + $0x80] sm:$0xff]  ;;  %v3297_v38 = vadd.f32 %v3296_v57, %v3295_v48  ;;  %v3308_v41 = vrot.slane %v3307_v3, 1  ;;  %v3612_v60 = vrot.slane %v6550_v36, 4  ;;  %v3017_v61 = vrot.slane %v3010_v40, %v7673_v7 }
 0x25b   : > { %5788 = vmatprep.mubr.f32.mxu0 %v5717_v16  ;;  %5863 = vmatprep.mubr.f32.mxu1 %v5719_v28  ;;  %v5718_v63 = vld [vmem:[#allocation2 + $0x90] sm:$0xff]  ;;  %v3303_v24 = vadd.f32 %v3302_v50, %v3301_v56  ;;  %v3607_v58 = vadd.f32 %v6549_v47, %v3606_v31  ;;  %v3618_v4 = vrot.slane %v6551_v18, 4  ;;  %v3624_v35 = vrot.slane %v6552_v21, 4  ;;  %v7225_v48 = vld [vmem:[%s10016_s1 + $0x178] sm:$0xff] }
 0x25c   : > { %5789 = vmatmul.mubr.f32.vlgmr.msra.gmra.mxu0 %v5716_v17  ;;  %5864 = vmatmul.mubr.f32.vlgmr.msra.gmra.mxu1 %v5718_v63  ;;  %v3309_v20 = vadd.f32 %v3308_v41, %v3307_v3  ;;  %v3314_v8 = vcombine.low %v3291_v15, %v3297_v38  ;;  %v3613_v19 = vadd.f32 %v6550_v36, %v3612_v60  ;;  %vm3914_vm3 = vcmp.eq.s32.totalorder %v10196_v42, 2  ;;  %v7226_v36 = vld [vmem:[%s10016_s1 + $0xf0] sm:$0xff]  ;;  %v10229_v28 = vld [vmem:[#allocation37_spill] sm:$0xff]  ;;  %v7232_v60 = vld [vmem:[%s10016_s1 + $0x68] sm:$0xff] }
 0x25d   : > { %6939 = vmatpush3.msra.mxu0 %v7224_v51  ;;  %6977 = vmatpush3.msra.mxu1 %v7225_v48  ;;  %3020 = vst.msk [vmem:[#allocation2 + $0xa0] ss:$8 sm:$0xf] %vm7766_vm8, %v3017_v61  ;;  %v3608_v56 = vrot.slane %v3607_v58, 2  ;;  %v3619_v47 = vadd.f32 %v6551_v18, %v3618_v4  ;;  %vm3915_vm4 = vcmp.eq.s32.totalorder %v10197_v11, 2  ;;  %v3625_v40 = vadd.f32 %v6552_v21, %v3624_v35  ;;  %v7228_v4 = vld [vmem:[%s10016_s1 + $0x70] sm:$0xff] }
 0x25e   : > { %6940 = vmatprep.subr.mxu0 %v7226_v36  ;;  %6978 = vmatprep.subr.mxu1 %v7227_v29  ;;  %v3315_v57 = vcombine.low %v3303_v24, %v3309_v20  ;;  %v3322_v3 = vrot.slane %v3314_v8, %v7673_v7  ;;  %v3614_v61 = vrot.slane %v3613_v19, 2  ;;  %v7229_v18 = vld [vmem:[%s10016_s1 + $0x170] sm:$0xff]  ;;  %vm3917_vm6 = vcmp.eq.s32.totalorder %v10229_v28, 2  ;;  %v7230_v35 = vld [vmem:[%s10016_s1 + $0xe8] sm:$0xff]  ;;  %v7234_v8 = vld [vmem:[%s10016_s1 + $0xe0] sm:$0xff] }
 0x25f   : > { %6941 = vmatpush3.msra.mxu0 %v7228_v4  ;;  %6979 = vmatpush3.msra.mxu1 %v7229_v18  ;;  %v3609_v50 = vadd.f32 %v3608_v56, %v3607_v58  ;;  %v3620_v31 = vrot.slane %v3619_v47, 2  ;;  %v10228_v16 = vld [vmem:[#allocation36_spill] sm:$0xff]  ;;  %v7231_v21 = vld [vmem:[%s10016_s1 + $0x1e8] sm:$0xff]  ;;  %v3626_v38 = vrot.slane %v3625_v40, 2  ;;  %v6577_v41 = vsel %vm3914_vm3, 1.0, %v10147_v52  ;;  %v7235_v51 = vld [vmem:[%s10016_s1 + $0x1e0] sm:$0xff] }
 0x260   : > { %vm3916_vm5 = vcmp.eq.s32.totalorder %v10228_v16, 2  ;;  %6942 = vmatprep.subr.mxu0 %v7230_v35  ;;  %6980 = vmatprep.subr.mxu1 %v7231_v21  ;;  %v3329_v17 = vrot.slane %v3315_v57, %v7673_v7  ;;  %v3615_v15 = vadd.f32 %v3614_v61, %v3613_v19  ;;  %v7233_v63 = vld [vmem:[%s10016_s1 + $0x168] sm:$0xff]  ;;  %v6578_v19 = vsel %vm3915_vm4, 1.0, %v10147_v52  ;;  %v7236_v29 = vld [vmem:[%s10016_s1 + $0x60] sm:$0xff] }
 0x261   : > { %6943 = vmatpush3.msra.mxu0 %v7232_v60  ;;  %6981 = vmatpush3.msra.mxu1 %v7233_v63  ;;  %v3610_v24 = vrot.slane %v3609_v50, 1  ;;  %v3621_v58 = vadd.f32 %v3620_v31, %v3619_v47  ;;  %v6579_v20 = vsel %vm3916_vm5, 1.0, %v10147_v52  ;;  %v3627_v47 = vadd.f32 %v3626_v38, %v3625_v40  ;;  %v7237_v57 = vld [vmem:[%s10016_s1 + $0x160] sm:$0xff]  ;;  %v7238_v40 = vld [vmem:[%s10016_s1 + $0xd8] sm:$0xff] }
 0x262   : > { %6944 = vmatprep.subr.mxu0 %v7234_v8  ;;  %6982 = vmatprep.subr.mxu1 %v7235_v51  ;;  %v3330_v48 = vcombine.low %v3322_v3, %v3329_v17  ;;  %v3616_v56 = vrot.slane %v3615_v15, 1  ;;  %v6580_v36 = vsel %vm3917_vm6, 1.0, %v10147_v52  ;;  %v3926_v18 = vrot.slane %v6577_v41, 4  ;;  %v7239_v31 = vld [vmem:[%s10016_s1 + $0x1d8] sm:$0xff] }
 0x263   : > { %6945 = vmatpush3.msra.mxu0 %v7236_v29  ;;  %6983 = vmatpush3.msra.mxu1 %v7237_v57  ;;  %v3611_v61 = vadd.f32 %v3610_v24, %v3609_v50  ;;  %v3622_v4 = vrot.slane %v3621_v58, 1  ;;  %v3932_v3 = vrot.slane %v6578_v19, 4  ;;  %v3628_v17 = vrot.slane %v3627_v47, 1  ;;  %v7240_v50 = vld [vmem:[%s10016_s1 + $0x58] sm:$0xff] }
 0x264   : > { %6946 = vmatprep.subr.mxu0 %v7238_v40  ;;  %6984 = vmatprep.subr.mxu1 %v7239_v31  ;;  %v3337_v35 = vrot.slane %v3330_v48, %v7673_v7  ;;  %v3617_v21 = vadd.f32 %v3616_v56, %v3615_v15  ;;  %v3938_v38 = vrot.slane %v6579_v20, 4  ;;  %v7241_v60 = vld [vmem:[%s10016_s1 + $0x158] sm:$0xff]  ;;  %v3927_v24 = vadd.f32 %v6577_v41, %v3926_v18  ;;  %v7242_v15 = vld [vmem:[%s10016_s1 + $0xd0] sm:$0xff]  ;;  %v10231_v40 = vld [vmem:[#allocation39_spill] sm:$0xff] }
 0x265   : > { %6947 = vmatpush3.msra.mxu0 %v7240_v50  ;;  %6985 = vmatpush3.msra.mxu1 %v7241_v60  ;;  %v3623_v63 = vadd.f32 %v3622_v4, %v3621_v58  ;;  %v3933_v8 = vadd.f32 %v6578_v19, %v3932_v3  ;;  %v3944_v51 = vrot.slane %v6580_v36, 4  ;;  %v7243_v48 = vld [vmem:[%s10016_s1 + $0x1d0] sm:$0xff]  ;;  %v3629_v56 = vadd.f32 %v3628_v17, %v3627_v47  ;;  %v10230_v58 = vld [vmem:[#allocation38_spill] sm:$0xff]  ;;  %v7247_v47 = vld [vmem:[%s10016_s1 + $0x1c8] sm:$0xff] }
 0x266   : > { %6948 = vmatprep.subr.mxu0 %v7242_v15  ;;  %6986 = vmatprep.subr.mxu1 %v7243_v48  ;;  %3340 = vst.msk [vmem:[#allocation2 + $0xa1] ss:$8 sm:$0xf] %vm7766_vm8, %v3337_v35  ;;  %v3634_v29 = vcombine.low %v3611_v61, %v3617_v21  ;;  %v3939_v57 = vadd.f32 %v6579_v20, %v3938_v38  ;;  %vm4234_vm7 = vcmp.eq.s32.totalorder %v10230_v58, 2  ;;  %v7244_v41 = vld [vmem:[%s10016_s1 + $0x50] sm:$0xff]  ;;  %v3928_v4 = vrot.slane %v3927_v24, 2 }
 0x267   : > { %6949 = vmatpush3.msra.mxu0 %v7244_v41  ;;  %v7245_v19 = vld [vmem:[%s10016_s1 + $0x150] sm:$0xff]  ;;  %v3934_v18 = vrot.slane %v3933_v8, 2  ;;  %v3945_v3 = vadd.f32 %v6580_v36, %v3944_v51  ;;  %vm4235_vm9 = vcmp.eq.s32.totalorder %v10231_v40, 2  ;;  %v7246_v20 = vld [vmem:[%s10016_s1 + $0xc8] sm:$0xff]  ;;  %v3635_v61 = vcombine.low %v3623_v63, %v3629_v56  ;;  %v10233_v51 = vld [vmem:[#allocation41_spill] sm:$0xff] }
 0x268   : > { %6987 = vmatpush3.msra.mxu1 %v7245_v19  ;;  %6950 = vmatprep.subr.mxu0 %v7246_v20  ;;  %v3642_v31 = vrot.slane %v3634_v29, %v7673_v7  ;;  %v3940_v35 = vrot.slane %v3939_v57, 2  ;;  %v10232_v21 = vld [vmem:[#allocation40_spill] sm:$0xff]  ;;  %v7248_v36 = vld [vmem:[%s10016_s1 + $0x48] sm:$0xff]  ;;  %v3929_v38 = vadd.f32 %v3928_v4, %v3927_v24  ;;  %vm4237_vm11 = vcmp.eq.s32.totalorder %v10233_v51, 2  ;;  %v7250_v63 = vld [vmem:[%s10016_s1 + $0xc0] sm:$0xff] }
 0x269   : > { %6988 = vmatprep.subr.mxu1 %v7247_v47  ;;  %vm4236_vm10 = vcmp.eq.s32.totalorder %v10232_v21, 2  ;;  %6951 = vmatpush3.msra.mxu0 %v7248_v36  ;;  %v7249_v17 = vld [vmem:[%s10016_s1 + $0x148] sm:$0xff]  ;;  %v3935_v50 = vadd.f32 %v3934_v18, %v3933_v8  ;;  %v3946_v60 = vrot.slane %v3945_v3, 2  ;;  %v7251_v15 = vld [vmem:[%s10016_s1 + $0x1c0] sm:$0xff]  ;;  %v3649_v48 = vrot.slane %v3635_v61, %v7673_v7  ;;  %v7254_v20 = vld [vmem:[%s10016_s1 + $0xb8] sm:$0xff] }
 0x26a   : > { %6989 = vmatpush3.msra.mxu1 %v7249_v17  ;;  %6952 = vmatprep.subr.mxu0 %v7250_v63  ;;  %v3941_v56 = vadd.f32 %v3940_v35, %v3939_v57  ;;  %v6605_v24 = vsel %vm4234_vm7, 1.0, %v10147_v52  ;;  %v6606_v8 = vsel %vm4235_vm9, 1.0, %v10147_v52  ;;  %v7252_v29 = vld [vmem:[%s10016_s1 + $0x40] sm:$0xff]  ;;  %v3930_v19 = vrot.slane %v3929_v38, 1  ;;  %v7255_v47 = vld [vmem:[%s10016_s1 + $0x1b8] sm:$0xff] }
 0x26b   : > { %6990 = vmatprep.subr.mxu1 %v7251_v15  ;;  %6953 = vmatpush3.msra.mxu0 %v7252_v29  ;;  %v7253_v41 = vld [vmem:[%s10016_s1 + $0x140] sm:$0xff]  ;;  %v3936_v57 = vrot.slane %v3935_v50, 1  ;;  %v3947_v4 = vadd.f32 %v3946_v60, %v3945_v3  ;;  %v6607_v18 = vsel %vm4236_vm10, 1.0, %v10147_v52  ;;  %v3650_v61 = vcombine.low %v3642_v31, %v3649_v48  ;;  %v7256_v17 = vld [vmem:[%s10016_s1 + $0x38] sm:$0xff]  ;;  %v7258_v48 = vld [vmem:[%s10016_s1 + $0xb0] sm:$0xff] }
 0x26c   : > { %6991 = vmatpush3.msra.mxu1 %v7253_v41  ;;  %6954 = vmatprep.subr.mxu0 %v7254_v20  ;;  %v3942_v35 = vrot.slane %v3941_v56, 1  ;;  %v6608_v3 = vsel %vm4237_vm11, 1.0, %v10147_v52  ;;  %v4246_v36 = vrot.slane %v6605_v24, 4  ;;  %v7257_v60 = vld [vmem:[%s10016_s1 + $0x138] sm:$0xff]  ;;  %v3931_v63 = vadd.f32 %v3930_v19, %v3929_v38  ;;  %v7259_v41 = vld [vmem:[%s10016_s1 + $0x1b0] sm:$0xff] }
 0x26d   : > { %6992 = vmatprep.subr.mxu1 %v7255_v47  ;;  %6955 = vmatpush3.msra.mxu0 %v7256_v17  ;;  %v3937_v15 = vadd.f32 %v3936_v57, %v3935_v50  ;;  %v3948_v29 = vrot.slane %v3947_v4, 1  ;;  %v4252_v31 = vrot.slane %v6606_v8, 4  ;;  %v3657_v20 = vrot.slane %v3650_v61, %v7673_v7  ;;  %v7260_v38 = vld [vmem:[%s10016_s1 + $0x30] sm:$0xff] }
 0x26e   : > { %6993 = vmatpush3.msra.mxu1 %v7257_v60  ;;  %6956 = vmatprep.subr.mxu0 %v7258_v48  ;;  %v3943_v47 = vadd.f32 %v3942_v35, %v3941_v56  ;;  %v4247_v17 = vadd.f32 %v6605_v24, %v4246_v36  ;;  %v4258_v51 = vrot.slane %v6607_v18, 4  ;;  %v7261_v50 = vld [vmem:[%s10016_s1 + $0x130] sm:$0xff]  ;;  %v4264_v48 = vrot.slane %v6608_v3, 4  ;;  %v7262_v56 = vld [vmem:[%s10016_s1 + $0xa8] sm:$0xff]  ;;  %v10234_v36 = vld [vmem:[#allocation42_spill] sm:$0xff] }
 0x26f   : > { %6994 = vmatprep.subr.mxu1 %v7259_v41  ;;  %6957 = vmatpush3.msra.mxu0 %v7260_v38  ;;  %v3949_v19 = vadd.f32 %v3948_v29, %v3947_v4  ;;  %v3954_v57 = vcombine.low %v3931_v63, %v3937_v15  ;;  %v4253_v60 = vadd.f32 %v6606_v8, %v4252_v31  ;;  %v7263_v24 = vld [vmem:[%s10016_s1 + $0x1a8] sm:$0xff]  ;;  %vm4554_vm12 = vcmp.eq.s32.totalorder %v10234_v36, 2 }
 0x270   : > { %6995 = vmatpush3.msra.mxu1 %v7261_v50  ;;  %6958 = vmatprep.subr.mxu0 %v7262_v56  ;;  %3660 = vst.msk [vmem:[#allocation2 + $0xa2] ss:$8 sm:$0xf] %vm7766_vm8, %v3657_v20  ;;  %v4248_v61 = vrot.slane %v4247_v17, 2  ;;  %v4259_v35 = vadd.f32 %v6607_v18, %v4258_v51  ;;  %v10235_v4 = vld [vmem:[#allocation43_spill] sm:$0xff]  ;;  %v4265_v41 = vadd.f32 %v6608_v3, %v4264_v48  ;;  %v7266_v51 = vld [vmem:[%s10016_s1 + $0xa0] sm:$0xff] }
 0x271   : > { %6996 = vmatprep.subr.mxu1 %v7263_v24  ;;  %vm4555_vm13 = vcmp.eq.s32.totalorder %v10235_v4, 2  ;;  %v7264_v8 = vld [vmem:[%s10016_s1 + $0x28] sm:$0xff]  ;;  %v3955_v15 = vcombine.low %v3943_v47, %v3949_v19  ;;  %v3962_v29 = vrot.slane %v3954_v57, %v7673_v7  ;;  %v4254_v31 = vrot.slane %v4253_v60, 2  ;;  %v7267_v18 = vld [vmem:[%s10016_s1 + $0x1a0] sm:$0xff]  ;;  %v10236_v50 = vld [vmem:[#allocation44_spill] sm:$0xff] }
 0x272   : > { %6959 = vmatpush3.msra.mxu0 %v7264_v8  ;;  %v7265_v63 = vld [vmem:[%s10016_s1 + $0x128] sm:$0xff]  ;;  %v4249_v20 = vadd.f32 %v4248_v61, %v4247_v17  ;;  %v4260_v38 = vrot.slane %v4259_v35, 2  ;;  %vm4556_vm14 = vcmp.eq.s32.totalorder %v10236_v50, 2  ;;  %v10237_v56 = vld [vmem:[#allocation45_spill] sm:$0xff]  ;;  %v7268_v3 = vld [vmem:[%s10016_s1 + $0x20] sm:$0xff]  ;;  %v4266_v48 = vrot.slane %v4265_v41, 2 }
 0x273   : > { %6997 = vmatpush3.msra.mxu1 %v7265_v63  ;;  %6960 = vmatprep.subr.mxu0 %v7266_v51  ;;  %vm4557_vm15 = vcmp.eq.s32.totalorder %v10237_v56, 2  ;;  %v7269_v47 = vld [vmem:[%s10016_s1 + $0x120] sm:$0xff]  ;;  %v3969_v19 = vrot.slane %v3955_v15, %v7673_v7  ;;  %v4255_v57 = vadd.f32 %v4254_v31, %v4253_v60  ;;  %v6633_v17 = vsel %vm4554_vm12, 1.0, %v10147_v52  ;;  %v7270_v24 = vld [vmem:[%s10016_s1 + $0x98] sm:$0xff] }
 0x274   : > { %6998 = vmatprep.subr.mxu1 %v7267_v18  ;;  %6961 = vmatpush3.msra.mxu0 %v7268_v3  ;;  %v7271_v61 = vld [vmem:[%s10016_s1 + $0x198] sm:$0xff]  ;;  %v4250_v8 = vrot.slane %v4249_v20, 1  ;;  %v4261_v63 = vadd.f32 %v4260_v38, %v4259_v35  ;;  %v6634_v60 = vsel %vm4555_vm13, 1.0, %v10147_v52  ;;  %v6635_v15 = vsel %vm4556_vm14, 1.0, %v10147_v52 }
 0x275   : > { %6999 = vmatpush3.msra.mxu1 %v7269_v47  ;;  %6962 = vmatprep.subr.mxu0 %v7270_v24  ;;  %v3970_v31 = vcombine.low %v3962_v29, %v3969_v19  ;;  %v4256_v51 = vrot.slane %v4255_v57, 1  ;;  %v4267_v18 = vadd.f32 %v4266_v48, %v4265_v41  ;;  %v6636_v3 = vsel %vm4557_vm15, 1.0, %v10147_v52  ;;  %v7272_v47 = vld [vmem:[%s10016_s1 + $0x18] sm:$0xff]  ;;  %v7274_v41 = vld [vmem:[%s10016_s1 + $0x90] sm:$0xff] }
 0x276   : > { %7000 = vmatprep.subr.mxu1 %v7271_v61  ;;  %6963 = vmatpush3.msra.mxu0 %v7272_v47  ;;  %v7273_v35 = vld [vmem:[%s10016_s1 + $0x118] sm:$0xff]  ;;  %v4251_v38 = vadd.f32 %v4250_v8, %v4249_v20  ;;  %v4262_v24 = vrot.slane %v4261_v63, 1  ;;  %v4566_v61 = vrot.slane %v6633_v17, 4  ;;  %v4572_v29 = vrot.slane %v6634_v60, 4  ;;  %v7275_v19 = vld [vmem:[%s10016_s1 + $0x190] sm:$0xff] }
 0x277   : > { %7001 = vmatpush3.msra.mxu1 %v7273_v35  ;;  %6964 = vmatprep.subr.mxu0 %v7274_v41  ;;  %v3977_v48 = vrot.slane %v3970_v31, %v7673_v7  ;;  %v4257_v47 = vadd.f32 %v4256_v51, %v4255_v57  ;;  %v4268_v56 = vrot.slane %v4267_v18, 1  ;;  %v4578_v50 = vrot.slane %v6635_v15, 4  ;;  %v7276_v20 = vld [vmem:[%s10016_s1 + $0x10] sm:$0xff]  ;;  %v7278_v57 = vld [vmem:[%s10016_s1 + $0x88] sm:$0xff] }
 0x278   : > { %7002 = vmatprep.subr.mxu1 %v7275_v19  ;;  %6965 = vmatpush3.msra.mxu0 %v7276_v20  ;;  %v7277_v8 = vld [vmem:[%s10016_s1 + $0x110] sm:$0xff]  ;;  %v4263_v35 = vadd.f32 %v4262_v24, %v4261_v63  ;;  %v4567_v41 = vadd.f32 %v6633_v17, %v4566_v61  ;;  %v4573_v4 = vadd.f32 %v6634_v60, %v4572_v29  ;;  %v4584_v36 = vrot.slane %v6636_v3, 4  ;;  %v7279_v31 = vld [vmem:[%s10016_s1 + $0x188] sm:$0xff]  ;;  %v10238_v63 = vld [vmem:[#allocation46_spill] sm:$0xff] }
 0x279   : > { %7003 = vmatpush3.msra.mxu1 %v7277_v8  ;;  %6966 = vmatprep.subr.mxu0 %v7278_v57  ;;  %3980 = vst.msk [vmem:[#allocation2 + $0xa3] ss:$8 sm:$0xf] %vm7766_vm8, %v3977_v48  ;;  %v4269_v51 = vadd.f32 %v4268_v56, %v4267_v18  ;;  %v4274_v19 = vcombine.low %v4251_v38, %v4257_v47  ;;  %vm4874_vm0 = vcmp.eq.s32.totalorder %v10238_v63, 2  ;;  %v7280_v17 = vld [vmem:[%s10016_s1 + $0x8] sm:$0xff]  ;;  %v7283_v56 = vld [vmem:[%s10016_s1 + $0x180] sm:$0xff] }
 0x27a   : > { %7004 = vmatprep.subr.mxu1 %v7279_v31  ;;  %v4579_v20 = vadd.f32 %v6635_v15, %v4578_v50  ;;  %6967 = vmatpush3.msra.mxu0 %v7280_v17  ;;  %v7281_v60 = vld [vmem:[%s10016_s1 + $0x108] sm:$0xff]  ;;  %v4568_v24 = vrot.slane %v4567_v41, 2  ;;  %v4574_v61 = vrot.slane %v4573_v4, 2  ;;  %v4585_v29 = vadd.f32 %v6636_v3, %v4584_v36  ;;  %v7282_v50 = vld [vmem:[%s10016_s1 + $0x80] sm:$0xff]  ;;  %v10240_v31 = vld [vmem:[#allocation49_spill] sm:$0xff] }
 0x27b   : > { %7005 = vmatpush3.msra.mxu1 %v7281_v60  ;;  %v10239_v8 = vld [vmem:[#allocation47_spill] sm:$0xff]  ;;  %6968 = vmatprep.subr.mxu0 %v7282_v50  ;;  %v4275_v15 = vcombine.low %v4263_v35, %v4269_v51  ;;  %v4282_v18 = vrot.slane %v4274_v19, %v7673_v7  ;;  %vm4876_vm2 = vcmp.eq.s32.totalorder %v10209_v49, 2  ;;  %v7284_v36 = vld [vmem:[%s10016_s1] sm:$0xff]  ;;  %vm4877_vm3 = vcmp.eq.s32.totalorder %v10240_v31, 2 }
 0x27c   : > { %vm4875_vm1 = vcmp.eq.s32.totalorder %v10239_v8, 2  ;;  %7006 = vmatprep.subr.mxu1 %v7283_v56  ;;  %v4580_v38 = vrot.slane %v4579_v20, 2  ;;  %6969 = vmatpush3.msra.mxu0 %v7284_v36  ;;  %v7285_v3 = vld [vmem:[%s10016_s1 + $0x100] sm:$0xff]  ;;  %v4569_v48 = vadd.f32 %v4568_v24, %v4567_v41  ;;  %v4575_v47 = vadd.f32 %v4574_v61, %v4573_v4 }
 0x27d   : > { %7007 = vmatpush3.msra.mxu1 %v7285_v3  ;;  %v4586_v57 = vrot.slane %v4585_v29, 2  ;;  %v4289_v35 = vrot.slane %v4275_v15, %v7673_v7  ;;  %v6661_v19 = vsel %vm4874_vm0, 1.0, %v10147_v52  ;;  %v6662_v17 = vsel %vm4875_vm1, 1.0, %v10147_v52 }
 0x27e   : > { %v4581_v51 = vadd.f32 %v4580_v38, %v4579_v20  ;;  %v4570_v60 = vrot.slane %v4569_v48, 1  ;;  %v4576_v50 = vrot.slane %v4575_v47, 1  ;;  %v6663_v4 = vsel %vm4876_vm2, 1.0, %v10147_v52 }
 0x27f   : > { %v4587_v56 = vadd.f32 %v4586_v57, %v4585_v29  ;;  %v4290_v41 = vcombine.low %v4282_v18, %v4289_v35  ;;  %v6664_v61 = vsel %vm4877_vm3, 1.0, %v10147_v52  ;;  %v4886_v20 = vrot.slane %v6661_v19, 4 }
 0x280   : > { %v4582_v24 = vrot.slane %v4581_v51, 1  ;;  %v4571_v15 = vadd.f32 %v4570_v60, %v4569_v48  ;;  %v4577_v38 = vadd.f32 %v4576_v50, %v4575_v47  ;;  %v4892_v3 = vrot.slane %v6662_v17, 4 }
 0x281   : > { %v4588_v36 = vrot.slane %v4587_v56, 1  ;;  %v4297_v31 = vrot.slane %v4290_v41, %v7673_v7  ;;  %v4887_v63 = vadd.f32 %v6661_v19, %v4886_v20  ;;  %v4898_v21 = vrot.slane %v6663_v4, 4 }
 0x282   : > { %v4583_v8 = vadd.f32 %v4582_v24, %v4581_v51  ;;  %v4594_v29 = vcombine.low %v4571_v15, %v4577_v38  ;;  %v4893_v57 = vadd.f32 %v6662_v17, %v4892_v3  ;;  %v4904_v58 = vrot.slane %v6664_v61, 4  ;;  %v10241_v17 = vld [vmem:[#allocation51_spill] sm:$0xff] }
 0x283   : > { %v4589_v40 = vadd.f32 %v4588_v36, %v4587_v56  ;;  %4300 = vst.msk [vmem:[#allocation2 + $0xa4] ss:$8 sm:$0xf] %vm7766_vm8, %v4297_v31  ;;  %v4888_v18 = vrot.slane %v4887_v63, 2  ;;  %v4899_v35 = vadd.f32 %v6663_v4, %v4898_v21  ;;  %vm5194_vm4 = vcmp.eq.s32.totalorder %v8818_v23, 2 }
 0x284   : > { %vm5195_vm5 = vcmp.eq.s32.totalorder %v8820_v30, 2  ;;  %v4602_v47 = vrot.slane %v4594_v29, %v7673_v7  ;;  %v4894_v60 = vrot.slane %v4893_v57, 2  ;;  %v4905_v51 = vadd.f32 %v6664_v61, %v4904_v58 }
 0x285   : > { %v4595_v48 = vcombine.low %v4583_v8, %v4589_v40  ;;  %v4889_v19 = vadd.f32 %v4888_v18, %v4887_v63  ;;  %v4900_v50 = vrot.slane %v4899_v35, 2  ;;  %vm5196_vm6 = vcmp.eq.s32.totalorder %v8824_v26, 2  ;;  %v10242_v26 = vld [vmem:[#allocation10_spill] sm:$0xff] }
 0x286   : > { %vm5197_vm7 = vcmp.eq.s32.totalorder %v10241_v17, 2  ;;  %v4895_v31 = vadd.f32 %v4894_v60, %v4893_v57  ;;  %v4906_v41 = vrot.slane %v4905_v51, 2  ;;  %v6689_v21 = vsel %vm5194_vm4, 1.0, %v10147_v52 }
 0x287   : > { %v4609_v56 = vrot.slane %v4595_v48, %v7673_v7  ;;  %v4890_v4 = vrot.slane %v4889_v19, 1  ;;  %v4901_v24 = vadd.f32 %v4900_v50, %v4899_v35  ;;  %v6690_v40 = vsel %vm5195_vm5, 1.0, %v10147_v52 }
 0x288   : > { %v6691_v8 = vsel %vm5196_vm6, 1.0, %v10147_v52  ;;  %v4896_v58 = vrot.slane %v4895_v31, 1  ;;  %v4907_v63 = vadd.f32 %v4906_v41, %v4905_v51  ;;  %v6692_v61 = vsel %vm5197_vm7, 1.0, %v10147_v52 }
 0x289   : > { %v4610_v20 = vcombine.low %v4602_v47, %v4609_v56  ;;  %v4891_v15 = vadd.f32 %v4890_v4, %v4889_v19  ;;  %v4902_v38 = vrot.slane %v4901_v24, 1  ;;  %v5206_v36 = vrot.slane %v6689_v21, 4 }
 0x28a   : > { %v5212_v3 = vrot.slane %v6690_v40, 4  ;;  %v4897_v57 = vadd.f32 %v4896_v58, %v4895_v31  ;;  %v4908_v18 = vrot.slane %v4907_v63, 1  ;;  %v5218_v48 = vrot.slane %v6691_v8, 4 }
 0x28b   : > { %v4617_v29 = vrot.slane %v4610_v20, %v7673_v7  ;;  %v4903_v60 = vadd.f32 %v4902_v38, %v4901_v24  ;;  %v5207_v35 = vadd.f32 %v6689_v21, %v5206_v36  ;;  %v5224_v17 = vrot.slane %v6692_v61, 4  ;;  %v10243_v21 = vld [vmem:[#allocation11_spill] sm:$0xff]  ;;  %v10244_v36 = vld [vmem:[#allocation12_spill] sm:$0xff] }
 0x28c   : > { %v5213_v50 = vadd.f32 %v6690_v40, %v5212_v3  ;;  %v4909_v47 = vadd.f32 %v4908_v18, %v4907_v63  ;;  %v4914_v51 = vcombine.low %v4891_v15, %v4897_v57  ;;  %v5219_v56 = vadd.f32 %v6691_v8, %v5218_v48 }
 0x28d   : > { %4620 = vst.msk [vmem:[#allocation2 + $0xa5] ss:$8 sm:$0xf] %vm7766_vm8, %v4617_v29  ;;  %vm462_vm9 = vcmp.eq.s32.totalorder %v7722_v43, 3  ;;  %v5208_v19 = vrot.slane %v5207_v35, 2  ;;  %v5225_v4 = vadd.f32 %v6692_v61, %v5224_v17  ;;  %vm463_vm10 = vcmp.eq.s32.totalorder %v10242_v26, 3 }
 0x28e   : > { %v5214_v41 = vrot.slane %v5213_v50, 2  ;;  %v4915_v31 = vcombine.low %v4903_v60, %v4909_v47  ;;  %v4922_v20 = vrot.slane %v4914_v51, %v7673_v7  ;;  %v5220_v24 = vrot.slane %v5219_v56, 2 }
 0x28f   : > { %vm464_vm11 = vcmp.eq.s32.totalorder %v10243_v21, 3  ;;  %v5209_v40 = vadd.f32 %v5208_v19, %v5207_v35  ;;  %v5226_v38 = vrot.slane %v5225_v4, 2  ;;  %vm465_vm12 = vcmp.eq.s32.totalorder %v10244_v36, 3 }
 0x290   : > { %v5215_v58 = vadd.f32 %v5214_v41, %v5213_v50  ;;  %v4929_v8 = vrot.slane %v4915_v31, %v7673_v7  ;;  %v5221_v63 = vadd.f32 %v5220_v24, %v5219_v56  ;;  %v6273_v43 = vsel %vm462_vm9, 1.0, %v10147_v52 }
 0x291   : > { %v6274_v17 = vsel %vm463_vm10, 1.0, %v10147_v52  ;;  %v5210_v61 = vrot.slane %v5209_v40, 1  ;;  %v5227_v15 = vadd.f32 %v5226_v38, %v5225_v4  ;;  %v6275_v3 = vsel %vm464_vm11, 1.0, %v10147_v52 }
 0x292   : > { %v5216_v26 = vrot.slane %v5215_v58, 1  ;;  %v4930_v29 = vcombine.low %v4922_v20, %v4929_v8  ;;  %v5222_v57 = vrot.slane %v5221_v63, 1  ;;  %v6276_v18 = vsel %vm465_vm12, 1.0, %v10147_v52 }
 0x293   : > { %v474_v48 = vrot.slane %v6273_v43, 4  ;;  %v5211_v60 = vadd.f32 %v5210_v61, %v5209_v40  ;;  %v5228_v50 = vrot.slane %v5227_v15, 1  ;;  %v480_v47 = vrot.slane %v6274_v17, 4 }
 0x294   : > { %v5217_v35 = vadd.f32 %v5216_v26, %v5215_v58  ;;  %v4937_v51 = vrot.slane %v4930_v29, %v7673_v7  ;;  %v5223_v56 = vadd.f32 %v5222_v57, %v5221_v63  ;;  %v486_v41 = vrot.slane %v6275_v3, 4 }
 0x295   : > { %v475_v19 = vadd.f32 %v6273_v43, %v474_v48  ;;  %v5229_v31 = vadd.f32 %v5228_v50, %v5227_v15  ;;  %v481_v21 = vadd.f32 %v6274_v17, %v480_v47  ;;  %v492_v4 = vrot.slane %v6276_v18, 4 }
 0x296   : > { %v5234_v24 = vcombine.low %v5211_v60, %v5217_v35  ;;  %4940 = vst.msk [vmem:[#allocation2 + $0xa6] ss:$8 sm:$0xf] %vm7766_vm8, %v4937_v51  ;;  %v487_v38 = vadd.f32 %v6275_v3, %v486_v41  ;;  %vm782_vm13 = vcmp.eq.s32.totalorder %v7780_v53, 3  ;;  %vm783_vm14 = vcmp.eq.s32.totalorder %v7782_v54, 3 }
 0x297   : > { %v476_v20 = vrot.slane %v475_v19, 2  ;;  %v5235_v40 = vcombine.low %v5223_v56, %v5229_v31  ;;  %v482_v36 = vrot.slane %v481_v21, 2  ;;  %v493_v8 = vadd.f32 %v6276_v18, %v492_v4 }
 0x298   : > { %v5242_v58 = vrot.slane %v5234_v24, %v7673_v7  ;;  %v488_v43 = vrot.slane %v487_v38, 2  ;;  %vm784_vm15 = vcmp.eq.s32.totalorder %v7784_v55, 3  ;;  %vm785_vm0 = vcmp.eq.s32.totalorder %v7789_v59, 3 }
 0x299   : > { %v477_v63 = vadd.f32 %v476_v20, %v475_v19  ;;  %v5249_v17 = vrot.slane %v5235_v40, %v7673_v7  ;;  %v483_v61 = vadd.f32 %v482_v36, %v481_v21  ;;  %v494_v26 = vrot.slane %v493_v8, 2 }
 0x29a   : > { %v6301_v15 = vsel %vm782_vm13, 1.0, %v10147_v52  ;;  %v489_v3 = vadd.f32 %v488_v43, %v487_v38  ;;  %v6302_v54 = vsel %vm783_vm14, 1.0, %v10147_v52  ;;  %v6303_v29 = vsel %vm784_vm15, 1.0, %v10147_v52 }
 0x29b   : > { %v478_v53 = vrot.slane %v477_v63, 1  ;;  %v5250_v57 = vcombine.low %v5242_v58, %v5249_v17  ;;  %v484_v18 = vrot.slane %v483_v61, 1  ;;  %v495_v48 = vadd.f32 %v494_v26, %v493_v8 }
 0x29c   : > { %v6304_v60 = vsel %vm785_vm0, 1.0, %v10147_v52  ;;  %v490_v35 = vrot.slane %v489_v3, 1  ;;  %v794_v59 = vrot.slane %v6301_v15, 4  ;;  %v800_v50 = vrot.slane %v6302_v54, 4 }
 0x29d   : > { %v479_v55 = vadd.f32 %v478_v53, %v477_v63  ;;  %v5257_v47 = vrot.slane %v5250_v57, %v7673_v7  ;;  %v485_v51 = vadd.f32 %v484_v18, %v483_v61  ;;  %v496_v56 = vrot.slane %v495_v48, 1 }
 0x29e   : > { %v806_v19 = vrot.slane %v6303_v29, 4  ;;  %v491_v41 = vadd.f32 %v490_v35, %v489_v3  ;;  %v795_v31 = vadd.f32 %v6301_v15, %v794_v59  ;;  %v801_v24 = vadd.f32 %v6302_v54, %v800_v50  ;;  %v10245_v15 = vld [vmem:[#allocation13_spill] sm:$0xff] }
 0x29f   : > { %v812_v21 = vrot.slane %v6304_v60, 4  ;;  %5260 = vst.msk [vmem:[#allocation2 + $0xa7] ss:$8 sm:$0xf] %vm7766_vm8, %v5257_v47  ;;  %v497_v4 = vadd.f32 %v496_v56, %v495_v48  ;;  %v502_v20 = vcombine.low %v479_v55, %v485_v51  ;;  %vm1102_vm1 = vcmp.eq.s32.totalorder %v7837_v9, 3 }
 0x2a0   : > { %v807_v38 = vadd.f32 %v6303_v29, %v806_v19  ;;  %v796_v40 = vrot.slane %v795_v31, 2  ;;  %v802_v58 = vrot.slane %v801_v24, 2  ;;  %vm1103_vm2 = vcmp.eq.s32.totalorder %v7841_v12, 3 }
 0x2a1   : > { %v813_v36 = vadd.f32 %v6304_v60, %v812_v21  ;;  %v503_v8 = vcombine.low %v491_v41, %v497_v4  ;;  %v510_v63 = vrot.slane %v502_v20, %v7673_v7  ;;  %vm1104_vm3 = vcmp.eq.s32.totalorder %v7843_v13, 3 }
 0x2a2   : > { %v808_v43 = vrot.slane %v807_v38, 2  ;;  %v797_v17 = vadd.f32 %v796_v40, %v795_v31  ;;  %v803_v61 = vadd.f32 %v802_v58, %v801_v24  ;;  %vm1105_vm4 = vcmp.eq.s32.totalorder %v10245_v15, 3 }
 0x2a3   : > { %v814_v26 = vrot.slane %v813_v36, 2  ;;  %v517_v53 = vrot.slane %v503_v8, %v7673_v7  ;;  %v6329_v9 = vsel %vm1102_vm1, 1.0, %v10147_v52  ;;  %v6330_v54 = vsel %vm1103_vm2, 1.0, %v10147_v52 }
 0x2a4   : > { %v809_v3 = vadd.f32 %v808_v43, %v807_v38  ;;  %v798_v29 = vrot.slane %v797_v17, 1  ;;  %v804_v12 = vrot.slane %v803_v61, 1  ;;  %v6331_v18 = vsel %vm1104_vm3, 1.0, %v10147_v52 }
 0x2a5   : > { %v815_v57 = vadd.f32 %v814_v26, %v813_v36  ;;  %v518_v48 = vcombine.low %v510_v63, %v517_v53  ;;  %v6332_v13 = vsel %vm1105_vm4, 1.0, %v10147_v52  ;;  %v1114_v55 = vrot.slane %v6329_v9, 4 }
 0x2a6   : > { %v810_v60 = vrot.slane %v809_v3, 1  ;;  %v5721_v35 = vld [vmem:[#allocation2 + $0xa8] sm:$0xff]  ;;  %v5723_v59 = vld [vmem:[#allocation2 + $0xb8] sm:$0xff]  ;;  %v5720_v50 = vld [vmem:[#allocation2 + $0xa0] sm:$0xff]  ;;  %v799_v47 = vadd.f32 %v798_v29, %v797_v17  ;;  %v805_v51 = vadd.f32 %v804_v12, %v803_v61  ;;  %v1120_v19 = vrot.slane %v6330_v54, 4 }
 0x2a7   : > { %v816_v56 = vrot.slane %v815_v57, 1  ;;  %5793 = vmatprep.mubr.f32.mxu0 %v5721_v35  ;;  %5868 = vmatprep.mubr.f32.mxu1 %v5723_v59  ;;  %v5722_v41 = vld [vmem:[#allocation2 + $0xb0] sm:$0xff]  ;;  %v525_v31 = vrot.slane %v518_v48, %v7673_v7  ;;  %v1115_v21 = vadd.f32 %v6329_v9, %v1114_v55  ;;  %v1126_v4 = vrot.slane %v6331_v18, 4 }
 0x2a8   : > { %v811_v24 = vadd.f32 %v810_v60, %v809_v3  ;;  %5794 = vmatmul.mubr.f32.gmra.mxu0 %v5720_v50  ;;  %5869 = vmatmul.mubr.f32.gmra.mxu1 %v5722_v41  ;;  %v822_v38 = vcombine.low %v799_v47, %v805_v51  ;;  %v1121_v40 = vadd.f32 %v6330_v54, %v1120_v19  ;;  %v1132_v58 = vrot.slane %v6332_v13, 4 }
 0x2a9   : > { %v817_v20 = vadd.f32 %v816_v56, %v815_v57  ;;  %528 = vst.msk [vmem:[#allocation2 + $0xc0] ss:$8 sm:$0xf] %vm7766_vm8, %v525_v31  ;;  %v1116_v36 = vrot.slane %v1115_v21, 2  ;;  %v1127_v8 = vadd.f32 %v6331_v18, %v1126_v4  ;;  %vm1422_vm5 = vcmp.eq.s32.totalorder %v7895_v33, 3 }
 0x2aa   : > { %vm1423_vm6 = vcmp.eq.s32.totalorder %v7897_v34, 3  ;;  %v830_v43 = vrot.slane %v822_v38, %v7673_v7  ;;  %v1122_v17 = vrot.slane %v1121_v40, 2  ;;  %v1133_v61 = vadd.f32 %v6332_v13, %v1132_v58 }
 0x2ab   : > { %v823_v63 = vcombine.low %v811_v24, %v817_v20  ;;  %v1117_v26 = vadd.f32 %v1116_v36, %v1115_v21  ;;  %v1128_v15 = vrot.slane %v1127_v8, 2  ;;  %vm1424_vm7 = vcmp.eq.s32.totalorder %v7901_v37, 3 }
 0x2ac   : > { %vm1425_vm9 = vcmp.eq.s32.totalorder %v7903_v39, 3  ;;  %v1123_v3 = vadd.f32 %v1122_v17, %v1121_v40  ;;  %v1134_v9 = vrot.slane %v1133_v61, 2  ;;  %v6357_v54 = vsel %vm1422_vm5, 1.0, %v10147_v52 }
 0x2ad   : > { %v837_v53 = vrot.slane %v823_v63, %v7673_v7  ;;  %v1118_v33 = vrot.slane %v1117_v26, 1  ;;  %v1129_v29 = vadd.f32 %v1128_v15, %v1127_v8  ;;  %v6358_v34 = vsel %vm1423_vm6, 1.0, %v10147_v52 }
 0x2ae   : > { %v6359_v12 = vsel %vm1424_vm7, 1.0, %v10147_v52  ;;  %v1124_v18 = vrot.slane %v1123_v3, 1  ;;  %v1135_v48 = vadd.f32 %v1134_v9, %v1133_v61  ;;  %v6360_v60 = vsel %vm1425_vm9, 1.0, %v10147_v52 }
 0x2af   : > { %v838_v57 = vcombine.low %v830_v43, %v837_v53  ;;  %v1119_v37 = vadd.f32 %v1118_v33, %v1117_v26  ;;  %v1130_v13 = vrot.slane %v1129_v29, 1  ;;  %v1434_v39 = vrot.slane %v6357_v54, 4 }
 0x2b0   : > { %v1440_v55 = vrot.slane %v6358_v34, 4  ;;  %v1125_v59 = vadd.f32 %v1124_v18, %v1123_v3  ;;  %v1136_v50 = vrot.slane %v1135_v48, 1  ;;  %v1446_v47 = vrot.slane %v6359_v12, 4 }
 0x2b1   : > { %v845_v35 = vrot.slane %v838_v57, %v7673_v7  ;;  %v1131_v51 = vadd.f32 %v1130_v13, %v1129_v29  ;;  %v1435_v56 = vadd.f32 %v6357_v54, %v1434_v39  ;;  %v1452_v41 = vrot.slane %v6360_v60, 4 }
 0x2b2   : > { %v1441_v19 = vadd.f32 %v6358_v34, %v1440_v55  ;;  %v1137_v31 = vadd.f32 %v1136_v50, %v1135_v48  ;;  %v1142_v24 = vcombine.low %v1119_v37, %v1125_v59  ;;  %v1447_v21 = vadd.f32 %v6359_v12, %v1446_v47 }
 0x2b3   : > { %848 = vst.msk [vmem:[#allocation2 + $0xc1] ss:$8 sm:$0xf] %vm7766_vm8, %v845_v35  ;;  %vm1742_vm10 = vcmp.eq.s32.totalorder %v7951_v5, 3  ;;  %v1436_v4 = vrot.slane %v1435_v56, 2  ;;  %v1453_v38 = vadd.f32 %v6360_v60, %v1452_v41  ;;  %vm1743_vm11 = vcmp.eq.s32.totalorder %v7955_v6, 3 }
 0x2b4   : > { %v1442_v20 = vrot.slane %v1441_v19, 2  ;;  %v1143_v40 = vcombine.low %v1131_v51, %v1137_v31  ;;  %v1150_v58 = vrot.slane %v1142_v24, %v7673_v7  ;;  %v1448_v36 = vrot.slane %v1447_v21, 2 }
 0x2b5   : > { %vm1744_vm12 = vcmp.eq.s32.totalorder %v7957_v10, 3  ;;  %v1437_v8 = vadd.f32 %v1436_v4, %v1435_v56  ;;  %v1454_v43 = vrot.slane %v1453_v38, 2  ;;  %vm1745_vm13 = vcmp.eq.s32.totalorder %v7960_v14, 3 }
 0x2b6   : > { %v1443_v63 = vadd.f32 %v1442_v20, %v1441_v19  ;;  %v1157_v17 = vrot.slane %v1143_v40, %v7673_v7  ;;  %v1449_v61 = vadd.f32 %v1448_v36, %v1447_v21  ;;  %v6385_v5 = vsel %vm1742_vm10, 1.0, %v10147_v52 }
 0x2b7   : > { %v6386_v26 = vsel %vm1743_vm11, 1.0, %v10147_v52  ;;  %v1438_v15 = vrot.slane %v1437_v8, 1  ;;  %v1455_v53 = vadd.f32 %v1454_v43, %v1453_v38  ;;  %v6387_v3 = vsel %vm1744_vm12, 1.0, %v10147_v52 }
 0x2b8   : > { %v1444_v6 = vrot.slane %v1443_v63, 1  ;;  %v1158_v9 = vcombine.low %v1150_v58, %v1157_v17  ;;  %v1450_v54 = vrot.slane %v1449_v61, 1  ;;  %v6388_v10 = vsel %vm1745_vm13, 1.0, %v10147_v52 }
 0x2b9   : > { %v1754_v33 = vrot.slane %v6385_v5, 4  ;;  %v1439_v29 = vadd.f32 %v1438_v15, %v1437_v8  ;;  %v1456_v14 = vrot.slane %v1455_v53, 1  ;;  %v1760_v12 = vrot.slane %v6386_v26, 4 }
 0x2ba   : > { %v1445_v34 = vadd.f32 %v1444_v6, %v1443_v63  ;;  %v1165_v57 = vrot.slane %v1158_v9, %v7673_v7  ;;  %v1451_v18 = vadd.f32 %v1450_v54, %v1449_v61  ;;  %v1766_v60 = vrot.slane %v6387_v3, 4 }
 0x2bb   : > { %v1755_v48 = vadd.f32 %v6385_v5, %v1754_v33  ;;  %v1457_v37 = vadd.f32 %v1456_v14, %v1455_v53  ;;  %v1761_v39 = vadd.f32 %v6386_v26, %v1760_v12  ;;  %v1772_v55 = vrot.slane %v6388_v10, 4 }
 0x2bc   : > { %v1462_v13 = vcombine.low %v1439_v29, %v1445_v34  ;;  %1168 = vst.msk [vmem:[#allocation2 + $0xc2] ss:$8 sm:$0xf] %vm7766_vm8, %v1165_v57  ;;  %v1767_v59 = vadd.f32 %v6387_v3, %v1766_v60  ;;  %vm2062_vm14 = vcmp.eq.s32.totalorder %v8009_v44, 3  ;;  %vm2063_vm15 = vcmp.eq.s32.totalorder %v8011_v46, 3 }
 0x2bd   : > { %v1756_v35 = vrot.slane %v1755_v48, 2  ;;  %v1463_v50 = vcombine.low %v1451_v18, %v1457_v37  ;;  %v1762_v51 = vrot.slane %v1761_v39, 2  ;;  %v1773_v56 = vadd.f32 %v6388_v10, %v1772_v55  ;;  %v10246_v37 = vld [vmem:[#allocation19_spill] sm:$0xff] }
 0x2be   : > { %v1470_v47 = vrot.slane %v1462_v13, %v7673_v7  ;;  %v1768_v41 = vrot.slane %v1767_v59, 2  ;;  %vm2064_vm0 = vcmp.eq.s32.totalorder %v10176_v1, 3  ;;  %vm2065_vm1 = vcmp.eq.s32.totalorder %v10177_v62, 3 }
 0x2bf   : > { %v1757_v19 = vadd.f32 %v1756_v35, %v1755_v48  ;;  %v1477_v31 = vrot.slane %v1463_v50, %v7673_v7  ;;  %v1763_v24 = vadd.f32 %v1762_v51, %v1761_v39  ;;  %v1774_v21 = vrot.slane %v1773_v56, 2 }
 0x2c0   : > { %v6413_v4 = vsel %vm2062_vm14, 1.0, %v10147_v52  ;;  %v1769_v20 = vadd.f32 %v1768_v41, %v1767_v59  ;;  %v6414_v46 = vsel %vm2063_vm15, 1.0, %v10147_v52  ;;  %v6415_v38 = vsel %vm2064_vm0, 1.0, %v10147_v52 }
 0x2c1   : > { %v1758_v44 = vrot.slane %v1757_v19, 1  ;;  %v1478_v40 = vcombine.low %v1470_v47, %v1477_v31  ;;  %v1764_v58 = vrot.slane %v1763_v24, 1  ;;  %v1775_v36 = vadd.f32 %v1774_v21, %v1773_v56 }
 0x2c2   : > { %v6416_v8 = vsel %vm2065_vm1, 1.0, %v10147_v52  ;;  %v1770_v63 = vrot.slane %v1769_v20, 1  ;;  %v2074_v62 = vrot.slane %v6413_v4, 4  ;;  %v2080_v43 = vrot.slane %v6414_v46, 4 }
 0x2c3   : > { %v1759_v1 = vadd.f32 %v1758_v44, %v1757_v19  ;;  %v1485_v17 = vrot.slane %v1478_v40, %v7673_v7  ;;  %v1765_v61 = vadd.f32 %v1764_v58, %v1763_v24  ;;  %v1776_v5 = vrot.slane %v1775_v36, 1 }
 0x2c4   : > { %v2086_v26 = vrot.slane %v6415_v38, 4  ;;  %v1771_v15 = vadd.f32 %v1770_v63, %v1769_v20  ;;  %v2075_v6 = vadd.f32 %v6413_v4, %v2074_v62  ;;  %v2081_v53 = vadd.f32 %v6414_v46, %v2080_v43  ;;  %v10248_v63 = vld [vmem:[#allocation21_spill] sm:$0xff] }
 0x2c5   : > { %v2092_v3 = vrot.slane %v6416_v8, 4  ;;  %1488 = vst.msk [vmem:[#allocation2 + $0xc3] ss:$8 sm:$0xf] %vm7766_vm8, %v1485_v17  ;;  %v1777_v9 = vadd.f32 %v1776_v5, %v1775_v36  ;;  %v1782_v54 = vcombine.low %v1759_v1, %v1765_v61  ;;  %vm2382_vm2 = vcmp.eq.s32.totalorder %v10178_v0, 3  ;;  %v10247_v1 = vld [vmem:[#allocation20_spill] sm:$0xff] }
 0x2c6   : > { %v2087_v10 = vadd.f32 %v6415_v38, %v2086_v26  ;;  %v2076_v33 = vrot.slane %v2075_v6, 2  ;;  %v2082_v29 = vrot.slane %v2081_v53, 2  ;;  %vm2383_vm3 = vcmp.eq.s32.totalorder %v10179_v22, 3 }
 0x2c7   : > { %v2093_v34 = vadd.f32 %v6416_v8, %v2092_v3  ;;  %v1783_v14 = vcombine.low %v1771_v15, %v1777_v9  ;;  %v1790_v12 = vrot.slane %v1782_v54, %v7673_v7  ;;  %vm2384_vm4 = vcmp.eq.s32.totalorder %v10214_v27, 3  ;;  %v10249_v15 = vld [vmem:[#allocation22_spill] sm:$0xff] }
 0x2c8   : > { %v2088_v57 = vrot.slane %v2087_v10, 2  ;;  %v2077_v18 = vadd.f32 %v2076_v33, %v2075_v6  ;;  %v2083_v48 = vadd.f32 %v2082_v29, %v2081_v53  ;;  %vm2385_vm5 = vcmp.eq.s32.totalorder %v10246_v37, 3  ;;  %v10250_v6 = vld [vmem:[#allocation23_spill] sm:$0xff] }
 0x2c9   : > { %v2094_v60 = vrot.slane %v2093_v34, 2  ;;  %v1797_v13 = vrot.slane %v1783_v14, %v7673_v7  ;;  %v6441_v0 = vsel %vm2382_vm2, 1.0, %v10147_v52  ;;  %v6442_v55 = vsel %vm2383_vm3, 1.0, %v10147_v52 }
 0x2ca   : > { %v2089_v39 = vadd.f32 %v2088_v57, %v2087_v10  ;;  %v2078_v35 = vrot.slane %v2077_v18, 1  ;;  %v2084_v22 = vrot.slane %v2083_v48, 1  ;;  %v6443_v50 = vsel %vm2384_vm4, 1.0, %v10147_v52 }
 0x2cb   : > { %v2095_v59 = vadd.f32 %v2094_v60, %v2093_v34  ;;  %v1798_v47 = vcombine.low %v1790_v12, %v1797_v13  ;;  %v6444_v27 = vsel %vm2385_vm5, 1.0, %v10147_v52  ;;  %v2394_v56 = vrot.slane %v6441_v0, 4 }
 0x2cc   : > { %v2090_v51 = vrot.slane %v2089_v39, 1  ;;  %v2079_v19 = vadd.f32 %v2078_v35, %v2077_v18  ;;  %v2085_v41 = vadd.f32 %v2084_v22, %v2083_v48  ;;  %v2400_v24 = vrot.slane %v6442_v55, 4 }
 0x2cd   : > { %v2096_v31 = vrot.slane %v2095_v59, 1  ;;  %v1805_v21 = vrot.slane %v1798_v47, %v7673_v7  ;;  %v2395_v44 = vadd.f32 %v6441_v0, %v2394_v56  ;;  %v2406_v20 = vrot.slane %v6443_v50, 4 }
 0x2ce   : > { %v2091_v4 = vadd.f32 %v2090_v51, %v2089_v39  ;;  %v2102_v38 = vcombine.low %v2079_v19, %v2085_v41  ;;  %v2401_v40 = vadd.f32 %v6442_v55, %v2400_v24  ;;  %v2412_v58 = vrot.slane %v6444_v27, 4  ;;  %v10251_v24 = vld [vmem:[#allocation25_spill] sm:$0xff] }
 0x2cf   : > { %v2097_v46 = vadd.f32 %v2096_v31, %v2095_v59  ;;  %1808 = vst.msk [vmem:[#allocation2 + $0xc4] ss:$8 sm:$0xf] %vm7766_vm8, %v1805_v21  ;;  %v2396_v36 = vrot.slane %v2395_v44, 2  ;;  %v2407_v8 = vadd.f32 %v6443_v50, %v2406_v20  ;;  %vm2702_vm6 = vcmp.eq.s32.totalorder %v10247_v1, 3  ;;  %v10252_v20 = vld [vmem:[#allocation26_spill] sm:$0xff] }
 0x2d0   : > { %vm2703_vm7 = vcmp.eq.s32.totalorder %v10248_v63, 3  ;;  %v2110_v43 = vrot.slane %v2102_v38, %v7673_v7  ;;  %v2402_v17 = vrot.slane %v2401_v40, 2  ;;  %v2413_v61 = vadd.f32 %v6444_v27, %v2412_v58  ;;  %v10253_v58 = vld [vmem:[#allocation27_spill] sm:$0xff] }
 0x2d1   : > { %v2103_v62 = vcombine.low %v2091_v4, %v2097_v46  ;;  %v2397_v5 = vadd.f32 %v2396_v36, %v2395_v44  ;;  %v2408_v26 = vrot.slane %v2407_v8, 2  ;;  %vm2704_vm9 = vcmp.eq.s32.totalorder %v10249_v15, 3 }
 0x2d2   : > { %vm2705_vm10 = vcmp.eq.s32.totalorder %v10250_v6, 3  ;;  %v2403_v3 = vadd.f32 %v2402_v17, %v2401_v40  ;;  %v2414_v9 = vrot.slane %v2413_v61, 2  ;;  %v6469_v54 = vsel %vm2702_vm6, 1.0, %v10147_v52 }
 0x2d3   : > { %v2117_v53 = vrot.slane %v2103_v62, %v7673_v7  ;;  %v2398_v10 = vrot.slane %v2397_v5, 1  ;;  %v2409_v33 = vadd.f32 %v2408_v26, %v2407_v8  ;;  %v6470_v29 = vsel %vm2703_vm7, 1.0, %v10147_v52 }
 0x2d4   : > { %v6471_v34 = vsel %vm2704_vm9, 1.0, %v10147_v52  ;;  %v2404_v12 = vrot.slane %v2403_v3, 1  ;;  %v2415_v57 = vadd.f32 %v2414_v9, %v2413_v61  ;;  %v6472_v18 = vsel %vm2705_vm10, 1.0, %v10147_v52 }
 0x2d5   : > { %v2118_v14 = vcombine.low %v2110_v43, %v2117_v53  ;;  %v2399_v48 = vadd.f32 %v2398_v10, %v2397_v5  ;;  %v2410_v60 = vrot.slane %v2409_v33, 1  ;;  %v2714_v37 = vrot.slane %v6469_v54, 4 }
 0x2d6   : > { %v2720_v13 = vrot.slane %v6470_v29, 4  ;;  %v2405_v0 = vadd.f32 %v2404_v12, %v2403_v3  ;;  %v2416_v55 = vrot.slane %v2415_v57, 1  ;;  %v2726_v35 = vrot.slane %v6471_v34, 4 }
 0x2d7   : > { %v2125_v39 = vrot.slane %v2118_v14, %v7673_v7  ;;  %v2411_v22 = vadd.f32 %v2410_v60, %v2409_v33  ;;  %v2715_v59 = vadd.f32 %v6469_v54, %v2714_v37  ;;  %v2732_v47 = vrot.slane %v6472_v18, 4 }
 0x2d8   : > { %v2721_v50 = vadd.f32 %v6470_v29, %v2720_v13  ;;  %v2417_v51 = vadd.f32 %v2416_v55, %v2415_v57  ;;  %v2422_v27 = vcombine.low %v2399_v48, %v2405_v0  ;;  %v2727_v56 = vadd.f32 %v6471_v34, %v2726_v35  ;;  %v10254_v35 = vld [vmem:[#allocation28_spill] sm:$0xff] }
 0x2d9   : > { %2128 = vst.msk [vmem:[#allocation2 + $0xc5] ss:$8 sm:$0xf] %vm7766_vm8, %v2125_v39  ;;  %vm3022_vm11 = vcmp.eq.s32.totalorder %v10219_v2, 3  ;;  %v2716_v19 = vrot.slane %v2715_v59, 2  ;;  %v2733_v31 = vadd.f32 %v6472_v18, %v2732_v47  ;;  %vm3023_vm12 = vcmp.eq.s32.totalorder %v10251_v24, 3 }
 0x2da   : > { %v2722_v41 = vrot.slane %v2721_v50, 2  ;;  %v2423_v21 = vcombine.low %v2411_v22, %v2417_v51  ;;  %v2430_v4 = vrot.slane %v2422_v27, %v7673_v7  ;;  %v2728_v44 = vrot.slane %v2727_v56, 2  ;;  %v10255_v22 = vld [vmem:[#allocation29_spill] sm:$0xff] }
 0x2db   : > { %vm3024_vm13 = vcmp.eq.s32.totalorder %v10252_v20, 3  ;;  %v2717_v46 = vadd.f32 %v2716_v19, %v2715_v59  ;;  %v2734_v40 = vrot.slane %v2733_v31, 2  ;;  %vm3025_vm14 = vcmp.eq.s32.totalorder %v10253_v58, 3 }
 0x2dc   : > { %v2723_v38 = vadd.f32 %v2722_v41, %v2721_v50  ;;  %v2437_v36 = vrot.slane %v2423_v21, %v7673_v7  ;;  %v2729_v8 = vadd.f32 %v2728_v44, %v2727_v56  ;;  %v6497_v2 = vsel %vm3022_vm11, 1.0, %v10147_v52 }
 0x2dd   : > { %v6498_v1 = vsel %vm3023_vm12, 1.0, %v10147_v52  ;;  %v2718_v63 = vrot.slane %v2717_v46, 1  ;;  %v2735_v43 = vadd.f32 %v2734_v40, %v2733_v31  ;;  %v6499_v17 = vsel %vm3024_vm13, 1.0, %v10147_v52 }
 0x2de   : > { %v2724_v62 = vrot.slane %v2723_v38, 1  ;;  %v2438_v61 = vcombine.low %v2430_v4, %v2437_v36  ;;  %v2730_v5 = vrot.slane %v2729_v8, 1  ;;  %v6500_v26 = vsel %vm3025_vm14, 1.0, %v10147_v52 }
 0x2df   : > { %v3034_v15 = vrot.slane %v6497_v2, 4  ;;  %v2719_v6 = vadd.f32 %v2718_v63, %v2717_v46  ;;  %v2736_v3 = vrot.slane %v2735_v43, 1  ;;  %v3040_v9 = vrot.slane %v6498_v1, 4 }
 0x2e0   : > { %v2725_v53 = vadd.f32 %v2724_v62, %v2723_v38  ;;  %v2445_v54 = vrot.slane %v2438_v61, %v7673_v7  ;;  %v2731_v10 = vadd.f32 %v2730_v5, %v2729_v8  ;;  %v3046_v29 = vrot.slane %v6499_v17, 4 }
 0x2e1   : > { %v3035_v33 = vadd.f32 %v6497_v2, %v3034_v15  ;;  %v2737_v34 = vadd.f32 %v2736_v3, %v2735_v43  ;;  %v3041_v12 = vadd.f32 %v6498_v1, %v3040_v9  ;;  %v3052_v57 = vrot.slane %v6500_v26, 4  ;;  %v10257_v15 = vld [vmem:[#allocation31_spill] sm:$0xff]  ;;  %v10258_v9 = vld [vmem:[#allocation32_spill] sm:$0xff] }
 0x2e2   : > { %v2742_v14 = vcombine.low %v2719_v6, %v2725_v53  ;;  %2448 = vst.msk [vmem:[#allocation2 + $0xc6] ss:$8 sm:$0xf] %vm7766_vm8, %v2445_v54  ;;  %v3047_v48 = vadd.f32 %v6499_v17, %v3046_v29  ;;  %vm3342_vm15 = vcmp.eq.s32.totalorder %v8249_v25, 3  ;;  %vm3343_vm0 = vcmp.eq.s32.totalorder %v8258_v45, 3  ;;  %v10256_v17 = vld [vmem:[#allocation30_spill] sm:$0xff] }
 0x2e3   : > { %v3036_v18 = vrot.slane %v3035_v33, 2  ;;  %v2743_v60 = vcombine.low %v2731_v10, %v2737_v34  ;;  %v3042_v13 = vrot.slane %v3041_v12, 2  ;;  %v3053_v39 = vadd.f32 %v6500_v26, %v3052_v57  ;;  %v10259_v29 = vld [vmem:[#allocation33_spill] sm:$0xff] }
 0x2e4   : > { %v2750_v37 = vrot.slane %v2742_v14, %v7673_v7  ;;  %v3048_v55 = vrot.slane %v3047_v48, 2  ;;  %vm3344_vm1 = vcmp.eq.s32.totalorder %v10254_v35, 3  ;;  %vm3345_vm2 = vcmp.eq.s32.totalorder %v10255_v22, 3 }
 0x2e5   : > { %v3037_v0 = vadd.f32 %v3036_v18, %v3035_v33  ;;  %v2757_v59 = vrot.slane %v2743_v60, %v7673_v7  ;;  %v3043_v50 = vadd.f32 %v3042_v13, %v3041_v12  ;;  %v3054_v47 = vrot.slane %v3053_v39, 2 }
 0x2e6   : > { %v6525_v51 = vsel %vm3342_vm15, 1.0, %v10147_v52  ;;  %v3049_v27 = vadd.f32 %v3048_v55, %v3047_v48  ;;  %v6526_v45 = vsel %vm3343_vm0, 1.0, %v10147_v52  ;;  %v6527_v56 = vsel %vm3344_vm1, 1.0, %v10147_v52 }
 0x2e7   : > { %v3038_v25 = vrot.slane %v3037_v0, 1  ;;  %v2758_v19 = vcombine.low %v2750_v37, %v2757_v59  ;;  %v3044_v41 = vrot.slane %v3043_v50, 1  ;;  %v3055_v31 = vadd.f32 %v3054_v47, %v3053_v39 }
 0x2e8   : > { %v6528_v24 = vsel %vm3345_vm2, 1.0, %v10147_v52  ;;  %v3050_v4 = vrot.slane %v3049_v27, 1  ;;  %v3354_v44 = vrot.slane %v6525_v51, 4  ;;  %v3360_v20 = vrot.slane %v6526_v45, 4 }
 0x2e9   : > { %v3039_v21 = vadd.f32 %v3038_v25, %v3037_v0  ;;  %v2765_v46 = vrot.slane %v2758_v19, %v7673_v7  ;;  %v3045_v38 = vadd.f32 %v3044_v41, %v3043_v50  ;;  %v3056_v40 = vrot.slane %v3055_v31, 1 }
 0x2ea   : > { %v3366_v58 = vrot.slane %v6527_v56, 4  ;;  %v3051_v36 = vadd.f32 %v3050_v4, %v3049_v27  ;;  %v3355_v8 = vadd.f32 %v6525_v51, %v3354_v44  ;;  %v3361_v2 = vadd.f32 %v6526_v45, %v3360_v20 }
 0x2eb   : > { %v3372_v1 = vrot.slane %v6528_v24, 4  ;;  %2768 = vst.msk [vmem:[#allocation2 + $0xc7] ss:$8 sm:$0xf] %vm7766_vm8, %v2765_v46  ;;  %v3057_v63 = vadd.f32 %v3056_v40, %v3055_v31  ;;  %v3062_v62 = vcombine.low %v3039_v21, %v3045_v38  ;;  %vm3662_vm3 = vcmp.eq.s32.totalorder %v10256_v17, 3 }
 0x2ec   : > { %v3367_v43 = vadd.f32 %v6527_v56, %v3366_v58  ;;  %v3356_v61 = vrot.slane %v3355_v8, 2  ;;  %v3362_v5 = vrot.slane %v3361_v2, 2  ;;  %vm3663_vm4 = vcmp.eq.s32.totalorder %v10257_v15, 3 }
 0x2ed   : > { %v3373_v26 = vadd.f32 %v6528_v24, %v3372_v1  ;;  %v3063_v6 = vcombine.low %v3051_v36, %v3057_v63  ;;  %v3070_v53 = vrot.slane %v3062_v62, %v7673_v7  ;;  %vm3664_vm5 = vcmp.eq.s32.totalorder %v10258_v9, 3 }
 0x2ee   : > { %v3368_v3 = vrot.slane %v3367_v43, 2  ;;  %v3357_v54 = vadd.f32 %v3356_v61, %v3355_v8  ;;  %v3363_v10 = vadd.f32 %v3362_v5, %v3361_v2  ;;  %vm3665_vm6 = vcmp.eq.s32.totalorder %v10259_v29, 3 }
 0x2ef   : > { %v3374_v33 = vrot.slane %v3373_v26, 2  ;;  %v3077_v34 = vrot.slane %v3063_v6, %v7673_v7  ;;  %v6553_v12 = vsel %vm3662_vm3, 1.0, %v10147_v52  ;;  %v6554_v57 = vsel %vm3663_vm4, 1.0, %v10147_v52 }
 0x2f0   : > { %v3369_v14 = vadd.f32 %v3368_v3, %v3367_v43  ;;  %v3358_v18 = vrot.slane %v3357_v54, 1  ;;  %v3364_v48 = vrot.slane %v3363_v10, 1  ;;  %v6555_v37 = vsel %vm3664_vm5, 1.0, %v10147_v52 }
 0x2f1   : > { %v3375_v60 = vadd.f32 %v3374_v33, %v3373_v26  ;;  %v3078_v13 = vcombine.low %v3070_v53, %v3077_v34  ;;  %v6556_v0 = vsel %vm3665_vm6, 1.0, %v10147_v52  ;;  %v3674_v55 = vrot.slane %v6553_v12, 4 }
 0x2f2   : > { %v3370_v39 = vrot.slane %v3369_v14, 1  ;;  %v5878_v35 = vld [vmem:[#allocation2 + $0xc8] sm:$0xff]  ;;  %v5880_v22 = vld [vmem:[#allocation2 + $0xd8] sm:$0xff]  ;;  %v5877_v59 = vld [vmem:[#allocation2 + $0xc0] sm:$0xff]  ;;  %v3359_v50 = vadd.f32 %v3358_v18, %v3357_v54  ;;  %v3365_v47 = vadd.f32 %v3364_v48, %v3363_v10  ;;  %v3680_v25 = vrot.slane %v6554_v57, 4 }
 0x2f3   : > { %v3376_v51 = vrot.slane %v3375_v60, 1  ;;  %5949 = vmatprep.mubr.f32.mxu0 %v5878_v35  ;;  %6024 = vmatprep.mubr.f32.mxu1 %v5880_v22  ;;  %v5879_v27 = vld [vmem:[#allocation2 + $0xd0] sm:$0xff]  ;;  %v3085_v45 = vrot.slane %v3078_v13, %v7673_v7  ;;  %v3675_v19 = vadd.f32 %v6553_v12, %v3674_v55  ;;  %v3686_v41 = vrot.slane %v6555_v37, 4  ;;  %v10260_v48 = vld [vmem:[#allocation38_spill] sm:$0xff] }
 0x2f4   : > { %v3371_v56 = vadd.f32 %v3370_v39, %v3369_v14  ;;  %5950 = vmatmul.mubr.f32.vlgmr.msra.gmra.mxu0 %v5877_v59  ;;  %6025 = vmatmul.mubr.f32.vlgmr.msra.gmra.mxu1 %v5879_v27  ;;  %v3382_v24 = vcombine.low %v3359_v50, %v3365_v47  ;;  %v3681_v21 = vadd.f32 %v6554_v57, %v3680_v25  ;;  %v3692_v4 = vrot.slane %v6556_v0, 4  ;;  %v10261_v39 = vld [vmem:[#allocation39_spill] sm:$0xff]  ;;  %v10262_v22 = vld [vmem:[#allocation40_spill] sm:$0xff] }
 0x2f5   : > { %v3377_v31 = vadd.f32 %v3376_v51, %v3375_v60  ;;  %3088 = vst.msk [vmem:[#allocation2 + $0xe0] ss:$8 sm:$0xf] %vm7766_vm8, %v3085_v45  ;;  %v3676_v44 = vrot.slane %v3675_v19, 2  ;;  %v3687_v20 = vadd.f32 %v6555_v37, %v3686_v41  ;;  %vm3982_vm7 = vcmp.eq.s32.totalorder %v10196_v42, 3  ;;  %v10263_v51 = vld [vmem:[#allocation41_spill] sm:$0xff] }
 0x2f6   : > { %vm3983_vm9 = vcmp.eq.s32.totalorder %v10197_v11, 3  ;;  %v3390_v38 = vrot.slane %v3382_v24, %v7673_v7  ;;  %v3682_v40 = vrot.slane %v3681_v21, 2  ;;  %v3693_v58 = vadd.f32 %v6556_v0, %v3692_v4 }
 0x2f7   : > { %v3383_v46 = vcombine.low %v3371_v56, %v3377_v31  ;;  %v3677_v36 = vadd.f32 %v3676_v44, %v3675_v19  ;;  %v3688_v8 = vrot.slane %v3687_v20, 2  ;;  %vm3984_vm10 = vcmp.eq.s32.totalorder %v10228_v16, 3 }
 0x2f8   : > { %vm3985_vm11 = vcmp.eq.s32.totalorder %v10229_v28, 3  ;;  %v3683_v1 = vadd.f32 %v3682_v40, %v3681_v21  ;;  %v3694_v63 = vrot.slane %v3693_v58, 2  ;;  %v6581_v62 = vsel %vm3982_vm7, 1.0, %v10147_v52 }
 0x2f9   : > { %v3397_v2 = vrot.slane %v3383_v46, %v7673_v7  ;;  %v3678_v42 = vrot.slane %v3677_v36, 1  ;;  %v3689_v43 = vadd.f32 %v3688_v8, %v3687_v20  ;;  %v6582_v11 = vsel %vm3983_vm9, 1.0, %v10147_v52 }
 0x2fa   : > { %v6583_v17 = vsel %vm3984_vm10, 1.0, %v10147_v52  ;;  %v3684_v5 = vrot.slane %v3683_v1, 1  ;;  %v3695_v26 = vadd.f32 %v3694_v63, %v3693_v58  ;;  %v6584_v15 = vsel %vm3985_vm11, 1.0, %v10147_v52 }
 0x2fb   : > { %v3398_v61 = vcombine.low %v3390_v38, %v3397_v2  ;;  %v3679_v16 = vadd.f32 %v3678_v42, %v3677_v36  ;;  %v3690_v6 = vrot.slane %v3689_v43, 1  ;;  %v3994_v28 = vrot.slane %v6581_v62, 4 }
 0x2fc   : > { %v4000_v53 = vrot.slane %v6582_v11, 4  ;;  %v3685_v9 = vadd.f32 %v3684_v5, %v3683_v1  ;;  %v3696_v54 = vrot.slane %v3695_v26, 1  ;;  %v4006_v10 = vrot.slane %v6583_v17, 4  ;;  %v10265_v5 = vld [vmem:[#allocation43_spill] sm:$0xff] }
 0x2fd   : > { %v3405_v3 = vrot.slane %v3398_v61, %v7673_v7  ;;  %v3691_v33 = vadd.f32 %v3690_v6, %v3689_v43  ;;  %v3995_v29 = vadd.f32 %v6581_v62, %v3994_v28  ;;  %v4012_v14 = vrot.slane %v6584_v15, 4  ;;  %v10264_v61 = vld [vmem:[#allocation42_spill] sm:$0xff] }
 0x2fe   : > { %v4001_v34 = vadd.f32 %v6582_v11, %v4000_v53  ;;  %v3697_v12 = vadd.f32 %v3696_v54, %v3695_v26  ;;  %v3702_v57 = vcombine.low %v3679_v16, %v3685_v9  ;;  %v4007_v18 = vadd.f32 %v6583_v17, %v4006_v10  ;;  %v10267_v9 = vld [vmem:[#allocation45_spill] sm:$0xff]  ;;  %v9865_v54 = vpop.f32.mrf.mxu0  ;;  %v9867_v10 = vpop.f32.mrf.mxu1 }
 0x2ff   : > { %3408 = vst.msk [vmem:[#allocation2 + $0xe1] ss:$8 sm:$0xf] %vm7766_vm8, %v3405_v3  ;;  %vm4302_vm12 = vcmp.eq.s32.totalorder %v10260_v48, 3  ;;  %v3996_v60 = vrot.slane %v3995_v29, 2  ;;  %v4013_v13 = vadd.f32 %v6584_v15, %v4012_v14  ;;  %vm4303_vm13 = vcmp.eq.s32.totalorder %v10261_v39, 3 }
 0x300   : > { %v4002_v37 = vrot.slane %v4001_v34, 2  ;;  %v3703_v0 = vcombine.low %v3691_v33, %v3697_v12  ;;  %v3710_v55 = vrot.slane %v3702_v57, %v7673_v7  ;;  %v4008_v35 = vrot.slane %v4007_v18, 2  ;;  %v10266_v3 = vld [vmem:[#allocation44_spill] sm:$0xff] }
 0x301   : > { %vm4304_vm14 = vcmp.eq.s32.totalorder %v10262_v22, 3  ;;  %v3997_v59 = vadd.f32 %v3996_v60, %v3995_v29  ;;  %v4014_v47 = vrot.slane %v4013_v13, 2  ;;  %vm4305_vm15 = vcmp.eq.s32.totalorder %v10263_v51, 3 }
 0x302   : > { %v4003_v50 = vadd.f32 %v4002_v37, %v4001_v34  ;;  %v3717_v25 = vrot.slane %v3703_v0, %v7673_v7  ;;  %v4009_v27 = vadd.f32 %v4008_v35, %v4007_v18  ;;  %v6609_v45 = vsel %vm4302_vm12, 1.0, %v10147_v52 }
 0x303   : > { %v6610_v56 = vsel %vm4303_vm13, 1.0, %v10147_v52  ;;  %v3998_v19 = vrot.slane %v3997_v59, 1  ;;  %v4015_v31 = vadd.f32 %v4014_v47, %v4013_v13  ;;  %v6611_v24 = vsel %vm4304_vm14, 1.0, %v10147_v52 }
 0x304   : > { %v4004_v41 = vrot.slane %v4003_v50, 1  ;;  %v3718_v21 = vcombine.low %v3710_v55, %v3717_v25  ;;  %v4010_v4 = vrot.slane %v4009_v27, 1  ;;  %v6612_v44 = vsel %vm4305_vm15, 1.0, %v10147_v52 }
 0x305   : > { %v4314_v20 = vrot.slane %v6609_v45, 4  ;;  %v3999_v46 = vadd.f32 %v3998_v19, %v3997_v59  ;;  %v4016_v40 = vrot.slane %v4015_v31, 1  ;;  %v4320_v58 = vrot.slane %v6610_v56, 4  ;;  %v9876_v59 = vpop.f32.mrf.mxu0 }
 0x306   : > { %v4005_v38 = vadd.f32 %v4004_v41, %v4003_v50  ;;  %v3725_v36 = vrot.slane %v3718_v21, %v7673_v7  ;;  %v4011_v8 = vadd.f32 %v4010_v4, %v4009_v27  ;;  %v4326_v1 = vrot.slane %v6611_v24, 4  ;;  %v9878_v50 = vpop.f32.mrf.mxu1 }
 0x307   : > { %v4315_v2 = vadd.f32 %v6609_v45, %v4314_v20  ;;  %v4017_v63 = vadd.f32 %v4016_v40, %v4015_v31  ;;  %v4321_v42 = vadd.f32 %v6610_v56, %v4320_v58  ;;  %v4332_v43 = vrot.slane %v6612_v44, 4  ;;  %v9881_v31 = vpop.f32.mrf.mxu0  ;;  %v10268_v20 = vld [vmem:[#allocation46_spill] sm:$0xff]  ;;  %v10269_v58 = vld [vmem:[#allocation47_spill] sm:$0xff] }
 0x308   : > { %v4022_v62 = vcombine.low %v3999_v46, %v4005_v38  ;;  %3728 = vst.msk [vmem:[#allocation2 + $0xe2] ss:$8 sm:$0xf] %vm7766_vm8, %v3725_v36  ;;  %v4327_v17 = vadd.f32 %v6611_v24, %v4326_v1  ;;  %vm4622_vm0 = vcmp.eq.s32.totalorder %v10264_v61, 3  ;;  %vm4623_vm1 = vcmp.eq.s32.totalorder %v10265_v5, 3  ;;  %v9883_v24 = vpop.f32.mrf.mxu1 }
 0x309   : > { %v4316_v11 = vrot.slane %v4315_v2, 2  ;;  %v4023_v26 = vcombine.low %v4011_v8, %v4017_v63  ;;  %v4322_v16 = vrot.slane %v4321_v42, 2  ;;  %v4333_v6 = vadd.f32 %v6612_v44, %v4332_v43  ;;  %v9892_v43 = vpop.f32.mrf.mxu0 }
 0x30a   : > { %v4030_v15 = vrot.slane %v4022_v62, %v7673_v7  ;;  %v4328_v53 = vrot.slane %v4327_v17, 2  ;;  %vm4624_vm2 = vcmp.eq.s32.totalorder %v10266_v3, 3  ;;  %vm4625_vm3 = vcmp.eq.s32.totalorder %v10267_v9, 3 }
 0x30b   : > { %v4317_v28 = vadd.f32 %v4316_v11, %v4315_v2  ;;  %v4037_v33 = vrot.slane %v4023_v26, %v7673_v7  ;;  %v4323_v29 = vadd.f32 %v4322_v16, %v4321_v42  ;;  %v4334_v34 = vrot.slane %v4333_v6, 2  ;;  %v10270_v42 = vld [vmem:[#allocation49_spill] sm:$0xff]  ;;  %v9894_v11 = vpop.f32.mrf.mxu1 }
 0x30c   : > { %v6637_v14 = vsel %vm4622_vm0, 1.0, %v10147_v52  ;;  %v4329_v57 = vadd.f32 %v4328_v53, %v4327_v17  ;;  %v6638_v18 = vsel %vm4623_vm1, 1.0, %v10147_v52  ;;  %v6639_v48 = vsel %vm4624_vm2, 1.0, %v10147_v52 }
 0x30d   : > { %v4318_v12 = vrot.slane %v4317_v28, 1  ;;  %v4038_v60 = vcombine.low %v4030_v15, %v4037_v33  ;;  %v4324_v37 = vrot.slane %v4323_v29, 1  ;;  %v4335_v13 = vadd.f32 %v4334_v34, %v4333_v6 }
 0x30e   : > { %v6640_v39 = vsel %vm4625_vm3, 1.0, %v10147_v52  ;;  %v4330_v55 = vrot.slane %v4329_v57, 1  ;;  %v4634_v35 = vrot.slane %v6637_v14, 4  ;;  %v4640_v22 = vrot.slane %v6638_v18, 4 }
 0x30f   : > { %v4319_v0 = vadd.f32 %v4318_v12, %v4317_v28  ;;  %v4045_v47 = vrot.slane %v4038_v60, %v7673_v7  ;;  %v4325_v51 = vadd.f32 %v4324_v37, %v4323_v29  ;;  %v4336_v25 = vrot.slane %v4335_v13, 1  ;;  %v9903_v12 = vpop.f32.mrf.mxu0 }
 0x310   : > { %v4646_v27 = vrot.slane %v6639_v48, 4  ;;  %v4331_v45 = vadd.f32 %v4330_v55, %v4329_v57  ;;  %v4635_v56 = vadd.f32 %v6637_v14, %v4634_v35  ;;  %v4641_v19 = vadd.f32 %v6638_v18, %v4640_v22  ;;  %v9905_v57 = vpop.f32.mrf.mxu1 }
 0x311   : > { %v4652_v41 = vrot.slane %v6640_v39, 4  ;;  %4048 = vst.msk [vmem:[#allocation2 + $0xe3] ss:$8 sm:$0xf] %vm7766_vm8, %v4045_v47  ;;  %v4337_v21 = vadd.f32 %v4336_v25, %v4335_v13  ;;  %v4342_v4 = vcombine.low %v4319_v0, %v4325_v51  ;;  %vm4942_vm4 = vcmp.eq.s32.totalorder %v10268_v20, 3 }
 0x312   : > { %v4647_v44 = vadd.f32 %v6639_v48, %v4646_v27  ;;  %v4636_v46 = vrot.slane %v4635_v56, 2  ;;  %v4642_v38 = vrot.slane %v4641_v19, 2  ;;  %vm4943_vm5 = vcmp.eq.s32.totalorder %v10269_v58, 3 }
 0x313   : > { %v4653_v40 = vadd.f32 %v6640_v39, %v4652_v41  ;;  %v4343_v36 = vcombine.low %v4331_v45, %v4337_v21  ;;  %v4350_v8 = vrot.slane %v4342_v4, %v7673_v7  ;;  %vm4944_vm6 = vcmp.eq.s32.totalorder %v10209_v49, 3  ;;  %v9913_v45 = vpop.f32.mrf.mxu0  ;;  %v10271_v21 = vld [vmem:[#allocation50_spill] sm:$0xff]  ;;  %v10272_v4 = vld [vmem:[#allocation51_spill] sm:$0xff] }
 0x314   : > { %v4648_v2 = vrot.slane %v4647_v44, 2  ;;  %v4637_v1 = vadd.f32 %v4636_v46, %v4635_v56  ;;  %v4643_v63 = vadd.f32 %v4642_v38, %v4641_v19  ;;  %vm4945_vm7 = vcmp.eq.s32.totalorder %v10270_v42, 3  ;;  %v9915_v56 = vpop.f32.mrf.mxu1 }
 0x315   : > { %v4654_v62 = vrot.slane %v4653_v40, 2  ;;  %v4357_v17 = vrot.slane %v4343_v36, %v7673_v7  ;;  %v6665_v5 = vsel %vm4942_vm4, 1.0, %v10147_v52  ;;  %v6666_v26 = vsel %vm4943_vm5, 1.0, %v10147_v52  ;;  %v9921_v38 = vpop.f32.mrf.mxu0 }
 0x316   : > { %v4649_v61 = vadd.f32 %v4648_v2, %v4647_v44  ;;  %v4638_v15 = vrot.slane %v4637_v1, 1  ;;  %v4644_v49 = vrot.slane %v4643_v63, 1  ;;  %v6667_v6 = vsel %vm4944_vm6, 1.0, %v10147_v52 }
 0x317   : > { %v4655_v16 = vadd.f32 %v4654_v62, %v4653_v40  ;;  %v4358_v28 = vcombine.low %v4350_v8, %v4357_v17  ;;  %v6668_v3 = vsel %vm4945_vm7, 1.0, %v10147_v52  ;;  %v4954_v9 = vrot.slane %v6665_v5, 4  ;;  %v9923_v40 = vpop.f32.mrf.mxu1 }
 0x318   : > { %v4650_v53 = vrot.slane %v4649_v61, 1  ;;  %v4639_v33 = vadd.f32 %v4638_v15, %v4637_v1  ;;  %v4645_v29 = vadd.f32 %v4644_v49, %v4643_v63  ;;  %v4960_v14 = vrot.slane %v6666_v26, 4 }
 0x319   : > { %v4656_v34 = vrot.slane %v4655_v16, 1  ;;  %v4365_v18 = vrot.slane %v4358_v28, %v7673_v7  ;;  %v4955_v60 = vadd.f32 %v6665_v5, %v4954_v9  ;;  %v4966_v37 = vrot.slane %v6667_v6, 4  ;;  %v6822_v28 = vpop.f32.mrf.mxu0 }
 0x31a   : > { %v4651_v48 = vadd.f32 %v4650_v53, %v4649_v61  ;;  %v4662_v39 = vcombine.low %v4639_v33, %v4645_v29  ;;  %v4961_v0 = vadd.f32 %v6666_v26, %v4960_v14  ;;  %v4972_v55 = vrot.slane %v6668_v3, 4 }
 0x31b   : > { %v4657_v13 = vadd.f32 %v4656_v34, %v4655_v16  ;;  %4368 = vst.msk [vmem:[#allocation2 + $0xe4] ss:$8 sm:$0xf] %vm7766_vm8, %v4365_v18  ;;  %v4956_v35 = vrot.slane %v4955_v60, 2  ;;  %v4967_v22 = vadd.f32 %v6667_v6, %v4966_v37  ;;  %vm5262_vm9 = vcmp.eq.s32.totalorder %v8818_v23, 3 }
 0x31c   : > { %vm5263_vm10 = vcmp.eq.s32.totalorder %v8820_v30, 3  ;;  %v4670_v51 = vrot.slane %v4662_v39, %v7673_v7  ;;  %v4962_v25 = vrot.slane %v4961_v0, 2  ;;  %v4973_v27 = vadd.f32 %v6668_v3, %v4972_v55  ;;  %v6860_v30 = vpop.f32.mrf.mxu1  ;;  %v6894_v55 = vpop.f32.mrf.mxu0 }
 0x31d   : > { %v4663_v47 = vcombine.low %v4651_v48, %v4657_v13  ;;  %v4957_v19 = vadd.f32 %v4956_v35, %v4955_v60  ;;  %v4968_v41 = vrot.slane %v4967_v22, 2  ;;  %vm5264_vm11 = vcmp.eq.s32.totalorder %v10271_v21, 3 }
 0x31e   : > { %vm5265_vm12 = vcmp.eq.s32.totalorder %v10272_v4, 3  ;;  %v4963_v23 = vadd.f32 %v4962_v25, %v4961_v0  ;;  %v4974_v20 = vrot.slane %v4973_v27, 2  ;;  %v6693_v46 = vsel %vm5262_vm9, 1.0, %v10147_v52  ;;  %v6932_v35 = vpop.f32.mrf.mxu1 }
 0x31f   : > { %v4677_v44 = vrot.slane %v4663_v47, %v7673_v7  ;;  %v4958_v58 = vrot.slane %v4957_v19, 1  ;;  %v4969_v36 = vadd.f32 %v4968_v41, %v4967_v22  ;;  %v6694_v8 = vsel %vm5263_vm10, 1.0, %v10147_v52 }
 0x320   : > { %v6695_v2 = vsel %vm5264_vm11, 1.0, %v10147_v52  ;;  %v4964_v63 = vrot.slane %v4963_v23, 1  ;;  %v4975_v62 = vadd.f32 %v4974_v20, %v4973_v27  ;;  %v6696_v42 = vsel %vm5265_vm12, 1.0, %v10147_v52 }
 0x321   : > { %v4678_v1 = vcombine.low %v4670_v51, %v4677_v44  ;;  %v4959_v17 = vadd.f32 %v4958_v58, %v4957_v19  ;;  %v4970_v61 = vrot.slane %v4969_v36, 1  ;;  %v5274_v5 = vrot.slane %v6693_v46, 4 }
 0x322   : > { %v5280_v26 = vrot.slane %v6694_v8, 4  ;;  %v4965_v49 = vadd.f32 %v4964_v63, %v4963_v23  ;;  %v4976_v16 = vrot.slane %v4975_v62, 1  ;;  %v5286_v6 = vrot.slane %v6695_v2, 4 }
 0x323   : > { %v4685_v15 = vrot.slane %v4678_v1, %v7673_v7  ;;  %v4971_v53 = vadd.f32 %v4970_v61, %v4969_v36  ;;  %v5275_v3 = vadd.f32 %v6693_v46, %v5274_v5  ;;  %v5292_v33 = vrot.slane %v6696_v42, 4 }
 0x324   : > { %v5281_v9 = vadd.f32 %v6694_v8, %v5280_v26  ;;  %v4977_v52 = vadd.f32 %v4976_v16, %v4975_v62  ;;  %v4982_v29 = vcombine.low %v4959_v17, %v4965_v49  ;;  %v5287_v34 = vadd.f32 %v6695_v2, %v5286_v6 }
 0x325   : > { %4688 = vst.msk [vmem:[#allocation2 + $0xe5] ss:$8 sm:$0xf] %vm7766_vm8, %v4685_v15  ;;  %v6744_v14 = vadd.f32 %v9876_v59, %v9865_v54  ;;  %v5276_v18 = vrot.slane %v5275_v3, 2  ;;  %v5293_v60 = vadd.f32 %v6696_v42, %v5292_v33  ;;  %v6782_v37 = vadd.f32 %v9878_v50, %v9867_v10 }
 0x326   : > { %v5282_v48 = vrot.slane %v5281_v9, 2  ;;  %v4983_v13 = vcombine.low %v4971_v53, %v4977_v52  ;;  %v4990_v39 = vrot.slane %v4982_v29, %v7673_v7  ;;  %v5288_v0 = vrot.slane %v5287_v34, 2 }
 0x327   : > { %vm5552_vm13 = vcmask 523264   ;;  %v5277_v22 = vadd.f32 %v5276_v18, %v5275_v3  ;;  %v5294_v51 = vrot.slane %v5293_v60, 2  ;;  %v5544_v25 = vadd.f32 %v6782_v37, %v6744_v14 }
 0x328   : > { %v5283_v47 = vadd.f32 %v5282_v48, %v5281_v9  ;;  %v4997_v27 = vrot.slane %v4983_v13, %v7673_v7  ;;  %v5289_v54 = vadd.f32 %v5288_v0, %v5287_v34  ;;  %v6747_v59 = vadd.f32 %v9892_v43, %v9881_v31  ;;  %v6895_v43 = vpop.f32.mrf.mxu0 }
 0x329   : > { %v6785_v10 = vadd.f32 %v9894_v11, %v9883_v24  ;;  %v5278_v50 = vrot.slane %v5277_v22, 1  ;;  %v5295_v41 = vadd.f32 %v5294_v51, %v5293_v60  ;;  %5553 = vst.msk [vmem:[%s9944_s7] sm:$0xff] %vm5552_vm13, %v5544_v25  ;;  %v6820_v21 = vadd.f32 %v9913_v45, %v9903_v12  ;;  %v6933_v24 = vpop.f32.mrf.mxu1 }
 0x32a   : > { %v5284_v19 = vrot.slane %v5283_v47, 1  ;;  %v4998_v4 = vcombine.low %v4990_v39, %v4997_v27  ;;  %v5290_v44 = vrot.slane %v5289_v54, 1  ;;  %v6858_v31 = vadd.f32 %v9915_v56, %v9905_v57 }
 0x32b   : > { %v5549_v23 = vadd.f32 %v6785_v10, %v6747_v59  ;;  %v5279_v11 = vadd.f32 %v5278_v50, %v5277_v22  ;;  %v5296_v46 = vrot.slane %v5295_v41, 1  ;;  %v6823_v58 = vadd.f32 %v6822_v28, %v9921_v38 }
 0x32c   : > { %v5285_v20 = vadd.f32 %v5284_v19, %v5283_v47  ;;  %v5005_v36 = vrot.slane %v4998_v4, %v7673_v7  ;;  %v5291_v8 = vadd.f32 %v5290_v44, %v5289_v54  ;;  %v5705_v12 = vadd.f32 %v6858_v31, %v6820_v21 }
 0x32d   : > { %5554 = vst.msk [vmem:[%s9944_s7 + $0x8] sm:$0xff] %vm5552_vm13, %v5549_v23  ;;  %v6861_v45 = vadd.f32 %v6860_v30, %v9923_v40  ;;  %v5297_v2 = vadd.f32 %v5296_v46, %v5295_v41  ;;  %v6896_v56 = vadd.f32 %v6895_v43, %v6894_v55  ;;  %v6934_v1 = vadd.f32 %v6933_v24, %v6932_v35 }
 0x32e   : > { %v5302_v57 = vcombine.low %v5279_v11, %v5285_v20  ;;  %5008 = vst.msk [vmem:[#allocation2 + $0xe6] ss:$8 sm:$0xf] %vm7766_vm8, %v5005_v36 }
 0x32f   : > { %6697 = vst.msk [vmem:[%s9944_s7 + $0x10] sm:$0xff] %vm5552_vm13, %v5705_v12  ;;  %v5710_v38 = vadd.f32 %v6861_v45, %v6823_v58  ;;  %v5303_v63 = vcombine.low %v5291_v8, %v5297_v2  ;;  %v5866_v42 = vadd.f32 %v6934_v1, %v6896_v56 }
 0x330   : > { %v5310_v62 = vrot.slane %v5302_v57, %v7673_v7  ;;  %v6092_v55 = vld [vmem:[%s9944_s7] sm:$0xff] (%p7447_p9) }
 0x331   : > { %6698 = vst.msk [vmem:[%s9944_s7 + $0x18] sm:$0xff] %vm5552_vm13, %v5710_v38  ;;  %v5317_v17 = vrot.slane %v5303_v63, %v7673_v7  ;;  %6699 = vst.msk [vmem:[%s9944_s7 + $0x20] sm:$0xff] %vm5552_vm13, %v5866_v42 }
 0x332   : > { %6093 = vst [vmem:[%s6049_s6] sm:$0xff] (%p7447_p9), %v6092_v55 }
 0x333   : > { %v5318_v40 = vcombine.low %v5310_v62, %v5317_v17 }
 0x334   : > { %v6094_v35 = vld [vmem:[%s9944_s7 + $0x8] sm:$0xff] (%p7447_p9) }
 0x335   : > { %v5325_v61 = vrot.slane %v5318_v40, %v7673_v7  ;;  %6095 = vst [vmem:[%s6049_s6 + $0x8] sm:$0xff] (%p7447_p9), %v6094_v35 }
 0x336   : > { %v6096_v22 = vld [vmem:[%s9944_s7 + $0x10] sm:$0xff] (%p7447_p9) }
 0x337   : > { %5328 = vst.msk [vmem:[#allocation2 + $0xe7] ss:$8 sm:$0xf] %vm7766_vm8, %v5325_v61  ;;  %6097 = vst [vmem:[%s6049_s6 + $0x40] sm:$0xff] (%p7447_p9), %v6096_v22 }
 0x338   : > { %v6098_v47 = vld [vmem:[%s9944_s7 + $0x18] sm:$0xff] (%p7447_p9)  ;;  %v6100_v51 = vld [vmem:[%s9944_s7 + $0x20] sm:$0xff] (%p7447_p9) }
 0x339   : > { %6099 = vst [vmem:[%s6049_s6 + $0x48] sm:$0xff] (%p7447_p9), %v6098_v47  ;;  %6101 = vst [vmem:[%s6049_s6 + $0x80] sm:$0xff] (%p7447_p9), %v6100_v51 }
 0x33e   : > { %v5882_v5 = vld [vmem:[#allocation2 + $0xe8] sm:$0xff]  ;;  %v5884_v26 = vld [vmem:[#allocation2 + $0xf8] sm:$0xff]  ;;  %v5881_v15 = vld [vmem:[#allocation2 + $0xe0] sm:$0xff] }
 0x33f   : > { %5954 = vmatprep.mubr.f32.mxu0 %v5882_v5  ;;  %6029 = vmatprep.mubr.f32.mxu1 %v5884_v26  ;;  %v5883_v49 = vld [vmem:[#allocation2 + $0xf0] sm:$0xff] }
 0x340   : > { %5955 = vmatmul.mubr.f32.gmra.mxu0 %v5881_v15  ;;  %6030 = vmatmul.mubr.f32.gmra.mxu1 %v5883_v49 }
 0x368   : > { %v6897_v16 = vpop.f32.mrf.mxu0  ;;  %v6935_v6 = vpop.f32.mrf.mxu1 }
 0x36a   : > { %v6898_v28 = vpop.f32.mrf.mxu0  ;;  %v6936_v30 = vpop.f32.mrf.mxu1 }
 0x36b   : > { %v6899_v53 = vadd.f32 %v6898_v28, %v6897_v16  ;;  %v6937_v3 = vadd.f32 %v6936_v30, %v6935_v6 }
 0x36d   : > { %v5871_v7 = vadd.f32 %v6937_v3, %v6899_v53 }
 0x36f   : > { %6700 = vst.msk [vmem:[%s9944_s7 + $0x28] sm:$0xff] %vm5552_vm13, %v5871_v7 }
 0x376   : > { %v6102_v25 = vld [vmem:[%s9944_s7 + $0x28] sm:$0xff] (%p7447_p9) }
 0x377   : > { %6103 = vst [vmem:[%s6049_s6 + $0x88] sm:$0xff] (%p7447_p9), %v6102_v25 }
 0x3b4   : > { %v6970_v32 = vpop.f32.mrf.mxu0  ;;  %v7008_v9 = vpop.f32.mrf.mxu1 }
 0x3b6   : > { %v6971_v33 = vpop.f32.mrf.mxu0  ;;  %v7009_v52 = vpop.f32.mrf.mxu1 }
 0x3b7   : > { %v6972_v29 = vadd.f32 %v6971_v33, %v6970_v32  ;;  %v7010_v34 = vadd.f32 %v7009_v52, %v7008_v9 }
 0x3b9   : > { %v6027_v14 = vadd.f32 %v7010_v34, %v6972_v29 }
 0x3bb   : > { %6701 = vst.msk [vmem:[%s9944_s7 + $0x30] sm:$0xff] %vm5552_vm13, %v6027_v14 }
 0x3c2   : > { %v6104_v27 = vld [vmem:[%s9944_s7 + $0x30] sm:$0xff] (%p7447_p9) }
 0x3c3   : > { %6105 = vst [vmem:[%s6049_s6 + $0xc0] sm:$0xff] (%p7447_p9), %v6104_v27 }
 0x400   : > { %v6973_v18 = vpop.f32.mrf.mxu0  ;;  %v7011_v48 = vpop.f32.mrf.mxu1 }
 0x402   : > { %v6974_v60 = vpop.f32.mrf.mxu0  ;;  %v7012_v37 = vpop.f32.mrf.mxu1 }
 0x403   : > { %v6975_v13 = vadd.f32 %v6974_v60, %v6973_v18  ;;  %v7013_v39 = vadd.f32 %v7012_v37, %v7011_v48  ;;  %6044 = sbr.rel (!%p7447_p9) target bundleno = 1040 (0x410), region = 36 }
 0x405   : > { %v6032_v0 = vadd.f32 %v7013_v39, %v6975_v13 }
 0x407   : > { %6702 = vst.msk [vmem:[%s9944_s7 + $0x38] sm:$0xff] %vm5552_vm13, %v6032_v0 }
 0x40e   : > { %v6106_v54 = vld [vmem:[%s9944_s7 + $0x38] sm:$0xff] }
 0x40f   : > { %6107 = vst [vmem:[%s6049_s6 + $0xc8] sm:$0xff] %v6106_v54 }
 0x410 PF: > { %s15_s16 = sadd.s32 1, %s7352_s16   ;;  %s10273_s9 = smov %s7328_s10 }
 0x411   : > { %p12_p1 = scmp.ge.s32.totalorder %s15_s16, 10   ;;  %s10274_s10 = smov %s7332_s11 }
 0x412   : > { %s10275_s11 = smov %s7452_s27  ;;  %s10276_s12 = smov %s7344_s14 }
 0x413   : > { %s10277_s13 = smov %s7348_s15  ;;  %s10278_s14 = smov %s10281_s17 }
 0x414   : > { %s10279_s15 = smov %s10285_s18  ;;  %14 = sbr.rel (!%p12_p1) target bundleno = 5 (0x5), region = 180 }
 0x419   :  { %6123 = vsyncpa [#allocation4], 1 }
 0x41a   :  { %6125 = vsyncpa [#allocation4 + $0x1], 1 }

</bundles_post_ra>
